<compile_context>
chip_gen: v6e
topology: v6e:2x2x1
jax: 0.10.0
libtpu: 0.0.40
codegen_flags: <defaults>
</compile_context>

<pallas_src>
import functools

import jax
import jax.numpy as jnp
from jax import lax
from jax.experimental import pallas as pl
from jax.experimental.pallas import tpu as pltpu

F32 = jnp.float32
BF16 = jnp.bfloat16

# (Cout, K, stride) per conv of each branch (conv3 stride is 2, pool is (4,2)).
AE_ARCH = dict(conv1=(3, 61, 20), conv2=(5, 23, 10), conv3=(8, 4, 2))
MIC_ARCH = dict(conv1=(3, 46, 10), conv2=(5, 14, 5), conv3=(8, 3, 2))
FORCE_ARCH = dict(conv1=(6, 7, 2), conv2=(15, 3, 1), conv3=(24, 4, 2))


def _const_spec(shape):
    n = len(shape)
    return pl.BlockSpec(shape, lambda *_, _n=n: (0,) * _n)


# ----------------------------------------------------------------------------
# Glue: transposed, phase-major im2col for conv1 (static strided slices, no gather)
# ----------------------------------------------------------------------------
def _phase_major_patches_T(x, K, s, P, Q, O):
    # x: (T, L, Cin)  ->  (T, Cin*K, P*Q); column p*Q + q holds conv1 position q*P + p.
    T, L, Cin = x.shape
    rows = []
    for c in range(Cin):
        for k in range(K):
            rows.append(x[:, k:k + (O - 1) * s + 1:s, c])         # (T, O)
    pat = jnp.stack(rows, axis=1)                                 # (T, Cin*K, O)
    pad = P * Q - O
    if pad:
        pat = jnp.concatenate(
            [pat, jnp.zeros((T, Cin * K, pad), pat.dtype)], axis=2)
    pat = pat.reshape(T, Cin * K, Q, P)                           # [..., q, p]
    pat = jnp.transpose(pat, (0, 1, 3, 2)).reshape(T, Cin * K, P * Q)
    return pat


# ----------------------------------------------------------------------------
# Kernel 1: fused CNN branch (one grid step = one time step)
# ----------------------------------------------------------------------------
def _branch_kernel(patches_ref, w1_ref, bn1s_ref, bn1t_ref,
                   w2_ref, b2_ref, bn2s_ref, bn2t_ref,
                   w3_ref, b3_ref, wd_ref, bd_ref,
                   out_ref, p2_s, p3_s, flat_s, *, cfg):
    P1, Q1 = cfg["P1"], cfg["Q1"]
    C1, C2, C3 = cfg["C1"], cfg["C2"], cfg["C3"]
    K2, K3, s2 = cfg["K2"], cfg["K3"], cfg["s2"]
    O2, O3, L4 = cfg["O2"], cfg["O3"], cfg["L4"]

    # conv1 (bias folded into BN shift) -> BN -> ReLU.
    # Channels on sublanes, output positions on lanes, phase-major (pos mod P1).
    z1 = jnp.dot(w1_ref[...], patches_ref[0],
                 preferred_element_type=jnp.float32)              # (C1, P1*Q1)
    a1 = jax.nn.relu(z1 * bn1s_ref[...] + bn1t_ref[...])

    # conv2 -> ReLU -> BN; outputs grouped by (position mod 4); all taps are
    # unit-stride static slices of a1 thanks to the phase-major layout.
    a2 = []
    for p2 in range(4):
        n2 = -(-(O2 - p2) // 4)
        for k2 in range(K2):
            tap = p2 * s2 + k2
            col0 = (tap % P1) * Q1 + tap // P1
            p2_s[k2 * C1:(k2 + 1) * C1, 0:n2] = a1[:, col0:col0 + n2]
        z2 = jnp.dot(w2_ref[...], p2_s[:, 0:n2],
                     preferred_element_type=jnp.float32)          # (C2, n2)
        a2.append(jax.nn.relu(z2 + b2_ref[...]) * bn2s_ref[...] + bn2t_ref[...])

    # conv3 (stride 2) -> ReLU; outputs grouped by parity.
    a3 = []
    for p3 in range(2):
        n3 = -(-(O3 - p3) // 2)
        for k3 in range(K3):
            u = 2 * p3 + k3
            p3_s[k3 * C2:(k3 + 1) * C2, 0:n3] = a2[u % 4][:, u // 4:u // 4 + n3]
        z3 = jnp.dot(w3_ref[...], p3_s[:, 0:n3],
                     preferred_element_type=jnp.float32)          # (C3, n3)
        a3.append(jax.nn.relu(z3 + b3_ref[...]))

    # AvgPool1d(kernel_size=4, stride=2): three adds + one scale.
    pooled = 0.25 * (a3[0][:, 0:L4] + a3[1][:, 0:L4] +
                     a3[0][:, 1:L4 + 1] + a3[1][:, 1:L4 + 1])     # (C3, L4)

    # PyTorch channel-major flatten (view(-1, C3*L4)) + Linear + ReLU.
    for c in range(C3):
        flat_s[0:1, c * L4:(c + 1) * L4] = pooled[c:c + 1, :]
    y = jnp.dot(flat_s[...], wd_ref[...],
                preferred_element_type=jnp.float32) + bd_ref[...]  # (1, F)
    out_ref[0] = jax.nn.relu(y)


def cnn_branch(x, p, arch):
    # x: (T, L, Cin)  ->  (T, F)
    T, L, Cin = x.shape
    C1, K1, s1 = arch["conv1"]
    C2, K2, s2 = arch["conv2"]
    C3, K3, s3 = arch["conv3"]
    assert s3 == 2  # conv3 stride and pool stride are fixed at 2 in the module
    O1 = (L - K1) // s1 + 1
    O2 = (O1 - K2) // s2 + 1
    O3 = (O2 - K3) // s3 + 1
    L4 = (O3 - 4) // 2 + 1
    flat = C3 * L4
    assert p["wd"].shape[0] == flat
    F = p["wd"].shape[1]
    P1 = 4 * s2                     # conv3 stride * pool stride = 4
    Q1 = -(-O1 // P1)

    patches = _phase_major_patches_T(x.astype(F32), K1, s1, P1, Q1, O1).astype(BF16)

    # Host-side weight preparation.
    w1 = p["w1"].reshape(C1, Cin * K1).astype(BF16)               # col order c*K1+k
    bn1s = p["bn1_scale"].reshape(C1, 1).astype(F32)
    bn1t = (p["bn1_shift"] + p["b1"] * p["bn1_scale"]).reshape(C1, 1).astype(F32)
    w2 = jnp.transpose(p["w2"], (0, 2, 1)).reshape(C2, K2 * C1).astype(F32)
    b2 = p["b2"].reshape(C2, 1).astype(F32)
    bn2s = p["bn2_scale"].reshape(C2, 1).astype(F32)
    bn2t = p["bn2_shift"].reshape(C2, 1).astype(F32)
    w3 = jnp.transpose(p["w3"], (0, 2, 1)).reshape(C3, K3 * C2).astype(F32)
    b3 = p["b3"].reshape(C3, 1).astype(F32)
    wd = p["wd"].astype(F32)                                      # (C3*L4, F)
    bd = p["bd"].reshape(1, F).astype(F32)

    cfg = dict(P1=P1, Q1=Q1, C1=C1, C2=C2, C3=C3, K2=K2, K3=K3, s2=s2,
               O2=O2, O3=O3, L4=L4)
    n2max = -(-O2 // 4)
    n3max = -(-O3 // 2)

    out = pl.pallas_call(
        functools.partial(_branch_kernel, cfg=cfg),
        grid=(T,),
        in_specs=[pl.BlockSpec((1, Cin * K1, P1 * Q1), lambda t: (t, 0, 0))]
                 + [_const_spec(a.shape) for a in
                    (w1, bn1s, bn1t, w2, b2, bn2s, bn2t, w3, b3, wd, bd)],
        out_specs=pl.BlockSpec((1, 1, F), lambda t: (t, 0, 0)),
        out_shape=jax.ShapeDtypeStruct((T, 1, F), F32),
        scratch_shapes=[pltpu.VMEM((K2 * C1, n2max), F32),
                        pltpu.VMEM((K3 * C2, n3max), F32),
                        pltpu.VMEM((1, flat), F32)],
        compiler_params=pltpu.CompilerParams(
            dimension_semantics=("parallel",)),   # megacore/TC sharding over T (v7x)
    )(patches, w1, bn1s, bn1t, w2, b2, bn2s, bn2t, w3, b3, wd, bd)
    return out.reshape(T, F)


# ----------------------------------------------------------------------------
# Kernel 2: LSTM (input projection hoisted out of the recurrence)
# ----------------------------------------------------------------------------
def _lstm_core(x_ref, wih_ref, whh_ref, b_ref, gx_ref, H, store_step=None):
    T = x_ref.shape[0]
    x = x_ref[...]
    # Hoisted input projection: one (T, D) x (D, H) matmul per gate.
    for g in range(4):
        gx_ref[g] = (jnp.dot(x, wih_ref[g], preferred_element_type=jnp.float32)
                     + b_ref[g])
    whh = [whh_ref[g] for g in range(4)]        # loop-invariant (H, H) weights

    def step(t, carry):
        h, c = carry
        pre = [gx_ref[g, pl.ds(t, 1), :]
               + jnp.dot(h, whh[g], preferred_element_type=jnp.float32)
               for g in range(4)]               # four separate (1, H) gates
        i_g = jax.nn.sigmoid(pre[0])
        f_g = jax.nn.sigmoid(pre[1])
        g_g = jnp.tanh(pre[2])
        o_g = jax.nn.sigmoid(pre[3])
        c_new = f_g * c + i_g * g_g
        h_new = o_g * jnp.tanh(c_new)
        if store_step is not None:
            store_step(t, h_new)
        return (h_new, c_new)

    z = jnp.zeros((1, H), jnp.float32)
    h_fin, _ = lax.fori_loop(0, T, step, (z, z))
    return h_fin


def _lstm_seq_kernel(x_ref, wih_ref, whh_ref, b_ref, o_ref, gx_ref, *, hidden):
    def store(t, h):
        o_ref[pl.ds(t, 1), :] = h
    _lstm_core(x_ref, wih_ref, whh_ref, b_ref, gx_ref, hidden, store)


def _lstm_head_kernel(x_ref, wih_ref, whh_ref, b_ref, wd_ref, bd_ref,
                      o_ref, gx_ref, *, hidden):
    # Final LSTM layer: only the last hidden state is needed -> no per-step HBM
    # writes; Dense1 + tanh fused here.
    h_fin = _lstm_core(x_ref, wih_ref, whh_ref, b_ref, gx_ref, hidden)
    o_ref[...] = jnp.tanh(
        jnp.dot(h_fin, wd_ref[...], preferred_element_type=jnp.float32)
        + bd_ref[...])


def _prep_lstm(lp, H):
    w_ih = lp["w_ih"].astype(F32)                               # (4H, D)
    w_hh = lp["w_hh"].astype(F32)                               # (4H, H)
    b = (lp["b_ih"] + lp["b_hh"]).astype(F32)                   # (4H,)
    wih = jnp.stack([jnp.transpose(w_ih[g * H:(g + 1) * H, :]) for g in range(4)])
    whh = jnp.stack([jnp.transpose(w_hh[g * H:(g + 1) * H, :]) for g in range(4)])
    return wih, whh, b.reshape(4, 1, H)


def lstm_layer_seq(x, lp, hidden):
    T = x.shape[0]
    x = x.astype(F32)
    wih, whh, b = _prep_lstm(lp, hidden)
    return pl.pallas_call(
        functools.partial(_lstm_seq_kernel, hidden=hidden),
        grid=(1,),
        in_specs=[_const_spec(a.shape) for a in (x, wih, whh, b)],
        out_specs=_const_spec((T, hidden)),
        out_shape=jax.ShapeDtypeStruct((T, hidden), F32),
        scratch_shapes=[pltpu.VMEM((4, T, hidden), F32)],
    )(x, wih, whh, b)


def lstm_head(x, lp, dense_w, dense_b, hidden):
    T = x.shape[0]
    x = x.astype(F32)
    wih, whh, b = _prep_lstm(lp, hidden)
    wd = dense_w.astype(F32)                                    # (hidden, 125)
    bd = dense_b.reshape(1, -1).astype(F32)
    n_out = wd.shape[1]
    return pl.pallas_call(
        functools.partial(_lstm_head_kernel, hidden=hidden),
        grid=(1,),
        in_specs=[_const_spec(a.shape) for a in (x, wih, whh, b, wd, bd)],
        out_specs=_const_spec((1, n_out)),
        out_shape=jax.ShapeDtypeStruct((1, n_out), F32),
        scratch_shapes=[pltpu.VMEM((4, T, hidden), F32)],
    )(x, wih, whh, b, wd, bd)


# ----------------------------------------------------------------------------
# Model forward (mirrors LSTMModel.forward, inference mode)
# ----------------------------------------------------------------------------
def lstm_model_forward(params, cfg, AE, Mic, Forces):
    ae_x = AE[:, :, None].astype(F32)                  # (T, L_AE, 1)
    mic_x = Mic[:, :, None].astype(F32)                # (T, L_Mic, 1)
    force_x = jnp.transpose(Forces, (1, 2, 0)).astype(F32)  # (T, 125, 3)

    ae_feat = cnn_branch(ae_x, params["ae"], AE_ARCH)          # (T, F_AE)
    mic_feat = cnn_branch(mic_x, params["mic"], MIC_ARCH)      # (T, F_MIC)
    force_feat = cnn_branch(force_x, params["force"], FORCE_ARCH)  # (T, F_FORCE)

    feat = jnp.concatenate([ae_feat, mic_feat, force_feat], axis=1)  # (T, D)

    h = feat
    for l in range(cfg["num_layers"] - 1):
        h = lstm_layer_seq(h, params["lstm"][l], cfg["hidden"])
        # TODO(synk): inter-layer LSTM dropout is an inference no-op.
    out = lstm_head(h, params["lstm"][cfg["num_layers"] - 1],
                    params["dense1_w"], params["dense1_b"], cfg["hidden"])
    return out                                                  # (1, 125)


# ----------------------------------------------------------------------------
# Deterministic parameter init (shapes follow the PyTorch __init__)
# ----------------------------------------------------------------------------
def init_params(key, F_AE=8, F_MIC=8, F_FORCE=16, hidden=32, num_layers=1):
    keys = iter(jax.random.split(key, 128))

    def nrm(shape, scale=0.05):
        return (scale * jax.random.normal(next(keys), shape)).astype(F32)

    def bn(c, eps=1e-5):
        gamma = jnp.ones((c,), F32)
        beta = jnp.zeros((c,), F32)
        rmean = jnp.zeros((c,), F32)
        rvar = jnp.ones((c,), F32)
        scale = gamma / jnp.sqrt(rvar + eps)
        shift = beta - rmean * scale
        return scale, shift

    def branch(conv_shapes, flat_in, feat):
        (c1, c2, c3) = conv_shapes
        bn1s, bn1t = bn(c1[0])
        bn2s, bn2t = bn(c2[0])
        return dict(
            w1=nrm(c1), b1=nrm((c1[0],)), bn1_scale=bn1s, bn1_shift=bn1t,
            w2=nrm(c2), b2=nrm((c2[0],)), bn2_scale=bn2s, bn2_shift=bn2t,
            w3=nrm(c3), b3=nrm((c3[0],)),
            wd=nrm((flat_in, feat)), bd=nrm((feat,)),
        )

    params = {
        "ae":    branch(((3, 1, 61), (5, 3, 23), (8, 5, 4)), 360, F_AE),
        "mic":   branch(((3, 1, 46), (5, 3, 14), (8, 5, 3)), 360, F_MIC),
        "force": branch(((6, 3, 7), (15, 6, 3), (24, 15, 4)), 24 * 13, F_FORCE),
    }
    D = F_AE + F_MIC + F_FORCE
    lstm = []
    for l in range(num_layers):
        in_d = D if l == 0 else hidden
        lstm.append(dict(
            w_ih=nrm((4 * hidden, in_d)),
            w_hh=nrm((4 * hidden, hidden)),
            b_ih=nrm((4 * hidden,)),
            b_hh=nrm((4 * hidden,)),
        ))
    params["lstm"] = lstm
    params["dense1_w"] = nrm((hidden, 125))
    params["dense1_b"] = nrm((125,))
    cfg = dict(hidden=hidden, num_layers=num_layers,
               F_AE=F_AE, F_MIC=F_MIC, F_FORCE=F_FORCE)
    return params, cfg


# ----------------------------------------------------------------------------
if __name__ == "__main__":
    key = jax.random.PRNGKey(0)
    k_param, k_ae, k_mic, k_force = jax.random.split(key, 4)

    # tillTimeT and the minimal signal lengths consistent with the CNN stacks
    # (flatten sizes 360 / 360 / 24*13 force L_AE=37501, L_Mic=9376, L_F=125).
    T = 4
    params, cfg = init_params(k_param, F_AE=8, F_MIC=8, F_FORCE=16,
                              hidden=32, num_layers=1)

    AE = jax.random.normal(k_ae, (T, 37501), dtype=F32)
    Mic = jax.random.normal(k_mic, (T, 9376), dtype=F32)
    Forces = jax.random.normal(k_force, (3, T, 125), dtype=F32)

    fwd = jax.jit(lambda a, m, f: lstm_model_forward(params, cfg, a, m, f))
    out = jax.block_until_ready(fwd(AE, Mic, Forces))

    assert out.shape == (1, 125), out.shape
    assert bool(jnp.all(jnp.isfinite(out)))
    print("KERNEL_OK")
</pallas_src>

<mosaic_0001>
module attributes {stable_mosaic.version = 11 : i64} {
  func.func @_branch_kernel(%arg0: i32, %arg1: memref<1x61x1880xbf16, #tpu.memory_space<vmem>>, %arg2: memref<3x61xbf16, #tpu.memory_space<vmem>>, %arg3: memref<3x1xf32, #tpu.memory_space<vmem>>, %arg4: memref<3x1xf32, #tpu.memory_space<vmem>>, %arg5: memref<5x69xf32, #tpu.memory_space<vmem>>, %arg6: memref<5x1xf32, #tpu.memory_space<vmem>>, %arg7: memref<5x1xf32, #tpu.memory_space<vmem>>, %arg8: memref<5x1xf32, #tpu.memory_space<vmem>>, %arg9: memref<8x20xf32, #tpu.memory_space<vmem>>, %arg10: memref<8x1xf32, #tpu.memory_space<vmem>>, %arg11: memref<360x8xf32, #tpu.memory_space<vmem>>, %arg12: memref<1x8xf32, #tpu.memory_space<vmem>>, %arg13: memref<1x1x8xf32, #tpu.memory_space<vmem>>, %arg14: memref<69x47xf32, #tpu.memory_space<vmem>>, %arg15: memref<20x46xf32, #tpu.memory_space<vmem>>, %arg16: memref<1x360xf32, #tpu.memory_space<vmem>>) attributes {dimension_semantics = [#tpu.dimension_semantics<parallel>], iteration_bounds = array<i64: 4>, scalar_prefetch = 0 : i64, scratch_operands = 3 : i64, tpu.core_type = #tpu.core_type<tc>, window_params = [{transform_indices = @transform_0, window_bounds = array<i64: 1, 61, 1880>}, {pipeline_mode = #tpu.pipeline_mode<synchronous>, transform_indices = @transform_1, window_bounds = array<i64: 3, 61>}, {pipeline_mode = #tpu.pipeline_mode<synchronous>, transform_indices = @transform_2, window_bounds = array<i64: 3, 1>}, {pipeline_mode = #tpu.pipeline_mode<synchronous>, transform_indices = @transform_3, window_bounds = array<i64: 3, 1>}, {pipeline_mode = #tpu.pipeline_mode<synchronous>, transform_indices = @transform_4, window_bounds = array<i64: 5, 69>}, {pipeline_mode = #tpu.pipeline_mode<synchronous>, transform_indices = @transform_5, window_bounds = array<i64: 5, 1>}, {pipeline_mode = #tpu.pipeline_mode<synchronous>, transform_indices = @transform_6, window_bounds = array<i64: 5, 1>}, {pipeline_mode = #tpu.pipeline_mode<synchronous>, transform_indices = @transform_7, window_bounds = array<i64: 5, 1>}, {pipeline_mode = #tpu.pipeline_mode<synchronous>, transform_indices = @transform_8, window_bounds = array<i64: 8, 20>}, {pipeline_mode = #tpu.pipeline_mode<synchronous>, transform_indices = @transform_9, window_bounds = array<i64: 8, 1>}, {pipeline_mode = #tpu.pipeline_mode<synchronous>, transform_indices = @transform_10, window_bounds = array<i64: 360, 8>}, {pipeline_mode = #tpu.pipeline_mode<synchronous>, transform_indices = @transform_11, window_bounds = array<i64: 1, 8>}, {transform_indices = @transform_12, window_bounds = array<i64: 1, 1, 8>}]} {
    %c0 = arith.constant 0 : index
    %c0_0 = arith.constant 0 : index
    %0 = vector.load %arg2[%c0, %c0_0] : memref<3x61xbf16, #tpu.memory_space<vmem>>, vector<3x61xbf16>
    %c0_1 = arith.constant 0 : index
    %c0_2 = arith.constant 0 : index
    %c0_3 = arith.constant 0 : index
    %1 = vector.load %arg1[%c0_1, %c0_2, %c0_3] : memref<1x61x1880xbf16, #tpu.memory_space<vmem>>, vector<1x61x1880xbf16>
    %2 = vector.shape_cast %1 : vector<1x61x1880xbf16> to vector<61x1880xbf16>
    %cst = arith.constant dense<0.000000e+00> : vector<3x1880xf32>
    %3 = tpu.matmul %0, %2, %cst {dimension_numbers = #tpu.dot_dimension_numbers<[1], [0], [0], [1], [0, 0, 1, 1], [], []>} : vector<3x61xbf16>, vector<61x1880xbf16>, vector<3x1880xf32> -> vector<3x1880xf32>
    %c0_4 = arith.constant 0 : index
    %c0_5 = arith.constant 0 : index
    %4 = vector.load %arg3[%c0_4, %c0_5] : memref<3x1xf32, #tpu.memory_space<vmem>>, vector<3x1xf32>
    %5 = vector.broadcast %4 : vector<3x1xf32> to vector<3x1880xf32>
    %6 = arith.mulf %3, %5 : vector<3x1880xf32>
    %c0_6 = arith.constant 0 : index
    %c0_7 = arith.constant 0 : index
    %7 = vector.load %arg4[%c0_6, %c0_7] : memref<3x1xf32, #tpu.memory_space<vmem>>, vector<3x1xf32>
    %8 = vector.broadcast %7 : vector<3x1xf32> to vector<3x1880xf32>
    %9 = arith.addf %6, %8 : vector<3x1880xf32>
    %cst_8 = arith.constant 0.000000e+00 : f32
    %10 = vector.broadcast %cst_8 : f32 to vector<3x1880xf32>
    %11 = arith.maximumf %9, %10 : vector<3x1880xf32>
    %12 = vector.extract_strided_slice %11 {offsets = [0, 0], sizes = [3, 47], strides = [1, 1]} : vector<3x1880xf32> to vector<3x47xf32>
    %c0_9 = arith.constant 0 : index
    %c0_10 = arith.constant 0 : index
    %13 = vector.load %arg14[%c0_9, %c0_10] : memref<69x47xf32, #tpu.memory_space<vmem>>, vector<3x47xf32>
    tpu.vector_store %arg14[%c0_9, %c0_10], %12 {strides = array<i32>} : memref<69x47xf32, #tpu.memory_space<vmem>>, vector<3x47xf32>,
    %14 = vector.extract_strided_slice %11 {offsets = [0, 47], sizes = [3, 47], strides = [1, 1]} : vector<3x1880xf32> to vector<3x47xf32>
    %c3 = arith.constant 3 : index
    %c0_11 = arith.constant 0 : index
    %15 = vector.load %arg14[%c3, %c0_11] : memref<69x47xf32, #tpu.memory_space<vmem>>, vector<3x47xf32>
    tpu.vector_store %arg14[%c3, %c0_11], %14 {strides = array<i32>} : memref<69x47xf32, #tpu.memory_space<vmem>>, vector<3x47xf32>,
    %16 = vector.extract_strided_slice %11 {offsets = [0, 94], sizes = [3, 47], strides = [1, 1]} : vector<3x1880xf32> to vector<3x47xf32>
    %c6 = arith.constant 6 : index
    %c0_12 = arith.constant 0 : index
    %17 = vector.load %arg14[%c6, %c0_12] : memref<69x47xf32, #tpu.memory_space<vmem>>, vector<3x47xf32>
    tpu.vector_store %arg14[%c6, %c0_12], %16 {strides = array<i32>} : memref<69x47xf32, #tpu.memory_space<vmem>>, vector<3x47xf32>,
    %18 = vector.extract_strided_slice %11 {offsets = [0, 141], sizes = [3, 47], strides = [1, 1]} : vector<3x1880xf32> to vector<3x47xf32>
    %c9 = arith.constant 9 : index
    %c0_13 = arith.constant 0 : index
    %19 = vector.load %arg14[%c9, %c0_13] : memref<69x47xf32, #tpu.memory_space<vmem>>, vector<3x47xf32>
    tpu.vector_store %arg14[%c9, %c0_13], %18 {strides = array<i32>} : memref<69x47xf32, #tpu.memory_space<vmem>>, vector<3x47xf32>,
    %20 = vector.extract_strided_slice %11 {offsets = [0, 188], sizes = [3, 47], strides = [1, 1]} : vector<3x1880xf32> to vector<3x47xf32>
    %c12 = arith.constant 12 : index
    %c0_14 = arith.constant 0 : index
    %21 = vector.load %arg14[%c12, %c0_14] : memref<69x47xf32, #tpu.memory_space<vmem>>, vector<3x47xf32>
    tpu.vector_store %arg14[%c12, %c0_14], %20 {strides = array<i32>} : memref<69x47xf32, #tpu.memory_space<vmem>>, vector<3x47xf32>,
    %22 = vector.extract_strided_slice %11 {offsets = [0, 235], sizes = [3, 47], strides = [1, 1]} : vector<3x1880xf32> to vector<3x47xf32>
    %c15 = arith.constant 15 : index
    %c0_15 = arith.constant 0 : index
    %23 = vector.load %arg14[%c15, %c0_15] : memref<69x47xf32, #tpu.memory_space<vmem>>, vector<3x47xf32>
    tpu.vector_store %arg14[%c15, %c0_15], %22 {strides = array<i32>} : memref<69x47xf32, #tpu.memory_space<vmem>>, vector<3x47xf32>,
    %24 = vector.extract_strided_slice %11 {offsets = [0, 282], sizes = [3, 47], strides = [1, 1]} : vector<3x1880xf32> to vector<3x47xf32>
    %c18 = arith.constant 18 : index
    %c0_16 = arith.constant 0 : index
    %25 = vector.load %arg14[%c18, %c0_16] : memref<69x47xf32, #tpu.memory_space<vmem>>, vector<3x47xf32>
    tpu.vector_store %arg14[%c18, %c0_16], %24 {strides = array<i32>} : memref<69x47xf32, #tpu.memory_space<vmem>>, vector<3x47xf32>,
    %26 = vector.extract_strided_slice %11 {offsets = [0, 329], sizes = [3, 47], strides = [1, 1]} : vector<3x1880xf32> to vector<3x47xf32>
    %c21 = arith.constant 21 : index
    %c0_17 = arith.constant 0 : index
    %27 = vector.load %arg14[%c21, %c0_17] : memref<69x47xf32, #tpu.memory_space<vmem>>, vector<3x47xf32>
    tpu.vector_store %arg14[%c21, %c0_17], %26 {strides = array<i32>} : memref<69x47xf32, #tpu.memory_space<vmem>>, vector<3x47xf32>,
    %28 = vector.extract_strided_slice %11 {offsets = [0, 376], sizes = [3, 47], strides = [1, 1]} : vector<3x1880xf32> to vector<3x47xf32>
    %c24 = arith.constant 24 : index
    %c0_18 = arith.constant 0 : index
    %29 = vector.load %arg14[%c24, %c0_18] : memref<69x47xf32, #tpu.memory_space<vmem>>, vector<3x47xf32>
    tpu.vector_store %arg14[%c24, %c0_18], %28 {strides = array<i32>} : memref<69x47xf32, #tpu.memory_space<vmem>>, vector<3x47xf32>,
    %30 = vector.extract_strided_slice %11 {offsets = [0, 423], sizes = [3, 47], strides = [1, 1]} : vector<3x1880xf32> to vector<3x47xf32>
    %c27 = arith.constant 27 : index
    %c0_19 = arith.constant 0 : index
    %31 = vector.load %arg14[%c27, %c0_19] : memref<69x47xf32, #tpu.memory_space<vmem>>, vector<3x47xf32>
    tpu.vector_store %arg14[%c27, %c0_19], %30 {strides = array<i32>} : memref<69x47xf32, #tpu.memory_space<vmem>>, vector<3x47xf32>,
    %32 = vector.extract_strided_slice %11 {offsets = [0, 470], sizes = [3, 47], strides = [1, 1]} : vector<3x1880xf32> to vector<3x47xf32>
    %c30 = arith.constant 30 : index
    %c0_20 = arith.constant 0 : index
    %33 = vector.load %arg14[%c30, %c0_20] : memref<69x47xf32, #tpu.memory_space<vmem>>, vector<3x47xf32>
    tpu.vector_store %arg14[%c30, %c0_20], %32 {strides = array<i32>} : memref<69x47xf32, #tpu.memory_space<vmem>>, vector<3x47xf32>,
    %34 = vector.extract_strided_slice %11 {offsets = [0, 517], sizes = [3, 47], strides = [1, 1]} : vector<3x1880xf32> to vector<3x47xf32>
    %c33 = arith.constant 33 : index
    %c0_21 = arith.constant 0 : index
    %35 = vector.load %arg14[%c33, %c0_21] : memref<69x47xf32, #tpu.memory_space<vmem>>, vector<3x47xf32>
    tpu.vector_store %arg14[%c33, %c0_21], %34 {strides = array<i32>} : memref<69x47xf32, #tpu.memory_space<vmem>>, vector<3x47xf32>,
    %36 = vector.extract_strided_slice %11 {offsets = [0, 564], sizes = [3, 47], strides = [1, 1]} : vector<3x1880xf32> to vector<3x47xf32>
    %c36 = arith.constant 36 : index
    %c0_22 = arith.constant 0 : index
    %37 = vector.load %arg14[%c36, %c0_22] : memref<69x47xf32, #tpu.memory_space<vmem>>, vector<3x47xf32>
    tpu.vector_store %arg14[%c36, %c0_22], %36 {strides = array<i32>} : memref<69x47xf32, #tpu.memory_space<vmem>>, vector<3x47xf32>,
    %38 = vector.extract_strided_slice %11 {offsets = [0, 611], sizes = [3, 47], strides = [1, 1]} : vector<3x1880xf32> to vector<3x47xf32>
    %c39 = arith.constant 39 : index
    %c0_23 = arith.constant 0 : index
    %39 = vector.load %arg14[%c39, %c0_23] : memref<69x47xf32, #tpu.memory_space<vmem>>, vector<3x47xf32>
    tpu.vector_store %arg14[%c39, %c0_23], %38 {strides = array<i32>} : memref<69x47xf32, #tpu.memory_space<vmem>>, vector<3x47xf32>,
    %40 = vector.extract_strided_slice %11 {offsets = [0, 658], sizes = [3, 47], strides = [1, 1]} : vector<3x1880xf32> to vector<3x47xf32>
    %c42 = arith.constant 42 : index
    %c0_24 = arith.constant 0 : index
    %41 = vector.load %arg14[%c42, %c0_24] : memref<69x47xf32, #tpu.memory_space<vmem>>, vector<3x47xf32>
    tpu.vector_store %arg14[%c42, %c0_24], %40 {strides = array<i32>} : memref<69x47xf32, #tpu.memory_space<vmem>>, vector<3x47xf32>,
    %42 = vector.extract_strided_slice %11 {offsets = [0, 705], sizes = [3, 47], strides = [1, 1]} : vector<3x1880xf32> to vector<3x47xf32>
    %c45 = arith.constant 45 : index
    %c0_25 = arith.constant 0 : index
    %43 = vector.load %arg14[%c45, %c0_25] : memref<69x47xf32, #tpu.memory_space<vmem>>, vector<3x47xf32>
    tpu.vector_store %arg14[%c45, %c0_25], %42 {strides = array<i32>} : memref<69x47xf32, #tpu.memory_space<vmem>>, vector<3x47xf32>,
    %44 = vector.extract_strided_slice %11 {offsets = [0, 752], sizes = [3, 47], strides = [1, 1]} : vector<3x1880xf32> to vector<3x47xf32>
    %c48 = arith.constant 48 : index
    %c0_26 = arith.constant 0 : index
    %45 = vector.load %arg14[%c48, %c0_26] : memref<69x47xf32, #tpu.memory_space<vmem>>, vector<3x47xf32>
    tpu.vector_store %arg14[%c48, %c0_26], %44 {strides = array<i32>} : memref<69x47xf32, #tpu.memory_space<vmem>>, vector<3x47xf32>,
    %46 = vector.extract_strided_slice %11 {offsets = [0, 799], sizes = [3, 47], strides = [1, 1]} : vector<3x1880xf32> to vector<3x47xf32>
    %c51 = arith.constant 51 : index
    %c0_27 = arith.constant 0 : index
    %47 = vector.load %arg14[%c51, %c0_27] : memref<69x47xf32, #tpu.memory_space<vmem>>, vector<3x47xf32>
    tpu.vector_store %arg14[%c51, %c0_27], %46 {strides = array<i32>} : memref<69x47xf32, #tpu.memory_space<vmem>>, vector<3x47xf32>,
    %48 = vector.extract_strided_slice %11 {offsets = [0, 846], sizes = [3, 47], strides = [1, 1]} : vector<3x1880xf32> to vector<3x47xf32>
    %c54 = arith.constant 54 : index
    %c0_28 = arith.constant 0 : index
    %49 = vector.load %arg14[%c54, %c0_28] : memref<69x47xf32, #tpu.memory_space<vmem>>, vector<3x47xf32>
    tpu.vector_store %arg14[%c54, %c0_28], %48 {strides = array<i32>} : memref<69x47xf32, #tpu.memory_space<vmem>>, vector<3x47xf32>,
    %50 = vector.extract_strided_slice %11 {offsets = [0, 893], sizes = [3, 47], strides = [1, 1]} : vector<3x1880xf32> to vector<3x47xf32>
    %c57 = arith.constant 57 : index
    %c0_29 = arith.constant 0 : index
    %51 = vector.load %arg14[%c57, %c0_29] : memref<69x47xf32, #tpu.memory_space<vmem>>, vector<3x47xf32>
    tpu.vector_store %arg14[%c57, %c0_29], %50 {strides = array<i32>} : memref<69x47xf32, #tpu.memory_space<vmem>>, vector<3x47xf32>,
    %52 = vector.extract_strided_slice %11 {offsets = [0, 940], sizes = [3, 47], strides = [1, 1]} : vector<3x1880xf32> to vector<3x47xf32>
    %c60 = arith.constant 60 : index
    %c0_30 = arith.constant 0 : index
    %53 = vector.load %arg14[%c60, %c0_30] : memref<69x47xf32, #tpu.memory_space<vmem>>, vector<3x47xf32>
    tpu.vector_store %arg14[%c60, %c0_30], %52 {strides = array<i32>} : memref<69x47xf32, #tpu.memory_space<vmem>>, vector<3x47xf32>,
    %54 = vector.extract_strided_slice %11 {offsets = [0, 987], sizes = [3, 47], strides = [1, 1]} : vector<3x1880xf32> to vector<3x47xf32>
    %c63 = arith.constant 63 : index
    %c0_31 = arith.constant 0 : index
    %55 = vector.load %arg14[%c63, %c0_31] : memref<69x47xf32, #tpu.memory_space<vmem>>, vector<3x47xf32>
    tpu.vector_store %arg14[%c63, %c0_31], %54 {strides = array<i32>} : memref<69x47xf32, #tpu.memory_space<vmem>>, vector<3x47xf32>,
    %56 = vector.extract_strided_slice %11 {offsets = [0, 1034], sizes = [3, 47], strides = [1, 1]} : vector<3x1880xf32> to vector<3x47xf32>
    %c66 = arith.constant 66 : index
    %c0_32 = arith.constant 0 : index
    %57 = vector.load %arg14[%c66, %c0_32] : memref<69x47xf32, #tpu.memory_space<vmem>>, vector<3x47xf32>
    tpu.vector_store %arg14[%c66, %c0_32], %56 {strides = array<i32>} : memref<69x47xf32, #tpu.memory_space<vmem>>, vector<3x47xf32>,
    %c0_33 = arith.constant 0 : index
    %c0_34 = arith.constant 0 : index
    %58 = vector.load %arg5[%c0_33, %c0_34] : memref<5x69xf32, #tpu.memory_space<vmem>>, vector<5x69xf32>
    %c0_35 = arith.constant 0 : index
    %c0_36 = arith.constant 0 : index
    %59 = vector.load %arg14[%c0_35, %c0_36] : memref<69x47xf32, #tpu.memory_space<vmem>>, vector<69x47xf32>
    %cst_37 = arith.constant dense<0.000000e+00> : vector<5x47xf32>
    %60 = tpu.matmul %58, %59, %cst_37 {dimension_numbers = #tpu.dot_dimension_numbers<[1], [0], [0], [1], [0, 0, 1, 1], [], []>} : vector<5x69xf32>, vector<69x47xf32>, vector<5x47xf32> -> vector<5x47xf32>
    %c0_38 = arith.constant 0 : index
    %c0_39 = arith.constant 0 : index
    %61 = vector.load %arg6[%c0_38, %c0_39] : memref<5x1xf32, #tpu.memory_space<vmem>>, vector<5x1xf32>
    %62 = vector.broadcast %61 : vector<5x1xf32> to vector<5x47xf32>
    %63 = arith.addf %60, %62 : vector<5x47xf32>
    %cst_40 = arith.constant 0.000000e+00 : f32
    %64 = vector.broadcast %cst_40 : f32 to vector<5x47xf32>
    %65 = arith.maximumf %63, %64 : vector<5x47xf32>
    %c0_41 = arith.constant 0 : index
    %c0_42 = arith.constant 0 : index
    %66 = vector.load %arg7[%c0_41, %c0_42] : memref<5x1xf32, #tpu.memory_space<vmem>>, vector<5x1xf32>
    %67 = vector.broadcast %66 : vector<5x1xf32> to vector<5x47xf32>
    %68 = arith.mulf %65, %67 : vector<5x47xf32>
    %c0_43 = arith.constant 0 : index
    %c0_44 = arith.constant 0 : index
    %69 = vector.load %arg8[%c0_43, %c0_44] : memref<5x1xf32, #tpu.memory_space<vmem>>, vector<5x1xf32>
    %70 = vector.broadcast %69 : vector<5x1xf32> to vector<5x47xf32>
    %71 = arith.addf %68, %70 : vector<5x47xf32>
    %72 = vector.extract_strided_slice %11 {offsets = [0, 470], sizes = [3, 47], strides = [1, 1]} : vector<3x1880xf32> to vector<3x47xf32>
    %c0_45 = arith.constant 0 : index
    %c0_46 = arith.constant 0 : index
    %73 = vector.load %arg14[%c0_45, %c0_46] : memref<69x47xf32, #tpu.memory_space<vmem>>, vector<3x47xf32>
    tpu.vector_store %arg14[%c0_45, %c0_46], %72 {strides = array<i32>} : memref<69x47xf32, #tpu.memory_space<vmem>>, vector<3x47xf32>,
    %74 = vector.extract_strided_slice %11 {offsets = [0, 517], sizes = [3, 47], strides = [1, 1]} : vector<3x1880xf32> to vector<3x47xf32>
    %c3_47 = arith.constant 3 : index
    %c0_48 = arith.constant 0 : index
    %75 = vector.load %arg14[%c3_47, %c0_48] : memref<69x47xf32, #tpu.memory_space<vmem>>, vector<3x47xf32>
    tpu.vector_store %arg14[%c3_47, %c0_48], %74 {strides = array<i32>} : memref<69x47xf32, #tpu.memory_space<vmem>>, vector<3x47xf32>,
    %76 = vector.extract_strided_slice %11 {offsets = [0, 564], sizes = [3, 47], strides = [1, 1]} : vector<3x1880xf32> to vector<3x47xf32>
    %c6_49 = arith.constant 6 : index
    %c0_50 = arith.constant 0 : index
    %77 = vector.load %arg14[%c6_49, %c0_50] : memref<69x47xf32, #tpu.memory_space<vmem>>, vector<3x47xf32>
    tpu.vector_store %arg14[%c6_49, %c0_50], %76 {strides = array<i32>} : memref<69x47xf32, #tpu.memory_space<vmem>>, vector<3x47xf32>,
    %78 = vector.extract_strided_slice %11 {offsets = [0, 611], sizes = [3, 47], strides = [1, 1]} : vector<3x1880xf32> to vector<3x47xf32>
    %c9_51 = arith.constant 9 : index
    %c0_52 = arith.constant 0 : index
    %79 = vector.load %arg14[%c9_51, %c0_52] : memref<69x47xf32, #tpu.memory_space<vmem>>, vector<3x47xf32>
    tpu.vector_store %arg14[%c9_51, %c0_52], %78 {strides = array<i32>} : memref<69x47xf32, #tpu.memory_space<vmem>>, vector<3x47xf32>,
    %80 = vector.extract_strided_slice %11 {offsets = [0, 658], sizes = [3, 47], strides = [1, 1]} : vector<3x1880xf32> to vector<3x47xf32>
    %c12_53 = arith.constant 12 : index
    %c0_54 = arith.constant 0 : index
    %81 = vector.load %arg14[%c12_53, %c0_54] : memref<69x47xf32, #tpu.memory_space<vmem>>, vector<3x47xf32>
    tpu.vector_store %arg14[%c12_53, %c0_54], %80 {strides = array<i32>} : memref<69x47xf32, #tpu.memory_space<vmem>>, vector<3x47xf32>,
    %82 = vector.extract_strided_slice %11 {offsets = [0, 705], sizes = [3, 47], strides = [1, 1]} : vector<3x1880xf32> to vector<3x47xf32>
    %c15_55 = arith.constant 15 : index
    %c0_56 = arith.constant 0 : index
    %83 = vector.load %arg14[%c15_55, %c0_56] : memref<69x47xf32, #tpu.memory_space<vmem>>, vector<3x47xf32>
    tpu.vector_store %arg14[%c15_55, %c0_56], %82 {strides = array<i32>} : memref<69x47xf32, #tpu.memory_space<vmem>>, vector<3x47xf32>,
    %84 = vector.extract_strided_slice %11 {offsets = [0, 752], sizes = [3, 47], strides = [1, 1]} : vector<3x1880xf32> to vector<3x47xf32>
    %c18_57 = arith.constant 18 : index
    %c0_58 = arith.constant 0 : index
    %85 = vector.load %arg14[%c18_57, %c0_58] : memref<69x47xf32, #tpu.memory_space<vmem>>, vector<3x47xf32>
    tpu.vector_store %arg14[%c18_57, %c0_58], %84 {strides = array<i32>} : memref<69x47xf32, #tpu.memory_space<vmem>>, vector<3x47xf32>,
    %86 = vector.extract_strided_slice %11 {offsets = [0, 799], sizes = [3, 47], strides = [1, 1]} : vector<3x1880xf32> to vector<3x47xf32>
    %c21_59 = arith.constant 21 : index
    %c0_60 = arith.constant 0 : index
    %87 = vector.load %arg14[%c21_59, %c0_60] : memref<69x47xf32, #tpu.memory_space<vmem>>, vector<3x47xf32>
    tpu.vector_store %arg14[%c21_59, %c0_60], %86 {strides = array<i32>} : memref<69x47xf32, #tpu.memory_space<vmem>>, vector<3x47xf32>,
    %88 = vector.extract_strided_slice %11 {offsets = [0, 846], sizes = [3, 47], strides = [1, 1]} : vector<3x1880xf32> to vector<3x47xf32>
    %c24_61 = arith.constant 24 : index
    %c0_62 = arith.constant 0 : index
    %89 = vector.load %arg14[%c24_61, %c0_62] : memref<69x47xf32, #tpu.memory_space<vmem>>, vector<3x47xf32>
    tpu.vector_store %arg14[%c24_61, %c0_62], %88 {strides = array<i32>} : memref<69x47xf32, #tpu.memory_space<vmem>>, vector<3x47xf32>,
    %90 = vector.extract_strided_slice %11 {offsets = [0, 893], sizes = [3, 47], strides = [1, 1]} : vector<3x1880xf32> to vector<3x47xf32>
    %c27_63 = arith.constant 27 : index
    %c0_64 = arith.constant 0 : index
    %91 = vector.load %arg14[%c27_63, %c0_64] : memref<69x47xf32, #tpu.memory_space<vmem>>, vector<3x47xf32>
    tpu.vector_store %arg14[%c27_63, %c0_64], %90 {strides = array<i32>} : memref<69x47xf32, #tpu.memory_space<vmem>>, vector<3x47xf32>,
    %92 = vector.extract_strided_slice %11 {offsets = [0, 940], sizes = [3, 47], strides = [1, 1]} : vector<3x1880xf32> to vector<3x47xf32>
    %c30_65 = arith.constant 30 : index
    %c0_66 = arith.constant 0 : index
    %93 = vector.load %arg14[%c30_65, %c0_66] : memref<69x47xf32, #tpu.memory_space<vmem>>, vector<3x47xf32>
    tpu.vector_store %arg14[%c30_65, %c0_66], %92 {strides = array<i32>} : memref<69x47xf32, #tpu.memory_space<vmem>>, vector<3x47xf32>,
    %94 = vector.extract_strided_slice %11 {offsets = [0, 987], sizes = [3, 47], strides = [1, 1]} : vector<3x1880xf32> to vector<3x47xf32>
    %c33_67 = arith.constant 33 : index
    %c0_68 = arith.constant 0 : index
    %95 = vector.load %arg14[%c33_67, %c0_68] : memref<69x47xf32, #tpu.memory_space<vmem>>, vector<3x47xf32>
    tpu.vector_store %arg14[%c33_67, %c0_68], %94 {strides = array<i32>} : memref<69x47xf32, #tpu.memory_space<vmem>>, vector<3x47xf32>,
    %96 = vector.extract_strided_slice %11 {offsets = [0, 1034], sizes = [3, 47], strides = [1, 1]} : vector<3x1880xf32> to vector<3x47xf32>
    %c36_69 = arith.constant 36 : index
    %c0_70 = arith.constant 0 : index
    %97 = vector.load %arg14[%c36_69, %c0_70] : memref<69x47xf32, #tpu.memory_space<vmem>>, vector<3x47xf32>
    tpu.vector_store %arg14[%c36_69, %c0_70], %96 {strides = array<i32>} : memref<69x47xf32, #tpu.memory_space<vmem>>, vector<3x47xf32>,
    %98 = vector.extract_strided_slice %11 {offsets = [0, 1081], sizes = [3, 47], strides = [1, 1]} : vector<3x1880xf32> to vector<3x47xf32>
    %c39_71 = arith.constant 39 : index
    %c0_72 = arith.constant 0 : index
    %99 = vector.load %arg14[%c39_71, %c0_72] : memref<69x47xf32, #tpu.memory_space<vmem>>, vector<3x47xf32>
    tpu.vector_store %arg14[%c39_71, %c0_72], %98 {strides = array<i32>} : memref<69x47xf32, #tpu.memory_space<vmem>>, vector<3x47xf32>,
    %100 = vector.extract_strided_slice %11 {offsets = [0, 1128], sizes = [3, 47], strides = [1, 1]} : vector<3x1880xf32> to vector<3x47xf32>
    %c42_73 = arith.constant 42 : index
    %c0_74 = arith.constant 0 : index
    %101 = vector.load %arg14[%c42_73, %c0_74] : memref<69x47xf32, #tpu.memory_space<vmem>>, vector<3x47xf32>
    tpu.vector_store %arg14[%c42_73, %c0_74], %100 {strides = array<i32>} : memref<69x47xf32, #tpu.memory_space<vmem>>, vector<3x47xf32>,
    %102 = vector.extract_strided_slice %11 {offsets = [0, 1175], sizes = [3, 47], strides = [1, 1]} : vector<3x1880xf32> to vector<3x47xf32>
    %c45_75 = arith.constant 45 : index
    %c0_76 = arith.constant 0 : index
    %103 = vector.load %arg14[%c45_75, %c0_76] : memref<69x47xf32, #tpu.memory_space<vmem>>, vector<3x47xf32>
    tpu.vector_store %arg14[%c45_75, %c0_76], %102 {strides = array<i32>} : memref<69x47xf32, #tpu.memory_space<vmem>>, vector<3x47xf32>,
    %104 = vector.extract_strided_slice %11 {offsets = [0, 1222], sizes = [3, 47], strides = [1, 1]} : vector<3x1880xf32> to vector<3x47xf32>
    %c48_77 = arith.constant 48 : index
    %c0_78 = arith.constant 0 : index
    %105 = vector.load %arg14[%c48_77, %c0_78] : memref<69x47xf32, #tpu.memory_space<vmem>>, vector<3x47xf32>
    tpu.vector_store %arg14[%c48_77, %c0_78], %104 {strides = array<i32>} : memref<69x47xf32, #tpu.memory_space<vmem>>, vector<3x47xf32>,
    %106 = vector.extract_strided_slice %11 {offsets = [0, 1269], sizes = [3, 47], strides = [1, 1]} : vector<3x1880xf32> to vector<3x47xf32>
    %c51_79 = arith.constant 51 : index
    %c0_80 = arith.constant 0 : index
    %107 = vector.load %arg14[%c51_79, %c0_80] : memref<69x47xf32, #tpu.memory_space<vmem>>, vector<3x47xf32>
    tpu.vector_store %arg14[%c51_79, %c0_80], %106 {strides = array<i32>} : memref<69x47xf32, #tpu.memory_space<vmem>>, vector<3x47xf32>,
    %108 = vector.extract_strided_slice %11 {offsets = [0, 1316], sizes = [3, 47], strides = [1, 1]} : vector<3x1880xf32> to vector<3x47xf32>
    %c54_81 = arith.constant 54 : index
    %c0_82 = arith.constant 0 : index
    %109 = vector.load %arg14[%c54_81, %c0_82] : memref<69x47xf32, #tpu.memory_space<vmem>>, vector<3x47xf32>
    tpu.vector_store %arg14[%c54_81, %c0_82], %108 {strides = array<i32>} : memref<69x47xf32, #tpu.memory_space<vmem>>, vector<3x47xf32>,
    %110 = vector.extract_strided_slice %11 {offsets = [0, 1363], sizes = [3, 47], strides = [1, 1]} : vector<3x1880xf32> to vector<3x47xf32>
    %c57_83 = arith.constant 57 : index
    %c0_84 = arith.constant 0 : index
    %111 = vector.load %arg14[%c57_83, %c0_84] : memref<69x47xf32, #tpu.memory_space<vmem>>, vector<3x47xf32>
    tpu.vector_store %arg14[%c57_83, %c0_84], %110 {strides = array<i32>} : memref<69x47xf32, #tpu.memory_space<vmem>>, vector<3x47xf32>,
    %112 = vector.extract_strided_slice %11 {offsets = [0, 1410], sizes = [3, 47], strides = [1, 1]} : vector<3x1880xf32> to vector<3x47xf32>
    %c60_85 = arith.constant 60 : index
    %c0_86 = arith.constant 0 : index
    %113 = vector.load %arg14[%c60_85, %c0_86] : memref<69x47xf32, #tpu.memory_space<vmem>>, vector<3x47xf32>
    tpu.vector_store %arg14[%c60_85, %c0_86], %112 {strides = array<i32>} : memref<69x47xf32, #tpu.memory_space<vmem>>, vector<3x47xf32>,
    %114 = vector.extract_strided_slice %11 {offsets = [0, 1457], sizes = [3, 47], strides = [1, 1]} : vector<3x1880xf32> to vector<3x47xf32>
    %c63_87 = arith.constant 63 : index
    %c0_88 = arith.constant 0 : index
    %115 = vector.load %arg14[%c63_87, %c0_88] : memref<69x47xf32, #tpu.memory_space<vmem>>, vector<3x47xf32>
    tpu.vector_store %arg14[%c63_87, %c0_88], %114 {strides = array<i32>} : memref<69x47xf32, #tpu.memory_space<vmem>>, vector<3x47xf32>,
    %116 = vector.extract_strided_slice %11 {offsets = [0, 1504], sizes = [3, 47], strides = [1, 1]} : vector<3x1880xf32> to vector<3x47xf32>
    %c66_89 = arith.constant 66 : index
    %c0_90 = arith.constant 0 : index
    %117 = vector.load %arg14[%c66_89, %c0_90] : memref<69x47xf32, #tpu.memory_space<vmem>>, vector<3x47xf32>
    tpu.vector_store %arg14[%c66_89, %c0_90], %116 {strides = array<i32>} : memref<69x47xf32, #tpu.memory_space<vmem>>, vector<3x47xf32>,
    %c0_91 = arith.constant 0 : index
    %c0_92 = arith.constant 0 : index
    %118 = vector.load %arg5[%c0_91, %c0_92] : memref<5x69xf32, #tpu.memory_space<vmem>>, vector<5x69xf32>
    %c0_93 = arith.constant 0 : index
    %c0_94 = arith.constant 0 : index
    %119 = vector.load %arg14[%c0_93, %c0_94] : memref<69x47xf32, #tpu.memory_space<vmem>>, vector<69x47xf32>
    %cst_95 = arith.constant dense<0.000000e+00> : vector<5x47xf32>
    %120 = tpu.matmul %118, %119, %cst_95 {dimension_numbers = #tpu.dot_dimension_numbers<[1], [0], [0], [1], [0, 0, 1, 1], [], []>} : vector<5x69xf32>, vector<69x47xf32>, vector<5x47xf32> -> vector<5x47xf32>
    %c0_96 = arith.constant 0 : index
    %c0_97 = arith.constant 0 : index
    %121 = vector.load %arg6[%c0_96, %c0_97] : memref<5x1xf32, #tpu.memory_space<vmem>>, vector<5x1xf32>
    %122 = vector.broadcast %121 : vector<5x1xf32> to vector<5x47xf32>
    %123 = arith.addf %120, %122 : vector<5x47xf32>
    %cst_98 = arith.constant 0.000000e+00 : f32
    %124 = vector.broadcast %cst_98 : f32 to vector<5x47xf32>
    %125 = arith.maximumf %123, %124 : vector<5x47xf32>
    %c0_99 = arith.constant 0 : index
    %c0_100 = arith.constant 0 : index
    %126 = vector.load %arg7[%c0_99, %c0_100] : memref<5x1xf32, #tpu.memory_space<vmem>>, vector<5x1xf32>
    %127 = vector.broadcast %126 : vector<5x1xf32> to vector<5x47xf32>
    %128 = arith.mulf %125, %127 : vector<5x47xf32>
    %c0_101 = arith.constant 0 : index
    %c0_102 = arith.constant 0 : index
    %129 = vector.load %arg8[%c0_101, %c0_102] : memref<5x1xf32, #tpu.memory_space<vmem>>, vector<5x1xf32>
    %130 = vector.broadcast %129 : vector<5x1xf32> to vector<5x47xf32>
    %131 = arith.addf %128, %130 : vector<5x47xf32>
    %132 = vector.extract_strided_slice %11 {offsets = [0, 940], sizes = [3, 46], strides = [1, 1]} : vector<3x1880xf32> to vector<3x46xf32>
    %c0_103 = arith.constant 0 : index
    %c0_104 = arith.constant 0 : index
    %133 = vector.load %arg14[%c0_103, %c0_104] : memref<69x47xf32, #tpu.memory_space<vmem>>, vector<3x46xf32>
    tpu.vector_store %arg14[%c0_103, %c0_104], %132 {strides = array<i32>} : memref<69x47xf32, #tpu.memory_space<vmem>>, vector<3x46xf32>,
    %134 = vector.extract_strided_slice %11 {offsets = [0, 987], sizes = [3, 46], strides = [1, 1]} : vector<3x1880xf32> to vector<3x46xf32>
    %c3_105 = arith.constant 3 : index
    %c0_106 = arith.constant 0 : index
    %135 = vector.load %arg14[%c3_105, %c0_106] : memref<69x47xf32, #tpu.memory_space<vmem>>, vector<3x46xf32>
    tpu.vector_store %arg14[%c3_105, %c0_106], %134 {strides = array<i32>} : memref<69x47xf32, #tpu.memory_space<vmem>>, vector<3x46xf32>,
    %136 = vector.extract_strided_slice %11 {offsets = [0, 1034], sizes = [3, 46], strides = [1, 1]} : vector<3x1880xf32> to vector<3x46xf32>
    %c6_107 = arith.constant 6 : index
    %c0_108 = arith.constant 0 : index
    %137 = vector.load %arg14[%c6_107, %c0_108] : memref<69x47xf32, #tpu.memory_space<vmem>>, vector<3x46xf32>
    tpu.vector_store %arg14[%c6_107, %c0_108], %136 {strides = array<i32>} : memref<69x47xf32, #tpu.memory_space<vmem>>, vector<3x46xf32>,
    %138 = vector.extract_strided_slice %11 {offsets = [0, 1081], sizes = [3, 46], strides = [1, 1]} : vector<3x1880xf32> to vector<3x46xf32>
    %c9_109 = arith.constant 9 : index
    %c0_110 = arith.constant 0 : index
    %139 = vector.load %arg14[%c9_109, %c0_110] : memref<69x47xf32, #tpu.memory_space<vmem>>, vector<3x46xf32>
    tpu.vector_store %arg14[%c9_109, %c0_110], %138 {strides = array<i32>} : memref<69x47xf32, #tpu.memory_space<vmem>>, vector<3x46xf32>,
    %140 = vector.extract_strided_slice %11 {offsets = [0, 1128], sizes = [3, 46], strides = [1, 1]} : vector<3x1880xf32> to vector<3x46xf32>
    %c12_111 = arith.constant 12 : index
    %c0_112 = arith.constant 0 : index
    %141 = vector.load %arg14[%c12_111, %c0_112] : memref<69x47xf32, #tpu.memory_space<vmem>>, vector<3x46xf32>
    tpu.vector_store %arg14[%c12_111, %c0_112], %140 {strides = array<i32>} : memref<69x47xf32, #tpu.memory_space<vmem>>, vector<3x46xf32>,
    %142 = vector.extract_strided_slice %11 {offsets = [0, 1175], sizes = [3, 46], strides = [1, 1]} : vector<3x1880xf32> to vector<3x46xf32>
    %c15_113 = arith.constant 15 : index
    %c0_114 = arith.constant 0 : index
    %143 = vector.load %arg14[%c15_113, %c0_114] : memref<69x47xf32, #tpu.memory_space<vmem>>, vector<3x46xf32>
    tpu.vector_store %arg14[%c15_113, %c0_114], %142 {strides = array<i32>} : memref<69x47xf32, #tpu.memory_space<vmem>>, vector<3x46xf32>,
    %144 = vector.extract_strided_slice %11 {offsets = [0, 1222], sizes = [3, 46], strides = [1, 1]} : vector<3x1880xf32> to vector<3x46xf32>
    %c18_115 = arith.constant 18 : index
    %c0_116 = arith.constant 0 : index
    %145 = vector.load %arg14[%c18_115, %c0_116] : memref<69x47xf32, #tpu.memory_space<vmem>>, vector<3x46xf32>
    tpu.vector_store %arg14[%c18_115, %c0_116], %144 {strides = array<i32>} : memref<69x47xf32, #tpu.memory_space<vmem>>, vector<3x46xf32>,
    %146 = vector.extract_strided_slice %11 {offsets = [0, 1269], sizes = [3, 46], strides = [1, 1]} : vector<3x1880xf32> to vector<3x46xf32>
    %c21_117 = arith.constant 21 : index
    %c0_118 = arith.constant 0 : index
    %147 = vector.load %arg14[%c21_117, %c0_118] : memref<69x47xf32, #tpu.memory_space<vmem>>, vector<3x46xf32>
    tpu.vector_store %arg14[%c21_117, %c0_118], %146 {strides = array<i32>} : memref<69x47xf32, #tpu.memory_space<vmem>>, vector<3x46xf32>,
    %148 = vector.extract_strided_slice %11 {offsets = [0, 1316], sizes = [3, 46], strides = [1, 1]} : vector<3x1880xf32> to vector<3x46xf32>
    %c24_119 = arith.constant 24 : index
    %c0_120 = arith.constant 0 : index
    %149 = vector.load %arg14[%c24_119, %c0_120] : memref<69x47xf32, #tpu.memory_space<vmem>>, vector<3x46xf32>
    tpu.vector_store %arg14[%c24_119, %c0_120], %148 {strides = array<i32>} : memref<69x47xf32, #tpu.memory_space<vmem>>, vector<3x46xf32>,
    %150 = vector.extract_strided_slice %11 {offsets = [0, 1363], sizes = [3, 46], strides = [1, 1]} : vector<3x1880xf32> to vector<3x46xf32>
    %c27_121 = arith.constant 27 : index
    %c0_122 = arith.constant 0 : index
    %151 = vector.load %arg14[%c27_121, %c0_122] : memref<69x47xf32, #tpu.memory_space<vmem>>, vector<3x46xf32>
    tpu.vector_store %arg14[%c27_121, %c0_122], %150 {strides = array<i32>} : memref<69x47xf32, #tpu.memory_space<vmem>>, vector<3x46xf32>,
    %152 = vector.extract_strided_slice %11 {offsets = [0, 1410], sizes = [3, 46], strides = [1, 1]} : vector<3x1880xf32> to vector<3x46xf32>
    %c30_123 = arith.constant 30 : index
    %c0_124 = arith.constant 0 : index
    %153 = vector.load %arg14[%c30_123, %c0_124] : memref<69x47xf32, #tpu.memory_space<vmem>>, vector<3x46xf32>
    tpu.vector_store %arg14[%c30_123, %c0_124], %152 {strides = array<i32>} : memref<69x47xf32, #tpu.memory_space<vmem>>, vector<3x46xf32>,
    %154 = vector.extract_strided_slice %11 {offsets = [0, 1457], sizes = [3, 46], strides = [1, 1]} : vector<3x1880xf32> to vector<3x46xf32>
    %c33_125 = arith.constant 33 : index
    %c0_126 = arith.constant 0 : index
    %155 = vector.load %arg14[%c33_125, %c0_126] : memref<69x47xf32, #tpu.memory_space<vmem>>, vector<3x46xf32>
    tpu.vector_store %arg14[%c33_125, %c0_126], %154 {strides = array<i32>} : memref<69x47xf32, #tpu.memory_space<vmem>>, vector<3x46xf32>,
    %156 = vector.extract_strided_slice %11 {offsets = [0, 1504], sizes = [3, 46], strides = [1, 1]} : vector<3x1880xf32> to vector<3x46xf32>
    %c36_127 = arith.constant 36 : index
    %c0_128 = arith.constant 0 : index
    %157 = vector.load %arg14[%c36_127, %c0_128] : memref<69x47xf32, #tpu.memory_space<vmem>>, vector<3x46xf32>
    tpu.vector_store %arg14[%c36_127, %c0_128], %156 {strides = array<i32>} : memref<69x47xf32, #tpu.memory_space<vmem>>, vector<3x46xf32>,
    %158 = vector.extract_strided_slice %11 {offsets = [0, 1551], sizes = [3, 46], strides = [1, 1]} : vector<3x1880xf32> to vector<3x46xf32>
    %c39_129 = arith.constant 39 : index
    %c0_130 = arith.constant 0 : index
    %159 = vector.load %arg14[%c39_129, %c0_130] : memref<69x47xf32, #tpu.memory_space<vmem>>, vector<3x46xf32>
    tpu.vector_store %arg14[%c39_129, %c0_130], %158 {strides = array<i32>} : memref<69x47xf32, #tpu.memory_space<vmem>>, vector<3x46xf32>,
    %160 = vector.extract_strided_slice %11 {offsets = [0, 1598], sizes = [3, 46], strides = [1, 1]} : vector<3x1880xf32> to vector<3x46xf32>
    %c42_131 = arith.constant 42 : index
    %c0_132 = arith.constant 0 : index
    %161 = vector.load %arg14[%c42_131, %c0_132] : memref<69x47xf32, #tpu.memory_space<vmem>>, vector<3x46xf32>
    tpu.vector_store %arg14[%c42_131, %c0_132], %160 {strides = array<i32>} : memref<69x47xf32, #tpu.memory_space<vmem>>, vector<3x46xf32>,
    %162 = vector.extract_strided_slice %11 {offsets = [0, 1645], sizes = [3, 46], strides = [1, 1]} : vector<3x1880xf32> to vector<3x46xf32>
    %c45_133 = arith.constant 45 : index
    %c0_134 = arith.constant 0 : index
    %163 = vector.load %arg14[%c45_133, %c0_134] : memref<69x47xf32, #tpu.memory_space<vmem>>, vector<3x46xf32>
    tpu.vector_store %arg14[%c45_133, %c0_134], %162 {strides = array<i32>} : memref<69x47xf32, #tpu.memory_space<vmem>>, vector<3x46xf32>,
    %164 = vector.extract_strided_slice %11 {offsets = [0, 1692], sizes = [3, 46], strides = [1, 1]} : vector<3x1880xf32> to vector<3x46xf32>
    %c48_135 = arith.constant 48 : index
    %c0_136 = arith.constant 0 : index
    %165 = vector.load %arg14[%c48_135, %c0_136] : memref<69x47xf32, #tpu.memory_space<vmem>>, vector<3x46xf32>
    tpu.vector_store %arg14[%c48_135, %c0_136], %164 {strides = array<i32>} : memref<69x47xf32, #tpu.memory_space<vmem>>, vector<3x46xf32>,
    %166 = vector.extract_strided_slice %11 {offsets = [0, 1739], sizes = [3, 46], strides = [1, 1]} : vector<3x1880xf32> to vector<3x46xf32>
    %c51_137 = arith.constant 51 : index
    %c0_138 = arith.constant 0 : index
    %167 = vector.load %arg14[%c51_137, %c0_138] : memref<69x47xf32, #tpu.memory_space<vmem>>, vector<3x46xf32>
    tpu.vector_store %arg14[%c51_137, %c0_138], %166 {strides = array<i32>} : memref<69x47xf32, #tpu.memory_space<vmem>>, vector<3x46xf32>,
    %168 = vector.extract_strided_slice %11 {offsets = [0, 1786], sizes = [3, 46], strides = [1, 1]} : vector<3x1880xf32> to vector<3x46xf32>
    %c54_139 = arith.constant 54 : index
    %c0_140 = arith.constant 0 : index
    %169 = vector.load %arg14[%c54_139, %c0_140] : memref<69x47xf32, #tpu.memory_space<vmem>>, vector<3x46xf32>
    tpu.vector_store %arg14[%c54_139, %c0_140], %168 {strides = array<i32>} : memref<69x47xf32, #tpu.memory_space<vmem>>, vector<3x46xf32>,
    %170 = vector.extract_strided_slice %11 {offsets = [0, 1833], sizes = [3, 46], strides = [1, 1]} : vector<3x1880xf32> to vector<3x46xf32>
    %c57_141 = arith.constant 57 : index
    %c0_142 = arith.constant 0 : index
    %171 = vector.load %arg14[%c57_141, %c0_142] : memref<69x47xf32, #tpu.memory_space<vmem>>, vector<3x46xf32>
    tpu.vector_store %arg14[%c57_141, %c0_142], %170 {strides = array<i32>} : memref<69x47xf32, #tpu.memory_space<vmem>>, vector<3x46xf32>,
    %172 = vector.extract_strided_slice %11 {offsets = [0, 1], sizes = [3, 46], strides = [1, 1]} : vector<3x1880xf32> to vector<3x46xf32>
    %c60_143 = arith.constant 60 : index
    %c0_144 = arith.constant 0 : index
    %173 = vector.load %arg14[%c60_143, %c0_144] : memref<69x47xf32, #tpu.memory_space<vmem>>, vector<3x46xf32>
    tpu.vector_store %arg14[%c60_143, %c0_144], %172 {strides = array<i32>} : memref<69x47xf32, #tpu.memory_space<vmem>>, vector<3x46xf32>,
    %174 = vector.extract_strided_slice %11 {offsets = [0, 48], sizes = [3, 46], strides = [1, 1]} : vector<3x1880xf32> to vector<3x46xf32>
    %c63_145 = arith.constant 63 : index
    %c0_146 = arith.constant 0 : index
    %175 = vector.load %arg14[%c63_145, %c0_146] : memref<69x47xf32, #tpu.memory_space<vmem>>, vector<3x46xf32>
    tpu.vector_store %arg14[%c63_145, %c0_146], %174 {strides = array<i32>} : memref<69x47xf32, #tpu.memory_space<vmem>>, vector<3x46xf32>,
    %176 = vector.extract_strided_slice %11 {offsets = [0, 95], sizes = [3, 46], strides = [1, 1]} : vector<3x1880xf32> to vector<3x46xf32>
    %c66_147 = arith.constant 66 : index
    %c0_148 = arith.constant 0 : index
    %177 = vector.load %arg14[%c66_147, %c0_148] : memref<69x47xf32, #tpu.memory_space<vmem>>, vector<3x46xf32>
    tpu.vector_store %arg14[%c66_147, %c0_148], %176 {strides = array<i32>} : memref<69x47xf32, #tpu.memory_space<vmem>>, vector<3x46xf32>,
    %c0_149 = arith.constant 0 : index
    %c0_150 = arith.constant 0 : index
    %178 = vector.load %arg5[%c0_149, %c0_150] : memref<5x69xf32, #tpu.memory_space<vmem>>, vector<5x69xf32>
    %c0_151 = arith.constant 0 : index
    %c0_152 = arith.constant 0 : index
    %179 = vector.load %arg14[%c0_151, %c0_152] : memref<69x47xf32, #tpu.memory_space<vmem>>, vector<69x46xf32>
    %cst_153 = arith.constant dense<0.000000e+00> : vector<5x46xf32>
    %180 = tpu.matmul %178, %179, %cst_153 {dimension_numbers = #tpu.dot_dimension_numbers<[1], [0], [0], [1], [0, 0, 1, 1], [], []>} : vector<5x69xf32>, vector<69x46xf32>, vector<5x46xf32> -> vector<5x46xf32>
    %c0_154 = arith.constant 0 : index
    %c0_155 = arith.constant 0 : index
    %181 = vector.load %arg6[%c0_154, %c0_155] : memref<5x1xf32, #tpu.memory_space<vmem>>, vector<5x1xf32>
    %182 = vector.broadcast %181 : vector<5x1xf32> to vector<5x46xf32>
    %183 = arith.addf %180, %182 : vector<5x46xf32>
    %cst_156 = arith.constant 0.000000e+00 : f32
    %184 = vector.broadcast %cst_156 : f32 to vector<5x46xf32>
    %185 = arith.maximumf %183, %184 : vector<5x46xf32>
    %c0_157 = arith.constant 0 : index
    %c0_158 = arith.constant 0 : index
    %186 = vector.load %arg7[%c0_157, %c0_158] : memref<5x1xf32, #tpu.memory_space<vmem>>, vector<5x1xf32>
    %187 = vector.broadcast %186 : vector<5x1xf32> to vector<5x46xf32>
    %188 = arith.mulf %185, %187 : vector<5x46xf32>
    %c0_159 = arith.constant 0 : index
    %c0_160 = arith.constant 0 : index
    %189 = vector.load %arg8[%c0_159, %c0_160] : memref<5x1xf32, #tpu.memory_space<vmem>>, vector<5x1xf32>
    %190 = vector.broadcast %189 : vector<5x1xf32> to vector<5x46xf32>
    %191 = arith.addf %188, %190 : vector<5x46xf32>
    %192 = vector.extract_strided_slice %11 {offsets = [0, 1410], sizes = [3, 46], strides = [1, 1]} : vector<3x1880xf32> to vector<3x46xf32>
    %c0_161 = arith.constant 0 : index
    %c0_162 = arith.constant 0 : index
    %193 = vector.load %arg14[%c0_161, %c0_162] : memref<69x47xf32, #tpu.memory_space<vmem>>, vector<3x46xf32>
    tpu.vector_store %arg14[%c0_161, %c0_162], %192 {strides = array<i32>} : memref<69x47xf32, #tpu.memory_space<vmem>>, vector<3x46xf32>,
    %194 = vector.extract_strided_slice %11 {offsets = [0, 1457], sizes = [3, 46], strides = [1, 1]} : vector<3x1880xf32> to vector<3x46xf32>
    %c3_163 = arith.constant 3 : index
    %c0_164 = arith.constant 0 : index
    %195 = vector.load %arg14[%c3_163, %c0_164] : memref<69x47xf32, #tpu.memory_space<vmem>>, vector<3x46xf32>
    tpu.vector_store %arg14[%c3_163, %c0_164], %194 {strides = array<i32>} : memref<69x47xf32, #tpu.memory_space<vmem>>, vector<3x46xf32>,
    %196 = vector.extract_strided_slice %11 {offsets = [0, 1504], sizes = [3, 46], strides = [1, 1]} : vector<3x1880xf32> to vector<3x46xf32>
    %c6_165 = arith.constant 6 : index
    %c0_166 = arith.constant 0 : index
    %197 = vector.load %arg14[%c6_165, %c0_166] : memref<69x47xf32, #tpu.memory_space<vmem>>, vector<3x46xf32>
    tpu.vector_store %arg14[%c6_165, %c0_166], %196 {strides = array<i32>} : memref<69x47xf32, #tpu.memory_space<vmem>>, vector<3x46xf32>,
    %198 = vector.extract_strided_slice %11 {offsets = [0, 1551], sizes = [3, 46], strides = [1, 1]} : vector<3x1880xf32> to vector<3x46xf32>
    %c9_167 = arith.constant 9 : index
    %c0_168 = arith.constant 0 : index
    %199 = vector.load %arg14[%c9_167, %c0_168] : memref<69x47xf32, #tpu.memory_space<vmem>>, vector<3x46xf32>
    tpu.vector_store %arg14[%c9_167, %c0_168], %198 {strides = array<i32>} : memref<69x47xf32, #tpu.memory_space<vmem>>, vector<3x46xf32>,
    %200 = vector.extract_strided_slice %11 {offsets = [0, 1598], sizes = [3, 46], strides = [1, 1]} : vector<3x1880xf32> to vector<3x46xf32>
    %c12_169 = arith.constant 12 : index
    %c0_170 = arith.constant 0 : index
    %201 = vector.load %arg14[%c12_169, %c0_170] : memref<69x47xf32, #tpu.memory_space<vmem>>, vector<3x46xf32>
    tpu.vector_store %arg14[%c12_169, %c0_170], %200 {strides = array<i32>} : memref<69x47xf32, #tpu.memory_space<vmem>>, vector<3x46xf32>,
    %202 = vector.extract_strided_slice %11 {offsets = [0, 1645], sizes = [3, 46], strides = [1, 1]} : vector<3x1880xf32> to vector<3x46xf32>
    %c15_171 = arith.constant 15 : index
    %c0_172 = arith.constant 0 : index
    %203 = vector.load %arg14[%c15_171, %c0_172] : memref<69x47xf32, #tpu.memory_space<vmem>>, vector<3x46xf32>
    tpu.vector_store %arg14[%c15_171, %c0_172], %202 {strides = array<i32>} : memref<69x47xf32, #tpu.memory_space<vmem>>, vector<3x46xf32>,
    %204 = vector.extract_strided_slice %11 {offsets = [0, 1692], sizes = [3, 46], strides = [1, 1]} : vector<3x1880xf32> to vector<3x46xf32>
    %c18_173 = arith.constant 18 : index
    %c0_174 = arith.constant 0 : index
    %205 = vector.load %arg14[%c18_173, %c0_174] : memref<69x47xf32, #tpu.memory_space<vmem>>, vector<3x46xf32>
    tpu.vector_store %arg14[%c18_173, %c0_174], %204 {strides = array<i32>} : memref<69x47xf32, #tpu.memory_space<vmem>>, vector<3x46xf32>,
    %206 = vector.extract_strided_slice %11 {offsets = [0, 1739], sizes = [3, 46], strides = [1, 1]} : vector<3x1880xf32> to vector<3x46xf32>
    %c21_175 = arith.constant 21 : index
    %c0_176 = arith.constant 0 : index
    %207 = vector.load %arg14[%c21_175, %c0_176] : memref<69x47xf32, #tpu.memory_space<vmem>>, vector<3x46xf32>
    tpu.vector_store %arg14[%c21_175, %c0_176], %206 {strides = array<i32>} : memref<69x47xf32, #tpu.memory_space<vmem>>, vector<3x46xf32>,
    %208 = vector.extract_strided_slice %11 {offsets = [0, 1786], sizes = [3, 46], strides = [1, 1]} : vector<3x1880xf32> to vector<3x46xf32>
    %c24_177 = arith.constant 24 : index
    %c0_178 = arith.constant 0 : index
    %209 = vector.load %arg14[%c24_177, %c0_178] : memref<69x47xf32, #tpu.memory_space<vmem>>, vector<3x46xf32>
    tpu.vector_store %arg14[%c24_177, %c0_178], %208 {strides = array<i32>} : memref<69x47xf32, #tpu.memory_space<vmem>>, vector<3x46xf32>,
    %210 = vector.extract_strided_slice %11 {offsets = [0, 1833], sizes = [3, 46], strides = [1, 1]} : vector<3x1880xf32> to vector<3x46xf32>
    %c27_179 = arith.constant 27 : index
    %c0_180 = arith.constant 0 : index
    %211 = vector.load %arg14[%c27_179, %c0_180] : memref<69x47xf32, #tpu.memory_space<vmem>>, vector<3x46xf32>
    tpu.vector_store %arg14[%c27_179, %c0_180], %210 {strides = array<i32>} : memref<69x47xf32, #tpu.memory_space<vmem>>, vector<3x46xf32>,
    %212 = vector.extract_strided_slice %11 {offsets = [0, 1], sizes = [3, 46], strides = [1, 1]} : vector<3x1880xf32> to vector<3x46xf32>
    %c30_181 = arith.constant 30 : index
    %c0_182 = arith.constant 0 : index
    %213 = vector.load %arg14[%c30_181, %c0_182] : memref<69x47xf32, #tpu.memory_space<vmem>>, vector<3x46xf32>
    tpu.vector_store %arg14[%c30_181, %c0_182], %212 {strides = array<i32>} : memref<69x47xf32, #tpu.memory_space<vmem>>, vector<3x46xf32>,
    %214 = vector.extract_strided_slice %11 {offsets = [0, 48], sizes = [3, 46], strides = [1, 1]} : vector<3x1880xf32> to vector<3x46xf32>
    %c33_183 = arith.constant 33 : index
    %c0_184 = arith.constant 0 : index
    %215 = vector.load %arg14[%c33_183, %c0_184] : memref<69x47xf32, #tpu.memory_space<vmem>>, vector<3x46xf32>
    tpu.vector_store %arg14[%c33_183, %c0_184], %214 {strides = array<i32>} : memref<69x47xf32, #tpu.memory_space<vmem>>, vector<3x46xf32>,
    %216 = vector.extract_strided_slice %11 {offsets = [0, 95], sizes = [3, 46], strides = [1, 1]} : vector<3x1880xf32> to vector<3x46xf32>
    %c36_185 = arith.constant 36 : index
    %c0_186 = arith.constant 0 : index
    %217 = vector.load %arg14[%c36_185, %c0_186] : memref<69x47xf32, #tpu.memory_space<vmem>>, vector<3x46xf32>
    tpu.vector_store %arg14[%c36_185, %c0_186], %216 {strides = array<i32>} : memref<69x47xf32, #tpu.memory_space<vmem>>, vector<3x46xf32>,
    %218 = vector.extract_strided_slice %11 {offsets = [0, 142], sizes = [3, 46], strides = [1, 1]} : vector<3x1880xf32> to vector<3x46xf32>
    %c39_187 = arith.constant 39 : index
    %c0_188 = arith.constant 0 : index
    %219 = vector.load %arg14[%c39_187, %c0_188] : memref<69x47xf32, #tpu.memory_space<vmem>>, vector<3x46xf32>
    tpu.vector_store %arg14[%c39_187, %c0_188], %218 {strides = array<i32>} : memref<69x47xf32, #tpu.memory_space<vmem>>, vector<3x46xf32>,
    %220 = vector.extract_strided_slice %11 {offsets = [0, 189], sizes = [3, 46], strides = [1, 1]} : vector<3x1880xf32> to vector<3x46xf32>
    %c42_189 = arith.constant 42 : index
    %c0_190 = arith.constant 0 : index
    %221 = vector.load %arg14[%c42_189, %c0_190] : memref<69x47xf32, #tpu.memory_space<vmem>>, vector<3x46xf32>
    tpu.vector_store %arg14[%c42_189, %c0_190], %220 {strides = array<i32>} : memref<69x47xf32, #tpu.memory_space<vmem>>, vector<3x46xf32>,
    %222 = vector.extract_strided_slice %11 {offsets = [0, 236], sizes = [3, 46], strides = [1, 1]} : vector<3x1880xf32> to vector<3x46xf32>
    %c45_191 = arith.constant 45 : index
    %c0_192 = arith.constant 0 : index
    %223 = vector.load %arg14[%c45_191, %c0_192] : memref<69x47xf32, #tpu.memory_space<vmem>>, vector<3x46xf32>
    tpu.vector_store %arg14[%c45_191, %c0_192], %222 {strides = array<i32>} : memref<69x47xf32, #tpu.memory_space<vmem>>, vector<3x46xf32>,
    %224 = vector.extract_strided_slice %11 {offsets = [0, 283], sizes = [3, 46], strides = [1, 1]} : vector<3x1880xf32> to vector<3x46xf32>
    %c48_193 = arith.constant 48 : index
    %c0_194 = arith.constant 0 : index
    %225 = vector.load %arg14[%c48_193, %c0_194] : memref<69x47xf32, #tpu.memory_space<vmem>>, vector<3x46xf32>
    tpu.vector_store %arg14[%c48_193, %c0_194], %224 {strides = array<i32>} : memref<69x47xf32, #tpu.memory_space<vmem>>, vector<3x46xf32>,
    %226 = vector.extract_strided_slice %11 {offsets = [0, 330], sizes = [3, 46], strides = [1, 1]} : vector<3x1880xf32> to vector<3x46xf32>
    %c51_195 = arith.constant 51 : index
    %c0_196 = arith.constant 0 : index
    %227 = vector.load %arg14[%c51_195, %c0_196] : memref<69x47xf32, #tpu.memory_space<vmem>>, vector<3x46xf32>
    tpu.vector_store %arg14[%c51_195, %c0_196], %226 {strides = array<i32>} : memref<69x47xf32, #tpu.memory_space<vmem>>, vector<3x46xf32>,
    %228 = vector.extract_strided_slice %11 {offsets = [0, 377], sizes = [3, 46], strides = [1, 1]} : vector<3x1880xf32> to vector<3x46xf32>
    %c54_197 = arith.constant 54 : index
    %c0_198 = arith.constant 0 : index
    %229 = vector.load %arg14[%c54_197, %c0_198] : memref<69x47xf32, #tpu.memory_space<vmem>>, vector<3x46xf32>
    tpu.vector_store %arg14[%c54_197, %c0_198], %228 {strides = array<i32>} : memref<69x47xf32, #tpu.memory_space<vmem>>, vector<3x46xf32>,
    %230 = vector.extract_strided_slice %11 {offsets = [0, 424], sizes = [3, 46], strides = [1, 1]} : vector<3x1880xf32> to vector<3x46xf32>
    %c57_199 = arith.constant 57 : index
    %c0_200 = arith.constant 0 : index
    %231 = vector.load %arg14[%c57_199, %c0_200] : memref<69x47xf32, #tpu.memory_space<vmem>>, vector<3x46xf32>
    tpu.vector_store %arg14[%c57_199, %c0_200], %230 {strides = array<i32>} : memref<69x47xf32, #tpu.memory_space<vmem>>, vector<3x46xf32>,
    %232 = vector.extract_strided_slice %11 {offsets = [0, 471], sizes = [3, 46], strides = [1, 1]} : vector<3x1880xf32> to vector<3x46xf32>
    %c60_201 = arith.constant 60 : index
    %c0_202 = arith.constant 0 : index
    %233 = vector.load %arg14[%c60_201, %c0_202] : memref<69x47xf32, #tpu.memory_space<vmem>>, vector<3x46xf32>
    tpu.vector_store %arg14[%c60_201, %c0_202], %232 {strides = array<i32>} : memref<69x47xf32, #tpu.memory_space<vmem>>, vector<3x46xf32>,
    %234 = vector.extract_strided_slice %11 {offsets = [0, 518], sizes = [3, 46], strides = [1, 1]} : vector<3x1880xf32> to vector<3x46xf32>
    %c63_203 = arith.constant 63 : index
    %c0_204 = arith.constant 0 : index
    %235 = vector.load %arg14[%c63_203, %c0_204] : memref<69x47xf32, #tpu.memory_space<vmem>>, vector<3x46xf32>
    tpu.vector_store %arg14[%c63_203, %c0_204], %234 {strides = array<i32>} : memref<69x47xf32, #tpu.memory_space<vmem>>, vector<3x46xf32>,
    %236 = vector.extract_strided_slice %11 {offsets = [0, 565], sizes = [3, 46], strides = [1, 1]} : vector<3x1880xf32> to vector<3x46xf32>
    %c66_205 = arith.constant 66 : index
    %c0_206 = arith.constant 0 : index
    %237 = vector.load %arg14[%c66_205, %c0_206] : memref<69x47xf32, #tpu.memory_space<vmem>>, vector<3x46xf32>
    tpu.vector_store %arg14[%c66_205, %c0_206], %236 {strides = array<i32>} : memref<69x47xf32, #tpu.memory_space<vmem>>, vector<3x46xf32>,
    %c0_207 = arith.constant 0 : index
    %c0_208 = arith.constant 0 : index
    %238 = vector.load %arg5[%c0_207, %c0_208] : memref<5x69xf32, #tpu.memory_space<vmem>>, vector<5x69xf32>
    %c0_209 = arith.constant 0 : index
    %c0_210 = arith.constant 0 : index
    %239 = vector.load %arg14[%c0_209, %c0_210] : memref<69x47xf32, #tpu.memory_space<vmem>>, vector<69x46xf32>
    %cst_211 = arith.constant dense<0.000000e+00> : vector<5x46xf32>
    %240 = tpu.matmul %238, %239, %cst_211 {dimension_numbers = #tpu.dot_dimension_numbers<[1], [0], [0], [1], [0, 0, 1, 1], [], []>} : vector<5x69xf32>, vector<69x46xf32>, vector<5x46xf32> -> vector<5x46xf32>
    %c0_212 = arith.constant 0 : index
    %c0_213 = arith.constant 0 : index
    %241 = vector.load %arg6[%c0_212, %c0_213] : memref<5x1xf32, #tpu.memory_space<vmem>>, vector<5x1xf32>
    %242 = vector.broadcast %241 : vector<5x1xf32> to vector<5x46xf32>
    %243 = arith.addf %240, %242 : vector<5x46xf32>
    %cst_214 = arith.constant 0.000000e+00 : f32
    %244 = vector.broadcast %cst_214 : f32 to vector<5x46xf32>
    %245 = arith.maximumf %243, %244 : vector<5x46xf32>
    %c0_215 = arith.constant 0 : index
    %c0_216 = arith.constant 0 : index
    %246 = vector.load %arg7[%c0_215, %c0_216] : memref<5x1xf32, #tpu.memory_space<vmem>>, vector<5x1xf32>
    %247 = vector.broadcast %246 : vector<5x1xf32> to vector<5x46xf32>
    %248 = arith.mulf %245, %247 : vector<5x46xf32>
    %c0_217 = arith.constant 0 : index
    %c0_218 = arith.constant 0 : index
    %249 = vector.load %arg8[%c0_217, %c0_218] : memref<5x1xf32, #tpu.memory_space<vmem>>, vector<5x1xf32>
    %250 = vector.broadcast %249 : vector<5x1xf32> to vector<5x46xf32>
    %251 = arith.addf %248, %250 : vector<5x46xf32>
    %252 = vector.extract_strided_slice %71 {offsets = [0, 0], sizes = [5, 46], strides = [1, 1]} : vector<5x47xf32> to vector<5x46xf32>
    %c0_219 = arith.constant 0 : index
    %c0_220 = arith.constant 0 : index
    %253 = vector.load %arg15[%c0_219, %c0_220] : memref<20x46xf32, #tpu.memory_space<vmem>>, vector<5x46xf32>
    tpu.vector_store %arg15[%c0_219, %c0_220], %252 {strides = array<i32>} : memref<20x46xf32, #tpu.memory_space<vmem>>, vector<5x46xf32>,
    %254 = vector.extract_strided_slice %131 {offsets = [0, 0], sizes = [5, 46], strides = [1, 1]} : vector<5x47xf32> to vector<5x46xf32>
    %c5 = arith.constant 5 : index
    %c0_221 = arith.constant 0 : index
    %255 = vector.load %arg15[%c5, %c0_221] : memref<20x46xf32, #tpu.memory_space<vmem>>, vector<5x46xf32>
    tpu.vector_store %arg15[%c5, %c0_221], %254 {strides = array<i32>} : memref<20x46xf32, #tpu.memory_space<vmem>>, vector<5x46xf32>,
    %c10 = arith.constant 10 : index
    %c0_222 = arith.constant 0 : index
    %256 = vector.load %arg15[%c10, %c0_222] : memref<20x46xf32, #tpu.memory_space<vmem>>, vector<5x46xf32>
    tpu.vector_store %arg15[%c10, %c0_222], %191 {strides = array<i32>} : memref<20x46xf32, #tpu.memory_space<vmem>>, vector<5x46xf32>,
    %c15_223 = arith.constant 15 : index
    %c0_224 = arith.constant 0 : index
    %257 = vector.load %arg15[%c15_223, %c0_224] : memref<20x46xf32, #tpu.memory_space<vmem>>, vector<5x46xf32>
    tpu.vector_store %arg15[%c15_223, %c0_224], %251 {strides = array<i32>} : memref<20x46xf32, #tpu.memory_space<vmem>>, vector<5x46xf32>,
    %c0_225 = arith.constant 0 : index
    %c0_226 = arith.constant 0 : index
    %258 = vector.load %arg9[%c0_225, %c0_226] : memref<8x20xf32, #tpu.memory_space<vmem>>, vector<8x20xf32>
    %c0_227 = arith.constant 0 : index
    %c0_228 = arith.constant 0 : index
    %259 = vector.load %arg15[%c0_227, %c0_228] : memref<20x46xf32, #tpu.memory_space<vmem>>, vector<20x46xf32>
    %cst_229 = arith.constant dense<0.000000e+00> : vector<8x46xf32>
    %260 = tpu.matmul %258, %259, %cst_229 {dimension_numbers = #tpu.dot_dimension_numbers<[1], [0], [0], [1], [0, 0, 1, 1], [], []>} : vector<8x20xf32>, vector<20x46xf32>, vector<8x46xf32> -> vector<8x46xf32>
    %c0_230 = arith.constant 0 : index
    %c0_231 = arith.constant 0 : index
    %261 = vector.load %arg10[%c0_230, %c0_231] : memref<8x1xf32, #tpu.memory_space<vmem>>, vector<8x1xf32>
    %262 = vector.broadcast %261 : vector<8x1xf32> to vector<8x46xf32>
    %263 = arith.addf %260, %262 : vector<8x46xf32>
    %cst_232 = arith.constant 0.000000e+00 : f32
    %264 = vector.broadcast %cst_232 : f32 to vector<8x46xf32>
    %265 = arith.maximumf %263, %264 : vector<8x46xf32>
    %c0_233 = arith.constant 0 : index
    %c0_234 = arith.constant 0 : index
    %266 = vector.load %arg15[%c0_233, %c0_234] : memref<20x46xf32, #tpu.memory_space<vmem>>, vector<5x46xf32>
    tpu.vector_store %arg15[%c0_233, %c0_234], %191 {strides = array<i32>} : memref<20x46xf32, #tpu.memory_space<vmem>>, vector<5x46xf32>,
    %c5_235 = arith.constant 5 : index
    %c0_236 = arith.constant 0 : index
    %267 = vector.load %arg15[%c5_235, %c0_236] : memref<20x46xf32, #tpu.memory_space<vmem>>, vector<5x46xf32>
    tpu.vector_store %arg15[%c5_235, %c0_236], %251 {strides = array<i32>} : memref<20x46xf32, #tpu.memory_space<vmem>>, vector<5x46xf32>,
    %268 = vector.extract_strided_slice %71 {offsets = [0, 1], sizes = [5, 46], strides = [1, 1]} : vector<5x47xf32> to vector<5x46xf32>
    %c10_237 = arith.constant 10 : index
    %c0_238 = arith.constant 0 : index
    %269 = vector.load %arg15[%c10_237, %c0_238] : memref<20x46xf32, #tpu.memory_space<vmem>>, vector<5x46xf32>
    tpu.vector_store %arg15[%c10_237, %c0_238], %268 {strides = array<i32>} : memref<20x46xf32, #tpu.memory_space<vmem>>, vector<5x46xf32>,
    %270 = vector.extract_strided_slice %131 {offsets = [0, 1], sizes = [5, 46], strides = [1, 1]} : vector<5x47xf32> to vector<5x46xf32>
    %c15_239 = arith.constant 15 : index
    %c0_240 = arith.constant 0 : index
    %271 = vector.load %arg15[%c15_239, %c0_240] : memref<20x46xf32, #tpu.memory_space<vmem>>, vector<5x46xf32>
    tpu.vector_store %arg15[%c15_239, %c0_240], %270 {strides = array<i32>} : memref<20x46xf32, #tpu.memory_space<vmem>>, vector<5x46xf32>,
    %c0_241 = arith.constant 0 : index
    %c0_242 = arith.constant 0 : index
    %272 = vector.load %arg9[%c0_241, %c0_242] : memref<8x20xf32, #tpu.memory_space<vmem>>, vector<8x20xf32>
    %c0_243 = arith.constant 0 : index
    %c0_244 = arith.constant 0 : index
    %273 = vector.load %arg15[%c0_243, %c0_244] : memref<20x46xf32, #tpu.memory_space<vmem>>, vector<20x46xf32>
    %cst_245 = arith.constant dense<0.000000e+00> : vector<8x46xf32>
    %274 = tpu.matmul %272, %273, %cst_245 {dimension_numbers = #tpu.dot_dimension_numbers<[1], [0], [0], [1], [0, 0, 1, 1], [], []>} : vector<8x20xf32>, vector<20x46xf32>, vector<8x46xf32> -> vector<8x46xf32>
    %c0_246 = arith.constant 0 : index
    %c0_247 = arith.constant 0 : index
    %275 = vector.load %arg10[%c0_246, %c0_247] : memref<8x1xf32, #tpu.memory_space<vmem>>, vector<8x1xf32>
    %276 = vector.broadcast %275 : vector<8x1xf32> to vector<8x46xf32>
    %277 = arith.addf %274, %276 : vector<8x46xf32>
    %cst_248 = arith.constant 0.000000e+00 : f32
    %278 = vector.broadcast %cst_248 : f32 to vector<8x46xf32>
    %279 = arith.maximumf %277, %278 : vector<8x46xf32>
    %280 = vector.extract_strided_slice %265 {offsets = [0, 0], sizes = [8, 45], strides = [1, 1]} : vector<8x46xf32> to vector<8x45xf32>
    %281 = vector.extract_strided_slice %279 {offsets = [0, 0], sizes = [8, 45], strides = [1, 1]} : vector<8x46xf32> to vector<8x45xf32>
    %282 = arith.addf %280, %281 : vector<8x45xf32>
    %283 = vector.extract_strided_slice %265 {offsets = [0, 1], sizes = [8, 45], strides = [1, 1]} : vector<8x46xf32> to vector<8x45xf32>
    %284 = arith.addf %282, %283 : vector<8x45xf32>
    %285 = vector.extract_strided_slice %279 {offsets = [0, 1], sizes = [8, 45], strides = [1, 1]} : vector<8x46xf32> to vector<8x45xf32>
    %286 = arith.addf %284, %285 : vector<8x45xf32>
    %cst_249 = arith.constant 2.500000e-01 : f32
    %287 = vector.broadcast %cst_249 : f32 to vector<8x45xf32>
    %288 = arith.mulf %287, %286 : vector<8x45xf32>
    %289 = vector.extract_strided_slice %288 {offsets = [0, 0], sizes = [1, 45], strides = [1, 1]} : vector<8x45xf32> to vector<1x45xf32>
    %c0_250 = arith.constant 0 : index
    %c0_251 = arith.constant 0 : index
    %290 = vector.load %arg16[%c0_250, %c0_251] : memref<1x360xf32, #tpu.memory_space<vmem>>, vector<1x45xf32>
    tpu.vector_store %arg16[%c0_250, %c0_251], %289 {strides = array<i32>} : memref<1x360xf32, #tpu.memory_space<vmem>>, vector<1x45xf32>,
    %291 = vector.extract_strided_slice %288 {offsets = [1, 0], sizes = [1, 45], strides = [1, 1]} : vector<8x45xf32> to vector<1x45xf32>
    %c0_252 = arith.constant 0 : index
    %c45_253 = arith.constant 45 : index
    %292 = vector.load %arg16[%c0_252, %c45_253] : memref<1x360xf32, #tpu.memory_space<vmem>>, vector<1x45xf32>
    tpu.vector_store %arg16[%c0_252, %c45_253], %291 {strides = array<i32>} : memref<1x360xf32, #tpu.memory_space<vmem>>, vector<1x45xf32>,
    %293 = vector.extract_strided_slice %288 {offsets = [2, 0], sizes = [1, 45], strides = [1, 1]} : vector<8x45xf32> to vector<1x45xf32>
    %c0_254 = arith.constant 0 : index
    %c90 = arith.constant 90 : index
    %294 = vector.load %arg16[%c0_254, %c90] : memref<1x360xf32, #tpu.memory_space<vmem>>, vector<1x45xf32>
    tpu.vector_store %arg16[%c0_254, %c90], %293 {strides = array<i32>} : memref<1x360xf32, #tpu.memory_space<vmem>>, vector<1x45xf32>,
    %295 = vector.extract_strided_slice %288 {offsets = [3, 0], sizes = [1, 45], strides = [1, 1]} : vector<8x45xf32> to vector<1x45xf32>
    %c0_255 = arith.constant 0 : index
    %c135 = arith.constant 135 : index
    %296 = vector.load %arg16[%c0_255, %c135] : memref<1x360xf32, #tpu.memory_space<vmem>>, vector<1x45xf32>
    tpu.vector_store %arg16[%c0_255, %c135], %295 {strides = array<i32>} : memref<1x360xf32, #tpu.memory_space<vmem>>, vector<1x45xf32>,
    %297 = vector.extract_strided_slice %288 {offsets = [4, 0], sizes = [1, 45], strides = [1, 1]} : vector<8x45xf32> to vector<1x45xf32>
    %c0_256 = arith.constant 0 : index
    %c180 = arith.constant 180 : index
    %298 = vector.load %arg16[%c0_256, %c180] : memref<1x360xf32, #tpu.memory_space<vmem>>, vector<1x45xf32>
    tpu.vector_store %arg16[%c0_256, %c180], %297 {strides = array<i32>} : memref<1x360xf32, #tpu.memory_space<vmem>>, vector<1x45xf32>,
    %299 = vector.extract_strided_slice %288 {offsets = [5, 0], sizes = [1, 45], strides = [1, 1]} : vector<8x45xf32> to vector<1x45xf32>
    %c0_257 = arith.constant 0 : index
    %c225 = arith.constant 225 : index
    %300 = vector.load %arg16[%c0_257, %c225] : memref<1x360xf32, #tpu.memory_space<vmem>>, vector<1x45xf32>
    tpu.vector_store %arg16[%c0_257, %c225], %299 {strides = array<i32>} : memref<1x360xf32, #tpu.memory_space<vmem>>, vector<1x45xf32>,
    %301 = vector.extract_strided_slice %288 {offsets = [6, 0], sizes = [1, 45], strides = [1, 1]} : vector<8x45xf32> to vector<1x45xf32>
    %c0_258 = arith.constant 0 : index
    %c270 = arith.constant 270 : index
    %302 = vector.load %arg16[%c0_258, %c270] : memref<1x360xf32, #tpu.memory_space<vmem>>, vector<1x45xf32>
    tpu.vector_store %arg16[%c0_258, %c270], %301 {strides = array<i32>} : memref<1x360xf32, #tpu.memory_space<vmem>>, vector<1x45xf32>,
    %303 = vector.extract_strided_slice %288 {offsets = [7, 0], sizes = [1, 45], strides = [1, 1]} : vector<8x45xf32> to vector<1x45xf32>
    %c0_259 = arith.constant 0 : index
    %c315 = arith.constant 315 : index
    %304 = vector.load %arg16[%c0_259, %c315] : memref<1x360xf32, #tpu.memory_space<vmem>>, vector<1x45xf32>
    tpu.vector_store %arg16[%c0_259, %c315], %303 {strides = array<i32>} : memref<1x360xf32, #tpu.memory_space<vmem>>, vector<1x45xf32>,
    %c0_260 = arith.constant 0 : index
    %c0_261 = arith.constant 0 : index
    %305 = vector.load %arg16[%c0_260, %c0_261] : memref<1x360xf32, #tpu.memory_space<vmem>>, vector<1x360xf32>
    %c0_262 = arith.constant 0 : index
    %c0_263 = arith.constant 0 : index
    %306 = vector.load %arg11[%c0_262, %c0_263] : memref<360x8xf32, #tpu.memory_space<vmem>>, vector<360x8xf32>
    %cst_264 = arith.constant dense<0.000000e+00> : vector<1x8xf32>
    %307 = tpu.matmul %305, %306, %cst_264 {dimension_numbers = #tpu.dot_dimension_numbers<[1], [0], [0], [1], [0, 0, 1, 1], [], []>} : vector<1x360xf32>, vector<360x8xf32>, vector<1x8xf32> -> vector<1x8xf32>
    %c0_265 = arith.constant 0 : index
    %c0_266 = arith.constant 0 : index
    %308 = vector.load %arg12[%c0_265, %c0_266] : memref<1x8xf32, #tpu.memory_space<vmem>>, vector<1x8xf32>
    %309 = arith.addf %307, %308 : vector<1x8xf32>
    %cst_267 = arith.constant 0.000000e+00 : f32
    %310 = vector.broadcast %cst_267 : f32 to vector<1x8xf32>
    %311 = arith.maximumf %309, %310 : vector<1x8xf32>
    %c0_268 = arith.constant 0 : index
    %c0_269 = arith.constant 0 : index
    %c0_270 = arith.constant 0 : index
    %312 = vector.load %arg13[%c0_268, %c0_269, %c0_270] : memref<1x1x8xf32, #tpu.memory_space<vmem>>, vector<1x1x8xf32>
    %313 = vector.shape_cast %312 : vector<1x1x8xf32> to vector<1x8xf32>
    %314 = vector.shape_cast %311 : vector<1x8xf32> to vector<1x1x8xf32>
    tpu.vector_store %arg13[%c0_268, %c0_269, %c0_270], %314 {strides = array<i32>} : memref<1x1x8xf32, #tpu.memory_space<vmem>>, vector<1x1x8xf32>,
    return
  }
  func.func @transform_0(%arg0: i32) -> (i32, i32, i32) {
    %c0_i32 = arith.constant 0 : i32
    %c0_i32_0 = arith.constant 0 : i32
    %c0_i32_1 = arith.constant 0 : i32
    return %arg0, %c0_i32, %c0_i32_0 : i32, i32, i32
  }
  func.func @transform_1(%arg0: i32) -> (i32, i32) {
    %c0_i32 = arith.constant 0 : i32
    %c0_i32_0 = arith.constant 0 : i32
    %c0_i32_1 = arith.constant 0 : i32
    return %c0_i32, %c0_i32_0 : i32, i32
  }
  func.func @transform_2(%arg0: i32) -> (i32, i32) {
    %c0_i32 = arith.constant 0 : i32
    %c0_i32_0 = arith.constant 0 : i32
    %c0_i32_1 = arith.constant 0 : i32
    return %c0_i32, %c0_i32_0 : i32, i32
  }
  func.func @transform_3(%arg0: i32) -> (i32, i32) {
    %c0_i32 = arith.constant 0 : i32
    %c0_i32_0 = arith.constant 0 : i32
    %c0_i32_1 = arith.constant 0 : i32
    return %c0_i32, %c0_i32_0 : i32, i32
  }
  func.func @transform_4(%arg0: i32) -> (i32, i32) {
    %c0_i32 = arith.constant 0 : i32
    %c0_i32_0 = arith.constant 0 : i32
    %c0_i32_1 = arith.constant 0 : i32
    return %c0_i32, %c0_i32_0 : i32, i32
  }
  func.func @transform_5(%arg0: i32) -> (i32, i32) {
    %c0_i32 = arith.constant 0 : i32
    %c0_i32_0 = arith.constant 0 : i32
    %c0_i32_1 = arith.constant 0 : i32
    return %c0_i32, %c0_i32_0 : i32, i32
  }
  func.func @transform_6(%arg0: i32) -> (i32, i32) {
    %c0_i32 = arith.constant 0 : i32
    %c0_i32_0 = arith.constant 0 : i32
    %c0_i32_1 = arith.constant 0 : i32
    return %c0_i32, %c0_i32_0 : i32, i32
  }
  func.func @transform_7(%arg0: i32) -> (i32, i32) {
    %c0_i32 = arith.constant 0 : i32
    %c0_i32_0 = arith.constant 0 : i32
    %c0_i32_1 = arith.constant 0 : i32
    return %c0_i32, %c0_i32_0 : i32, i32
  }
  func.func @transform_8(%arg0: i32) -> (i32, i32) {
    %c0_i32 = arith.constant 0 : i32
    %c0_i32_0 = arith.constant 0 : i32
    %c0_i32_1 = arith.constant 0 : i32
    return %c0_i32, %c0_i32_0 : i32, i32
  }
  func.func @transform_9(%arg0: i32) -> (i32, i32) {
    %c0_i32 = arith.constant 0 : i32
    %c0_i32_0 = arith.constant 0 : i32
    %c0_i32_1 = arith.constant 0 : i32
    return %c0_i32, %c0_i32_0 : i32, i32
  }
  func.func @transform_10(%arg0: i32) -> (i32, i32) {
    %c0_i32 = arith.constant 0 : i32
    %c0_i32_0 = arith.constant 0 : i32
    %c0_i32_1 = arith.constant 0 : i32
    return %c0_i32, %c0_i32_0 : i32, i32
  }
  func.func @transform_11(%arg0: i32) -> (i32, i32) {
    %c0_i32 = arith.constant 0 : i32
    %c0_i32_0 = arith.constant 0 : i32
    %c0_i32_1 = arith.constant 0 : i32
    return %c0_i32, %c0_i32_0 : i32, i32
  }
  func.func @transform_12(%arg0: i32) -> (i32, i32, i32) {
    %c0_i32 = arith.constant 0 : i32
    %c0_i32_0 = arith.constant 0 : i32
    %c0_i32_1 = arith.constant 0 : i32
    return %arg0, %c0_i32, %c0_i32_0 : i32, i32, i32
  }
}

module attributes {stable_mosaic.version = 11 : i64} {
  func.func @_branch_kernel(%arg0: i32, %arg1: memref<1x46x940xbf16, #tpu.memory_space<vmem>>, %arg2: memref<3x46xbf16, #tpu.memory_space<vmem>>, %arg3: memref<3x1xf32, #tpu.memory_space<vmem>>, %arg4: memref<3x1xf32, #tpu.memory_space<vmem>>, %arg5: memref<5x42xf32, #tpu.memory_space<vmem>>, %arg6: memref<5x1xf32, #tpu.memory_space<vmem>>, %arg7: memref<5x1xf32, #tpu.memory_space<vmem>>, %arg8: memref<5x1xf32, #tpu.memory_space<vmem>>, %arg9: memref<8x15xf32, #tpu.memory_space<vmem>>, %arg10: memref<8x1xf32, #tpu.memory_space<vmem>>, %arg11: memref<360x8xf32, #tpu.memory_space<vmem>>, %arg12: memref<1x8xf32, #tpu.memory_space<vmem>>, %arg13: memref<1x1x8xf32, #tpu.memory_space<vmem>>, %arg14: memref<42x47xf32, #tpu.memory_space<vmem>>, %arg15: memref<15x46xf32, #tpu.memory_space<vmem>>, %arg16: memref<1x360xf32, #tpu.memory_space<vmem>>) attributes {dimension_semantics = [#tpu.dimension_semantics<parallel>], iteration_bounds = array<i64: 4>, scalar_prefetch = 0 : i64, scratch_operands = 3 : i64, tpu.core_type = #tpu.core_type<tc>, window_params = [{transform_indices = @transform_0, window_bounds = array<i64: 1, 46, 940>}, {pipeline_mode = #tpu.pipeline_mode<synchronous>, transform_indices = @transform_1, window_bounds = array<i64: 3, 46>}, {pipeline_mode = #tpu.pipeline_mode<synchronous>, transform_indices = @transform_2, window_bounds = array<i64: 3, 1>}, {pipeline_mode = #tpu.pipeline_mode<synchronous>, transform_indices = @transform_3, window_bounds = array<i64: 3, 1>}, {pipeline_mode = #tpu.pipeline_mode<synchronous>, transform_indices = @transform_4, window_bounds = array<i64: 5, 42>}, {pipeline_mode = #tpu.pipeline_mode<synchronous>, transform_indices = @transform_5, window_bounds = array<i64: 5, 1>}, {pipeline_mode = #tpu.pipeline_mode<synchronous>, transform_indices = @transform_6, window_bounds = array<i64: 5, 1>}, {pipeline_mode = #tpu.pipeline_mode<synchronous>, transform_indices = @transform_7, window_bounds = array<i64: 5, 1>}, {pipeline_mode = #tpu.pipeline_mode<synchronous>, transform_indices = @transform_8, window_bounds = array<i64: 8, 15>}, {pipeline_mode = #tpu.pipeline_mode<synchronous>, transform_indices = @transform_9, window_bounds = array<i64: 8, 1>}, {pipeline_mode = #tpu.pipeline_mode<synchronous>, transform_indices = @transform_10, window_bounds = array<i64: 360, 8>}, {pipeline_mode = #tpu.pipeline_mode<synchronous>, transform_indices = @transform_11, window_bounds = array<i64: 1, 8>}, {transform_indices = @transform_12, window_bounds = array<i64: 1, 1, 8>}]} {
    %c0 = arith.constant 0 : index
    %c0_0 = arith.constant 0 : index
    %0 = vector.load %arg2[%c0, %c0_0] : memref<3x46xbf16, #tpu.memory_space<vmem>>, vector<3x46xbf16>
    %c0_1 = arith.constant 0 : index
    %c0_2 = arith.constant 0 : index
    %c0_3 = arith.constant 0 : index
    %1 = vector.load %arg1[%c0_1, %c0_2, %c0_3] : memref<1x46x940xbf16, #tpu.memory_space<vmem>>, vector<1x46x940xbf16>
    %2 = vector.shape_cast %1 : vector<1x46x940xbf16> to vector<46x940xbf16>
    %cst = arith.constant dense<0.000000e+00> : vector<3x940xf32>
    %3 = tpu.matmul %0, %2, %cst {dimension_numbers = #tpu.dot_dimension_numbers<[1], [0], [0], [1], [0, 0, 1, 1], [], []>} : vector<3x46xbf16>, vector<46x940xbf16>, vector<3x940xf32> -> vector<3x940xf32>
    %c0_4 = arith.constant 0 : index
    %c0_5 = arith.constant 0 : index
    %4 = vector.load %arg3[%c0_4, %c0_5] : memref<3x1xf32, #tpu.memory_space<vmem>>, vector<3x1xf32>
    %5 = vector.broadcast %4 : vector<3x1xf32> to vector<3x940xf32>
    %6 = arith.mulf %3, %5 : vector<3x940xf32>
    %c0_6 = arith.constant 0 : index
    %c0_7 = arith.constant 0 : index
    %7 = vector.load %arg4[%c0_6, %c0_7] : memref<3x1xf32, #tpu.memory_space<vmem>>, vector<3x1xf32>
    %8 = vector.broadcast %7 : vector<3x1xf32> to vector<3x940xf32>
    %9 = arith.addf %6, %8 : vector<3x940xf32>
    %cst_8 = arith.constant 0.000000e+00 : f32
    %10 = vector.broadcast %cst_8 : f32 to vector<3x940xf32>
    %11 = arith.maximumf %9, %10 : vector<3x940xf32>
    %12 = vector.extract_strided_slice %11 {offsets = [0, 0], sizes = [3, 47], strides = [1, 1]} : vector<3x940xf32> to vector<3x47xf32>
    %c0_9 = arith.constant 0 : index
    %c0_10 = arith.constant 0 : index
    %13 = vector.load %arg14[%c0_9, %c0_10] : memref<42x47xf32, #tpu.memory_space<vmem>>, vector<3x47xf32>
    tpu.vector_store %arg14[%c0_9, %c0_10], %12 {strides = array<i32>} : memref<42x47xf32, #tpu.memory_space<vmem>>, vector<3x47xf32>,
    %14 = vector.extract_strided_slice %11 {offsets = [0, 47], sizes = [3, 47], strides = [1, 1]} : vector<3x940xf32> to vector<3x47xf32>
    %c3 = arith.constant 3 : index
    %c0_11 = arith.constant 0 : index
    %15 = vector.load %arg14[%c3, %c0_11] : memref<42x47xf32, #tpu.memory_space<vmem>>, vector<3x47xf32>
    tpu.vector_store %arg14[%c3, %c0_11], %14 {strides = array<i32>} : memref<42x47xf32, #tpu.memory_space<vmem>>, vector<3x47xf32>,
    %16 = vector.extract_strided_slice %11 {offsets = [0, 94], sizes = [3, 47], strides = [1, 1]} : vector<3x940xf32> to vector<3x47xf32>
    %c6 = arith.constant 6 : index
    %c0_12 = arith.constant 0 : index
    %17 = vector.load %arg14[%c6, %c0_12] : memref<42x47xf32, #tpu.memory_space<vmem>>, vector<3x47xf32>
    tpu.vector_store %arg14[%c6, %c0_12], %16 {strides = array<i32>} : memref<42x47xf32, #tpu.memory_space<vmem>>, vector<3x47xf32>,
    %18 = vector.extract_strided_slice %11 {offsets = [0, 141], sizes = [3, 47], strides = [1, 1]} : vector<3x940xf32> to vector<3x47xf32>
    %c9 = arith.constant 9 : index
    %c0_13 = arith.constant 0 : index
    %19 = vector.load %arg14[%c9, %c0_13] : memref<42x47xf32, #tpu.memory_space<vmem>>, vector<3x47xf32>
    tpu.vector_store %arg14[%c9, %c0_13], %18 {strides = array<i32>} : memref<42x47xf32, #tpu.memory_space<vmem>>, vector<3x47xf32>,
    %20 = vector.extract_strided_slice %11 {offsets = [0, 188], sizes = [3, 47], strides = [1, 1]} : vector<3x940xf32> to vector<3x47xf32>
    %c12 = arith.constant 12 : index
    %c0_14 = arith.constant 0 : index
    %21 = vector.load %arg14[%c12, %c0_14] : memref<42x47xf32, #tpu.memory_space<vmem>>, vector<3x47xf32>
    tpu.vector_store %arg14[%c12, %c0_14], %20 {strides = array<i32>} : memref<42x47xf32, #tpu.memory_space<vmem>>, vector<3x47xf32>,
    %22 = vector.extract_strided_slice %11 {offsets = [0, 235], sizes = [3, 47], strides = [1, 1]} : vector<3x940xf32> to vector<3x47xf32>
    %c15 = arith.constant 15 : index
    %c0_15 = arith.constant 0 : index
    %23 = vector.load %arg14[%c15, %c0_15] : memref<42x47xf32, #tpu.memory_space<vmem>>, vector<3x47xf32>
    tpu.vector_store %arg14[%c15, %c0_15], %22 {strides = array<i32>} : memref<42x47xf32, #tpu.memory_space<vmem>>, vector<3x47xf32>,
    %24 = vector.extract_strided_slice %11 {offsets = [0, 282], sizes = [3, 47], strides = [1, 1]} : vector<3x940xf32> to vector<3x47xf32>
    %c18 = arith.constant 18 : index
    %c0_16 = arith.constant 0 : index
    %25 = vector.load %arg14[%c18, %c0_16] : memref<42x47xf32, #tpu.memory_space<vmem>>, vector<3x47xf32>
    tpu.vector_store %arg14[%c18, %c0_16], %24 {strides = array<i32>} : memref<42x47xf32, #tpu.memory_space<vmem>>, vector<3x47xf32>,
    %26 = vector.extract_strided_slice %11 {offsets = [0, 329], sizes = [3, 47], strides = [1, 1]} : vector<3x940xf32> to vector<3x47xf32>
    %c21 = arith.constant 21 : index
    %c0_17 = arith.constant 0 : index
    %27 = vector.load %arg14[%c21, %c0_17] : memref<42x47xf32, #tpu.memory_space<vmem>>, vector<3x47xf32>
    tpu.vector_store %arg14[%c21, %c0_17], %26 {strides = array<i32>} : memref<42x47xf32, #tpu.memory_space<vmem>>, vector<3x47xf32>,
    %28 = vector.extract_strided_slice %11 {offsets = [0, 376], sizes = [3, 47], strides = [1, 1]} : vector<3x940xf32> to vector<3x47xf32>
    %c24 = arith.constant 24 : index
    %c0_18 = arith.constant 0 : index
    %29 = vector.load %arg14[%c24, %c0_18] : memref<42x47xf32, #tpu.memory_space<vmem>>, vector<3x47xf32>
    tpu.vector_store %arg14[%c24, %c0_18], %28 {strides = array<i32>} : memref<42x47xf32, #tpu.memory_space<vmem>>, vector<3x47xf32>,
    %30 = vector.extract_strided_slice %11 {offsets = [0, 423], sizes = [3, 47], strides = [1, 1]} : vector<3x940xf32> to vector<3x47xf32>
    %c27 = arith.constant 27 : index
    %c0_19 = arith.constant 0 : index
    %31 = vector.load %arg14[%c27, %c0_19] : memref<42x47xf32, #tpu.memory_space<vmem>>, vector<3x47xf32>
    tpu.vector_store %arg14[%c27, %c0_19], %30 {strides = array<i32>} : memref<42x47xf32, #tpu.memory_space<vmem>>, vector<3x47xf32>,
    %32 = vector.extract_strided_slice %11 {offsets = [0, 470], sizes = [3, 47], strides = [1, 1]} : vector<3x940xf32> to vector<3x47xf32>
    %c30 = arith.constant 30 : index
    %c0_20 = arith.constant 0 : index
    %33 = vector.load %arg14[%c30, %c0_20] : memref<42x47xf32, #tpu.memory_space<vmem>>, vector<3x47xf32>
    tpu.vector_store %arg14[%c30, %c0_20], %32 {strides = array<i32>} : memref<42x47xf32, #tpu.memory_space<vmem>>, vector<3x47xf32>,
    %34 = vector.extract_strided_slice %11 {offsets = [0, 517], sizes = [3, 47], strides = [1, 1]} : vector<3x940xf32> to vector<3x47xf32>
    %c33 = arith.constant 33 : index
    %c0_21 = arith.constant 0 : index
    %35 = vector.load %arg14[%c33, %c0_21] : memref<42x47xf32, #tpu.memory_space<vmem>>, vector<3x47xf32>
    tpu.vector_store %arg14[%c33, %c0_21], %34 {strides = array<i32>} : memref<42x47xf32, #tpu.memory_space<vmem>>, vector<3x47xf32>,
    %36 = vector.extract_strided_slice %11 {offsets = [0, 564], sizes = [3, 47], strides = [1, 1]} : vector<3x940xf32> to vector<3x47xf32>
    %c36 = arith.constant 36 : index
    %c0_22 = arith.constant 0 : index
    %37 = vector.load %arg14[%c36, %c0_22] : memref<42x47xf32, #tpu.memory_space<vmem>>, vector<3x47xf32>
    tpu.vector_store %arg14[%c36, %c0_22], %36 {strides = array<i32>} : memref<42x47xf32, #tpu.memory_space<vmem>>, vector<3x47xf32>,
    %38 = vector.extract_strided_slice %11 {offsets = [0, 611], sizes = [3, 47], strides = [1, 1]} : vector<3x940xf32> to vector<3x47xf32>
    %c39 = arith.constant 39 : index
    %c0_23 = arith.constant 0 : index
    %39 = vector.load %arg14[%c39, %c0_23] : memref<42x47xf32, #tpu.memory_space<vmem>>, vector<3x47xf32>
    tpu.vector_store %arg14[%c39, %c0_23], %38 {strides = array<i32>} : memref<42x47xf32, #tpu.memory_space<vmem>>, vector<3x47xf32>,
    %c0_24 = arith.constant 0 : index
    %c0_25 = arith.constant 0 : index
    %40 = vector.load %arg5[%c0_24, %c0_25] : memref<5x42xf32, #tpu.memory_space<vmem>>, vector<5x42xf32>
    %c0_26 = arith.constant 0 : index
    %c0_27 = arith.constant 0 : index
    %41 = vector.load %arg14[%c0_26, %c0_27] : memref<42x47xf32, #tpu.memory_space<vmem>>, vector<42x47xf32>
    %cst_28 = arith.constant dense<0.000000e+00> : vector<5x47xf32>
    %42 = tpu.matmul %40, %41, %cst_28 {dimension_numbers = #tpu.dot_dimension_numbers<[1], [0], [0], [1], [0, 0, 1, 1], [], []>} : vector<5x42xf32>, vector<42x47xf32>, vector<5x47xf32> -> vector<5x47xf32>
    %c0_29 = arith.constant 0 : index
    %c0_30 = arith.constant 0 : index
    %43 = vector.load %arg6[%c0_29, %c0_30] : memref<5x1xf32, #tpu.memory_space<vmem>>, vector<5x1xf32>
    %44 = vector.broadcast %43 : vector<5x1xf32> to vector<5x47xf32>
    %45 = arith.addf %42, %44 : vector<5x47xf32>
    %cst_31 = arith.constant 0.000000e+00 : f32
    %46 = vector.broadcast %cst_31 : f32 to vector<5x47xf32>
    %47 = arith.maximumf %45, %46 : vector<5x47xf32>
    %c0_32 = arith.constant 0 : index
    %c0_33 = arith.constant 0 : index
    %48 = vector.load %arg7[%c0_32, %c0_33] : memref<5x1xf32, #tpu.memory_space<vmem>>, vector<5x1xf32>
    %49 = vector.broadcast %48 : vector<5x1xf32> to vector<5x47xf32>
    %50 = arith.mulf %47, %49 : vector<5x47xf32>
    %c0_34 = arith.constant 0 : index
    %c0_35 = arith.constant 0 : index
    %51 = vector.load %arg8[%c0_34, %c0_35] : memref<5x1xf32, #tpu.memory_space<vmem>>, vector<5x1xf32>
    %52 = vector.broadcast %51 : vector<5x1xf32> to vector<5x47xf32>
    %53 = arith.addf %50, %52 : vector<5x47xf32>
    %54 = vector.extract_strided_slice %11 {offsets = [0, 235], sizes = [3, 46], strides = [1, 1]} : vector<3x940xf32> to vector<3x46xf32>
    %c0_36 = arith.constant 0 : index
    %c0_37 = arith.constant 0 : index
    %55 = vector.load %arg14[%c0_36, %c0_37] : memref<42x47xf32, #tpu.memory_space<vmem>>, vector<3x46xf32>
    tpu.vector_store %arg14[%c0_36, %c0_37], %54 {strides = array<i32>} : memref<42x47xf32, #tpu.memory_space<vmem>>, vector<3x46xf32>,
    %56 = vector.extract_strided_slice %11 {offsets = [0, 282], sizes = [3, 46], strides = [1, 1]} : vector<3x940xf32> to vector<3x46xf32>
    %c3_38 = arith.constant 3 : index
    %c0_39 = arith.constant 0 : index
    %57 = vector.load %arg14[%c3_38, %c0_39] : memref<42x47xf32, #tpu.memory_space<vmem>>, vector<3x46xf32>
    tpu.vector_store %arg14[%c3_38, %c0_39], %56 {strides = array<i32>} : memref<42x47xf32, #tpu.memory_space<vmem>>, vector<3x46xf32>,
    %58 = vector.extract_strided_slice %11 {offsets = [0, 329], sizes = [3, 46], strides = [1, 1]} : vector<3x940xf32> to vector<3x46xf32>
    %c6_40 = arith.constant 6 : index
    %c0_41 = arith.constant 0 : index
    %59 = vector.load %arg14[%c6_40, %c0_41] : memref<42x47xf32, #tpu.memory_space<vmem>>, vector<3x46xf32>
    tpu.vector_store %arg14[%c6_40, %c0_41], %58 {strides = array<i32>} : memref<42x47xf32, #tpu.memory_space<vmem>>, vector<3x46xf32>,
    %60 = vector.extract_strided_slice %11 {offsets = [0, 376], sizes = [3, 46], strides = [1, 1]} : vector<3x940xf32> to vector<3x46xf32>
    %c9_42 = arith.constant 9 : index
    %c0_43 = arith.constant 0 : index
    %61 = vector.load %arg14[%c9_42, %c0_43] : memref<42x47xf32, #tpu.memory_space<vmem>>, vector<3x46xf32>
    tpu.vector_store %arg14[%c9_42, %c0_43], %60 {strides = array<i32>} : memref<42x47xf32, #tpu.memory_space<vmem>>, vector<3x46xf32>,
    %62 = vector.extract_strided_slice %11 {offsets = [0, 423], sizes = [3, 46], strides = [1, 1]} : vector<3x940xf32> to vector<3x46xf32>
    %c12_44 = arith.constant 12 : index
    %c0_45 = arith.constant 0 : index
    %63 = vector.load %arg14[%c12_44, %c0_45] : memref<42x47xf32, #tpu.memory_space<vmem>>, vector<3x46xf32>
    tpu.vector_store %arg14[%c12_44, %c0_45], %62 {strides = array<i32>} : memref<42x47xf32, #tpu.memory_space<vmem>>, vector<3x46xf32>,
    %64 = vector.extract_strided_slice %11 {offsets = [0, 470], sizes = [3, 46], strides = [1, 1]} : vector<3x940xf32> to vector<3x46xf32>
    %c15_46 = arith.constant 15 : index
    %c0_47 = arith.constant 0 : index
    %65 = vector.load %arg14[%c15_46, %c0_47] : memref<42x47xf32, #tpu.memory_space<vmem>>, vector<3x46xf32>
    tpu.vector_store %arg14[%c15_46, %c0_47], %64 {strides = array<i32>} : memref<42x47xf32, #tpu.memory_space<vmem>>, vector<3x46xf32>,
    %66 = vector.extract_strided_slice %11 {offsets = [0, 517], sizes = [3, 46], strides = [1, 1]} : vector<3x940xf32> to vector<3x46xf32>
    %c18_48 = arith.constant 18 : index
    %c0_49 = arith.constant 0 : index
    %67 = vector.load %arg14[%c18_48, %c0_49] : memref<42x47xf32, #tpu.memory_space<vmem>>, vector<3x46xf32>
    tpu.vector_store %arg14[%c18_48, %c0_49], %66 {strides = array<i32>} : memref<42x47xf32, #tpu.memory_space<vmem>>, vector<3x46xf32>,
    %68 = vector.extract_strided_slice %11 {offsets = [0, 564], sizes = [3, 46], strides = [1, 1]} : vector<3x940xf32> to vector<3x46xf32>
    %c21_50 = arith.constant 21 : index
    %c0_51 = arith.constant 0 : index
    %69 = vector.load %arg14[%c21_50, %c0_51] : memref<42x47xf32, #tpu.memory_space<vmem>>, vector<3x46xf32>
    tpu.vector_store %arg14[%c21_50, %c0_51], %68 {strides = array<i32>} : memref<42x47xf32, #tpu.memory_space<vmem>>, vector<3x46xf32>,
    %70 = vector.extract_strided_slice %11 {offsets = [0, 611], sizes = [3, 46], strides = [1, 1]} : vector<3x940xf32> to vector<3x46xf32>
    %c24_52 = arith.constant 24 : index
    %c0_53 = arith.constant 0 : index
    %71 = vector.load %arg14[%c24_52, %c0_53] : memref<42x47xf32, #tpu.memory_space<vmem>>, vector<3x46xf32>
    tpu.vector_store %arg14[%c24_52, %c0_53], %70 {strides = array<i32>} : memref<42x47xf32, #tpu.memory_space<vmem>>, vector<3x46xf32>,
    %72 = vector.extract_strided_slice %11 {offsets = [0, 658], sizes = [3, 46], strides = [1, 1]} : vector<3x940xf32> to vector<3x46xf32>
    %c27_54 = arith.constant 27 : index
    %c0_55 = arith.constant 0 : index
    %73 = vector.load %arg14[%c27_54, %c0_55] : memref<42x47xf32, #tpu.memory_space<vmem>>, vector<3x46xf32>
    tpu.vector_store %arg14[%c27_54, %c0_55], %72 {strides = array<i32>} : memref<42x47xf32, #tpu.memory_space<vmem>>, vector<3x46xf32>,
    %74 = vector.extract_strided_slice %11 {offsets = [0, 705], sizes = [3, 46], strides = [1, 1]} : vector<3x940xf32> to vector<3x46xf32>
    %c30_56 = arith.constant 30 : index
    %c0_57 = arith.constant 0 : index
    %75 = vector.load %arg14[%c30_56, %c0_57] : memref<42x47xf32, #tpu.memory_space<vmem>>, vector<3x46xf32>
    tpu.vector_store %arg14[%c30_56, %c0_57], %74 {strides = array<i32>} : memref<42x47xf32, #tpu.memory_space<vmem>>, vector<3x46xf32>,
    %76 = vector.extract_strided_slice %11 {offsets = [0, 752], sizes = [3, 46], strides = [1, 1]} : vector<3x940xf32> to vector<3x46xf32>
    %c33_58 = arith.constant 33 : index
    %c0_59 = arith.constant 0 : index
    %77 = vector.load %arg14[%c33_58, %c0_59] : memref<42x47xf32, #tpu.memory_space<vmem>>, vector<3x46xf32>
    tpu.vector_store %arg14[%c33_58, %c0_59], %76 {strides = array<i32>} : memref<42x47xf32, #tpu.memory_space<vmem>>, vector<3x46xf32>,
    %78 = vector.extract_strided_slice %11 {offsets = [0, 799], sizes = [3, 46], strides = [1, 1]} : vector<3x940xf32> to vector<3x46xf32>
    %c36_60 = arith.constant 36 : index
    %c0_61 = arith.constant 0 : index
    %79 = vector.load %arg14[%c36_60, %c0_61] : memref<42x47xf32, #tpu.memory_space<vmem>>, vector<3x46xf32>
    tpu.vector_store %arg14[%c36_60, %c0_61], %78 {strides = array<i32>} : memref<42x47xf32, #tpu.memory_space<vmem>>, vector<3x46xf32>,
    %80 = vector.extract_strided_slice %11 {offsets = [0, 846], sizes = [3, 46], strides = [1, 1]} : vector<3x940xf32> to vector<3x46xf32>
    %c39_62 = arith.constant 39 : index
    %c0_63 = arith.constant 0 : index
    %81 = vector.load %arg14[%c39_62, %c0_63] : memref<42x47xf32, #tpu.memory_space<vmem>>, vector<3x46xf32>
    tpu.vector_store %arg14[%c39_62, %c0_63], %80 {strides = array<i32>} : memref<42x47xf32, #tpu.memory_space<vmem>>, vector<3x46xf32>,
    %c0_64 = arith.constant 0 : index
    %c0_65 = arith.constant 0 : index
    %82 = vector.load %arg5[%c0_64, %c0_65] : memref<5x42xf32, #tpu.memory_space<vmem>>, vector<5x42xf32>
    %c0_66 = arith.constant 0 : index
    %c0_67 = arith.constant 0 : index
    %83 = vector.load %arg14[%c0_66, %c0_67] : memref<42x47xf32, #tpu.memory_space<vmem>>, vector<42x46xf32>
    %cst_68 = arith.constant dense<0.000000e+00> : vector<5x46xf32>
    %84 = tpu.matmul %82, %83, %cst_68 {dimension_numbers = #tpu.dot_dimension_numbers<[1], [0], [0], [1], [0, 0, 1, 1], [], []>} : vector<5x42xf32>, vector<42x46xf32>, vector<5x46xf32> -> vector<5x46xf32>
    %c0_69 = arith.constant 0 : index
    %c0_70 = arith.constant 0 : index
    %85 = vector.load %arg6[%c0_69, %c0_70] : memref<5x1xf32, #tpu.memory_space<vmem>>, vector<5x1xf32>
    %86 = vector.broadcast %85 : vector<5x1xf32> to vector<5x46xf32>
    %87 = arith.addf %84, %86 : vector<5x46xf32>
    %cst_71 = arith.constant 0.000000e+00 : f32
    %88 = vector.broadcast %cst_71 : f32 to vector<5x46xf32>
    %89 = arith.maximumf %87, %88 : vector<5x46xf32>
    %c0_72 = arith.constant 0 : index
    %c0_73 = arith.constant 0 : index
    %90 = vector.load %arg7[%c0_72, %c0_73] : memref<5x1xf32, #tpu.memory_space<vmem>>, vector<5x1xf32>
    %91 = vector.broadcast %90 : vector<5x1xf32> to vector<5x46xf32>
    %92 = arith.mulf %89, %91 : vector<5x46xf32>
    %c0_74 = arith.constant 0 : index
    %c0_75 = arith.constant 0 : index
    %93 = vector.load %arg8[%c0_74, %c0_75] : memref<5x1xf32, #tpu.memory_space<vmem>>, vector<5x1xf32>
    %94 = vector.broadcast %93 : vector<5x1xf32> to vector<5x46xf32>
    %95 = arith.addf %92, %94 : vector<5x46xf32>
    %96 = vector.extract_strided_slice %11 {offsets = [0, 470], sizes = [3, 46], strides = [1, 1]} : vector<3x940xf32> to vector<3x46xf32>
    %c0_76 = arith.constant 0 : index
    %c0_77 = arith.constant 0 : index
    %97 = vector.load %arg14[%c0_76, %c0_77] : memref<42x47xf32, #tpu.memory_space<vmem>>, vector<3x46xf32>
    tpu.vector_store %arg14[%c0_76, %c0_77], %96 {strides = array<i32>} : memref<42x47xf32, #tpu.memory_space<vmem>>, vector<3x46xf32>,
    %98 = vector.extract_strided_slice %11 {offsets = [0, 517], sizes = [3, 46], strides = [1, 1]} : vector<3x940xf32> to vector<3x46xf32>
    %c3_78 = arith.constant 3 : index
    %c0_79 = arith.constant 0 : index
    %99 = vector.load %arg14[%c3_78, %c0_79] : memref<42x47xf32, #tpu.memory_space<vmem>>, vector<3x46xf32>
    tpu.vector_store %arg14[%c3_78, %c0_79], %98 {strides = array<i32>} : memref<42x47xf32, #tpu.memory_space<vmem>>, vector<3x46xf32>,
    %100 = vector.extract_strided_slice %11 {offsets = [0, 564], sizes = [3, 46], strides = [1, 1]} : vector<3x940xf32> to vector<3x46xf32>
    %c6_80 = arith.constant 6 : index
    %c0_81 = arith.constant 0 : index
    %101 = vector.load %arg14[%c6_80, %c0_81] : memref<42x47xf32, #tpu.memory_space<vmem>>, vector<3x46xf32>
    tpu.vector_store %arg14[%c6_80, %c0_81], %100 {strides = array<i32>} : memref<42x47xf32, #tpu.memory_space<vmem>>, vector<3x46xf32>,
    %102 = vector.extract_strided_slice %11 {offsets = [0, 611], sizes = [3, 46], strides = [1, 1]} : vector<3x940xf32> to vector<3x46xf32>
    %c9_82 = arith.constant 9 : index
    %c0_83 = arith.constant 0 : index
    %103 = vector.load %arg14[%c9_82, %c0_83] : memref<42x47xf32, #tpu.memory_space<vmem>>, vector<3x46xf32>
    tpu.vector_store %arg14[%c9_82, %c0_83], %102 {strides = array<i32>} : memref<42x47xf32, #tpu.memory_space<vmem>>, vector<3x46xf32>,
    %104 = vector.extract_strided_slice %11 {offsets = [0, 658], sizes = [3, 46], strides = [1, 1]} : vector<3x940xf32> to vector<3x46xf32>
    %c12_84 = arith.constant 12 : index
    %c0_85 = arith.constant 0 : index
    %105 = vector.load %arg14[%c12_84, %c0_85] : memref<42x47xf32, #tpu.memory_space<vmem>>, vector<3x46xf32>
    tpu.vector_store %arg14[%c12_84, %c0_85], %104 {strides = array<i32>} : memref<42x47xf32, #tpu.memory_space<vmem>>, vector<3x46xf32>,
    %106 = vector.extract_strided_slice %11 {offsets = [0, 705], sizes = [3, 46], strides = [1, 1]} : vector<3x940xf32> to vector<3x46xf32>
    %c15_86 = arith.constant 15 : index
    %c0_87 = arith.constant 0 : index
    %107 = vector.load %arg14[%c15_86, %c0_87] : memref<42x47xf32, #tpu.memory_space<vmem>>, vector<3x46xf32>
    tpu.vector_store %arg14[%c15_86, %c0_87], %106 {strides = array<i32>} : memref<42x47xf32, #tpu.memory_space<vmem>>, vector<3x46xf32>,
    %108 = vector.extract_strided_slice %11 {offsets = [0, 752], sizes = [3, 46], strides = [1, 1]} : vector<3x940xf32> to vector<3x46xf32>
    %c18_88 = arith.constant 18 : index
    %c0_89 = arith.constant 0 : index
    %109 = vector.load %arg14[%c18_88, %c0_89] : memref<42x47xf32, #tpu.memory_space<vmem>>, vector<3x46xf32>
    tpu.vector_store %arg14[%c18_88, %c0_89], %108 {strides = array<i32>} : memref<42x47xf32, #tpu.memory_space<vmem>>, vector<3x46xf32>,
    %110 = vector.extract_strided_slice %11 {offsets = [0, 799], sizes = [3, 46], strides = [1, 1]} : vector<3x940xf32> to vector<3x46xf32>
    %c21_90 = arith.constant 21 : index
    %c0_91 = arith.constant 0 : index
    %111 = vector.load %arg14[%c21_90, %c0_91] : memref<42x47xf32, #tpu.memory_space<vmem>>, vector<3x46xf32>
    tpu.vector_store %arg14[%c21_90, %c0_91], %110 {strides = array<i32>} : memref<42x47xf32, #tpu.memory_space<vmem>>, vector<3x46xf32>,
    %112 = vector.extract_strided_slice %11 {offsets = [0, 846], sizes = [3, 46], strides = [1, 1]} : vector<3x940xf32> to vector<3x46xf32>
    %c24_92 = arith.constant 24 : index
    %c0_93 = arith.constant 0 : index
    %113 = vector.load %arg14[%c24_92, %c0_93] : memref<42x47xf32, #tpu.memory_space<vmem>>, vector<3x46xf32>
    tpu.vector_store %arg14[%c24_92, %c0_93], %112 {strides = array<i32>} : memref<42x47xf32, #tpu.memory_space<vmem>>, vector<3x46xf32>,
    %114 = vector.extract_strided_slice %11 {offsets = [0, 893], sizes = [3, 46], strides = [1, 1]} : vector<3x940xf32> to vector<3x46xf32>
    %c27_94 = arith.constant 27 : index
    %c0_95 = arith.constant 0 : index
    %115 = vector.load %arg14[%c27_94, %c0_95] : memref<42x47xf32, #tpu.memory_space<vmem>>, vector<3x46xf32>
    tpu.vector_store %arg14[%c27_94, %c0_95], %114 {strides = array<i32>} : memref<42x47xf32, #tpu.memory_space<vmem>>, vector<3x46xf32>,
    %116 = vector.extract_strided_slice %11 {offsets = [0, 1], sizes = [3, 46], strides = [1, 1]} : vector<3x940xf32> to vector<3x46xf32>
    %c30_96 = arith.constant 30 : index
    %c0_97 = arith.constant 0 : index
    %117 = vector.load %arg14[%c30_96, %c0_97] : memref<42x47xf32, #tpu.memory_space<vmem>>, vector<3x46xf32>
    tpu.vector_store %arg14[%c30_96, %c0_97], %116 {strides = array<i32>} : memref<42x47xf32, #tpu.memory_space<vmem>>, vector<3x46xf32>,
    %118 = vector.extract_strided_slice %11 {offsets = [0, 48], sizes = [3, 46], strides = [1, 1]} : vector<3x940xf32> to vector<3x46xf32>
    %c33_98 = arith.constant 33 : index
    %c0_99 = arith.constant 0 : index
    %119 = vector.load %arg14[%c33_98, %c0_99] : memref<42x47xf32, #tpu.memory_space<vmem>>, vector<3x46xf32>
    tpu.vector_store %arg14[%c33_98, %c0_99], %118 {strides = array<i32>} : memref<42x47xf32, #tpu.memory_space<vmem>>, vector<3x46xf32>,
    %120 = vector.extract_strided_slice %11 {offsets = [0, 95], sizes = [3, 46], strides = [1, 1]} : vector<3x940xf32> to vector<3x46xf32>
    %c36_100 = arith.constant 36 : index
    %c0_101 = arith.constant 0 : index
    %121 = vector.load %arg14[%c36_100, %c0_101] : memref<42x47xf32, #tpu.memory_space<vmem>>, vector<3x46xf32>
    tpu.vector_store %arg14[%c36_100, %c0_101], %120 {strides = array<i32>} : memref<42x47xf32, #tpu.memory_space<vmem>>, vector<3x46xf32>,
    %122 = vector.extract_strided_slice %11 {offsets = [0, 142], sizes = [3, 46], strides = [1, 1]} : vector<3x940xf32> to vector<3x46xf32>
    %c39_102 = arith.constant 39 : index
    %c0_103 = arith.constant 0 : index
    %123 = vector.load %arg14[%c39_102, %c0_103] : memref<42x47xf32, #tpu.memory_space<vmem>>, vector<3x46xf32>
    tpu.vector_store %arg14[%c39_102, %c0_103], %122 {strides = array<i32>} : memref<42x47xf32, #tpu.memory_space<vmem>>, vector<3x46xf32>,
    %c0_104 = arith.constant 0 : index
    %c0_105 = arith.constant 0 : index
    %124 = vector.load %arg5[%c0_104, %c0_105] : memref<5x42xf32, #tpu.memory_space<vmem>>, vector<5x42xf32>
    %c0_106 = arith.constant 0 : index
    %c0_107 = arith.constant 0 : index
    %125 = vector.load %arg14[%c0_106, %c0_107] : memref<42x47xf32, #tpu.memory_space<vmem>>, vector<42x46xf32>
    %cst_108 = arith.constant dense<0.000000e+00> : vector<5x46xf32>
    %126 = tpu.matmul %124, %125, %cst_108 {dimension_numbers = #tpu.dot_dimension_numbers<[1], [0], [0], [1], [0, 0, 1, 1], [], []>} : vector<5x42xf32>, vector<42x46xf32>, vector<5x46xf32> -> vector<5x46xf32>
    %c0_109 = arith.constant 0 : index
    %c0_110 = arith.constant 0 : index
    %127 = vector.load %arg6[%c0_109, %c0_110] : memref<5x1xf32, #tpu.memory_space<vmem>>, vector<5x1xf32>
    %128 = vector.broadcast %127 : vector<5x1xf32> to vector<5x46xf32>
    %129 = arith.addf %126, %128 : vector<5x46xf32>
    %cst_111 = arith.constant 0.000000e+00 : f32
    %130 = vector.broadcast %cst_111 : f32 to vector<5x46xf32>
    %131 = arith.maximumf %129, %130 : vector<5x46xf32>
    %c0_112 = arith.constant 0 : index
    %c0_113 = arith.constant 0 : index
    %132 = vector.load %arg7[%c0_112, %c0_113] : memref<5x1xf32, #tpu.memory_space<vmem>>, vector<5x1xf32>
    %133 = vector.broadcast %132 : vector<5x1xf32> to vector<5x46xf32>
    %134 = arith.mulf %131, %133 : vector<5x46xf32>
    %c0_114 = arith.constant 0 : index
    %c0_115 = arith.constant 0 : index
    %135 = vector.load %arg8[%c0_114, %c0_115] : memref<5x1xf32, #tpu.memory_space<vmem>>, vector<5x1xf32>
    %136 = vector.broadcast %135 : vector<5x1xf32> to vector<5x46xf32>
    %137 = arith.addf %134, %136 : vector<5x46xf32>
    %138 = vector.extract_strided_slice %11 {offsets = [0, 705], sizes = [3, 46], strides = [1, 1]} : vector<3x940xf32> to vector<3x46xf32>
    %c0_116 = arith.constant 0 : index
    %c0_117 = arith.constant 0 : index
    %139 = vector.load %arg14[%c0_116, %c0_117] : memref<42x47xf32, #tpu.memory_space<vmem>>, vector<3x46xf32>
    tpu.vector_store %arg14[%c0_116, %c0_117], %138 {strides = array<i32>} : memref<42x47xf32, #tpu.memory_space<vmem>>, vector<3x46xf32>,
    %140 = vector.extract_strided_slice %11 {offsets = [0, 752], sizes = [3, 46], strides = [1, 1]} : vector<3x940xf32> to vector<3x46xf32>
    %c3_118 = arith.constant 3 : index
    %c0_119 = arith.constant 0 : index
    %141 = vector.load %arg14[%c3_118, %c0_119] : memref<42x47xf32, #tpu.memory_space<vmem>>, vector<3x46xf32>
    tpu.vector_store %arg14[%c3_118, %c0_119], %140 {strides = array<i32>} : memref<42x47xf32, #tpu.memory_space<vmem>>, vector<3x46xf32>,
    %142 = vector.extract_strided_slice %11 {offsets = [0, 799], sizes = [3, 46], strides = [1, 1]} : vector<3x940xf32> to vector<3x46xf32>
    %c6_120 = arith.constant 6 : index
    %c0_121 = arith.constant 0 : index
    %143 = vector.load %arg14[%c6_120, %c0_121] : memref<42x47xf32, #tpu.memory_space<vmem>>, vector<3x46xf32>
    tpu.vector_store %arg14[%c6_120, %c0_121], %142 {strides = array<i32>} : memref<42x47xf32, #tpu.memory_space<vmem>>, vector<3x46xf32>,
    %144 = vector.extract_strided_slice %11 {offsets = [0, 846], sizes = [3, 46], strides = [1, 1]} : vector<3x940xf32> to vector<3x46xf32>
    %c9_122 = arith.constant 9 : index
    %c0_123 = arith.constant 0 : index
    %145 = vector.load %arg14[%c9_122, %c0_123] : memref<42x47xf32, #tpu.memory_space<vmem>>, vector<3x46xf32>
    tpu.vector_store %arg14[%c9_122, %c0_123], %144 {strides = array<i32>} : memref<42x47xf32, #tpu.memory_space<vmem>>, vector<3x46xf32>,
    %146 = vector.extract_strided_slice %11 {offsets = [0, 893], sizes = [3, 46], strides = [1, 1]} : vector<3x940xf32> to vector<3x46xf32>
    %c12_124 = arith.constant 12 : index
    %c0_125 = arith.constant 0 : index
    %147 = vector.load %arg14[%c12_124, %c0_125] : memref<42x47xf32, #tpu.memory_space<vmem>>, vector<3x46xf32>
    tpu.vector_store %arg14[%c12_124, %c0_125], %146 {strides = array<i32>} : memref<42x47xf32, #tpu.memory_space<vmem>>, vector<3x46xf32>,
    %148 = vector.extract_strided_slice %11 {offsets = [0, 1], sizes = [3, 46], strides = [1, 1]} : vector<3x940xf32> to vector<3x46xf32>
    %c15_126 = arith.constant 15 : index
    %c0_127 = arith.constant 0 : index
    %149 = vector.load %arg14[%c15_126, %c0_127] : memref<42x47xf32, #tpu.memory_space<vmem>>, vector<3x46xf32>
    tpu.vector_store %arg14[%c15_126, %c0_127], %148 {strides = array<i32>} : memref<42x47xf32, #tpu.memory_space<vmem>>, vector<3x46xf32>,
    %150 = vector.extract_strided_slice %11 {offsets = [0, 48], sizes = [3, 46], strides = [1, 1]} : vector<3x940xf32> to vector<3x46xf32>
    %c18_128 = arith.constant 18 : index
    %c0_129 = arith.constant 0 : index
    %151 = vector.load %arg14[%c18_128, %c0_129] : memref<42x47xf32, #tpu.memory_space<vmem>>, vector<3x46xf32>
    tpu.vector_store %arg14[%c18_128, %c0_129], %150 {strides = array<i32>} : memref<42x47xf32, #tpu.memory_space<vmem>>, vector<3x46xf32>,
    %152 = vector.extract_strided_slice %11 {offsets = [0, 95], sizes = [3, 46], strides = [1, 1]} : vector<3x940xf32> to vector<3x46xf32>
    %c21_130 = arith.constant 21 : index
    %c0_131 = arith.constant 0 : index
    %153 = vector.load %arg14[%c21_130, %c0_131] : memref<42x47xf32, #tpu.memory_space<vmem>>, vector<3x46xf32>
    tpu.vector_store %arg14[%c21_130, %c0_131], %152 {strides = array<i32>} : memref<42x47xf32, #tpu.memory_space<vmem>>, vector<3x46xf32>,
    %154 = vector.extract_strided_slice %11 {offsets = [0, 142], sizes = [3, 46], strides = [1, 1]} : vector<3x940xf32> to vector<3x46xf32>
    %c24_132 = arith.constant 24 : index
    %c0_133 = arith.constant 0 : index
    %155 = vector.load %arg14[%c24_132, %c0_133] : memref<42x47xf32, #tpu.memory_space<vmem>>, vector<3x46xf32>
    tpu.vector_store %arg14[%c24_132, %c0_133], %154 {strides = array<i32>} : memref<42x47xf32, #tpu.memory_space<vmem>>, vector<3x46xf32>,
    %156 = vector.extract_strided_slice %11 {offsets = [0, 189], sizes = [3, 46], strides = [1, 1]} : vector<3x940xf32> to vector<3x46xf32>
    %c27_134 = arith.constant 27 : index
    %c0_135 = arith.constant 0 : index
    %157 = vector.load %arg14[%c27_134, %c0_135] : memref<42x47xf32, #tpu.memory_space<vmem>>, vector<3x46xf32>
    tpu.vector_store %arg14[%c27_134, %c0_135], %156 {strides = array<i32>} : memref<42x47xf32, #tpu.memory_space<vmem>>, vector<3x46xf32>,
    %158 = vector.extract_strided_slice %11 {offsets = [0, 236], sizes = [3, 46], strides = [1, 1]} : vector<3x940xf32> to vector<3x46xf32>
    %c30_136 = arith.constant 30 : index
    %c0_137 = arith.constant 0 : index
    %159 = vector.load %arg14[%c30_136, %c0_137] : memref<42x47xf32, #tpu.memory_space<vmem>>, vector<3x46xf32>
    tpu.vector_store %arg14[%c30_136, %c0_137], %158 {strides = array<i32>} : memref<42x47xf32, #tpu.memory_space<vmem>>, vector<3x46xf32>,
    %160 = vector.extract_strided_slice %11 {offsets = [0, 283], sizes = [3, 46], strides = [1, 1]} : vector<3x940xf32> to vector<3x46xf32>
    %c33_138 = arith.constant 33 : index
    %c0_139 = arith.constant 0 : index
    %161 = vector.load %arg14[%c33_138, %c0_139] : memref<42x47xf32, #tpu.memory_space<vmem>>, vector<3x46xf32>
    tpu.vector_store %arg14[%c33_138, %c0_139], %160 {strides = array<i32>} : memref<42x47xf32, #tpu.memory_space<vmem>>, vector<3x46xf32>,
    %162 = vector.extract_strided_slice %11 {offsets = [0, 330], sizes = [3, 46], strides = [1, 1]} : vector<3x940xf32> to vector<3x46xf32>
    %c36_140 = arith.constant 36 : index
    %c0_141 = arith.constant 0 : index
    %163 = vector.load %arg14[%c36_140, %c0_141] : memref<42x47xf32, #tpu.memory_space<vmem>>, vector<3x46xf32>
    tpu.vector_store %arg14[%c36_140, %c0_141], %162 {strides = array<i32>} : memref<42x47xf32, #tpu.memory_space<vmem>>, vector<3x46xf32>,
    %164 = vector.extract_strided_slice %11 {offsets = [0, 377], sizes = [3, 46], strides = [1, 1]} : vector<3x940xf32> to vector<3x46xf32>
    %c39_142 = arith.constant 39 : index
    %c0_143 = arith.constant 0 : index
    %165 = vector.load %arg14[%c39_142, %c0_143] : memref<42x47xf32, #tpu.memory_space<vmem>>, vector<3x46xf32>
    tpu.vector_store %arg14[%c39_142, %c0_143], %164 {strides = array<i32>} : memref<42x47xf32, #tpu.memory_space<vmem>>, vector<3x46xf32>,
    %c0_144 = arith.constant 0 : index
    %c0_145 = arith.constant 0 : index
    %166 = vector.load %arg5[%c0_144, %c0_145] : memref<5x42xf32, #tpu.memory_space<vmem>>, vector<5x42xf32>
    %c0_146 = arith.constant 0 : index
    %c0_147 = arith.constant 0 : index
    %167 = vector.load %arg14[%c0_146, %c0_147] : memref<42x47xf32, #tpu.memory_space<vmem>>, vector<42x46xf32>
    %cst_148 = arith.constant dense<0.000000e+00> : vector<5x46xf32>
    %168 = tpu.matmul %166, %167, %cst_148 {dimension_numbers = #tpu.dot_dimension_numbers<[1], [0], [0], [1], [0, 0, 1, 1], [], []>} : vector<5x42xf32>, vector<42x46xf32>, vector<5x46xf32> -> vector<5x46xf32>
    %c0_149 = arith.constant 0 : index
    %c0_150 = arith.constant 0 : index
    %169 = vector.load %arg6[%c0_149, %c0_150] : memref<5x1xf32, #tpu.memory_space<vmem>>, vector<5x1xf32>
    %170 = vector.broadcast %169 : vector<5x1xf32> to vector<5x46xf32>
    %171 = arith.addf %168, %170 : vector<5x46xf32>
    %cst_151 = arith.constant 0.000000e+00 : f32
    %172 = vector.broadcast %cst_151 : f32 to vector<5x46xf32>
    %173 = arith.maximumf %171, %172 : vector<5x46xf32>
    %c0_152 = arith.constant 0 : index
    %c0_153 = arith.constant 0 : index
    %174 = vector.load %arg7[%c0_152, %c0_153] : memref<5x1xf32, #tpu.memory_space<vmem>>, vector<5x1xf32>
    %175 = vector.broadcast %174 : vector<5x1xf32> to vector<5x46xf32>
    %176 = arith.mulf %173, %175 : vector<5x46xf32>
    %c0_154 = arith.constant 0 : index
    %c0_155 = arith.constant 0 : index
    %177 = vector.load %arg8[%c0_154, %c0_155] : memref<5x1xf32, #tpu.memory_space<vmem>>, vector<5x1xf32>
    %178 = vector.broadcast %177 : vector<5x1xf32> to vector<5x46xf32>
    %179 = arith.addf %176, %178 : vector<5x46xf32>
    %180 = vector.extract_strided_slice %53 {offsets = [0, 0], sizes = [5, 46], strides = [1, 1]} : vector<5x47xf32> to vector<5x46xf32>
    %c0_156 = arith.constant 0 : index
    %c0_157 = arith.constant 0 : index
    %181 = vector.load %arg15[%c0_156, %c0_157] : memref<15x46xf32, #tpu.memory_space<vmem>>, vector<5x46xf32>
    tpu.vector_store %arg15[%c0_156, %c0_157], %180 {strides = array<i32>} : memref<15x46xf32, #tpu.memory_space<vmem>>, vector<5x46xf32>,
    %c5 = arith.constant 5 : index
    %c0_158 = arith.constant 0 : index
    %182 = vector.load %arg15[%c5, %c0_158] : memref<15x46xf32, #tpu.memory_space<vmem>>, vector<5x46xf32>
    tpu.vector_store %arg15[%c5, %c0_158], %95 {strides = array<i32>} : memref<15x46xf32, #tpu.memory_space<vmem>>, vector<5x46xf32>,
    %c10 = arith.constant 10 : index
    %c0_159 = arith.constant 0 : index
    %183 = vector.load %arg15[%c10, %c0_159] : memref<15x46xf32, #tpu.memory_space<vmem>>, vector<5x46xf32>
    tpu.vector_store %arg15[%c10, %c0_159], %137 {strides = array<i32>} : memref<15x46xf32, #tpu.memory_space<vmem>>, vector<5x46xf32>,
    %c0_160 = arith.constant 0 : index
    %c0_161 = arith.constant 0 : index
    %184 = vector.load %arg9[%c0_160, %c0_161] : memref<8x15xf32, #tpu.memory_space<vmem>>, vector<8x15xf32>
    %c0_162 = arith.constant 0 : index
    %c0_163 = arith.constant 0 : index
    %185 = vector.load %arg15[%c0_162, %c0_163] : memref<15x46xf32, #tpu.memory_space<vmem>>, vector<15x46xf32>
    %cst_164 = arith.constant dense<0.000000e+00> : vector<8x46xf32>
    %186 = tpu.matmul %184, %185, %cst_164 {dimension_numbers = #tpu.dot_dimension_numbers<[1], [0], [0], [1], [0, 0, 1, 1], [], []>} : vector<8x15xf32>, vector<15x46xf32>, vector<8x46xf32> -> vector<8x46xf32>
    %c0_165 = arith.constant 0 : index
    %c0_166 = arith.constant 0 : index
    %187 = vector.load %arg10[%c0_165, %c0_166] : memref<8x1xf32, #tpu.memory_space<vmem>>, vector<8x1xf32>
    %188 = vector.broadcast %187 : vector<8x1xf32> to vector<8x46xf32>
    %189 = arith.addf %186, %188 : vector<8x46xf32>
    %cst_167 = arith.constant 0.000000e+00 : f32
    %190 = vector.broadcast %cst_167 : f32 to vector<8x46xf32>
    %191 = arith.maximumf %189, %190 : vector<8x46xf32>
    %c0_168 = arith.constant 0 : index
    %c0_169 = arith.constant 0 : index
    %192 = vector.load %arg15[%c0_168, %c0_169] : memref<15x46xf32, #tpu.memory_space<vmem>>, vector<5x46xf32>
    tpu.vector_store %arg15[%c0_168, %c0_169], %137 {strides = array<i32>} : memref<15x46xf32, #tpu.memory_space<vmem>>, vector<5x46xf32>,
    %c5_170 = arith.constant 5 : index
    %c0_171 = arith.constant 0 : index
    %193 = vector.load %arg15[%c5_170, %c0_171] : memref<15x46xf32, #tpu.memory_space<vmem>>, vector<5x46xf32>
    tpu.vector_store %arg15[%c5_170, %c0_171], %179 {strides = array<i32>} : memref<15x46xf32, #tpu.memory_space<vmem>>, vector<5x46xf32>,
    %194 = vector.extract_strided_slice %53 {offsets = [0, 1], sizes = [5, 46], strides = [1, 1]} : vector<5x47xf32> to vector<5x46xf32>
    %c10_172 = arith.constant 10 : index
    %c0_173 = arith.constant 0 : index
    %195 = vector.load %arg15[%c10_172, %c0_173] : memref<15x46xf32, #tpu.memory_space<vmem>>, vector<5x46xf32>
    tpu.vector_store %arg15[%c10_172, %c0_173], %194 {strides = array<i32>} : memref<15x46xf32, #tpu.memory_space<vmem>>, vector<5x46xf32>,
    %c0_174 = arith.constant 0 : index
    %c0_175 = arith.constant 0 : index
    %196 = vector.load %arg9[%c0_174, %c0_175] : memref<8x15xf32, #tpu.memory_space<vmem>>, vector<8x15xf32>
    %c0_176 = arith.constant 0 : index
    %c0_177 = arith.constant 0 : index
    %197 = vector.load %arg15[%c0_176, %c0_177] : memref<15x46xf32, #tpu.memory_space<vmem>>, vector<15x46xf32>
    %cst_178 = arith.constant dense<0.000000e+00> : vector<8x46xf32>
    %198 = tpu.matmul %196, %197, %cst_178 {dimension_numbers = #tpu.dot_dimension_numbers<[1], [0], [0], [1], [0, 0, 1, 1], [], []>} : vector<8x15xf32>, vector<15x46xf32>, vector<8x46xf32> -> vector<8x46xf32>
    %c0_179 = arith.constant 0 : index
    %c0_180 = arith.constant 0 : index
    %199 = vector.load %arg10[%c0_179, %c0_180] : memref<8x1xf32, #tpu.memory_space<vmem>>, vector<8x1xf32>
    %200 = vector.broadcast %199 : vector<8x1xf32> to vector<8x46xf32>
    %201 = arith.addf %198, %200 : vector<8x46xf32>
    %cst_181 = arith.constant 0.000000e+00 : f32
    %202 = vector.broadcast %cst_181 : f32 to vector<8x46xf32>
    %203 = arith.maximumf %201, %202 : vector<8x46xf32>
    %204 = vector.extract_strided_slice %191 {offsets = [0, 0], sizes = [8, 45], strides = [1, 1]} : vector<8x46xf32> to vector<8x45xf32>
    %205 = vector.extract_strided_slice %203 {offsets = [0, 0], sizes = [8, 45], strides = [1, 1]} : vector<8x46xf32> to vector<8x45xf32>
    %206 = arith.addf %204, %205 : vector<8x45xf32>
    %207 = vector.extract_strided_slice %191 {offsets = [0, 1], sizes = [8, 45], strides = [1, 1]} : vector<8x46xf32> to vector<8x45xf32>
    %208 = arith.addf %206, %207 : vector<8x45xf32>
    %209 = vector.extract_strided_slice %203 {offsets = [0, 1], sizes = [8, 45], strides = [1, 1]} : vector<8x46xf32> to vector<8x45xf32>
    %210 = arith.addf %208, %209 : vector<8x45xf32>
    %cst_182 = arith.constant 2.500000e-01 : f32
    %211 = vector.broadcast %cst_182 : f32 to vector<8x45xf32>
    %212 = arith.mulf %211, %210 : vector<8x45xf32>
    %213 = vector.extract_strided_slice %212 {offsets = [0, 0], sizes = [1, 45], strides = [1, 1]} : vector<8x45xf32> to vector<1x45xf32>
    %c0_183 = arith.constant 0 : index
    %c0_184 = arith.constant 0 : index
    %214 = vector.load %arg16[%c0_183, %c0_184] : memref<1x360xf32, #tpu.memory_space<vmem>>, vector<1x45xf32>
    tpu.vector_store %arg16[%c0_183, %c0_184], %213 {strides = array<i32>} : memref<1x360xf32, #tpu.memory_space<vmem>>, vector<1x45xf32>,
    %215 = vector.extract_strided_slice %212 {offsets = [1, 0], sizes = [1, 45], strides = [1, 1]} : vector<8x45xf32> to vector<1x45xf32>
    %c0_185 = arith.constant 0 : index
    %c45 = arith.constant 45 : index
    %216 = vector.load %arg16[%c0_185, %c45] : memref<1x360xf32, #tpu.memory_space<vmem>>, vector<1x45xf32>
    tpu.vector_store %arg16[%c0_185, %c45], %215 {strides = array<i32>} : memref<1x360xf32, #tpu.memory_space<vmem>>, vector<1x45xf32>,
    %217 = vector.extract_strided_slice %212 {offsets = [2, 0], sizes = [1, 45], strides = [1, 1]} : vector<8x45xf32> to vector<1x45xf32>
    %c0_186 = arith.constant 0 : index
    %c90 = arith.constant 90 : index
    %218 = vector.load %arg16[%c0_186, %c90] : memref<1x360xf32, #tpu.memory_space<vmem>>, vector<1x45xf32>
    tpu.vector_store %arg16[%c0_186, %c90], %217 {strides = array<i32>} : memref<1x360xf32, #tpu.memory_space<vmem>>, vector<1x45xf32>,
    %219 = vector.extract_strided_slice %212 {offsets = [3, 0], sizes = [1, 45], strides = [1, 1]} : vector<8x45xf32> to vector<1x45xf32>
    %c0_187 = arith.constant 0 : index
    %c135 = arith.constant 135 : index
    %220 = vector.load %arg16[%c0_187, %c135] : memref<1x360xf32, #tpu.memory_space<vmem>>, vector<1x45xf32>
    tpu.vector_store %arg16[%c0_187, %c135], %219 {strides = array<i32>} : memref<1x360xf32, #tpu.memory_space<vmem>>, vector<1x45xf32>,
    %221 = vector.extract_strided_slice %212 {offsets = [4, 0], sizes = [1, 45], strides = [1, 1]} : vector<8x45xf32> to vector<1x45xf32>
    %c0_188 = arith.constant 0 : index
    %c180 = arith.constant 180 : index
    %222 = vector.load %arg16[%c0_188, %c180] : memref<1x360xf32, #tpu.memory_space<vmem>>, vector<1x45xf32>
    tpu.vector_store %arg16[%c0_188, %c180], %221 {strides = array<i32>} : memref<1x360xf32, #tpu.memory_space<vmem>>, vector<1x45xf32>,
    %223 = vector.extract_strided_slice %212 {offsets = [5, 0], sizes = [1, 45], strides = [1, 1]} : vector<8x45xf32> to vector<1x45xf32>
    %c0_189 = arith.constant 0 : index
    %c225 = arith.constant 225 : index
    %224 = vector.load %arg16[%c0_189, %c225] : memref<1x360xf32, #tpu.memory_space<vmem>>, vector<1x45xf32>
    tpu.vector_store %arg16[%c0_189, %c225], %223 {strides = array<i32>} : memref<1x360xf32, #tpu.memory_space<vmem>>, vector<1x45xf32>,
    %225 = vector.extract_strided_slice %212 {offsets = [6, 0], sizes = [1, 45], strides = [1, 1]} : vector<8x45xf32> to vector<1x45xf32>
    %c0_190 = arith.constant 0 : index
    %c270 = arith.constant 270 : index
    %226 = vector.load %arg16[%c0_190, %c270] : memref<1x360xf32, #tpu.memory_space<vmem>>, vector<1x45xf32>
    tpu.vector_store %arg16[%c0_190, %c270], %225 {strides = array<i32>} : memref<1x360xf32, #tpu.memory_space<vmem>>, vector<1x45xf32>,
    %227 = vector.extract_strided_slice %212 {offsets = [7, 0], sizes = [1, 45], strides = [1, 1]} : vector<8x45xf32> to vector<1x45xf32>
    %c0_191 = arith.constant 0 : index
    %c315 = arith.constant 315 : index
    %228 = vector.load %arg16[%c0_191, %c315] : memref<1x360xf32, #tpu.memory_space<vmem>>, vector<1x45xf32>
    tpu.vector_store %arg16[%c0_191, %c315], %227 {strides = array<i32>} : memref<1x360xf32, #tpu.memory_space<vmem>>, vector<1x45xf32>,
    %c0_192 = arith.constant 0 : index
    %c0_193 = arith.constant 0 : index
    %229 = vector.load %arg16[%c0_192, %c0_193] : memref<1x360xf32, #tpu.memory_space<vmem>>, vector<1x360xf32>
    %c0_194 = arith.constant 0 : index
    %c0_195 = arith.constant 0 : index
    %230 = vector.load %arg11[%c0_194, %c0_195] : memref<360x8xf32, #tpu.memory_space<vmem>>, vector<360x8xf32>
    %cst_196 = arith.constant dense<0.000000e+00> : vector<1x8xf32>
    %231 = tpu.matmul %229, %230, %cst_196 {dimension_numbers = #tpu.dot_dimension_numbers<[1], [0], [0], [1], [0, 0, 1, 1], [], []>} : vector<1x360xf32>, vector<360x8xf32>, vector<1x8xf32> -> vector<1x8xf32>
    %c0_197 = arith.constant 0 : index
    %c0_198 = arith.constant 0 : index
    %232 = vector.load %arg12[%c0_197, %c0_198] : memref<1x8xf32, #tpu.memory_space<vmem>>, vector<1x8xf32>
    %233 = arith.addf %231, %232 : vector<1x8xf32>
    %cst_199 = arith.constant 0.000000e+00 : f32
    %234 = vector.broadcast %cst_199 : f32 to vector<1x8xf32>
    %235 = arith.maximumf %233, %234 : vector<1x8xf32>
    %c0_200 = arith.constant 0 : index
    %c0_201 = arith.constant 0 : index
    %c0_202 = arith.constant 0 : index
    %236 = vector.load %arg13[%c0_200, %c0_201, %c0_202] : memref<1x1x8xf32, #tpu.memory_space<vmem>>, vector<1x1x8xf32>
    %237 = vector.shape_cast %236 : vector<1x1x8xf32> to vector<1x8xf32>
    %238 = vector.shape_cast %235 : vector<1x8xf32> to vector<1x1x8xf32>
    tpu.vector_store %arg13[%c0_200, %c0_201, %c0_202], %238 {strides = array<i32>} : memref<1x1x8xf32, #tpu.memory_space<vmem>>, vector<1x1x8xf32>,
    return
  }
  func.func @transform_0(%arg0: i32) -> (i32, i32, i32) {
    %c0_i32 = arith.constant 0 : i32
    %c0_i32_0 = arith.constant 0 : i32
    %c0_i32_1 = arith.constant 0 : i32
    return %arg0, %c0_i32, %c0_i32_0 : i32, i32, i32
  }
  func.func @transform_1(%arg0: i32) -> (i32, i32) {
    %c0_i32 = arith.constant 0 : i32
    %c0_i32_0 = arith.constant 0 : i32
    %c0_i32_1 = arith.constant 0 : i32
    return %c0_i32, %c0_i32_0 : i32, i32
  }
  func.func @transform_2(%arg0: i32) -> (i32, i32) {
    %c0_i32 = arith.constant 0 : i32
    %c0_i32_0 = arith.constant 0 : i32
    %c0_i32_1 = arith.constant 0 : i32
    return %c0_i32, %c0_i32_0 : i32, i32
  }
  func.func @transform_3(%arg0: i32) -> (i32, i32) {
    %c0_i32 = arith.constant 0 : i32
    %c0_i32_0 = arith.constant 0 : i32
    %c0_i32_1 = arith.constant 0 : i32
    return %c0_i32, %c0_i32_0 : i32, i32
  }
  func.func @transform_4(%arg0: i32) -> (i32, i32) {
    %c0_i32 = arith.constant 0 : i32
    %c0_i32_0 = arith.constant 0 : i32
    %c0_i32_1 = arith.constant 0 : i32
    return %c0_i32, %c0_i32_0 : i32, i32
  }
  func.func @transform_5(%arg0: i32) -> (i32, i32) {
    %c0_i32 = arith.constant 0 : i32
    %c0_i32_0 = arith.constant 0 : i32
    %c0_i32_1 = arith.constant 0 : i32
    return %c0_i32, %c0_i32_0 : i32, i32
  }
  func.func @transform_6(%arg0: i32) -> (i32, i32) {
    %c0_i32 = arith.constant 0 : i32
    %c0_i32_0 = arith.constant 0 : i32
    %c0_i32_1 = arith.constant 0 : i32
    return %c0_i32, %c0_i32_0 : i32, i32
  }
  func.func @transform_7(%arg0: i32) -> (i32, i32) {
    %c0_i32 = arith.constant 0 : i32
    %c0_i32_0 = arith.constant 0 : i32
    %c0_i32_1 = arith.constant 0 : i32
    return %c0_i32, %c0_i32_0 : i32, i32
  }
  func.func @transform_8(%arg0: i32) -> (i32, i32) {
    %c0_i32 = arith.constant 0 : i32
    %c0_i32_0 = arith.constant 0 : i32
    %c0_i32_1 = arith.constant 0 : i32
    return %c0_i32, %c0_i32_0 : i32, i32
  }
  func.func @transform_9(%arg0: i32) -> (i32, i32) {
    %c0_i32 = arith.constant 0 : i32
    %c0_i32_0 = arith.constant 0 : i32
    %c0_i32_1 = arith.constant 0 : i32
    return %c0_i32, %c0_i32_0 : i32, i32
  }
  func.func @transform_10(%arg0: i32) -> (i32, i32) {
    %c0_i32 = arith.constant 0 : i32
    %c0_i32_0 = arith.constant 0 : i32
    %c0_i32_1 = arith.constant 0 : i32
    return %c0_i32, %c0_i32_0 : i32, i32
  }
  func.func @transform_11(%arg0: i32) -> (i32, i32) {
    %c0_i32 = arith.constant 0 : i32
    %c0_i32_0 = arith.constant 0 : i32
    %c0_i32_1 = arith.constant 0 : i32
    return %c0_i32, %c0_i32_0 : i32, i32
  }
  func.func @transform_12(%arg0: i32) -> (i32, i32, i32) {
    %c0_i32 = arith.constant 0 : i32
    %c0_i32_0 = arith.constant 0 : i32
    %c0_i32_1 = arith.constant 0 : i32
    return %arg0, %c0_i32, %c0_i32_0 : i32, i32, i32
  }
}

module attributes {stable_mosaic.version = 11 : i64} {
  func.func @_branch_kernel(%arg0: i32, %arg1: memref<1x21x60xbf16, #tpu.memory_space<vmem>>, %arg2: memref<6x21xbf16, #tpu.memory_space<vmem>>, %arg3: memref<6x1xf32, #tpu.memory_space<vmem>>, %arg4: memref<6x1xf32, #tpu.memory_space<vmem>>, %arg5: memref<15x18xf32, #tpu.memory_space<vmem>>, %arg6: memref<15x1xf32, #tpu.memory_space<vmem>>, %arg7: memref<15x1xf32, #tpu.memory_space<vmem>>, %arg8: memref<15x1xf32, #tpu.memory_space<vmem>>, %arg9: memref<24x60xf32, #tpu.memory_space<vmem>>, %arg10: memref<24x1xf32, #tpu.memory_space<vmem>>, %arg11: memref<312x16xf32, #tpu.memory_space<vmem>>, %arg12: memref<1x16xf32, #tpu.memory_space<vmem>>, %arg13: memref<1x1x16xf32, #tpu.memory_space<vmem>>, %arg14: memref<18x15xf32, #tpu.memory_space<vmem>>, %arg15: memref<60x14xf32, #tpu.memory_space<vmem>>, %arg16: memref<1x312xf32, #tpu.memory_space<vmem>>) attributes {dimension_semantics = [#tpu.dimension_semantics<parallel>], iteration_bounds = array<i64: 4>, scalar_prefetch = 0 : i64, scratch_operands = 3 : i64, tpu.core_type = #tpu.core_type<tc>, window_params = [{transform_indices = @transform_0, window_bounds = array<i64: 1, 21, 60>}, {pipeline_mode = #tpu.pipeline_mode<synchronous>, transform_indices = @transform_1, window_bounds = array<i64: 6, 21>}, {pipeline_mode = #tpu.pipeline_mode<synchronous>, transform_indices = @transform_2, window_bounds = array<i64: 6, 1>}, {pipeline_mode = #tpu.pipeline_mode<synchronous>, transform_indices = @transform_3, window_bounds = array<i64: 6, 1>}, {pipeline_mode = #tpu.pipeline_mode<synchronous>, transform_indices = @transform_4, window_bounds = array<i64: 15, 18>}, {pipeline_mode = #tpu.pipeline_mode<synchronous>, transform_indices = @transform_5, window_bounds = array<i64: 15, 1>}, {pipeline_mode = #tpu.pipeline_mode<synchronous>, transform_indices = @transform_6, window_bounds = array<i64: 15, 1>}, {pipeline_mode = #tpu.pipeline_mode<synchronous>, transform_indices = @transform_7, window_bounds = array<i64: 15, 1>}, {pipeline_mode = #tpu.pipeline_mode<synchronous>, transform_indices = @transform_8, window_bounds = array<i64: 24, 60>}, {pipeline_mode = #tpu.pipeline_mode<synchronous>, transform_indices = @transform_9, window_bounds = array<i64: 24, 1>}, {pipeline_mode = #tpu.pipeline_mode<synchronous>, transform_indices = @transform_10, window_bounds = array<i64: 312, 16>}, {pipeline_mode = #tpu.pipeline_mode<synchronous>, transform_indices = @transform_11, window_bounds = array<i64: 1, 16>}, {transform_indices = @transform_12, window_bounds = array<i64: 1, 1, 16>}]} {
    %c0 = arith.constant 0 : index
    %c0_0 = arith.constant 0 : index
    %0 = vector.load %arg2[%c0, %c0_0] : memref<6x21xbf16, #tpu.memory_space<vmem>>, vector<6x21xbf16>
    %c0_1 = arith.constant 0 : index
    %c0_2 = arith.constant 0 : index
    %c0_3 = arith.constant 0 : index
    %1 = vector.load %arg1[%c0_1, %c0_2, %c0_3] : memref<1x21x60xbf16, #tpu.memory_space<vmem>>, vector<1x21x60xbf16>
    %2 = vector.shape_cast %1 : vector<1x21x60xbf16> to vector<21x60xbf16>
    %cst = arith.constant dense<0.000000e+00> : vector<6x60xf32>
    %3 = tpu.matmul %0, %2, %cst {dimension_numbers = #tpu.dot_dimension_numbers<[1], [0], [0], [1], [0, 0, 1, 1], [], []>} : vector<6x21xbf16>, vector<21x60xbf16>, vector<6x60xf32> -> vector<6x60xf32>
    %c0_4 = arith.constant 0 : index
    %c0_5 = arith.constant 0 : index
    %4 = vector.load %arg3[%c0_4, %c0_5] : memref<6x1xf32, #tpu.memory_space<vmem>>, vector<6x1xf32>
    %5 = vector.broadcast %4 : vector<6x1xf32> to vector<6x60xf32>
    %6 = arith.mulf %3, %5 : vector<6x60xf32>
    %c0_6 = arith.constant 0 : index
    %c0_7 = arith.constant 0 : index
    %7 = vector.load %arg4[%c0_6, %c0_7] : memref<6x1xf32, #tpu.memory_space<vmem>>, vector<6x1xf32>
    %8 = vector.broadcast %7 : vector<6x1xf32> to vector<6x60xf32>
    %9 = arith.addf %6, %8 : vector<6x60xf32>
    %cst_8 = arith.constant 0.000000e+00 : f32
    %10 = vector.broadcast %cst_8 : f32 to vector<6x60xf32>
    %11 = arith.maximumf %9, %10 : vector<6x60xf32>
    %12 = vector.extract_strided_slice %11 {offsets = [0, 0], sizes = [6, 15], strides = [1, 1]} : vector<6x60xf32> to vector<6x15xf32>
    %c0_9 = arith.constant 0 : index
    %c0_10 = arith.constant 0 : index
    %13 = vector.load %arg14[%c0_9, %c0_10] : memref<18x15xf32, #tpu.memory_space<vmem>>, vector<6x15xf32>
    tpu.vector_store %arg14[%c0_9, %c0_10], %12 {strides = array<i32>} : memref<18x15xf32, #tpu.memory_space<vmem>>, vector<6x15xf32>,
    %14 = vector.extract_strided_slice %11 {offsets = [0, 15], sizes = [6, 15], strides = [1, 1]} : vector<6x60xf32> to vector<6x15xf32>
    %c6 = arith.constant 6 : index
    %c0_11 = arith.constant 0 : index
    %15 = vector.load %arg14[%c6, %c0_11] : memref<18x15xf32, #tpu.memory_space<vmem>>, vector<6x15xf32>
    tpu.vector_store %arg14[%c6, %c0_11], %14 {strides = array<i32>} : memref<18x15xf32, #tpu.memory_space<vmem>>, vector<6x15xf32>,
    %16 = vector.extract_strided_slice %11 {offsets = [0, 30], sizes = [6, 15], strides = [1, 1]} : vector<6x60xf32> to vector<6x15xf32>
    %c12 = arith.constant 12 : index
    %c0_12 = arith.constant 0 : index
    %17 = vector.load %arg14[%c12, %c0_12] : memref<18x15xf32, #tpu.memory_space<vmem>>, vector<6x15xf32>
    tpu.vector_store %arg14[%c12, %c0_12], %16 {strides = array<i32>} : memref<18x15xf32, #tpu.memory_space<vmem>>, vector<6x15xf32>,
    %c0_13 = arith.constant 0 : index
    %c0_14 = arith.constant 0 : index
    %18 = vector.load %arg5[%c0_13, %c0_14] : memref<15x18xf32, #tpu.memory_space<vmem>>, vector<15x18xf32>
    %c0_15 = arith.constant 0 : index
    %c0_16 = arith.constant 0 : index
    %19 = vector.load %arg14[%c0_15, %c0_16] : memref<18x15xf32, #tpu.memory_space<vmem>>, vector<18x15xf32>
    %cst_17 = arith.constant dense<0.000000e+00> : vector<15x15xf32>
    %20 = tpu.matmul %18, %19, %cst_17 {dimension_numbers = #tpu.dot_dimension_numbers<[1], [0], [0], [1], [0, 0, 1, 1], [], []>} : vector<15x18xf32>, vector<18x15xf32>, vector<15x15xf32> -> vector<15x15xf32>
    %c0_18 = arith.constant 0 : index
    %c0_19 = arith.constant 0 : index
    %21 = vector.load %arg6[%c0_18, %c0_19] : memref<15x1xf32, #tpu.memory_space<vmem>>, vector<15x1xf32>
    %22 = vector.broadcast %21 : vector<15x1xf32> to vector<15x15xf32>
    %23 = arith.addf %20, %22 : vector<15x15xf32>
    %cst_20 = arith.constant 0.000000e+00 : f32
    %24 = vector.broadcast %cst_20 : f32 to vector<15x15xf32>
    %25 = arith.maximumf %23, %24 : vector<15x15xf32>
    %c0_21 = arith.constant 0 : index
    %c0_22 = arith.constant 0 : index
    %26 = vector.load %arg7[%c0_21, %c0_22] : memref<15x1xf32, #tpu.memory_space<vmem>>, vector<15x1xf32>
    %27 = vector.broadcast %26 : vector<15x1xf32> to vector<15x15xf32>
    %28 = arith.mulf %25, %27 : vector<15x15xf32>
    %c0_23 = arith.constant 0 : index
    %c0_24 = arith.constant 0 : index
    %29 = vector.load %arg8[%c0_23, %c0_24] : memref<15x1xf32, #tpu.memory_space<vmem>>, vector<15x1xf32>
    %30 = vector.broadcast %29 : vector<15x1xf32> to vector<15x15xf32>
    %31 = arith.addf %28, %30 : vector<15x15xf32>
    %32 = vector.extract_strided_slice %11 {offsets = [0, 15], sizes = [6, 15], strides = [1, 1]} : vector<6x60xf32> to vector<6x15xf32>
    %c0_25 = arith.constant 0 : index
    %c0_26 = arith.constant 0 : index
    %33 = vector.load %arg14[%c0_25, %c0_26] : memref<18x15xf32, #tpu.memory_space<vmem>>, vector<6x15xf32>
    tpu.vector_store %arg14[%c0_25, %c0_26], %32 {strides = array<i32>} : memref<18x15xf32, #tpu.memory_space<vmem>>, vector<6x15xf32>,
    %34 = vector.extract_strided_slice %11 {offsets = [0, 30], sizes = [6, 15], strides = [1, 1]} : vector<6x60xf32> to vector<6x15xf32>
    %c6_27 = arith.constant 6 : index
    %c0_28 = arith.constant 0 : index
    %35 = vector.load %arg14[%c6_27, %c0_28] : memref<18x15xf32, #tpu.memory_space<vmem>>, vector<6x15xf32>
    tpu.vector_store %arg14[%c6_27, %c0_28], %34 {strides = array<i32>} : memref<18x15xf32, #tpu.memory_space<vmem>>, vector<6x15xf32>,
    %36 = vector.extract_strided_slice %11 {offsets = [0, 45], sizes = [6, 15], strides = [1, 1]} : vector<6x60xf32> to vector<6x15xf32>
    %c12_29 = arith.constant 12 : index
    %c0_30 = arith.constant 0 : index
    %37 = vector.load %arg14[%c12_29, %c0_30] : memref<18x15xf32, #tpu.memory_space<vmem>>, vector<6x15xf32>
    tpu.vector_store %arg14[%c12_29, %c0_30], %36 {strides = array<i32>} : memref<18x15xf32, #tpu.memory_space<vmem>>, vector<6x15xf32>,
    %c0_31 = arith.constant 0 : index
    %c0_32 = arith.constant 0 : index
    %38 = vector.load %arg5[%c0_31, %c0_32] : memref<15x18xf32, #tpu.memory_space<vmem>>, vector<15x18xf32>
    %c0_33 = arith.constant 0 : index
    %c0_34 = arith.constant 0 : index
    %39 = vector.load %arg14[%c0_33, %c0_34] : memref<18x15xf32, #tpu.memory_space<vmem>>, vector<18x15xf32>
    %cst_35 = arith.constant dense<0.000000e+00> : vector<15x15xf32>
    %40 = tpu.matmul %38, %39, %cst_35 {dimension_numbers = #tpu.dot_dimension_numbers<[1], [0], [0], [1], [0, 0, 1, 1], [], []>} : vector<15x18xf32>, vector<18x15xf32>, vector<15x15xf32> -> vector<15x15xf32>
    %c0_36 = arith.constant 0 : index
    %c0_37 = arith.constant 0 : index
    %41 = vector.load %arg6[%c0_36, %c0_37] : memref<15x1xf32, #tpu.memory_space<vmem>>, vector<15x1xf32>
    %42 = vector.broadcast %41 : vector<15x1xf32> to vector<15x15xf32>
    %43 = arith.addf %40, %42 : vector<15x15xf32>
    %cst_38 = arith.constant 0.000000e+00 : f32
    %44 = vector.broadcast %cst_38 : f32 to vector<15x15xf32>
    %45 = arith.maximumf %43, %44 : vector<15x15xf32>
    %c0_39 = arith.constant 0 : index
    %c0_40 = arith.constant 0 : index
    %46 = vector.load %arg7[%c0_39, %c0_40] : memref<15x1xf32, #tpu.memory_space<vmem>>, vector<15x1xf32>
    %47 = vector.broadcast %46 : vector<15x1xf32> to vector<15x15xf32>
    %48 = arith.mulf %45, %47 : vector<15x15xf32>
    %c0_41 = arith.constant 0 : index
    %c0_42 = arith.constant 0 : index
    %49 = vector.load %arg8[%c0_41, %c0_42] : memref<15x1xf32, #tpu.memory_space<vmem>>, vector<15x1xf32>
    %50 = vector.broadcast %49 : vector<15x1xf32> to vector<15x15xf32>
    %51 = arith.addf %48, %50 : vector<15x15xf32>
    %52 = vector.extract_strided_slice %11 {offsets = [0, 30], sizes = [6, 14], strides = [1, 1]} : vector<6x60xf32> to vector<6x14xf32>
    %c0_43 = arith.constant 0 : index
    %c0_44 = arith.constant 0 : index
    %53 = vector.load %arg14[%c0_43, %c0_44] : memref<18x15xf32, #tpu.memory_space<vmem>>, vector<6x14xf32>
    tpu.vector_store %arg14[%c0_43, %c0_44], %52 {strides = array<i32>} : memref<18x15xf32, #tpu.memory_space<vmem>>, vector<6x14xf32>,
    %54 = vector.extract_strided_slice %11 {offsets = [0, 45], sizes = [6, 14], strides = [1, 1]} : vector<6x60xf32> to vector<6x14xf32>
    %c6_45 = arith.constant 6 : index
    %c0_46 = arith.constant 0 : index
    %55 = vector.load %arg14[%c6_45, %c0_46] : memref<18x15xf32, #tpu.memory_space<vmem>>, vector<6x14xf32>
    tpu.vector_store %arg14[%c6_45, %c0_46], %54 {strides = array<i32>} : memref<18x15xf32, #tpu.memory_space<vmem>>, vector<6x14xf32>,
    %56 = vector.extract_strided_slice %11 {offsets = [0, 1], sizes = [6, 14], strides = [1, 1]} : vector<6x60xf32> to vector<6x14xf32>
    %c12_47 = arith.constant 12 : index
    %c0_48 = arith.constant 0 : index
    %57 = vector.load %arg14[%c12_47, %c0_48] : memref<18x15xf32, #tpu.memory_space<vmem>>, vector<6x14xf32>
    tpu.vector_store %arg14[%c12_47, %c0_48], %56 {strides = array<i32>} : memref<18x15xf32, #tpu.memory_space<vmem>>, vector<6x14xf32>,
    %c0_49 = arith.constant 0 : index
    %c0_50 = arith.constant 0 : index
    %58 = vector.load %arg5[%c0_49, %c0_50] : memref<15x18xf32, #tpu.memory_space<vmem>>, vector<15x18xf32>
    %c0_51 = arith.constant 0 : index
    %c0_52 = arith.constant 0 : index
    %59 = vector.load %arg14[%c0_51, %c0_52] : memref<18x15xf32, #tpu.memory_space<vmem>>, vector<18x14xf32>
    %cst_53 = arith.constant dense<0.000000e+00> : vector<15x14xf32>
    %60 = tpu.matmul %58, %59, %cst_53 {dimension_numbers = #tpu.dot_dimension_numbers<[1], [0], [0], [1], [0, 0, 1, 1], [], []>} : vector<15x18xf32>, vector<18x14xf32>, vector<15x14xf32> -> vector<15x14xf32>
    %c0_54 = arith.constant 0 : index
    %c0_55 = arith.constant 0 : index
    %61 = vector.load %arg6[%c0_54, %c0_55] : memref<15x1xf32, #tpu.memory_space<vmem>>, vector<15x1xf32>
    %62 = vector.broadcast %61 : vector<15x1xf32> to vector<15x14xf32>
    %63 = arith.addf %60, %62 : vector<15x14xf32>
    %cst_56 = arith.constant 0.000000e+00 : f32
    %64 = vector.broadcast %cst_56 : f32 to vector<15x14xf32>
    %65 = arith.maximumf %63, %64 : vector<15x14xf32>
    %c0_57 = arith.constant 0 : index
    %c0_58 = arith.constant 0 : index
    %66 = vector.load %arg7[%c0_57, %c0_58] : memref<15x1xf32, #tpu.memory_space<vmem>>, vector<15x1xf32>
    %67 = vector.broadcast %66 : vector<15x1xf32> to vector<15x14xf32>
    %68 = arith.mulf %65, %67 : vector<15x14xf32>
    %c0_59 = arith.constant 0 : index
    %c0_60 = arith.constant 0 : index
    %69 = vector.load %arg8[%c0_59, %c0_60] : memref<15x1xf32, #tpu.memory_space<vmem>>, vector<15x1xf32>
    %70 = vector.broadcast %69 : vector<15x1xf32> to vector<15x14xf32>
    %71 = arith.addf %68, %70 : vector<15x14xf32>
    %72 = vector.extract_strided_slice %11 {offsets = [0, 45], sizes = [6, 14], strides = [1, 1]} : vector<6x60xf32> to vector<6x14xf32>
    %c0_61 = arith.constant 0 : index
    %c0_62 = arith.constant 0 : index
    %73 = vector.load %arg14[%c0_61, %c0_62] : memref<18x15xf32, #tpu.memory_space<vmem>>, vector<6x14xf32>
    tpu.vector_store %arg14[%c0_61, %c0_62], %72 {strides = array<i32>} : memref<18x15xf32, #tpu.memory_space<vmem>>, vector<6x14xf32>,
    %74 = vector.extract_strided_slice %11 {offsets = [0, 1], sizes = [6, 14], strides = [1, 1]} : vector<6x60xf32> to vector<6x14xf32>
    %c6_63 = arith.constant 6 : index
    %c0_64 = arith.constant 0 : index
    %75 = vector.load %arg14[%c6_63, %c0_64] : memref<18x15xf32, #tpu.memory_space<vmem>>, vector<6x14xf32>
    tpu.vector_store %arg14[%c6_63, %c0_64], %74 {strides = array<i32>} : memref<18x15xf32, #tpu.memory_space<vmem>>, vector<6x14xf32>,
    %76 = vector.extract_strided_slice %11 {offsets = [0, 16], sizes = [6, 14], strides = [1, 1]} : vector<6x60xf32> to vector<6x14xf32>
    %c12_65 = arith.constant 12 : index
    %c0_66 = arith.constant 0 : index
    %77 = vector.load %arg14[%c12_65, %c0_66] : memref<18x15xf32, #tpu.memory_space<vmem>>, vector<6x14xf32>
    tpu.vector_store %arg14[%c12_65, %c0_66], %76 {strides = array<i32>} : memref<18x15xf32, #tpu.memory_space<vmem>>, vector<6x14xf32>,
    %c0_67 = arith.constant 0 : index
    %c0_68 = arith.constant 0 : index
    %78 = vector.load %arg5[%c0_67, %c0_68] : memref<15x18xf32, #tpu.memory_space<vmem>>, vector<15x18xf32>
    %c0_69 = arith.constant 0 : index
    %c0_70 = arith.constant 0 : index
    %79 = vector.load %arg14[%c0_69, %c0_70] : memref<18x15xf32, #tpu.memory_space<vmem>>, vector<18x14xf32>
    %cst_71 = arith.constant dense<0.000000e+00> : vector<15x14xf32>
    %80 = tpu.matmul %78, %79, %cst_71 {dimension_numbers = #tpu.dot_dimension_numbers<[1], [0], [0], [1], [0, 0, 1, 1], [], []>} : vector<15x18xf32>, vector<18x14xf32>, vector<15x14xf32> -> vector<15x14xf32>
    %c0_72 = arith.constant 0 : index
    %c0_73 = arith.constant 0 : index
    %81 = vector.load %arg6[%c0_72, %c0_73] : memref<15x1xf32, #tpu.memory_space<vmem>>, vector<15x1xf32>
    %82 = vector.broadcast %81 : vector<15x1xf32> to vector<15x14xf32>
    %83 = arith.addf %80, %82 : vector<15x14xf32>
    %cst_74 = arith.constant 0.000000e+00 : f32
    %84 = vector.broadcast %cst_74 : f32 to vector<15x14xf32>
    %85 = arith.maximumf %83, %84 : vector<15x14xf32>
    %c0_75 = arith.constant 0 : index
    %c0_76 = arith.constant 0 : index
    %86 = vector.load %arg7[%c0_75, %c0_76] : memref<15x1xf32, #tpu.memory_space<vmem>>, vector<15x1xf32>
    %87 = vector.broadcast %86 : vector<15x1xf32> to vector<15x14xf32>
    %88 = arith.mulf %85, %87 : vector<15x14xf32>
    %c0_77 = arith.constant 0 : index
    %c0_78 = arith.constant 0 : index
    %89 = vector.load %arg8[%c0_77, %c0_78] : memref<15x1xf32, #tpu.memory_space<vmem>>, vector<15x1xf32>
    %90 = vector.broadcast %89 : vector<15x1xf32> to vector<15x14xf32>
    %91 = arith.addf %88, %90 : vector<15x14xf32>
    %92 = vector.extract_strided_slice %31 {offsets = [0, 0], sizes = [15, 14], strides = [1, 1]} : vector<15x15xf32> to vector<15x14xf32>
    %c0_79 = arith.constant 0 : index
    %c0_80 = arith.constant 0 : index
    %93 = vector.load %arg15[%c0_79, %c0_80] : memref<60x14xf32, #tpu.memory_space<vmem>>, vector<15x14xf32>
    tpu.vector_store %arg15[%c0_79, %c0_80], %92 {strides = array<i32>} : memref<60x14xf32, #tpu.memory_space<vmem>>, vector<15x14xf32>,
    %94 = vector.extract_strided_slice %51 {offsets = [0, 0], sizes = [15, 14], strides = [1, 1]} : vector<15x15xf32> to vector<15x14xf32>
    %c15 = arith.constant 15 : index
    %c0_81 = arith.constant 0 : index
    %95 = vector.load %arg15[%c15, %c0_81] : memref<60x14xf32, #tpu.memory_space<vmem>>, vector<15x14xf32>
    tpu.vector_store %arg15[%c15, %c0_81], %94 {strides = array<i32>} : memref<60x14xf32, #tpu.memory_space<vmem>>, vector<15x14xf32>,
    %c30 = arith.constant 30 : index
    %c0_82 = arith.constant 0 : index
    %96 = vector.load %arg15[%c30, %c0_82] : memref<60x14xf32, #tpu.memory_space<vmem>>, vector<15x14xf32>
    tpu.vector_store %arg15[%c30, %c0_82], %71 {strides = array<i32>} : memref<60x14xf32, #tpu.memory_space<vmem>>, vector<15x14xf32>,
    %c45 = arith.constant 45 : index
    %c0_83 = arith.constant 0 : index
    %97 = vector.load %arg15[%c45, %c0_83] : memref<60x14xf32, #tpu.memory_space<vmem>>, vector<15x14xf32>
    tpu.vector_store %arg15[%c45, %c0_83], %91 {strides = array<i32>} : memref<60x14xf32, #tpu.memory_space<vmem>>, vector<15x14xf32>,
    %c0_84 = arith.constant 0 : index
    %c0_85 = arith.constant 0 : index
    %98 = vector.load %arg9[%c0_84, %c0_85] : memref<24x60xf32, #tpu.memory_space<vmem>>, vector<24x60xf32>
    %c0_86 = arith.constant 0 : index
    %c0_87 = arith.constant 0 : index
    %99 = vector.load %arg15[%c0_86, %c0_87] : memref<60x14xf32, #tpu.memory_space<vmem>>, vector<60x14xf32>
    %cst_88 = arith.constant dense<0.000000e+00> : vector<24x14xf32>
    %100 = tpu.matmul %98, %99, %cst_88 {dimension_numbers = #tpu.dot_dimension_numbers<[1], [0], [0], [1], [0, 0, 1, 1], [], []>} : vector<24x60xf32>, vector<60x14xf32>, vector<24x14xf32> -> vector<24x14xf32>
    %c0_89 = arith.constant 0 : index
    %c0_90 = arith.constant 0 : index
    %101 = vector.load %arg10[%c0_89, %c0_90] : memref<24x1xf32, #tpu.memory_space<vmem>>, vector<24x1xf32>
    %102 = vector.broadcast %101 : vector<24x1xf32> to vector<24x14xf32>
    %103 = arith.addf %100, %102 : vector<24x14xf32>
    %cst_91 = arith.constant 0.000000e+00 : f32
    %104 = vector.broadcast %cst_91 : f32 to vector<24x14xf32>
    %105 = arith.maximumf %103, %104 : vector<24x14xf32>
    %c0_92 = arith.constant 0 : index
    %c0_93 = arith.constant 0 : index
    %106 = vector.load %arg15[%c0_92, %c0_93] : memref<60x14xf32, #tpu.memory_space<vmem>>, vector<15x14xf32>
    tpu.vector_store %arg15[%c0_92, %c0_93], %71 {strides = array<i32>} : memref<60x14xf32, #tpu.memory_space<vmem>>, vector<15x14xf32>,
    %c15_94 = arith.constant 15 : index
    %c0_95 = arith.constant 0 : index
    %107 = vector.load %arg15[%c15_94, %c0_95] : memref<60x14xf32, #tpu.memory_space<vmem>>, vector<15x14xf32>
    tpu.vector_store %arg15[%c15_94, %c0_95], %91 {strides = array<i32>} : memref<60x14xf32, #tpu.memory_space<vmem>>, vector<15x14xf32>,
    %108 = vector.extract_strided_slice %31 {offsets = [0, 1], sizes = [15, 14], strides = [1, 1]} : vector<15x15xf32> to vector<15x14xf32>
    %c30_96 = arith.constant 30 : index
    %c0_97 = arith.constant 0 : index
    %109 = vector.load %arg15[%c30_96, %c0_97] : memref<60x14xf32, #tpu.memory_space<vmem>>, vector<15x14xf32>
    tpu.vector_store %arg15[%c30_96, %c0_97], %108 {strides = array<i32>} : memref<60x14xf32, #tpu.memory_space<vmem>>, vector<15x14xf32>,
    %110 = vector.extract_strided_slice %51 {offsets = [0, 1], sizes = [15, 14], strides = [1, 1]} : vector<15x15xf32> to vector<15x14xf32>
    %c45_98 = arith.constant 45 : index
    %c0_99 = arith.constant 0 : index
    %111 = vector.load %arg15[%c45_98, %c0_99] : memref<60x14xf32, #tpu.memory_space<vmem>>, vector<15x14xf32>
    tpu.vector_store %arg15[%c45_98, %c0_99], %110 {strides = array<i32>} : memref<60x14xf32, #tpu.memory_space<vmem>>, vector<15x14xf32>,
    %c0_100 = arith.constant 0 : index
    %c0_101 = arith.constant 0 : index
    %112 = vector.load %arg9[%c0_100, %c0_101] : memref<24x60xf32, #tpu.memory_space<vmem>>, vector<24x60xf32>
    %c0_102 = arith.constant 0 : index
    %c0_103 = arith.constant 0 : index
    %113 = vector.load %arg15[%c0_102, %c0_103] : memref<60x14xf32, #tpu.memory_space<vmem>>, vector<60x14xf32>
    %cst_104 = arith.constant dense<0.000000e+00> : vector<24x14xf32>
    %114 = tpu.matmul %112, %113, %cst_104 {dimension_numbers = #tpu.dot_dimension_numbers<[1], [0], [0], [1], [0, 0, 1, 1], [], []>} : vector<24x60xf32>, vector<60x14xf32>, vector<24x14xf32> -> vector<24x14xf32>
    %c0_105 = arith.constant 0 : index
    %c0_106 = arith.constant 0 : index
    %115 = vector.load %arg10[%c0_105, %c0_106] : memref<24x1xf32, #tpu.memory_space<vmem>>, vector<24x1xf32>
    %116 = vector.broadcast %115 : vector<24x1xf32> to vector<24x14xf32>
    %117 = arith.addf %114, %116 : vector<24x14xf32>
    %cst_107 = arith.constant 0.000000e+00 : f32
    %118 = vector.broadcast %cst_107 : f32 to vector<24x14xf32>
    %119 = arith.maximumf %117, %118 : vector<24x14xf32>
    %120 = vector.extract_strided_slice %105 {offsets = [0, 0], sizes = [24, 13], strides = [1, 1]} : vector<24x14xf32> to vector<24x13xf32>
    %121 = vector.extract_strided_slice %119 {offsets = [0, 0], sizes = [24, 13], strides = [1, 1]} : vector<24x14xf32> to vector<24x13xf32>
    %122 = arith.addf %120, %121 : vector<24x13xf32>
    %123 = vector.extract_strided_slice %105 {offsets = [0, 1], sizes = [24, 13], strides = [1, 1]} : vector<24x14xf32> to vector<24x13xf32>
    %124 = arith.addf %122, %123 : vector<24x13xf32>
    %125 = vector.extract_strided_slice %119 {offsets = [0, 1], sizes = [24, 13], strides = [1, 1]} : vector<24x14xf32> to vector<24x13xf32>
    %126 = arith.addf %124, %125 : vector<24x13xf32>
    %cst_108 = arith.constant 2.500000e-01 : f32
    %127 = vector.broadcast %cst_108 : f32 to vector<24x13xf32>
    %128 = arith.mulf %127, %126 : vector<24x13xf32>
    %129 = vector.extract_strided_slice %128 {offsets = [0, 0], sizes = [1, 13], strides = [1, 1]} : vector<24x13xf32> to vector<1x13xf32>
    %c0_109 = arith.constant 0 : index
    %c0_110 = arith.constant 0 : index
    %130 = vector.load %arg16[%c0_109, %c0_110] : memref<1x312xf32, #tpu.memory_space<vmem>>, vector<1x13xf32>
    tpu.vector_store %arg16[%c0_109, %c0_110], %129 {strides = array<i32>} : memref<1x312xf32, #tpu.memory_space<vmem>>, vector<1x13xf32>,
    %131 = vector.extract_strided_slice %128 {offsets = [1, 0], sizes = [1, 13], strides = [1, 1]} : vector<24x13xf32> to vector<1x13xf32>
    %c0_111 = arith.constant 0 : index
    %c13 = arith.constant 13 : index
    %132 = vector.load %arg16[%c0_111, %c13] : memref<1x312xf32, #tpu.memory_space<vmem>>, vector<1x13xf32>
    tpu.vector_store %arg16[%c0_111, %c13], %131 {strides = array<i32>} : memref<1x312xf32, #tpu.memory_space<vmem>>, vector<1x13xf32>,
    %133 = vector.extract_strided_slice %128 {offsets = [2, 0], sizes = [1, 13], strides = [1, 1]} : vector<24x13xf32> to vector<1x13xf32>
    %c0_112 = arith.constant 0 : index
    %c26 = arith.constant 26 : index
    %134 = vector.load %arg16[%c0_112, %c26] : memref<1x312xf32, #tpu.memory_space<vmem>>, vector<1x13xf32>
    tpu.vector_store %arg16[%c0_112, %c26], %133 {strides = array<i32>} : memref<1x312xf32, #tpu.memory_space<vmem>>, vector<1x13xf32>,
    %135 = vector.extract_strided_slice %128 {offsets = [3, 0], sizes = [1, 13], strides = [1, 1]} : vector<24x13xf32> to vector<1x13xf32>
    %c0_113 = arith.constant 0 : index
    %c39 = arith.constant 39 : index
    %136 = vector.load %arg16[%c0_113, %c39] : memref<1x312xf32, #tpu.memory_space<vmem>>, vector<1x13xf32>
    tpu.vector_store %arg16[%c0_113, %c39], %135 {strides = array<i32>} : memref<1x312xf32, #tpu.memory_space<vmem>>, vector<1x13xf32>,
    %137 = vector.extract_strided_slice %128 {offsets = [4, 0], sizes = [1, 13], strides = [1, 1]} : vector<24x13xf32> to vector<1x13xf32>
    %c0_114 = arith.constant 0 : index
    %c52 = arith.constant 52 : index
    %138 = vector.load %arg16[%c0_114, %c52] : memref<1x312xf32, #tpu.memory_space<vmem>>, vector<1x13xf32>
    tpu.vector_store %arg16[%c0_114, %c52], %137 {strides = array<i32>} : memref<1x312xf32, #tpu.memory_space<vmem>>, vector<1x13xf32>,
    %139 = vector.extract_strided_slice %128 {offsets = [5, 0], sizes = [1, 13], strides = [1, 1]} : vector<24x13xf32> to vector<1x13xf32>
    %c0_115 = arith.constant 0 : index
    %c65 = arith.constant 65 : index
    %140 = vector.load %arg16[%c0_115, %c65] : memref<1x312xf32, #tpu.memory_space<vmem>>, vector<1x13xf32>
    tpu.vector_store %arg16[%c0_115, %c65], %139 {strides = array<i32>} : memref<1x312xf32, #tpu.memory_space<vmem>>, vector<1x13xf32>,
    %141 = vector.extract_strided_slice %128 {offsets = [6, 0], sizes = [1, 13], strides = [1, 1]} : vector<24x13xf32> to vector<1x13xf32>
    %c0_116 = arith.constant 0 : index
    %c78 = arith.constant 78 : index
    %142 = vector.load %arg16[%c0_116, %c78] : memref<1x312xf32, #tpu.memory_space<vmem>>, vector<1x13xf32>
    tpu.vector_store %arg16[%c0_116, %c78], %141 {strides = array<i32>} : memref<1x312xf32, #tpu.memory_space<vmem>>, vector<1x13xf32>,
    %143 = vector.extract_strided_slice %128 {offsets = [7, 0], sizes = [1, 13], strides = [1, 1]} : vector<24x13xf32> to vector<1x13xf32>
    %c0_117 = arith.constant 0 : index
    %c91 = arith.constant 91 : index
    %144 = vector.load %arg16[%c0_117, %c91] : memref<1x312xf32, #tpu.memory_space<vmem>>, vector<1x13xf32>
    tpu.vector_store %arg16[%c0_117, %c91], %143 {strides = array<i32>} : memref<1x312xf32, #tpu.memory_space<vmem>>, vector<1x13xf32>,
    %145 = vector.extract_strided_slice %128 {offsets = [8, 0], sizes = [1, 13], strides = [1, 1]} : vector<24x13xf32> to vector<1x13xf32>
    %c0_118 = arith.constant 0 : index
    %c104 = arith.constant 104 : index
    %146 = vector.load %arg16[%c0_118, %c104] : memref<1x312xf32, #tpu.memory_space<vmem>>, vector<1x13xf32>
    tpu.vector_store %arg16[%c0_118, %c104], %145 {strides = array<i32>} : memref<1x312xf32, #tpu.memory_space<vmem>>, vector<1x13xf32>,
    %147 = vector.extract_strided_slice %128 {offsets = [9, 0], sizes = [1, 13], strides = [1, 1]} : vector<24x13xf32> to vector<1x13xf32>
    %c0_119 = arith.constant 0 : index
    %c117 = arith.constant 117 : index
    %148 = vector.load %arg16[%c0_119, %c117] : memref<1x312xf32, #tpu.memory_space<vmem>>, vector<1x13xf32>
    tpu.vector_store %arg16[%c0_119, %c117], %147 {strides = array<i32>} : memref<1x312xf32, #tpu.memory_space<vmem>>, vector<1x13xf32>,
    %149 = vector.extract_strided_slice %128 {offsets = [10, 0], sizes = [1, 13], strides = [1, 1]} : vector<24x13xf32> to vector<1x13xf32>
    %c0_120 = arith.constant 0 : index
    %c130 = arith.constant 130 : index
    %150 = vector.load %arg16[%c0_120, %c130] : memref<1x312xf32, #tpu.memory_space<vmem>>, vector<1x13xf32>
    tpu.vector_store %arg16[%c0_120, %c130], %149 {strides = array<i32>} : memref<1x312xf32, #tpu.memory_space<vmem>>, vector<1x13xf32>,
    %151 = vector.extract_strided_slice %128 {offsets = [11, 0], sizes = [1, 13], strides = [1, 1]} : vector<24x13xf32> to vector<1x13xf32>
    %c0_121 = arith.constant 0 : index
    %c143 = arith.constant 143 : index
    %152 = vector.load %arg16[%c0_121, %c143] : memref<1x312xf32, #tpu.memory_space<vmem>>, vector<1x13xf32>
    tpu.vector_store %arg16[%c0_121, %c143], %151 {strides = array<i32>} : memref<1x312xf32, #tpu.memory_space<vmem>>, vector<1x13xf32>,
    %153 = vector.extract_strided_slice %128 {offsets = [12, 0], sizes = [1, 13], strides = [1, 1]} : vector<24x13xf32> to vector<1x13xf32>
    %c0_122 = arith.constant 0 : index
    %c156 = arith.constant 156 : index
    %154 = vector.load %arg16[%c0_122, %c156] : memref<1x312xf32, #tpu.memory_space<vmem>>, vector<1x13xf32>
    tpu.vector_store %arg16[%c0_122, %c156], %153 {strides = array<i32>} : memref<1x312xf32, #tpu.memory_space<vmem>>, vector<1x13xf32>,
    %155 = vector.extract_strided_slice %128 {offsets = [13, 0], sizes = [1, 13], strides = [1, 1]} : vector<24x13xf32> to vector<1x13xf32>
    %c0_123 = arith.constant 0 : index
    %c169 = arith.constant 169 : index
    %156 = vector.load %arg16[%c0_123, %c169] : memref<1x312xf32, #tpu.memory_space<vmem>>, vector<1x13xf32>
    tpu.vector_store %arg16[%c0_123, %c169], %155 {strides = array<i32>} : memref<1x312xf32, #tpu.memory_space<vmem>>, vector<1x13xf32>,
    %157 = vector.extract_strided_slice %128 {offsets = [14, 0], sizes = [1, 13], strides = [1, 1]} : vector<24x13xf32> to vector<1x13xf32>
    %c0_124 = arith.constant 0 : index
    %c182 = arith.constant 182 : index
    %158 = vector.load %arg16[%c0_124, %c182] : memref<1x312xf32, #tpu.memory_space<vmem>>, vector<1x13xf32>
    tpu.vector_store %arg16[%c0_124, %c182], %157 {strides = array<i32>} : memref<1x312xf32, #tpu.memory_space<vmem>>, vector<1x13xf32>,
    %159 = vector.extract_strided_slice %128 {offsets = [15, 0], sizes = [1, 13], strides = [1, 1]} : vector<24x13xf32> to vector<1x13xf32>
    %c0_125 = arith.constant 0 : index
    %c195 = arith.constant 195 : index
    %160 = vector.load %arg16[%c0_125, %c195] : memref<1x312xf32, #tpu.memory_space<vmem>>, vector<1x13xf32>
    tpu.vector_store %arg16[%c0_125, %c195], %159 {strides = array<i32>} : memref<1x312xf32, #tpu.memory_space<vmem>>, vector<1x13xf32>,
    %161 = vector.extract_strided_slice %128 {offsets = [16, 0], sizes = [1, 13], strides = [1, 1]} : vector<24x13xf32> to vector<1x13xf32>
    %c0_126 = arith.constant 0 : index
    %c208 = arith.constant 208 : index
    %162 = vector.load %arg16[%c0_126, %c208] : memref<1x312xf32, #tpu.memory_space<vmem>>, vector<1x13xf32>
    tpu.vector_store %arg16[%c0_126, %c208], %161 {strides = array<i32>} : memref<1x312xf32, #tpu.memory_space<vmem>>, vector<1x13xf32>,
    %163 = vector.extract_strided_slice %128 {offsets = [17, 0], sizes = [1, 13], strides = [1, 1]} : vector<24x13xf32> to vector<1x13xf32>
    %c0_127 = arith.constant 0 : index
    %c221 = arith.constant 221 : index
    %164 = vector.load %arg16[%c0_127, %c221] : memref<1x312xf32, #tpu.memory_space<vmem>>, vector<1x13xf32>
    tpu.vector_store %arg16[%c0_127, %c221], %163 {strides = array<i32>} : memref<1x312xf32, #tpu.memory_space<vmem>>, vector<1x13xf32>,
    %165 = vector.extract_strided_slice %128 {offsets = [18, 0], sizes = [1, 13], strides = [1, 1]} : vector<24x13xf32> to vector<1x13xf32>
    %c0_128 = arith.constant 0 : index
    %c234 = arith.constant 234 : index
    %166 = vector.load %arg16[%c0_128, %c234] : memref<1x312xf32, #tpu.memory_space<vmem>>, vector<1x13xf32>
    tpu.vector_store %arg16[%c0_128, %c234], %165 {strides = array<i32>} : memref<1x312xf32, #tpu.memory_space<vmem>>, vector<1x13xf32>,
    %167 = vector.extract_strided_slice %128 {offsets = [19, 0], sizes = [1, 13], strides = [1, 1]} : vector<24x13xf32> to vector<1x13xf32>
    %c0_129 = arith.constant 0 : index
    %c247 = arith.constant 247 : index
    %168 = vector.load %arg16[%c0_129, %c247] : memref<1x312xf32, #tpu.memory_space<vmem>>, vector<1x13xf32>
    tpu.vector_store %arg16[%c0_129, %c247], %167 {strides = array<i32>} : memref<1x312xf32, #tpu.memory_space<vmem>>, vector<1x13xf32>,
    %169 = vector.extract_strided_slice %128 {offsets = [20, 0], sizes = [1, 13], strides = [1, 1]} : vector<24x13xf32> to vector<1x13xf32>
    %c0_130 = arith.constant 0 : index
    %c260 = arith.constant 260 : index
    %170 = vector.load %arg16[%c0_130, %c260] : memref<1x312xf32, #tpu.memory_space<vmem>>, vector<1x13xf32>
    tpu.vector_store %arg16[%c0_130, %c260], %169 {strides = array<i32>} : memref<1x312xf32, #tpu.memory_space<vmem>>, vector<1x13xf32>,
    %171 = vector.extract_strided_slice %128 {offsets = [21, 0], sizes = [1, 13], strides = [1, 1]} : vector<24x13xf32> to vector<1x13xf32>
    %c0_131 = arith.constant 0 : index
    %c273 = arith.constant 273 : index
    %172 = vector.load %arg16[%c0_131, %c273] : memref<1x312xf32, #tpu.memory_space<vmem>>, vector<1x13xf32>
    tpu.vector_store %arg16[%c0_131, %c273], %171 {strides = array<i32>} : memref<1x312xf32, #tpu.memory_space<vmem>>, vector<1x13xf32>,
    %173 = vector.extract_strided_slice %128 {offsets = [22, 0], sizes = [1, 13], strides = [1, 1]} : vector<24x13xf32> to vector<1x13xf32>
    %c0_132 = arith.constant 0 : index
    %c286 = arith.constant 286 : index
    %174 = vector.load %arg16[%c0_132, %c286] : memref<1x312xf32, #tpu.memory_space<vmem>>, vector<1x13xf32>
    tpu.vector_store %arg16[%c0_132, %c286], %173 {strides = array<i32>} : memref<1x312xf32, #tpu.memory_space<vmem>>, vector<1x13xf32>,
    %175 = vector.extract_strided_slice %128 {offsets = [23, 0], sizes = [1, 13], strides = [1, 1]} : vector<24x13xf32> to vector<1x13xf32>
    %c0_133 = arith.constant 0 : index
    %c299 = arith.constant 299 : index
    %176 = vector.load %arg16[%c0_133, %c299] : memref<1x312xf32, #tpu.memory_space<vmem>>, vector<1x13xf32>
    tpu.vector_store %arg16[%c0_133, %c299], %175 {strides = array<i32>} : memref<1x312xf32, #tpu.memory_space<vmem>>, vector<1x13xf32>,
    %c0_134 = arith.constant 0 : index
    %c0_135 = arith.constant 0 : index
    %177 = vector.load %arg16[%c0_134, %c0_135] : memref<1x312xf32, #tpu.memory_space<vmem>>, vector<1x312xf32>
    %c0_136 = arith.constant 0 : index
    %c0_137 = arith.constant 0 : index
    %178 = vector.load %arg11[%c0_136, %c0_137] : memref<312x16xf32, #tpu.memory_space<vmem>>, vector<312x16xf32>
    %cst_138 = arith.constant dense<0.000000e+00> : vector<1x16xf32>
    %179 = tpu.matmul %177, %178, %cst_138 {dimension_numbers = #tpu.dot_dimension_numbers<[1], [0], [0], [1], [0, 0, 1, 1], [], []>} : vector<1x312xf32>, vector<312x16xf32>, vector<1x16xf32> -> vector<1x16xf32>
    %c0_139 = arith.constant 0 : index
    %c0_140 = arith.constant 0 : index
    %180 = vector.load %arg12[%c0_139, %c0_140] : memref<1x16xf32, #tpu.memory_space<vmem>>, vector<1x16xf32>
    %181 = arith.addf %179, %180 : vector<1x16xf32>
    %cst_141 = arith.constant 0.000000e+00 : f32
    %182 = vector.broadcast %cst_141 : f32 to vector<1x16xf32>
    %183 = arith.maximumf %181, %182 : vector<1x16xf32>
    %c0_142 = arith.constant 0 : index
    %c0_143 = arith.constant 0 : index
    %c0_144 = arith.constant 0 : index
    %184 = vector.load %arg13[%c0_142, %c0_143, %c0_144] : memref<1x1x16xf32, #tpu.memory_space<vmem>>, vector<1x1x16xf32>
    %185 = vector.shape_cast %184 : vector<1x1x16xf32> to vector<1x16xf32>
    %186 = vector.shape_cast %183 : vector<1x16xf32> to vector<1x1x16xf32>
    tpu.vector_store %arg13[%c0_142, %c0_143, %c0_144], %186 {strides = array<i32>} : memref<1x1x16xf32, #tpu.memory_space<vmem>>, vector<1x1x16xf32>,
    return
  }
  func.func @transform_0(%arg0: i32) -> (i32, i32, i32) {
    %c0_i32 = arith.constant 0 : i32
    %c0_i32_0 = arith.constant 0 : i32
    %c0_i32_1 = arith.constant 0 : i32
    return %arg0, %c0_i32, %c0_i32_0 : i32, i32, i32
  }
  func.func @transform_1(%arg0: i32) -> (i32, i32) {
    %c0_i32 = arith.constant 0 : i32
    %c0_i32_0 = arith.constant 0 : i32
    %c0_i32_1 = arith.constant 0 : i32
    return %c0_i32, %c0_i32_0 : i32, i32
  }
  func.func @transform_2(%arg0: i32) -> (i32, i32) {
    %c0_i32 = arith.constant 0 : i32
    %c0_i32_0 = arith.constant 0 : i32
    %c0_i32_1 = arith.constant 0 : i32
    return %c0_i32, %c0_i32_0 : i32, i32
  }
  func.func @transform_3(%arg0: i32) -> (i32, i32) {
    %c0_i32 = arith.constant 0 : i32
    %c0_i32_0 = arith.constant 0 : i32
    %c0_i32_1 = arith.constant 0 : i32
    return %c0_i32, %c0_i32_0 : i32, i32
  }
  func.func @transform_4(%arg0: i32) -> (i32, i32) {
    %c0_i32 = arith.constant 0 : i32
    %c0_i32_0 = arith.constant 0 : i32
    %c0_i32_1 = arith.constant 0 : i32
    return %c0_i32, %c0_i32_0 : i32, i32
  }
  func.func @transform_5(%arg0: i32) -> (i32, i32) {
    %c0_i32 = arith.constant 0 : i32
    %c0_i32_0 = arith.constant 0 : i32
    %c0_i32_1 = arith.constant 0 : i32
    return %c0_i32, %c0_i32_0 : i32, i32
  }
  func.func @transform_6(%arg0: i32) -> (i32, i32) {
    %c0_i32 = arith.constant 0 : i32
    %c0_i32_0 = arith.constant 0 : i32
    %c0_i32_1 = arith.constant 0 : i32
    return %c0_i32, %c0_i32_0 : i32, i32
  }
  func.func @transform_7(%arg0: i32) -> (i32, i32) {
    %c0_i32 = arith.constant 0 : i32
    %c0_i32_0 = arith.constant 0 : i32
    %c0_i32_1 = arith.constant 0 : i32
    return %c0_i32, %c0_i32_0 : i32, i32
  }
  func.func @transform_8(%arg0: i32) -> (i32, i32) {
    %c0_i32 = arith.constant 0 : i32
    %c0_i32_0 = arith.constant 0 : i32
    %c0_i32_1 = arith.constant 0 : i32
    return %c0_i32, %c0_i32_0 : i32, i32
  }
  func.func @transform_9(%arg0: i32) -> (i32, i32) {
    %c0_i32 = arith.constant 0 : i32
    %c0_i32_0 = arith.constant 0 : i32
    %c0_i32_1 = arith.constant 0 : i32
    return %c0_i32, %c0_i32_0 : i32, i32
  }
  func.func @transform_10(%arg0: i32) -> (i32, i32) {
    %c0_i32 = arith.constant 0 : i32
    %c0_i32_0 = arith.constant 0 : i32
    %c0_i32_1 = arith.constant 0 : i32
    return %c0_i32, %c0_i32_0 : i32, i32
  }
  func.func @transform_11(%arg0: i32) -> (i32, i32) {
    %c0_i32 = arith.constant 0 : i32
    %c0_i32_0 = arith.constant 0 : i32
    %c0_i32_1 = arith.constant 0 : i32
    return %c0_i32, %c0_i32_0 : i32, i32
  }
  func.func @transform_12(%arg0: i32) -> (i32, i32, i32) {
    %c0_i32 = arith.constant 0 : i32
    %c0_i32_0 = arith.constant 0 : i32
    %c0_i32_1 = arith.constant 0 : i32
    return %arg0, %c0_i32, %c0_i32_0 : i32, i32, i32
  }
}

module attributes {stable_mosaic.version = 11 : i64} {
  func.func @_lstm_head_kernel(%arg0: i32, %arg1: memref<4x32xf32, #tpu.memory_space<vmem>>, %arg2: memref<4x32x32xf32, #tpu.memory_space<vmem>>, %arg3: memref<4x32x32xf32, #tpu.memory_space<vmem>>, %arg4: memref<4x1x32xf32, #tpu.memory_space<vmem>>, %arg5: memref<32x125xf32, #tpu.memory_space<vmem>>, %arg6: memref<1x125xf32, #tpu.memory_space<vmem>>, %arg7: memref<1x125xf32, #tpu.memory_space<vmem>>, %arg8: memref<4x4x32xf32, #tpu.memory_space<vmem>>) attributes {dimension_semantics = [#tpu.dimension_semantics<arbitrary>], iteration_bounds = array<i64: 1>, scalar_prefetch = 0 : i64, scratch_operands = 1 : i64, tpu.core_type = #tpu.core_type<tc>, window_params = [{pipeline_mode = #tpu.pipeline_mode<synchronous>, transform_indices = @transform_0, window_bounds = array<i64: 4, 32>}, {pipeline_mode = #tpu.pipeline_mode<synchronous>, transform_indices = @transform_1, window_bounds = array<i64: 4, 32, 32>}, {pipeline_mode = #tpu.pipeline_mode<synchronous>, transform_indices = @transform_2, window_bounds = array<i64: 4, 32, 32>}, {pipeline_mode = #tpu.pipeline_mode<synchronous>, transform_indices = @transform_3, window_bounds = array<i64: 4, 1, 32>}, {pipeline_mode = #tpu.pipeline_mode<synchronous>, transform_indices = @transform_4, window_bounds = array<i64: 32, 125>}, {pipeline_mode = #tpu.pipeline_mode<synchronous>, transform_indices = @transform_5, window_bounds = array<i64: 1, 125>}, {pipeline_mode = #tpu.pipeline_mode<synchronous>, transform_indices = @transform_6, window_bounds = array<i64: 1, 125>}]} {
    %c0 = arith.constant 0 : index
    %c0_0 = arith.constant 0 : index
    %0 = vector.load %arg1[%c0, %c0_0] : memref<4x32xf32, #tpu.memory_space<vmem>>, vector<4x32xf32>
    %c0_1 = arith.constant 0 : index
    %c0_2 = arith.constant 0 : index
    %c0_3 = arith.constant 0 : index
    %1 = vector.load %arg2[%c0_1, %c0_2, %c0_3] : memref<4x32x32xf32, #tpu.memory_space<vmem>>, vector<1x32x32xf32>
    %2 = vector.shape_cast %1 : vector<1x32x32xf32> to vector<32x32xf32>
    %cst = arith.constant dense<0.000000e+00> : vector<4x32xf32>
    %3 = tpu.matmul %0, %2, %cst {dimension_numbers = #tpu.dot_dimension_numbers<[1], [0], [0], [1], [0, 0, 1, 1], [], []>} : vector<4x32xf32>, vector<32x32xf32>, vector<4x32xf32> -> vector<4x32xf32>
    %c0_4 = arith.constant 0 : index
    %c0_5 = arith.constant 0 : index
    %c0_6 = arith.constant 0 : index
    %4 = vector.load %arg4[%c0_4, %c0_5, %c0_6] : memref<4x1x32xf32, #tpu.memory_space<vmem>>, vector<1x1x32xf32>
    %5 = vector.shape_cast %4 : vector<1x1x32xf32> to vector<1x32xf32>
    %6 = vector.broadcast %5 : vector<1x32xf32> to vector<4x32xf32>
    %7 = arith.addf %3, %6 : vector<4x32xf32>
    %c0_7 = arith.constant 0 : index
    %c0_8 = arith.constant 0 : index
    %c0_9 = arith.constant 0 : index
    %8 = vector.load %arg8[%c0_7, %c0_8, %c0_9] : memref<4x4x32xf32, #tpu.memory_space<vmem>>, vector<1x4x32xf32>
    %9 = vector.shape_cast %8 : vector<1x4x32xf32> to vector<4x32xf32>
    %10 = vector.shape_cast %7 : vector<4x32xf32> to vector<1x4x32xf32>
    tpu.vector_store %arg8[%c0_7, %c0_8, %c0_9], %10 {strides = array<i32>} : memref<4x4x32xf32, #tpu.memory_space<vmem>>, vector<1x4x32xf32>,
    %c1 = arith.constant 1 : index
    %c0_10 = arith.constant 0 : index
    %c0_11 = arith.constant 0 : index
    %11 = vector.load %arg2[%c1, %c0_10, %c0_11] : memref<4x32x32xf32, #tpu.memory_space<vmem>>, vector<1x32x32xf32>
    %12 = vector.shape_cast %11 : vector<1x32x32xf32> to vector<32x32xf32>
    %cst_12 = arith.constant dense<0.000000e+00> : vector<4x32xf32>
    %13 = tpu.matmul %0, %12, %cst_12 {dimension_numbers = #tpu.dot_dimension_numbers<[1], [0], [0], [1], [0, 0, 1, 1], [], []>} : vector<4x32xf32>, vector<32x32xf32>, vector<4x32xf32> -> vector<4x32xf32>
    %c1_13 = arith.constant 1 : index
    %c0_14 = arith.constant 0 : index
    %c0_15 = arith.constant 0 : index
    %14 = vector.load %arg4[%c1_13, %c0_14, %c0_15] : memref<4x1x32xf32, #tpu.memory_space<vmem>>, vector<1x1x32xf32>
    %15 = vector.shape_cast %14 : vector<1x1x32xf32> to vector<1x32xf32>
    %16 = vector.broadcast %15 : vector<1x32xf32> to vector<4x32xf32>
    %17 = arith.addf %13, %16 : vector<4x32xf32>
    %c1_16 = arith.constant 1 : index
    %c0_17 = arith.constant 0 : index
    %c0_18 = arith.constant 0 : index
    %18 = vector.load %arg8[%c1_16, %c0_17, %c0_18] : memref<4x4x32xf32, #tpu.memory_space<vmem>>, vector<1x4x32xf32>
    %19 = vector.shape_cast %18 : vector<1x4x32xf32> to vector<4x32xf32>
    %20 = vector.shape_cast %17 : vector<4x32xf32> to vector<1x4x32xf32>
    tpu.vector_store %arg8[%c1_16, %c0_17, %c0_18], %20 {strides = array<i32>} : memref<4x4x32xf32, #tpu.memory_space<vmem>>, vector<1x4x32xf32>,
    %c2 = arith.constant 2 : index
    %c0_19 = arith.constant 0 : index
    %c0_20 = arith.constant 0 : index
    %21 = vector.load %arg2[%c2, %c0_19, %c0_20] : memref<4x32x32xf32, #tpu.memory_space<vmem>>, vector<1x32x32xf32>
    %22 = vector.shape_cast %21 : vector<1x32x32xf32> to vector<32x32xf32>
    %cst_21 = arith.constant dense<0.000000e+00> : vector<4x32xf32>
    %23 = tpu.matmul %0, %22, %cst_21 {dimension_numbers = #tpu.dot_dimension_numbers<[1], [0], [0], [1], [0, 0, 1, 1], [], []>} : vector<4x32xf32>, vector<32x32xf32>, vector<4x32xf32> -> vector<4x32xf32>
    %c2_22 = arith.constant 2 : index
    %c0_23 = arith.constant 0 : index
    %c0_24 = arith.constant 0 : index
    %24 = vector.load %arg4[%c2_22, %c0_23, %c0_24] : memref<4x1x32xf32, #tpu.memory_space<vmem>>, vector<1x1x32xf32>
    %25 = vector.shape_cast %24 : vector<1x1x32xf32> to vector<1x32xf32>
    %26 = vector.broadcast %25 : vector<1x32xf32> to vector<4x32xf32>
    %27 = arith.addf %23, %26 : vector<4x32xf32>
    %c2_25 = arith.constant 2 : index
    %c0_26 = arith.constant 0 : index
    %c0_27 = arith.constant 0 : index
    %28 = vector.load %arg8[%c2_25, %c0_26, %c0_27] : memref<4x4x32xf32, #tpu.memory_space<vmem>>, vector<1x4x32xf32>
    %29 = vector.shape_cast %28 : vector<1x4x32xf32> to vector<4x32xf32>
    %30 = vector.shape_cast %27 : vector<4x32xf32> to vector<1x4x32xf32>
    tpu.vector_store %arg8[%c2_25, %c0_26, %c0_27], %30 {strides = array<i32>} : memref<4x4x32xf32, #tpu.memory_space<vmem>>, vector<1x4x32xf32>,
    %c3 = arith.constant 3 : index
    %c0_28 = arith.constant 0 : index
    %c0_29 = arith.constant 0 : index
    %31 = vector.load %arg2[%c3, %c0_28, %c0_29] : memref<4x32x32xf32, #tpu.memory_space<vmem>>, vector<1x32x32xf32>
    %32 = vector.shape_cast %31 : vector<1x32x32xf32> to vector<32x32xf32>
    %cst_30 = arith.constant dense<0.000000e+00> : vector<4x32xf32>
    %33 = tpu.matmul %0, %32, %cst_30 {dimension_numbers = #tpu.dot_dimension_numbers<[1], [0], [0], [1], [0, 0, 1, 1], [], []>} : vector<4x32xf32>, vector<32x32xf32>, vector<4x32xf32> -> vector<4x32xf32>
    %c3_31 = arith.constant 3 : index
    %c0_32 = arith.constant 0 : index
    %c0_33 = arith.constant 0 : index
    %34 = vector.load %arg4[%c3_31, %c0_32, %c0_33] : memref<4x1x32xf32, #tpu.memory_space<vmem>>, vector<1x1x32xf32>
    %35 = vector.shape_cast %34 : vector<1x1x32xf32> to vector<1x32xf32>
    %36 = vector.broadcast %35 : vector<1x32xf32> to vector<4x32xf32>
    %37 = arith.addf %33, %36 : vector<4x32xf32>
    %c3_34 = arith.constant 3 : index
    %c0_35 = arith.constant 0 : index
    %c0_36 = arith.constant 0 : index
    %38 = vector.load %arg8[%c3_34, %c0_35, %c0_36] : memref<4x4x32xf32, #tpu.memory_space<vmem>>, vector<1x4x32xf32>
    %39 = vector.shape_cast %38 : vector<1x4x32xf32> to vector<4x32xf32>
    %40 = vector.shape_cast %37 : vector<4x32xf32> to vector<1x4x32xf32>
    tpu.vector_store %arg8[%c3_34, %c0_35, %c0_36], %40 {strides = array<i32>} : memref<4x4x32xf32, #tpu.memory_space<vmem>>, vector<1x4x32xf32>,
    %c0_37 = arith.constant 0 : index
    %c0_38 = arith.constant 0 : index
    %c0_39 = arith.constant 0 : index
    %41 = vector.load %arg3[%c0_37, %c0_38, %c0_39] : memref<4x32x32xf32, #tpu.memory_space<vmem>>, vector<1x32x32xf32>
    %42 = vector.shape_cast %41 : vector<1x32x32xf32> to vector<32x32xf32>
    %c1_40 = arith.constant 1 : index
    %c0_41 = arith.constant 0 : index
    %c0_42 = arith.constant 0 : index
    %43 = vector.load %arg3[%c1_40, %c0_41, %c0_42] : memref<4x32x32xf32, #tpu.memory_space<vmem>>, vector<1x32x32xf32>
    %44 = vector.shape_cast %43 : vector<1x32x32xf32> to vector<32x32xf32>
    %c2_43 = arith.constant 2 : index
    %c0_44 = arith.constant 0 : index
    %c0_45 = arith.constant 0 : index
    %45 = vector.load %arg3[%c2_43, %c0_44, %c0_45] : memref<4x32x32xf32, #tpu.memory_space<vmem>>, vector<1x32x32xf32>
    %46 = vector.shape_cast %45 : vector<1x32x32xf32> to vector<32x32xf32>
    %c3_46 = arith.constant 3 : index
    %c0_47 = arith.constant 0 : index
    %c0_48 = arith.constant 0 : index
    %47 = vector.load %arg3[%c3_46, %c0_47, %c0_48] : memref<4x32x32xf32, #tpu.memory_space<vmem>>, vector<1x32x32xf32>
    %48 = vector.shape_cast %47 : vector<1x32x32xf32> to vector<32x32xf32>
    %cst_49 = arith.constant 0.000000e+00 : f32
    %49 = vector.broadcast %cst_49 : f32 to vector<1x32xf32>
    %c0_i32 = arith.constant 0 : i32
    %c4_i32 = arith.constant 4 : i32
    %50 = arith.addi %c0_i32, %c4_i32 : i32
    %c1_i32 = arith.constant 1 : i32
    %51:2 = scf.for %arg9 = %c0_i32 to %50 step %c1_i32 iter_args(%arg10 = %49, %arg11 = %49) -> (vector<1x32xf32>, vector<1x32xf32>)  : i32 {
      %c0_58 = arith.constant 0 : index
      %58 = arith.index_cast %arg9 : i32 to index
      %c0_59 = arith.constant 0 : index
      %59 = vector.load %arg8[%c0_58, %58, %c0_59] : memref<4x4x32xf32, #tpu.memory_space<vmem>>, vector<1x1x32xf32>
      %60 = vector.shape_cast %59 : vector<1x1x32xf32> to vector<1x32xf32>
      %cst_60 = arith.constant dense<0.000000e+00> : vector<1x32xf32>
      %61 = tpu.matmul %arg10, %42, %cst_60 {dimension_numbers = #tpu.dot_dimension_numbers<[1], [0], [0], [1], [0, 0, 1, 1], [], []>} : vector<1x32xf32>, vector<32x32xf32>, vector<1x32xf32> -> vector<1x32xf32>
      %62 = arith.addf %60, %61 : vector<1x32xf32>
      %c1_61 = arith.constant 1 : index
      %63 = arith.index_cast %arg9 : i32 to index
      %c0_62 = arith.constant 0 : index
      %64 = vector.load %arg8[%c1_61, %63, %c0_62] : memref<4x4x32xf32, #tpu.memory_space<vmem>>, vector<1x1x32xf32>
      %65 = vector.shape_cast %64 : vector<1x1x32xf32> to vector<1x32xf32>
      %cst_63 = arith.constant dense<0.000000e+00> : vector<1x32xf32>
      %66 = tpu.matmul %arg10, %44, %cst_63 {dimension_numbers = #tpu.dot_dimension_numbers<[1], [0], [0], [1], [0, 0, 1, 1], [], []>} : vector<1x32xf32>, vector<32x32xf32>, vector<1x32xf32> -> vector<1x32xf32>
      %67 = arith.addf %65, %66 : vector<1x32xf32>
      %c2_64 = arith.constant 2 : index
      %68 = arith.index_cast %arg9 : i32 to index
      %c0_65 = arith.constant 0 : index
      %69 = vector.load %arg8[%c2_64, %68, %c0_65] : memref<4x4x32xf32, #tpu.memory_space<vmem>>, vector<1x1x32xf32>
      %70 = vector.shape_cast %69 : vector<1x1x32xf32> to vector<1x32xf32>
      %cst_66 = arith.constant dense<0.000000e+00> : vector<1x32xf32>
      %71 = tpu.matmul %arg10, %46, %cst_66 {dimension_numbers = #tpu.dot_dimension_numbers<[1], [0], [0], [1], [0, 0, 1, 1], [], []>} : vector<1x32xf32>, vector<32x32xf32>, vector<1x32xf32> -> vector<1x32xf32>
      %72 = arith.addf %70, %71 : vector<1x32xf32>
      %c3_67 = arith.constant 3 : index
      %73 = arith.index_cast %arg9 : i32 to index
      %c0_68 = arith.constant 0 : index
      %74 = vector.load %arg8[%c3_67, %73, %c0_68] : memref<4x4x32xf32, #tpu.memory_space<vmem>>, vector<1x1x32xf32>
      %75 = vector.shape_cast %74 : vector<1x1x32xf32> to vector<1x32xf32>
      %cst_69 = arith.constant dense<0.000000e+00> : vector<1x32xf32>
      %76 = tpu.matmul %arg10, %48, %cst_69 {dimension_numbers = #tpu.dot_dimension_numbers<[1], [0], [0], [1], [0, 0, 1, 1], [], []>} : vector<1x32xf32>, vector<32x32xf32>, vector<1x32xf32> -> vector<1x32xf32>
      %77 = arith.addf %75, %76 : vector<1x32xf32>
      %78 = arith.negf %62 : vector<1x32xf32>
      %79 = math.exp %78 : vector<1x32xf32>
      %cst_70 = arith.constant 1.000000e+00 : f32
      %80 = vector.broadcast %cst_70 : f32 to vector<1x32xf32>
      %81 = arith.addf %80, %79 : vector<1x32xf32>
      %82 = arith.divf %80, %81 : vector<1x32xf32>
      %83 = arith.negf %67 : vector<1x32xf32>
      %84 = math.exp %83 : vector<1x32xf32>
      %cst_71 = arith.constant 1.000000e+00 : f32
      %85 = vector.broadcast %cst_71 : f32 to vector<1x32xf32>
      %86 = arith.addf %85, %84 : vector<1x32xf32>
      %87 = arith.divf %85, %86 : vector<1x32xf32>
      %88 = math.tanh %72 : vector<1x32xf32>
      %89 = arith.negf %77 : vector<1x32xf32>
      %90 = math.exp %89 : vector<1x32xf32>
      %cst_72 = arith.constant 1.000000e+00 : f32
      %91 = vector.broadcast %cst_72 : f32 to vector<1x32xf32>
      %92 = arith.addf %91, %90 : vector<1x32xf32>
      %93 = arith.divf %91, %92 : vector<1x32xf32>
      %94 = arith.mulf %87, %arg11 : vector<1x32xf32>
      %95 = arith.mulf %82, %88 : vector<1x32xf32>
      %96 = arith.addf %94, %95 : vector<1x32xf32>
      %97 = math.tanh %96 : vector<1x32xf32>
      %98 = arith.mulf %93, %97 : vector<1x32xf32>
      scf.yield %98, %96 : vector<1x32xf32>, vector<1x32xf32>
    }
    %c4_i32_50 = arith.constant 4 : i32
    %c0_51 = arith.constant 0 : index
    %c0_52 = arith.constant 0 : index
    %52 = vector.load %arg5[%c0_51, %c0_52] : memref<32x125xf32, #tpu.memory_space<vmem>>, vector<32x125xf32>
    %cst_53 = arith.constant dense<0.000000e+00> : vector<1x125xf32>
    %53 = tpu.matmul %51#0, %52, %cst_53 {dimension_numbers = #tpu.dot_dimension_numbers<[1], [0], [0], [1], [0, 0, 1, 1], [], []>} : vector<1x32xf32>, vector<32x125xf32>, vector<1x125xf32> -> vector<1x125xf32>
    %c0_54 = arith.constant 0 : index
    %c0_55 = arith.constant 0 : index
    %54 = vector.load %arg6[%c0_54, %c0_55] : memref<1x125xf32, #tpu.memory_space<vmem>>, vector<1x125xf32>
    %55 = arith.addf %53, %54 : vector<1x125xf32>
    %56 = math.tanh %55 : vector<1x125xf32>
    %c0_56 = arith.constant 0 : index
    %c0_57 = arith.constant 0 : index
    %57 = vector.load %arg7[%c0_56, %c0_57] : memref<1x125xf32, #tpu.memory_space<vmem>>, vector<1x125xf32>
    tpu.vector_store %arg7[%c0_56, %c0_57], %56 {strides = array<i32>} : memref<1x125xf32, #tpu.memory_space<vmem>>, vector<1x125xf32>,
    return
  }
  func.func @transform_0(%arg0: i32) -> (i32, i32) {
    %c0_i32 = arith.constant 0 : i32
    %c0_i32_0 = arith.constant 0 : i32
    %c0_i32_1 = arith.constant 0 : i32
    return %c0_i32, %c0_i32_0 : i32, i32
  }
  func.func @transform_1(%arg0: i32) -> (i32, i32, i32) {
    %c0_i32 = arith.constant 0 : i32
    %c0_i32_0 = arith.constant 0 : i32
    %c0_i32_1 = arith.constant 0 : i32
    %c0_i32_2 = arith.constant 0 : i32
    return %c0_i32, %c0_i32_0, %c0_i32_1 : i32, i32, i32
  }
  func.func @transform_2(%arg0: i32) -> (i32, i32, i32) {
    %c0_i32 = arith.constant 0 : i32
    %c0_i32_0 = arith.constant 0 : i32
    %c0_i32_1 = arith.constant 0 : i32
    %c0_i32_2 = arith.constant 0 : i32
    return %c0_i32, %c0_i32_0, %c0_i32_1 : i32, i32, i32
  }
  func.func @transform_3(%arg0: i32) -> (i32, i32, i32) {
    %c0_i32 = arith.constant 0 : i32
    %c0_i32_0 = arith.constant 0 : i32
    %c0_i32_1 = arith.constant 0 : i32
    %c0_i32_2 = arith.constant 0 : i32
    return %c0_i32, %c0_i32_0, %c0_i32_1 : i32, i32, i32
  }
  func.func @transform_4(%arg0: i32) -> (i32, i32) {
    %c0_i32 = arith.constant 0 : i32
    %c0_i32_0 = arith.constant 0 : i32
    %c0_i32_1 = arith.constant 0 : i32
    return %c0_i32, %c0_i32_0 : i32, i32
  }
  func.func @transform_5(%arg0: i32) -> (i32, i32) {
    %c0_i32 = arith.constant 0 : i32
    %c0_i32_0 = arith.constant 0 : i32
    %c0_i32_1 = arith.constant 0 : i32
    return %c0_i32, %c0_i32_0 : i32, i32
  }
  func.func @transform_6(%arg0: i32) -> (i32, i32) {
    %c0_i32 = arith.constant 0 : i32
    %c0_i32_0 = arith.constant 0 : i32
    %c0_i32_1 = arith.constant 0 : i32
    return %c0_i32, %c0_i32_0 : i32, i32
  }
}

</mosaic_0001>

<bundles_post_ra>
// kernel: _lambda_.4
= control target key start
LH: loop header
LB: loop body
LE: loop exit
PB: predicated region body
PF: predicated region fallthrough
CT: control target
= control target key end

     0   :  { %s3166_s21 = smov 0   ;;  %s3945_s0 = inlined_call_operand.vmem [shape: bf16[4,61,1880], index: 0, kind: input, shape index: {}]   ;;  %s3946_s1 = inlined_call_operand.vmem [shape: bf16[3,61], index: 1, kind: input, shape index: {}]   ;;  %s3947_s2 = inlined_call_operand.vmem [shape: f32[3,1], index: 2, kind: input, shape index: {}]   ;;  %s3948_s3 = inlined_call_operand.vmem [shape: f32[3,1], index: 3, kind: input, shape index: {}]   ;;  %s3949_s4 = inlined_call_operand.vmem [shape: f32[5,69], index: 4, kind: input, shape index: {}]   ;;  %s3950_s5 = inlined_call_operand.vmem [shape: f32[5,1], index: 5, kind: input, shape index: {}]   ;;  %s3951_s6 = inlined_call_operand.vmem [shape: f32[5,1], index: 6, kind: input, shape index: {}]   ;;  %s3952_s7 = inlined_call_operand.vmem [shape: f32[5,1], index: 7, kind: input, shape index: {}]   ;;  %s3953_s8 = inlined_call_operand.vmem [shape: f32[8,20], index: 8, kind: input, shape index: {}]   ;;  %s3954_s9 = inlined_call_operand.vmem [shape: f32[8,1], index: 9, kind: input, shape index: {}]   ;;  %s3955_s10 = inlined_call_operand.vmem [shape: f32[360,8], index: 10, kind: input, shape index: {}]   ;;  %s3956_s11 = inlined_call_operand.vmem [shape: f32[1,8], index: 11, kind: input, shape index: {}]   ;;  %s3957_s12 = inlined_call_operand.vmem [shape: f32[4,1,8], index: 12, kind: output, shape index: {}]  }
   0x1 LB: > { %s2538_s22 = sadd.s32 4294967295, %s3038_s21   ;;  %p2542_p0 = scmp.ge.s32.totalorder %s3038_s21, 1  ;;  %s3038_s21 = sphi %s3166_s21, %s22_s21  }
   0x2   : > { %p362_p1 = scmp.lt.s32.totalorder %s3038_s21, 5 }
   0x4   : > { %p363_p2 = pnand %p2542_p0, %p362_p1 }
   0x5   : > { %p402_p3 = scmp.lt.s32.totalorder (!%p363_p2), %s2538_s22, 3  ;;  %s3044_s15 = smov (!%p363_p2), 21  }
   0x6   : > { %366 = sbr.rel (%p363_p2) target bundleno = 1451 (0x5ab), region = 68  ;;  %s3045_s16 = smov (!%p363_p2), 8  }
   0x7   : > { %s3046_s17 = smov (!%p363_p2), 55   ;;  %s3047_s18 = smov (!%p363_p2), 34  }
   0x8   : > { %s3048_s19 = smov (!%p363_p2), 102   ;;  %s3049_s20 = smov (!%p363_p2), 42  }
   0x9   : > { %s3050_s23 = smov (!%p363_p2), 89   ;;  %s3051_s24 = smov (!%p363_p2), 68  }
   0xa   : > { %s3053_s26 = smov (!%p363_p2), 115   ;;  %s3054_s27 = smov (!%p363_p2), 97  }
   0xb   : > { %vm769_vm0 = vcmask 1045504   ;;  %v3040_v0 = vmov 0   ;;  %s3975_s22 = smov (!%p402_p3, %s2538_s22), 3  ;;  %v1145_v1 = vld [vmem:[%s3947_s2] sm:$0x7]  ;;  %vm770_vm1 = vcmask 1046528  }
   0xc   : > { %850 = vmatprep.mubr.bf16.mxu0 %v3040_v0  ;;  %891 = vmatprep.mubr.bf16.mxu1 %v3040_v0  ;;  %v3041_v2 = vmov 65535   ;;  %s2872_s25 = smul.u32 480, %s3975_s22  ;;  %v1166_v4 = vld [vmem:[%s3948_s3] sm:$0x7]  ;;  %vm765_vm2 = vcmask 498688   ;;  %vm3043_vm3 = vmmov 0  }
   0xd   : > { %2942 = vset.pattern.permute.xlu0 %v3040_v0  ;;  %2943 = vset.pattern.permute.xlu1 %v3040_v0  ;;  %v771_v3 = vsel %vm769_vm0, 4294967295, %v3041_v2  ;;  %v3223_v32 = vld [vmem:[%s3946_s1] sm:$0x3]  ;;  %vm1202_vm4 = vcmask 378880   ;;  %s3055_s28 = smov 50   ;;  %s3056_s29 = smov 16  }
   0xe   : > { %1148 = vperm.xlu0 %2942, %v1145_v1   ;;  %s3190_s30 = scalar_lea.vmem %s3945_s0, %s2872_s25  ;;  %v3192_v5 = vsel %vm770_vm1, %v771_v3, 0  ;;  %s3052_s25 = smov 3   ;;  %vm1248_vm5 = vcmask 64512   ;;  %vm1214_vm6 = vcmask 277504   ;;  %vm1231_vm7 = vcmask 171008  }
   0xf   : > { %v2944_v6 = vld [vmem:[%s3190_s30 + $0x16c] ss:$60 sps:$4 sm:$0x7f]   ;;  %v2946_v7 = vld [vmem:[%s3190_s30 + $0x174] ss:$60 sps:$4 sm:$0x7f]  }
  0x10   : > { %v777_v8 = vand.u32 %v2944_v6, %v3192_v5  ;;  %v2948_v9 = vld [vmem:[%s3190_s30 + $0x168] ss:$60 sps:$4 sm:$0x7f]   ;;  %v2949_v10 = vld [vmem:[%s3190_s30 + $0x170] ss:$60 sps:$4 sm:$0x7f]   ;;  %v783_v11 = vand.u32 %v2946_v7, %v3192_v5 }
  0x11   : > { %v2950_v12 = vld [vmem:[%s3190_s30 + $0xf4] ss:$60 sps:$4 sm:$0xff]   ;;  %v774_v13 = vand.u32 %v2948_v9, %v3192_v5  ;;  %v780_v14 = vand.u32 %v2949_v10, %v3192_v5  ;;  %v2952_v15 = vld [vmem:[%s3190_s30 + $0xfc] ss:$60 sps:$4 sm:$0xff]   ;;  %v2958_v19 = vld [vmem:[%s3190_s30 + $0x84] ss:$60 sps:$4 sm:$0xff]  }
  0x12   : > { %1169 = vperm.xlu0 %2942, %v1166_v4   ;;  %826 = vmatprep.subr.bf16.mxu0 %v777_v8  ;;  %v2954_v16 = vld [vmem:[%s3190_s30 + $0xf0] ss:$60 sps:$4 sm:$0xff]   ;;  %v2955_v17 = vld [vmem:[%s3190_s30 + $0xf8] ss:$60 sps:$4 sm:$0xff]   ;;  %v2961_v21 = vld [vmem:[%s3190_s30 + $0x80] ss:$60 sps:$4 sm:$0xff]  }
  0x13   : > { %867 = vmatprep.subr.bf16.mxu1 %v783_v11  ;;  %827 = vmatpush1.bf16.msra.mxu0 %v774_v13  ;;  %v2956_v18 = vld [vmem:[%s3190_s30 + $0x7c] ss:$60 sps:$4 sm:$0xff]   ;;  %v2962_v22 = vld [vmem:[%s3190_s30 + $0x4] ss:$60 sps:$4 sm:$0xff]   ;;  %v2964_v23 = vld [vmem:[%s3190_s30 + $0xc] ss:$60 sps:$4 sm:$0xff]  }
  0x14   : > { %868 = vmatpush1.bf16.msra.mxu1 %v780_v14  ;;  %828 = vmatprep.subr.bf16.mxu0 %v2950_v12  ;;  %v2960_v20 = vld [vmem:[%s3190_s30 + $0x78] ss:$60 sps:$4 sm:$0xff]   ;;  %v2966_v24 = vld [vmem:[%s3190_s30] ss:$60 sps:$4 sm:$0xff]   ;;  %v2967_v25 = vld [vmem:[%s3190_s30 + $0x8] ss:$60 sps:$4 sm:$0xff]  }
  0x15   : > { %869 = vmatprep.subr.bf16.mxu1 %v2952_v15  ;;  %v2970_v26 = vld [vmem:[%s3190_s30 + $0x17c] ss:$60 sps:$4 sm:$0x7f]   ;;  %v2973_v28 = vld [vmem:[%s3190_s30 + $0x184] ss:$60 sps:$4 sm:$0x7f]  }
  0x16   : > { %v2968_v27 = vld [vmem:[%s3190_s30 + $0x178] ss:$60 sps:$4 sm:$0x7f]   ;;  %v2971_v29 = vld [vmem:[%s3190_s30 + $0x180] ss:$60 sps:$4 sm:$0x7f]   ;;  %v789_v30 = vand.u32 %v2970_v26, %v3192_v5  ;;  %v795_v31 = vand.u32 %v2973_v28, %v3192_v5 }
  0x17   : > { %829 = vmatpush1.bf16.msra.mxu0 %v2954_v16  ;;  %v786_v33 = vand.u32 %v2968_v27, %v3192_v5  ;;  %v792_v34 = vand.u32 %v2971_v29, %v3192_v5  ;;  %v2976_v35 = vld [vmem:[%s3190_s30 + $0x104] ss:$60 sps:$4 sm:$0xff]   ;;  %v2979_v36 = vld [vmem:[%s3190_s30 + $0x10c] ss:$60 sps:$4 sm:$0xff]   ;;  %v2985_v40 = vld [vmem:[%s3190_s30 + $0x94] ss:$60 sps:$4 sm:$0xff]  }
  0x18   : > { %870 = vmatpush1.bf16.msra.mxu1 %v2955_v17  ;;  %830 = vmatprep.subr.bf16.mxu0 %v2956_v18  ;;  %v2974_v37 = vld [vmem:[%s3190_s30 + $0x100] ss:$60 sps:$4 sm:$0xff]   ;;  %v2977_v38 = vld [vmem:[%s3190_s30 + $0x108] ss:$60 sps:$4 sm:$0xff]   ;;  %v2983_v42 = vld [vmem:[%s3190_s30 + $0x90] ss:$60 sps:$4 sm:$0xff]  }
  0x19   : > { %871 = vmatprep.subr.bf16.mxu1 %v2958_v19  ;;  %v2982_v39 = vld [vmem:[%s3190_s30 + $0x8c] ss:$60 sps:$4 sm:$0xff]   ;;  %v2988_v43 = vld [vmem:[%s3190_s30 + $0x14] ss:$60 sps:$4 sm:$0xff]   ;;  %v2991_v45 = vld [vmem:[%s3190_s30 + $0x1c] ss:$60 sps:$4 sm:$0xff]  }
  0x1a   : > { %v2980_v41 = vld [vmem:[%s3190_s30 + $0x88] ss:$60 sps:$4 sm:$0xff]   ;;  %v2997_v46 = vld [vmem:[%s3190_s30 + $0x194] ss:$60 sps:$4 sm:$0x7f]   ;;  %v3042_v11 = vmov 0.0  }
  0x1b   : > { %831 = vmatpush1.bf16.msra.mxu0 %v2960_v20  ;;  %v2994_v44 = vld [vmem:[%s3190_s30 + $0x18c] ss:$60 sps:$4 sm:$0x7f]   ;;  %v2989_v48 = vld [vmem:[%s3190_s30 + $0x18] ss:$60 sps:$4 sm:$0xff]   ;;  %v807_v52 = vand.u32 %v2997_v46, %v3192_v5  ;;  %s3058_s13 = smov 29  }
  0x1c   : > { %872 = vmatpush1.bf16.msra.mxu1 %v2961_v21  ;;  %832 = vmatprep.subr.bf16.mxu0 %v2962_v22  ;;  %v2986_v47 = vld [vmem:[%s3190_s30 + $0x10] ss:$60 sps:$4 sm:$0xff]   ;;  %v2992_v49 = vld [vmem:[%s3190_s30 + $0x188] ss:$60 sps:$4 sm:$0x7f]   ;;  %v801_v51 = vand.u32 %v2994_v44, %v3192_v5  ;;  %s3059_s14 = smov 123  }
  0x1d   : > { %873 = vmatprep.subr.bf16.mxu1 %v2964_v23  ;;  %v2995_v50 = vld [vmem:[%s3190_s30 + $0x190] ss:$60 sps:$4 sm:$0x7f]   ;;  %v798_v53 = vand.u32 %v2992_v49, %v3192_v5  ;;  %v3003_v56 = vld [vmem:[%s3190_s30 + $0x11c] ss:$60 sps:$4 sm:$0xff]   ;;  %vm1261_vm8 = vcmask 343040  }
  0x1e   : > { %v804_v54 = vand.u32 %v2995_v50, %v3192_v5  ;;  %v3000_v55 = vld [vmem:[%s3190_s30 + $0x114] ss:$60 sps:$4 sm:$0xff]   ;;  %v3006_v59 = vld [vmem:[%s3190_s30 + $0x9c] ss:$60 sps:$4 sm:$0xff]   ;;  %v3009_v60 = vld [vmem:[%s3190_s30 + $0xa4] ss:$60 sps:$4 sm:$0xff]  }
  0x1f   : > { %833 = vmatpush1.bf16.msra.mxu0 %v2966_v24  ;;  %v2998_v57 = vld [vmem:[%s3190_s30 + $0x110] ss:$60 sps:$4 sm:$0xff]   ;;  %v3001_v58 = vld [vmem:[%s3190_s30 + $0x118] ss:$60 sps:$4 sm:$0xff]   ;;  %v3007_v62 = vld [vmem:[%s3190_s30 + $0xa0] ss:$60 sps:$4 sm:$0xff]  }
  0x20   : > { %874 = vmatpush1.bf16.msra.mxu1 %v2967_v25  ;;  %908 = vmatprep.subr.bf16.mxu0 %v789_v30  ;;  %v3004_v61 = vld [vmem:[%s3190_s30 + $0x98] ss:$60 sps:$4 sm:$0xff]   ;;  %v3012_v63 = vld [vmem:[%s3190_s30 + $0x24] ss:$60 sps:$4 sm:$0xff]   ;;  %v3015_v1 = vld [vmem:[%s3190_s30 + $0x2c] ss:$60 sps:$4 sm:$0xff]  }
  0x21   : > { %949 = vmatprep.subr.bf16.mxu1 %v795_v31  ;;  %v3018_v2 = vld [vmem:[%s3190_s30 + $0x19c] ss:$60 sps:$4 sm:$0x7f]   ;;  %v3013_v4 = vld [vmem:[%s3190_s30 + $0x28] ss:$60 sps:$4 sm:$0xff]   ;;  %vm1312_vm9 = vcmask 23552  }
  0x22   : > { %2604 = vmatmul.mubr.msk.bf16.vlgmr.msra.gmra.mxu0 %vm765_vm2, %v3223_v32  ;;  %v3010_v3 = vld [vmem:[%s3190_s30 + $0x20] ss:$60 sps:$4 sm:$0xff]   ;;  %v3016_v6 = vld [vmem:[%s3190_s30 + $0x198] ss:$60 sps:$4 sm:$0x7f]   ;;  %v813_v8 = vand.u32 %v3018_v2, %v3192_v5  ;;  %vm1295_vm10 = vcmask 130048  }
  0x23   : > { %2605 = vmatmul.mubr.msk.bf16.vlgmr.msra.gmra.mxu1 %vm765_vm2, %v3223_v32  ;;  %909 = vmatpush1.bf16.msra.mxu0 %v786_v33  ;;  %v3019_v7 = vld [vmem:[%s3190_s30 + $0x1a0] ss:$60 sps:$4 sm:$0x7f]   ;;  %v810_v9 = vand.u32 %v3016_v6, %v3192_v5  ;;  %v3023_v14 = vld [vmem:[%s3190_s30 + $0x128] ss:$60 sps:$4 sm:$0xff]   ;;  %vm1278_vm11 = vcmask 236544  }
  0x24   : > { %950 = vmatpush1.bf16.msra.mxu1 %v792_v34  ;;  %910 = vmatprep.subr.bf16.mxu0 %v2976_v35  ;;  %v816_v10 = vand.u32 %v3019_v7, %v3192_v5  ;;  %v3022_v12 = vld [vmem:[%s3190_s30 + $0x124] ss:$60 sps:$4 sm:$0xff]   ;;  %v3026_v5 = vld [vmem:[%s3190_s30 + $0xac] ss:$60 sps:$4 sm:$0xff]   ;;  %v3030_v17 = vld [vmem:[%s3190_s30 + $0x34] ss:$60 sps:$4 sm:$0xff]  }
  0x25   : > { %951 = vmatprep.subr.bf16.mxu1 %v2979_v36  ;;  %932 = vmatprep.mubr.bf16.mxu0 %v3040_v0  ;;  %v3020_v13 = vld [vmem:[%s3190_s30 + $0x120] ss:$60 sps:$4 sm:$0xff]   ;;  %v3024_v15 = vld [vmem:[%s3190_s30 + $0xa8] ss:$60 sps:$4 sm:$0xff]   ;;  %v3027_v16 = vld [vmem:[%s3190_s30 + $0xb0] ss:$60 sps:$4 sm:$0xff]  }
  0x26   : > { %973 = vmatprep.mubr.bf16.mxu1 %v3040_v0  ;;  %v3028_v18 = vld [vmem:[%s3190_s30 + $0x30] ss:$60 sps:$4 sm:$0xff]   ;;  %v3031_v19 = vld [vmem:[%s3190_s30 + $0x38] ss:$60 sps:$4 sm:$0xff]   ;;  %s3057_s30 = smov 76   ;;  %vm1325_vm12 = vcmask 302080  }
  0x27   : > { %911 = vmatpush1.bf16.msra.mxu0 %v2974_v37  ;;  %vm1622_vm13 = vcmask 370688   ;;  %vm1353_vm14 = vcmask 1044480   ;;  %vm1481_vm15 = vcmask 89088   ;;  %vm1494_vm0 = vcmask 367616  }
  0x28   : > { %952 = vmatpush1.bf16.msra.mxu1 %v2977_v38  ;;  %912 = vmatprep.subr.bf16.mxu0 %v2982_v39  ;;  %vm1464_vm1 = vcmask 195584  }
  0x29   : > { %953 = vmatprep.subr.bf16.mxu1 %v2985_v40 }
  0x2b   : > { %913 = vmatpush1.bf16.msra.mxu0 %v2980_v41 }
  0x2c   : > { %954 = vmatpush1.bf16.msra.mxu1 %v2983_v42  ;;  %914 = vmatprep.subr.bf16.mxu0 %v2988_v43 }
  0x2d   : > { %955 = vmatprep.subr.bf16.mxu1 %v2991_v45 }
  0x2f   : > { %915 = vmatpush1.bf16.msra.mxu0 %v2986_v47 }
  0x30   : > { %956 = vmatpush1.bf16.msra.mxu1 %v2989_v48  ;;  %990 = vmatprep.subr.bf16.mxu0 %v801_v51 }
  0x31   : > { %1031 = vmatprep.subr.bf16.mxu1 %v807_v52 }
  0x32   : > { %2606 = vmatmul.mubr.msk.bf16.vlgmr.msra.gmra.mxu0 %vm765_vm2, %v3223_v32 }
  0x33   : > { %2607 = vmatmul.mubr.msk.bf16.vlgmr.msra.gmra.mxu1 %vm765_vm2, %v3223_v32  ;;  %991 = vmatpush1.bf16.msra.mxu0 %v798_v53 }
  0x34   : > { %1032 = vmatpush1.bf16.msra.mxu1 %v804_v54  ;;  %992 = vmatprep.subr.bf16.mxu0 %v3000_v55 }
  0x35   : > { %1033 = vmatprep.subr.bf16.mxu1 %v3003_v56  ;;  %1014 = vmatprep.mubr.bf16.mxu0 %v3040_v0 }
  0x36   : > { %1055 = vmatprep.mubr.bf16.mxu1 %v3040_v0 }
  0x37   : > { %993 = vmatpush1.bf16.msra.mxu0 %v2998_v57 }
  0x38   : > { %1034 = vmatpush1.bf16.msra.mxu1 %v3001_v58  ;;  %994 = vmatprep.subr.bf16.mxu0 %v3006_v59 }
  0x39   : > { %1035 = vmatprep.subr.bf16.mxu1 %v3009_v60 }
  0x3b   : > { %995 = vmatpush1.bf16.msra.mxu0 %v3004_v61 }
  0x3c   : > { %1036 = vmatpush1.bf16.msra.mxu1 %v3007_v62  ;;  %996 = vmatprep.subr.bf16.mxu0 %v3012_v63 }
  0x3d   : > { %1037 = vmatprep.subr.bf16.mxu1 %v3015_v1 }
  0x3f   : > { %997 = vmatpush1.bf16.msra.mxu0 %v3010_v3 }
  0x40   : > { %1038 = vmatpush1.bf16.msra.mxu1 %v3013_v4  ;;  %1072 = vmatprep.subr.bf16.mxu0 %v813_v8 }
  0x41   : > { %2729 = vmatprep.subr.bf16.mxu1 %v3042_v11 }
  0x42   : > { %2608 = vmatmul.mubr.msk.bf16.vlgmr.msra.gmra.mxu0 %vm765_vm2, %v3223_v32 }
  0x43   : > { %2609 = vmatmul.mubr.msk.bf16.vlgmr.msra.gmra.mxu1 %vm765_vm2, %v3223_v32  ;;  %1073 = vmatpush1.bf16.msra.mxu0 %v810_v9 }
  0x44   : > { %2730 = vmatpush3.bf16.msra.mxu1 %v816_v10  ;;  %1074 = vmatprep.subr.bf16.mxu0 %v3022_v12 }
  0x45   : > { %2731 = vmatprep.subr.bf16.mxu1 %v3042_v11  ;;  %1096 = vmatprep.mubr.bf16.mxu0 %v3040_v0 }
  0x46   : > { %2737 = vmatprep.mubr.msk.bf16.mxu1 %vm3043_vm3, %v3042_v11 }
  0x47   : > { %1075 = vmatpush1.bf16.msra.mxu0 %v3020_v13 }
  0x48   : > { %2732 = vmatpush3.bf16.msra.mxu1 %v3023_v14  ;;  %1076 = vmatprep.subr.bf16.mxu0 %v3026_v5 }
  0x49   : > { %2733 = vmatprep.subr.bf16.mxu1 %v3042_v11 }
  0x4b   : > { %1077 = vmatpush1.bf16.msra.mxu0 %v3024_v15 }
  0x4c   : > { %2734 = vmatpush3.bf16.msra.mxu1 %v3027_v16  ;;  %1078 = vmatprep.subr.bf16.mxu0 %v3030_v17 }
  0x4d   : > { %2735 = vmatprep.subr.bf16.mxu1 %v3042_v11 }
  0x4f   : > { %1079 = vmatpush1.bf16.msra.mxu0 %v3028_v18 }
  0x50   : > { %2736 = vmatpush3.bf16.msra.mxu1 %v3031_v19  ;;  %2741 = vmatprep.subr.mxu0 %v3042_v11 }
  0x51   : > { %2762 = vmatprep.subr.mxu1 %v3042_v11 }
  0x52   : > { %2610 = vmatmul.mubr.msk.bf16.vlgmr.msra.gmra.mxu0 %vm765_vm2, %v3223_v32 }
  0x53   : > { %2738 = vmatmul.mubr.msk.bf16.vlgmr.msra.gmra.mxu1 %vm765_vm2, %v3223_v32  ;;  %2759 = vmatprep.mubr.msk.f32.mxu0 %vm3043_vm3, %v3042_v11  ;;  %vm1511_vm2 = vcmask 261120  }
  0x54   : > { %2780 = vmatprep.mubr.msk.f32.mxu1 %vm3043_vm3, %v3042_v11 }
  0x89   : > { %v3307_v0 = vpop.permute.xlu0 %1148 }
  0x8d   : > { %v3309_v22 = vpop.permute.xlu0 %1169 }
  0xe2   : > { %v852_v20 = vpop.f32.mrf.mxu0 }
  0xe3   : > { %v893_v21 = vpop.f32.mrf.mxu1  ;;  %v1151_v23 = vmul.f32 %v3307_v0, %v852_v20 }
  0xe4   : > { %v1153_v24 = vmul.f32 %v3307_v0, %v893_v21  ;;  %v854_v25 = vpop.f32.mrf.mxu0 }
  0xe5   : > { %v895_v26 = vpop.f32.mrf.mxu1  ;;  %v1172_v27 = vadd.f32 %v3309_v22, %v1151_v23  ;;  %v1152_v37 = vmul.f32 %v3307_v0, %v854_v25 }
  0xe6   : > { %v1174_v28 = vadd.f32 %v3309_v22, %v1153_v24  ;;  %v856_v30 = vpop.f32.mrf.mxu0  ;;  %v1154_v33 = vmul.f32 %v3307_v0, %v895_v26 }
  0xe7   : > { %v897_v29 = vpop.f32.mrf.mxu1  ;;  %v3315_v31 = vmax.f32 %v1172_v27, 0.0  ;;  %v1173_v39 = vadd.f32 %v3309_v22, %v1152_v37 }
  0xe8   : > { %v3317_v32 = vmax.f32 %v1174_v28, 0.0  ;;  %v857_v35 = vpop.f32.mrf.mxu0  ;;  %v1175_v36 = vadd.f32 %v3309_v22, %v1154_v33 }
  0xe9   : > { %v898_v34 = vpop.f32.mrf.mxu1  ;;  %1203 = vst.msk [vmem:[#allocation2] sm:$0x7] %vm1202_vm4, %v3315_v31  ;;  %v3334_v42 = vmax.f32 %v1173_v39, 0.0 }
  0xea   : > { %1229 = vrot.lane.b32.xlu1 %v3317_v32, %s3044_s15  ;;  %1244 = vrot.lane.b32.xlu0 %v3317_v32, %s3045_s16  ;;  %v3329_v38 = vmax.f32 %v1175_v36, 0.0 }
  0xee   : > { %1239 = vrot.lane.b32.xlu1 %v3317_v32, %s3046_s17  ;;  %1210 = vrot.lane.b32.xlu0 %v3315_v31, %s3047_s18  ;;  %s3062_s17 = smov 110  }
  0xf2   : > { %1246 = vrot.lane.b32.xlu1 %v3329_v38, %s3045_s16  ;;  %1235 = vrot.lane.b32.xlu0 %v3317_v32, %s3048_s19  ;;  %v934_v40 = vpop.f32.mrf.mxu0  ;;  %s3061_s16 = smov 37   ;;  %s3064_s19 = smov 63  }
  0xf3   : > { %v975_v41 = vpop.f32.mrf.mxu1  ;;  %v1155_v51 = vmul.f32 %v3307_v0, %v934_v40 }
  0xf4   : > { %v1157_v43 = vmul.f32 %v3307_v0, %v975_v41  ;;  %v936_v44 = vpop.f32.mrf.mxu0 }
  0xf5   : > { %v977_v45 = vpop.f32.mrf.mxu1  ;;  %v1176_v53 = vadd.f32 %v3309_v22, %v1155_v51  ;;  %v1156_v2 = vmul.f32 %v3307_v0, %v936_v44 }
  0xf6   : > { %1257 = vrot.lane.b32.xlu0 %v3329_v38, %s3049_s20  ;;  %1212 = vrot.lane.b32.xlu1 %v3334_v42, %s3047_s18  ;;  %v938_v47 = vpop.f32.mrf.mxu0  ;;  %v1178_v48 = vadd.f32 %v3309_v22, %v1157_v43  ;;  %v1158_v57 = vmul.f32 %v3307_v0, %v977_v45  ;;  %s3063_s18 = smov 118  }
  0xf7   : > { %v979_v46 = vpop.f32.mrf.mxu1  ;;  %v3349_v56 = vmax.f32 %v1176_v53, 0.0  ;;  %v1177_v4 = vadd.f32 %v3309_v22, %v1156_v2  ;;  %v1608_v53 = vld [vmem:[%s3951_s6] sm:$0x1f] }
  0xf8   : > { %v939_v50 = vpop.f32.mrf.mxu0  ;;  %v1193_v52 = vmax.f32 %v1178_v48, 0.0  ;;  %v1179_v62 = vadd.f32 %v3309_v22, %v1158_v57 }
  0xf9   : > { %v980_v49 = vpop.f32.mrf.mxu1  ;;  %v1192_v9 = vmax.f32 %v1177_v4, 0.0 }
  0xfa   : > { %1252 = vrot.lane.b32.xlu0 %v3329_v38, %s3050_s23  ;;  %1222 = vrot.lane.b32.xlu1 %v3334_v42, %s3051_s24  ;;  %v1194_v3 = vmax.f32 %v1179_v62, 0.0  ;;  %s3066_s23 = smov 92   ;;  %s3067_s24 = smov 11   ;;  %v1525_v49 = vld [vmem:[%s3950_s5] sm:$0x1f] }
  0xfe   : > { %1227 = vrot.lane.b32.xlu0 %v3334_v42, %s3044_s15  ;;  %1308 = vrot.lane.b32.xlu1 %v1193_v52, %s3052_s25  ;;  %s3060_s15 = smov 84  }
 0x102   : > { %1218 = vrot.lane.b32.xlu0 %v3334_v42, %s3053_s26  ;;  %1299 = vrot.lane.b32.xlu1 %v1193_v52, %s3054_s27  ;;  %v1016_v54 = vpop.f32.mrf.mxu0  ;;  %s3069_s26 = smov 24  }
 0x103   : > { %v1057_v55 = vpop.f32.mrf.mxu1  ;;  %v1159_v8 = vmul.f32 %v3307_v0, %v1016_v54 }
 0x104   : > { %v1018_v58 = vpop.f32.mrf.mxu0  ;;  %v1161_v15 = vmul.f32 %v3307_v0, %v1057_v55 }
 0x105   : > { %v1059_v59 = vpop.f32.mrf.mxu1  ;;  %v1180_v5 = vadd.f32 %v3309_v22, %v1159_v8  ;;  %v1160_v23 = vmul.f32 %v3307_v0, %v1018_v58  ;;  %v1790_v8 = vld [vmem:[%s3952_s7] sm:$0x1f] }
 0x106   : > { %1303 = vrot.lane.b32.xlu0 %v1193_v52, %s3055_s28  ;;  %1259 = vrot.lane.b32.xlu1 %v3349_v56, %s3049_s20  ;;  %v1020_v60 = vpop.f32.mrf.mxu0  ;;  %v1182_v19 = vadd.f32 %v3309_v22, %v1161_v15  ;;  %v1162_v21 = vmul.f32 %v3307_v0, %v1059_v59  ;;  %s3065_s20 = smov 45   ;;  %s3070_s28 = smov 79   ;;  %v1343_v59 = vld [vmem:[%s3950_s5] sm:$0x1f] }
 0x107   : > { %v1061_v61 = vpop.f32.mrf.mxu1  ;;  %v1195_v18 = vmax.f32 %v1180_v5, 0.0  ;;  %v1181_v25 = vadd.f32 %v3309_v22, %v1160_v23 }
 0x108   : > { %v1021_v63 = vpop.f32.mrf.mxu0  ;;  %v1197_v20 = vmax.f32 %v1182_v19, 0.0  ;;  %v1183_v24 = vadd.f32 %v3309_v22, %v1162_v21 }
 0x109   : > { %v1062_v1 = vpop.f32.mrf.mxu1  ;;  %v1196_v27 = vmax.f32 %v1181_v25, 0.0  ;;  %v1428_v63 = vld [vmem:[%s3951_s6] sm:$0x1f] }
 0x10a   : > { %1293 = vrot.lane.b32.xlu0 %v1193_v52, %s3056_s29  ;;  %1269 = vrot.lane.b32.xlu1 %v3349_v56, %s3057_s30  ;;  %v1198_v26 = vmax.f32 %v1183_v24, 0.0  ;;  %s3072_s30 = smov 126   ;;  %v1783_v1 = vld [vmem:[%s3951_s6] sm:$0x1f] }
 0x10e   : > { %1274 = vrot.lane.b32.xlu0 %v3349_v56, %s3058_s13  ;;  %1310 = vrot.lane.b32.xlu1 %v1194_v3, %s3052_s25  ;;  %s3068_s25 = smov 32  }
 0x112   : > { %1265 = vrot.lane.b32.xlu0 %v3349_v56, %s3059_s14  ;;  %1316 = vrot.lane.b32.xlu1 %v1194_v3, %s3060_s15  ;;  %v1098_v6 = vpop.f32.mrf.mxu0  ;;  %s3074_s14 = smov 33   ;;  %s3075_s15 = smov 81  }
 0x113   : > { %v3360_v7 = vpop.f32.mrf.mxu1  ;;  %v1163_v28 = vmul.f32 %v3307_v0, %v1098_v6 }
 0x114   : > { %v3363_v10 = vpop.f32.mrf.mxu0  ;;  %v1165_v33 = vmul.f32 %v3307_v0, %v3360_v7 }
 0x115   : > { %v2739_v12 = vpop.f32.mrf.mxu1  ;;  %v1184_v29 = vadd.f32 %v3309_v22, %v1163_v28  ;;  %v1164_v36 = vmul.f32 %v3307_v0, %v3363_v10  ;;  %v1872_v10 = vld [vmem:[%s3950_s5] sm:$0x1f] }
 0x116   : > { %1321 = vrot.lane.b32.xlu0 %v1194_v3, %s3061_s16  ;;  %1291 = vrot.lane.b32.xlu1 %v1192_v9, %s3056_s29  ;;  %v1102_v13 = vpop.f32.mrf.mxu0  ;;  %s3071_s29 = smov 58   ;;  %v1186_v34 = vadd.f32 %v3309_v22, %v1165_v33  ;;  %v1435_v3 = vld [vmem:[%s3952_s7] sm:$0x1f] }
 0x117   : > { %v1142_v14 = vpop.f32.mrf.mxu1  ;;  %v1199_v30 = vmax.f32 %v1184_v29, 0.0  ;;  %v1185_v37 = vadd.f32 %v3309_v22, %v1164_v36 }
 0x118   : > { %v1103_v16 = vpop.f32.mrf.mxu0  ;;  %v1201_v35 = vmax.f32 %v1186_v34, 0.0  ;;  %v1955_v14 = vld [vmem:[%s3951_s6] sm:$0x1f] }
 0x119   : > { %v2740_v17 = vpop.f32.mrf.mxu1 }
 0x11a   : > { %1282 = vrot.lane.b32.xlu0 %v1192_v9, %s3062_s17  ;;  %1276 = vrot.lane.b32.xlu1 %v1192_v9, %s3058_s13  ;;  %s3073_s13 = smov 71   ;;  %s3077_s17 = smov 105  }
 0x11e   : > { %1329 = vrot.lane.b32.xlu0 %v1195_v18, %s3063_s18  ;;  %1286 = vrot.lane.b32.xlu1 %v1192_v9, %s3064_s19  ;;  %s3078_s18 = smov 75   ;;  %s3079_s19 = smov 7  }
 0x122   : > { %1490 = vrot.lane.b32.xlu0 %v1197_v20, %s3065_s20  ;;  %1323 = vrot.lane.b32.xlu1 %v1195_v18, %s3061_s16  ;;  %s3076_s16 = smov 80  }
 0x126   : > { %1485 = vrot.lane.b32.xlu0 %v1197_v20, %s3066_s23  ;;  %1479 = vrot.lane.b32.xlu1 %v1197_v20, %s3067_s24  ;;  %s3080_s23 = smov 127  }
 0x12a   : > { %1507 = vrot.lane.b32.xlu0 %v1198_v26, %s3068_s25  ;;  %1460 = vrot.lane.b32.xlu1 %v1195_v18, %s3069_s26 }
 0x12e   : > { %1477 = vrot.lane.b32.xlu0 %v1196_v27, %s3067_s24  ;;  %1502 = vrot.lane.b32.xlu1 %v1198_v26, %s3070_s28  ;;  %s3081_s24 = smov 41   ;;  %s3084_s28 = smov 66  }
 0x132   : > { %1472 = vrot.lane.b32.xlu0 %v1196_v27, %s3071_s29  ;;  %1492 = vrot.lane.b32.xlu1 %v1198_v26, %s3065_s20  ;;  %s3085_s29 = smov 6  }
 0x136   : > { %1462 = vrot.lane.b32.xlu0 %v1196_v27, %s3069_s26  ;;  %1498 = vrot.lane.b32.xlu1 %v1198_v26, %s3072_s30  ;;  %s3083_s26 = smov 87   ;;  %s3086_s30 = smov 88  }
 0x13a   : > { %1455 = vrot.lane.b32.xlu0 %v1195_v18, %s3073_s13  ;;  %1509 = vrot.lane.b32.xlu1 %v1199_v30, %s3068_s25  ;;  %s3082_s25 = smov 122   ;;  %s3087_s13 = smov 53   ;;  %v1962_v18 = vld [vmem:[%s3952_s7] sm:$0x1f] }
 0x13e   : > { %1682 = vrot.lane.b32.xlu0 %v3315_v31, %s3074_s14  ;;  %1205 = vrot.lane.b32.xlu1 %v3315_v31, %s3075_s15  ;;  %s3089_s15 = smov 101  }
 0x142   : > { %1678 = vrot.lane.b32.xlu0 %v3315_v31, %s3076_s16  ;;  %1468 = vrot.lane.b32.xlu1 %v1196_v27, %s3077_s17  ;;  %s3090_s16 = smov 113   ;;  %s3091_s17 = smov 20  }
 0x146   : > { %1858 = vrot.lane.b32.xlu0 %v3349_v56, %s3078_s18  ;;  %1684 = vrot.lane.b32.xlu1 %v3334_v42, %s3074_s14  ;;  %s3088_s14 = smov 19   ;;  %s3092_s18 = smov 100  }
 0x14a   : > { %1836 = vrot.lane.b32.xlu0 %v3329_v38, %s3079_s19  ;;  %1674 = vrot.lane.b32.xlu1 %v3315_v31, %s3080_s23  ;;  %v1200_v31 = vmax.f32 %v1185_v37, 0.0 }
 0x14e   : > { %1848 = vrot.lane.b32.xlu0 %v3349_v56, %s3081_s24  ;;  %1854 = vrot.lane.b32.xlu1 %v3349_v56, %s3082_s25  ;;  %s3094_s25 = smov 54   ;;  %v1615_v56 = vld [vmem:[%s3952_s7] sm:$0x1f] }
 0x152   : > { %1670 = vrot.lane.b32.xlu0 %v1201_v35, %s3083_s26  ;;  %1834 = vrot.lane.b32.xlu1 %v3317_v32, %s3079_s19 }
 0x156   : > { %1640 = vrot.lane.b32.xlu0 %v1199_v30, %s3084_s28  ;;  %1846 = vrot.lane.b32.xlu1 %v3329_v38, %s3081_s24  ;;  %s3093_s24 = smov 114  }
 0x15a   : > { %1662 = vrot.lane.b32.xlu0 %v1200_v31, %s3085_s29  ;;  %1842 = vrot.lane.b32.xlu1 %v3329_v38, %s3086_s30 }
 0x15c   : > { %v1230_v39 = vpop.permute.xlu1 %1229  ;;  %v1245_v40 = vpop.permute.xlu0 %1244 }
 0x15e   : > { %1657 = vrot.lane.b32.xlu0 %v1200_v31, %s3087_s13  ;;  %1664 = vrot.lane.b32.xlu1 %v1201_v35, %s3085_s29  ;;  %s3095_s13 = smov 67   ;;  %s3097_s29 = smov 90  }
 0x160   : > { %v1240_v0 = vpop.permute.xlu1 %1239  ;;  %v1211_v41 = vpop.permute.xlu0 %1210 }
 0x161   : > { %1242 = vst.msk [vmem:[#allocation2 + $0x15] sm:$0x7] %vm1202_vm4, %v1240_v0 }
 0x162   : > { %1647 = vrot.lane.b32.xlu0 %v1200_v31, %s3088_s14  ;;  %1645 = vrot.lane.b32.xlu1 %v1199_v30, %s3088_s14  ;;  %s3098_s14 = smov 52  }
 0x164   : > { %v1247_v22 = vpop.permute.xlu1 %1246  ;;  %v1236_v43 = vpop.permute.xlu0 %1235 }
 0x165   : > { %v1249_v44 = vsel %vm1248_vm5, %v1245_v40, %v1247_v22  ;;  %1238 = vst.msk [vmem:[#allocation2 + $0x12] sm:$0x7] %vm1202_vm4, %v1236_v43  ;;  %vm1686_vm5 = vcmask 269312  }
 0x166   : > { %1251 = vst.msk [vmem:[#allocation2 + $0x18] sm:$0x7] %vm1202_vm4, %v1249_v44  ;;  %1826 = vrot.lane.b32.xlu0 %v3317_v32, %s3089_s15  ;;  %1636 = vrot.lane.b32.xlu1 %v1199_v30, %s3090_s16  ;;  %s3099_s15 = smov 14  }
 0x168   : > { %v1258_v38 = vpop.permute.xlu0 %1257  ;;  %v1213_v45 = vpop.permute.xlu1 %1212 }
 0x169   : > { %v1215_v46 = vsel %vm1214_vm6, %v1211_v41, %v1213_v45  ;;  %vm1349_vm6 = vcmask 564224  }
 0x16a   : > { %1818 = vrot.lane.b32.xlu0 %v3334_v42, %s3091_s17  ;;  %1217 = vst.msk [vmem:[#allocation2 + $0x6] sm:$0x7] %vm1202_vm4, %v1215_v46  ;;  %1653 = vrot.lane.b32.xlu1 %v1200_v31, %s3092_s18 }
 0x16c   : > { %v1253_v47 = vpop.permute.xlu0 %1252  ;;  %v1223_v48 = vpop.permute.xlu1 %1222 }
 0x16d   : > { %1255 = vst.msk [vmem:[#allocation2 + $0x1b] sm:$0x7] %vm1202_vm4, %v1253_v47  ;;  %1225 = vst.msk [vmem:[#allocation2 + $0xc] sm:$0x7] %vm1202_vm4, %v1223_v48 }
 0x16e   : > { %1810 = vrot.lane.b32.xlu0 %v3334_v42, %s3093_s24  ;;  %1830 = vrot.lane.b32.xlu1 %v3317_v32, %s3094_s25  ;;  %s3100_s25 = smov 59  }
 0x170   : > { %v1228_v50 = vpop.permute.xlu0 %1227  ;;  %v1309_v52 = vpop.permute.xlu1 %1308 }
 0x171   : > { %v1232_v51 = vsel %vm1231_vm7, %v1228_v50, %v1230_v39  ;;  %vm1649_vm7 = vcmask 154624  }
 0x172   : > { %1234 = vst.msk [vmem:[#allocation2 + $0xf] sm:$0x7] %vm1202_vm4, %v1232_v51  ;;  %1528 = vperm.xlu0 %2942, %v1525_v49   ;;  %1820 = vrot.lane.b32.xlu1 %v3317_v32, %s3091_s17 }
 0x174   : > { %v1219_v54 = vpop.permute.xlu0 %1218  ;;  %v1300_v55 = vpop.permute.xlu1 %1299 }
 0x175   : > { %1221 = vst.msk [vmem:[#allocation2 + $0x9] sm:$0x7] %vm1202_vm4, %v1219_v54  ;;  %1302 = vst.msk [vmem:[#allocation2 + $0x33] sm:$0x7] %vm1202_vm4, %v1300_v55 }
 0x176   : > { %1611 = vperm.xlu0 %2942, %v1608_v53   ;;  %1814 = vrot.lane.b32.xlu1 %v3334_v42, %s3095_s13  ;;  %v1700_v42 = vld [vmem:[%s3950_s5] sm:$0x1f] }
 0x178   : > { %v1304_v32 = vpop.permute.xlu0 %1303  ;;  %v1260_v58 = vpop.permute.xlu1 %1259 }
 0x179   : > { %v3421_v57 = vld [vmem:[#allocation2 + $0x10] sm:$0xff]  ;;  %1306 = vst.msk [vmem:[#allocation2 + $0x36] sm:$0x7] %vm1202_vm4, %v1304_v32  ;;  %v3428_v60 = vsel %vm1261_vm8, %v1258_v38, %v1260_v58  ;;  %vm1850_vm8 = vcmask 334848  }
 0x17a   : > { %1449 = vst.msk [vmem:[#allocation2 + $0x15] sm:$0x7] %vm1202_vm4, %v1300_v55  ;;  %1618 = vperm.xlu0 %2942, %v1615_v56   ;;  %1264 = vst.msk [vmem:[#allocation2 + $0x1e] sm:$0x7] %vm1202_vm4, %v3428_v60  ;;  %1346 = vperm.xlu1 %2943, %v1343_v59  }
 0x17c   : > { %v1294_v61 = vpop.permute.xlu0 %1293  ;;  %v3435_v62 = vpop.permute.xlu1 %1269  ;;  %v3472_v16 = vld [vmem:[#allocation2 + $0x8] sm:$0xff] }
 0x17d   : > { %1272 = vst.msk [vmem:[#allocation2 + $0x24] sm:$0x7] %vm1202_vm4, %v3435_v62 }
 0x17e   : > { %1703 = vperm.xlu0 %2942, %v1700_v42   ;;  %1431 = vperm.xlu1 %2943, %v1428_v63  }
 0x180   : > { %v1275_v2 = vpop.permute.xlu0 %1274  ;;  %v1311_v4 = vpop.permute.xlu1 %1310 }
 0x181   : > { %v3448_v6 = vld [vmem:[#allocation2 + $0x18] sm:$0xff]  ;;  %v1313_v7 = vsel %vm1312_vm9, %v1309_v52, %v1311_v4  ;;  %vm1838_vm9 = vcmask 56320  }
 0x182   : > { %1786 = vperm.xlu0 %2942, %v1783_v1   ;;  %1315 = vst.msk [vmem:[#allocation2 + $0x39] sm:$0x7] %vm1202_vm4, %v1313_v7  ;;  %1451 = vst.msk [vmem:[#allocation2 + $0x1b] sm:$0x7] %vm1202_vm4, %v1313_v7  ;;  %1438 = vperm.xlu1 %2943, %v1435_v3  }
 0x183   : > { %1450 = vst.msk [vmem:[#allocation2 + $0x18] sm:$0x7] %vm1202_vm4, %v1304_v32 }
 0x184   : > { %v3456_v9 = vpop.permute.xlu0 %1265  ;;  %v3463_v12 = vpop.permute.xlu1 %1316 }
 0x185   : > { %1268 = vst.msk [vmem:[#allocation2 + $0x21] sm:$0x7] %vm1202_vm4, %v3456_v9  ;;  %1319 = vst.msk [vmem:[#allocation2 + $0x3c] sm:$0x7] %vm1202_vm4, %v3463_v12 }
 0x186   : > { %1793 = vperm.xlu0 %2942, %v1790_v8   ;;  %1875 = vperm.xlu1 %2943, %v1872_v10   ;;  %v1515_v10 = vld [vmem:[%s3949_s4] sm:$0x1f] }
 0x188   : > { %v1322_v13 = vpop.permute.xlu0 %1321  ;;  %v1292_v5 = vpop.permute.xlu1 %1291 }
 0x189   : > { %v1296_v15 = vsel %vm1295_vm10, %v1292_v5, %v1294_v61  ;;  %vm1822_vm10 = vcmask 162816  }
 0x18a   : > { %1298 = vst.msk [vmem:[#allocation2 + $0x30] sm:$0x7] %vm1202_vm4, %v1296_v15  ;;  %1448 = vst.msk [vmem:[#allocation2 + $0x12] sm:$0x7] %vm1202_vm4, %v1296_v15  ;;  %1958 = vperm.xlu1 %2943, %v1955_v14  }
 0x18c   : > { %v1283_v17 = vpop.permute.xlu0 %1282  ;;  %v1277_v19 = vpop.permute.xlu1 %1276 }
 0x18d   : > { %1285 = vst.msk [vmem:[#allocation2 + $0x2a] sm:$0x7] %vm1202_vm4, %v1283_v17  ;;  %1446 = vst.msk [vmem:[#allocation2 + $0xc] sm:$0x7] %vm1202_vm4, %v1283_v17  ;;  %v1279_v20 = vsel %vm1278_vm11, %v1275_v2, %v1277_v19  ;;  %vm1969_vm11 = vcmask 372736  }
 0x18e   : > { %1281 = vst.msk [vmem:[#allocation2 + $0x27] sm:$0x7] %vm1202_vm4, %v1279_v20  ;;  %1445 = vst.msk [vmem:[#allocation2 + $0x9] sm:$0x7] %vm1202_vm4, %v1279_v20  ;;  %1965 = vperm.xlu1 %2943, %v1962_v18  }
 0x190   : > { %v3481_v21 = vpop.permute.xlu0 %1329  ;;  %v1287_v23 = vpop.permute.xlu1 %1286 }
 0x191   : > { %1332 = vst.msk [vmem:[#allocation2 + $0x42] sm:$0x7] %vm1202_vm4, %v3481_v21  ;;  %1289 = vst.msk [vmem:[#allocation2 + $0x2d] sm:$0x7] %vm1202_vm4, %v1287_v23  ;;  %v1340_v33 = vld [vmem:[#allocation2 + $0x30] sm:$0xff] }
 0x192   : > { %1447 = vst.msk [vmem:[#allocation2 + $0xf] sm:$0x7] %vm1202_vm4, %v1287_v23 }
 0x194   : > { %v1491_v24 = vpop.permute.xlu0 %1490  ;;  %v1324_v25 = vpop.permute.xlu1 %1323 }
 0x195   : > { %v1338_v26 = vld [vmem:[#allocation2 + $0x20] sm:$0xff]  ;;  %v3487_v27 = vsel %vm1325_vm12, %v1322_v13, %v1324_v25  ;;  %vm1987_vm12 = vcmask 1043456  }
 0x196   : > { %1452 = vst.msk [vmem:[#allocation2 + $0x1e] sm:$0x7] %vm1202_vm4, %v3463_v12  ;;  %1454 = vst.msk [vmem:[#allocation2 + $0x24] sm:$0x7] %vm1202_vm4, %v3481_v21 }
 0x197   : > { %1328 = vst.msk [vmem:[#allocation2 + $0x3f] sm:$0x7] %vm1202_vm4, %v3487_v27  ;;  %1453 = vst.msk [vmem:[#allocation2 + $0x21] sm:$0x7] %vm1202_vm4, %v3487_v27 }
 0x198   : > { %v1486_v28 = vpop.permute.xlu0 %1485  ;;  %v1480_v29 = vpop.permute.xlu1 %1479  ;;  %v1339_v41 = vld [vmem:[#allocation2 + $0x28] sm:$0xff] }
 0x199   : > { %v3505_v40 = vld [vmem:[#allocation2 + $0x10] sm:$0xff] }
 0x19c   : > { %v1508_v30 = vpop.permute.xlu0 %1507  ;;  %v1461_v34 = vpop.permute.xlu1 %1460 }
 0x19d   : > { %v3497_v36 = vld [vmem:[#allocation2 + $0x18] sm:$0xff] }
 0x19e   : > { %v1341_v35 = vld [vmem:[#allocation2 + $0x38] sm:$0xff]  ;;  %v1342_v37 = vld [vmem:[#allocation2 + $0x40] sm:$0x1f]  ;;  %1631 = vst.msk [vmem:[#allocation2 + $0x18] sm:$0x7] %vm1622_vm13, %v1486_v28 }
 0x19f   : > { %1488 = vst.msk [vmem:[#allocation2 + $0x36] sm:$0x7] %vm1202_vm4, %v1486_v28  ;;  %2742 = vmatpush3.msk.msra.mxu0 %vm1353_vm14, %v1342_v37 }
 0x1a0   : > { %2743 = vmatprep.subr.mxu0 %v3042_v11  ;;  %v1478_v31 = vpop.permute.xlu0 %1477  ;;  %v3503_v39 = vpop.permute.xlu1 %1502 }
 0x1a1   : > { %2744 = vmatpush3.msra.mxu0 %v1341_v35  ;;  %v1482_v0 = vsel %vm1481_vm15, %v1478_v31, %v1480_v29  ;;  %1505 = vst.msk [vmem:[#allocation2 + $0x3f] sm:$0x7] %vm1202_vm4, %v3503_v39 }
 0x1a2   : > { %1484 = vst.msk [vmem:[#allocation2 + $0x33] sm:$0x7] %vm1202_vm4, %v1482_v0  ;;  %2745 = vmatprep.subr.mxu0 %v3042_v11 }
 0x1a3   : > { %1630 = vst.msk [vmem:[#allocation2 + $0x15] sm:$0x7] %vm1622_vm13, %v1482_v0  ;;  %2746 = vmatpush3.msra.mxu0 %v1340_v33 }
 0x1a4   : > { %2747 = vmatprep.subr.mxu0 %v3042_v11  ;;  %v1473_v22 = vpop.permute.xlu0 %1472  ;;  %v1493_v43 = vpop.permute.xlu1 %1492 }
 0x1a5   : > { %2748 = vmatpush3.msra.mxu0 %v1339_v41  ;;  %1475 = vst.msk [vmem:[#allocation2 + $0x30] sm:$0x7] %vm1202_vm4, %v1473_v22  ;;  %v1495_v44 = vsel %vm1494_vm0, %v1491_v24, %v1493_v43 }
 0x1a6   : > { %1629 = vst.msk [vmem:[#allocation2 + $0x12] sm:$0x7] %vm1622_vm13, %v1473_v22  ;;  %2749 = vmatprep.subr.mxu0 %v3042_v11  ;;  %1632 = vst.msk [vmem:[#allocation2 + $0x1b] sm:$0x7] %vm1622_vm13, %v1495_v44 }
 0x1a7   : > { %1497 = vst.msk [vmem:[#allocation2 + $0x39] sm:$0x7] %vm1202_vm4, %v1495_v44  ;;  %2750 = vmatpush3.msra.mxu0 %v1338_v26  ;;  %v1690_v44 = vld [vmem:[%s3949_s4] sm:$0x1f] }
 0x1a8   : > { %2751 = vmatprep.subr.mxu0 %v3042_v11  ;;  %v1463_v38 = vpop.permute.xlu0 %1462  ;;  %v3520_v45 = vpop.permute.xlu1 %1498 }
 0x1a9   : > { %2752 = vmatpush3.msra.mxu0 %v3448_v6  ;;  %v3522_v46 = vsel %vm1464_vm1, %v1461_v34, %v1463_v38  ;;  %1501 = vst.msk [vmem:[#allocation2 + $0x3c] sm:$0x7] %vm1202_vm4, %v3520_v45 }
 0x1aa   : > { %1467 = vst.msk [vmem:[#allocation2 + $0x2a] sm:$0x7] %vm1202_vm4, %v3522_v46  ;;  %2753 = vmatprep.subr.mxu0 %v3042_v11 }
 0x1ab   : > { %2754 = vmatpush3.msra.mxu0 %v3421_v57  ;;  %v1333_v57 = vld [vmem:[%s3949_s4] sm:$0x1f] }
 0x1ac   : > { %2755 = vmatprep.subr.mxu0 %v3042_v11  ;;  %v1456_v47 = vpop.permute.xlu0 %1455  ;;  %v1510_v48 = vpop.permute.xlu1 %1509  ;;  %v1522_v61 = vld [vmem:[#allocation2 + $0x30] sm:$0xff] }
 0x1ad   : > { %2756 = vmatpush3.msra.mxu0 %v3472_v16  ;;  %1458 = vst.msk [vmem:[#allocation2 + $0x27] sm:$0x7] %vm1202_vm4, %v1456_v47  ;;  %v3533_v49 = vsel %vm1511_vm2, %v1508_v30, %v1510_v48 }
 0x1ae   : > { %2757 = vmatprep.subr.mxu0 %v3042_v11  ;;  %1514 = vst.msk [vmem:[#allocation2 + $0x42] sm:$0x7] %vm1202_vm4, %v3533_v49 }
 0x1b0   : > { %v1683_v50 = vpop.permute.xlu0 %1682  ;;  %v1206_v51 = vpop.permute.xlu1 %1205  ;;  %v1523_v55 = vld [vmem:[#allocation2 + $0x38] sm:$0xff] }
 0x1b1   : > { %1208 = vst.msk [vmem:[#allocation2 + $0x3] sm:$0x7] %vm1202_vm4, %v1206_v51 }
 0x1b4   : > { %v1520_v52 = vld [vmem:[#allocation2 + $0x20] sm:$0xff]  ;;  %v3539_v53 = vpop.permute.xlu0 %1678  ;;  %v1469_v54 = vpop.permute.xlu1 %1468 }
 0x1b5   : > { %1635 = vst.msk [vmem:[#allocation2 + $0x24] sm:$0x7] %vm1622_vm13, %v3533_v49  ;;  %1633 = vst.msk [vmem:[#allocation2 + $0x1e] sm:$0x7] %vm1622_vm13, %v3520_v45  ;;  %v1524_v56 = vld [vmem:[#allocation2 + $0x40] sm:$0x1f] }
 0x1b6   : > { %1634 = vst.msk [vmem:[#allocation2 + $0x21] sm:$0x7] %vm1622_vm13, %v3503_v39  ;;  %2763 = vmatpush3.msk.msra.mxu1 %vm1353_vm14, %v1524_v56  ;;  %1681 = vst.msk [vmem:[#allocation2 + $0x3f] sm:$0x7] %vm1622_vm13, %v3539_v53 }
 0x1b7   : > { %1471 = vst.msk [vmem:[#allocation2 + $0x2d] sm:$0x7] %vm1202_vm4, %v1469_v54  ;;  %2764 = vmatprep.subr.mxu1 %v3042_v11 }
 0x1b8   : > { %v1859_v32 = vpop.permute.xlu0 %1858  ;;  %v1334_v58 = vld [vmem:[#allocation2] sm:$0xff]  ;;  %2765 = vmatpush3.msra.mxu1 %v1523_v55  ;;  %v1685_v59 = vpop.permute.xlu1 %1684 }
 0x1b9   : > { %1442 = vst.msk [vmem:[#allocation2] sm:$0x7] %vm1202_vm4, %v3428_v60  ;;  %1443 = vst.msk [vmem:[#allocation2 + $0x3] sm:$0x7] %vm1202_vm4, %v3456_v9  ;;  %v3561_v42 = vsel %vm1686_vm5, %v1683_v50, %v1685_v59  ;;  %2758 = vmatpush3.msra.mxu0 %v1334_v58  ;;  %2766 = vmatprep.subr.mxu1 %v3042_v11 }
 0x1ba   : > { %1444 = vst.msk [vmem:[#allocation2 + $0x6] sm:$0x7] %vm1202_vm4, %v3435_v62  ;;  %2760 = vmatmul.mubr.msk.f32.vlgmr.msra.gmra.mxu0 %vm1349_vm6, %v1333_v57  ;;  %2767 = vmatpush3.msra.mxu1 %v1522_v61  ;;  %vm1666_vm4 = vcmask 48128  }
 0x1bb   : > { %1689 = vst.msk [vmem:[#allocation2 + $0x42] sm:$0x7] %vm1622_vm13, %v3561_v42  ;;  %2768 = vmatprep.subr.mxu1 %v3042_v11  ;;  %2783 = vmatprep.subr.mxu0 %v3042_v11 }
 0x1bc   : > { %v3567_v63 = vpop.permute.xlu0 %1836  ;;  %v3571_v60 = vpop.permute.xlu1 %1674  ;;  %2801 = vmatprep.mubr.msk.f32.mxu0 %vm3043_vm3, %v3042_v11  ;;  %v3597_v8 = vld [vmem:[#allocation2 + $0x18] sm:$0xff] }
 0x1bd   : > { %1677 = vst.msk [vmem:[#allocation2 + $0x3c] sm:$0x7] %vm1622_vm13, %v3571_v60 }
 0x1be   : > { %v1521_v62 = vld [vmem:[#allocation2 + $0x28] sm:$0xff] }
 0x1bf   : > { %2769 = vmatpush3.msra.mxu1 %v1521_v62 }
 0x1c0   : > { %2770 = vmatprep.subr.mxu1 %v3042_v11  ;;  %v1849_v1 = vpop.permute.xlu0 %1848  ;;  %v3579_v4 = vpop.permute.xlu1 %1854 }
 0x1c1   : > { %2771 = vmatpush3.msra.mxu1 %v1520_v52  ;;  %v1516_v2 = vld [vmem:[#allocation2] sm:$0xff]  ;;  %v1517_v3 = vld [vmem:[#allocation2 + $0x8] sm:$0xff] }
 0x1c2   : > { %2772 = vmatprep.subr.mxu1 %v3042_v11  ;;  %1624 = vst.msk [vmem:[#allocation2 + $0x3] sm:$0x7] %vm1622_vm13, %v3487_v27  ;;  %1623 = vst.msk [vmem:[#allocation2] sm:$0x7] %vm1622_vm13, %v3463_v12  ;;  %v1699_v6 = vld [vmem:[#allocation2 + $0x40] sm:$0x1f] }
 0x1c3   : > { %1628 = vst.msk [vmem:[#allocation2 + $0xf] sm:$0x7] %vm1622_vm13, %v1469_v54  ;;  %1625 = vst.msk [vmem:[#allocation2 + $0x6] sm:$0x7] %vm1622_vm13, %v3481_v21  ;;  %2773 = vmatpush3.msra.mxu1 %v3497_v36  ;;  %2784 = vmatpush3.msk.msra.mxu0 %vm1353_vm14, %v1699_v6 }
 0x1c4   : > { %1626 = vst.msk [vmem:[#allocation2 + $0x9] sm:$0x7] %vm1622_vm13, %v1456_v47  ;;  %1627 = vst.msk [vmem:[#allocation2 + $0xc] sm:$0x7] %vm1622_vm13, %v3522_v46  ;;  %2774 = vmatprep.subr.mxu1 %v3042_v11  ;;  %v1671_v7 = vpop.permute.xlu0 %1670  ;;  %2785 = vmatprep.subr.mxu0 %v3042_v11  ;;  %v3601_v9 = vpop.permute.xlu1 %1834 }
 0x1c5   : > { %1861 = vst.msk [vmem:[#allocation2 + $0x42] sm:$0x7] %vm1622_vm13, %v1859_v32  ;;  %2775 = vmatpush3.msra.mxu1 %v3505_v40  ;;  %1673 = vst.msk [vmem:[#allocation2 + $0x39] sm:$0x7] %vm1622_vm13, %v1671_v7  ;;  %v1839_v31 = vsel %vm1838_vm9, %v3601_v9, %v3567_v63 }
 0x1c6   : > { %2776 = vmatprep.subr.mxu1 %v3042_v11  ;;  %1806 = vst.msk [vmem:[#allocation2 + $0x1b] sm:$0x7] %vm1622_vm13, %v1671_v7 }
 0x1c7   : > { %2777 = vmatpush3.msra.mxu1 %v1517_v3 }
 0x1c8   : > { %2778 = vmatprep.subr.mxu1 %v3042_v11  ;;  %v1641_v12 = vpop.permute.xlu0 %1640  ;;  %v1847_v13 = vpop.permute.xlu1 %1846 }
 0x1c9   : > { %2779 = vmatpush3.msra.mxu1 %v1516_v2  ;;  %1643 = vst.msk [vmem:[#allocation2 + $0x2a] sm:$0x7] %vm1622_vm13, %v1641_v12  ;;  %v1851_v27 = vsel %vm1850_vm8, %v1847_v13, %v1849_v1 }
 0x1ca   : > { %2781 = vmatmul.mubr.msk.f32.vlgmr.msra.gmra.mxu1 %vm1349_vm6, %v1515_v10  ;;  %2804 = vmatprep.subr.mxu1 %v3042_v11  ;;  %v3613_v5 = vld [vmem:[#allocation2] sm:$0xff]  ;;  %v1693_v18 = vld [vmem:[#allocation2 + $0x10] sm:$0xff] }
 0x1cb   : > { %v3611_v14 = vld [vmem:[#allocation2 + $0x8] sm:$0xff]  ;;  %1797 = vst.msk [vmem:[#allocation2] sm:$0x7] %vm1622_vm13, %v3520_v45  ;;  %1798 = vst.msk [vmem:[#allocation2 + $0x3] sm:$0x7] %vm1622_vm13, %v3503_v39  ;;  %2822 = vmatprep.mubr.msk.f32.mxu1 %vm3043_vm3, %v3042_v11 }
 0x1cc   : > { %1801 = vst.msk [vmem:[#allocation2 + $0xc] sm:$0x7] %vm1622_vm13, %v1641_v12  ;;  %1799 = vst.msk [vmem:[#allocation2 + $0x6] sm:$0x7] %vm1622_vm13, %v3533_v49  ;;  %v1663_v15 = vpop.permute.xlu0 %1662  ;;  %v1843_v16 = vpop.permute.xlu1 %1842  ;;  %v1862_v49 = vld [vmem:[%s3949_s4] sm:$0x1f] }
 0x1d0   : > { %v1658_v17 = vpop.permute.xlu0 %1657  ;;  %v1665_v19 = vpop.permute.xlu1 %1664 }
 0x1d1   : > { %1660 = vst.msk [vmem:[#allocation2 + $0x33] sm:$0x7] %vm1622_vm13, %v1658_v17  ;;  %1804 = vst.msk [vmem:[#allocation2 + $0x15] sm:$0x7] %vm1622_vm13, %v1658_v17  ;;  %v1667_v20 = vsel %vm1666_vm4, %v1663_v15, %v1665_v19 }
 0x1d2   : > { %1669 = vst.msk [vmem:[#allocation2 + $0x36] sm:$0x7] %vm1622_vm13, %v1667_v20  ;;  %1805 = vst.msk [vmem:[#allocation2 + $0x18] sm:$0x7] %vm1622_vm13, %v1667_v20 }
 0x1d3   : > { %v1863_v50 = vld [vmem:[#allocation2] sm:$0xff] }
 0x1d4   : > { %v1648_v21 = vpop.permute.xlu0 %1647  ;;  %v1646_v23 = vpop.permute.xlu1 %1645 }
 0x1d5   : > { %v1650_v24 = vsel %vm1649_vm7, %v1646_v23, %v1648_v21 }
 0x1d6   : > { %1652 = vst.msk [vmem:[#allocation2 + $0x2d] sm:$0x7] %vm1622_vm13, %v1650_v24  ;;  %1802 = vst.msk [vmem:[#allocation2 + $0xf] sm:$0x7] %vm1622_vm13, %v1650_v24 }
 0x1d8   : > { %v1827_v25 = vpop.permute.xlu0 %1826  ;;  %v1637_v26 = vpop.permute.xlu1 %1636 }
 0x1d9   : > { %1639 = vst.msk [vmem:[#allocation2 + $0x27] sm:$0x7] %vm1622_vm13, %v1637_v26  ;;  %v1698_v28 = vld [vmem:[#allocation2 + $0x38] sm:$0xff]  ;;  %1800 = vst.msk [vmem:[#allocation2 + $0x9] sm:$0x7] %vm1622_vm13, %v1637_v26 }
 0x1da   : > { %2786 = vmatpush3.msra.mxu0 %v1698_v28  ;;  %1845 = vst.msk [vmem:[#allocation2 + $0x39] sm:$0x7] %vm1622_vm13, %v1843_v16  ;;  %1853 = vst.msk [vmem:[#allocation2 + $0x3c] sm:$0x7] %vm1622_vm13, %v1851_v27  ;;  %v1974_v28 = vld [vmem:[%s3953_s8] sm:$0xff] }
 0x1db   : > { %1857 = vst.msk [vmem:[#allocation2 + $0x3f] sm:$0x7] %vm1622_vm13, %v3579_v4  ;;  %2787 = vmatprep.subr.mxu0 %v3042_v11 }
 0x1dc   : > { %v1819_v29 = vpop.permute.xlu0 %1818  ;;  %v1654_v30 = vpop.permute.xlu1 %1653 }
 0x1dd   : > { %1656 = vst.msk [vmem:[#allocation2 + $0x30] sm:$0x7] %vm1622_vm13, %v1654_v30  ;;  %1803 = vst.msk [vmem:[#allocation2 + $0x12] sm:$0x7] %vm1622_vm13, %v1654_v30 }
 0x1e0   : > { %v1811_v33 = vpop.permute.xlu0 %1810  ;;  %v1831_v34 = vpop.permute.xlu1 %1830  ;;  %v1696_v35 = vld [vmem:[#allocation2 + $0x28] sm:$0xff]  ;;  %v1695_v36 = vld [vmem:[#allocation2 + $0x20] sm:$0xff] }
 0x1e1   : > { %1808 = vst.msk [vmem:[#allocation2 + $0x21] sm:$0x7] %vm1622_vm13, %v3539_v53  ;;  %1809 = vst.msk [vmem:[#allocation2 + $0x24] sm:$0x7] %vm1622_vm13, %v3561_v42  ;;  %v1864_v48 = vld [vmem:[#allocation2 + $0x8] sm:$0xff]  ;;  %v2078_v42 = vld [vmem:[%s3954_s9] sm:$0xff] }
 0x1e2   : > { %v1871_v37 = vld [vmem:[#allocation2 + $0x40] sm:$0x1f]  ;;  %1813 = vst.msk [vmem:[#allocation2 + $0x27] sm:$0x7] %vm1622_vm13, %v1811_v33  ;;  %1807 = vst.msk [vmem:[#allocation2 + $0x1e] sm:$0x7] %vm1622_vm13, %v3571_v60 }
 0x1e3   : > { %2805 = vmatpush3.msk.msra.mxu1 %vm1353_vm14, %v1871_v37 }
 0x1e4   : > { %2806 = vmatprep.subr.mxu1 %v3042_v11  ;;  %v1821_v39 = vpop.permute.xlu1 %1820  ;;  %v1697_v40 = vld [vmem:[#allocation2 + $0x30] sm:$0xff] }
 0x1e5   : > { %v1823_v0 = vsel %vm1822_vm10, %v1819_v29, %v1821_v39  ;;  %2788 = vmatpush3.msra.mxu0 %v1697_v40  ;;  %1829 = vst.msk [vmem:[#allocation2 + $0x30] sm:$0x7] %vm1622_vm13, %v1827_v25  ;;  %1833 = vst.msk [vmem:[#allocation2 + $0x33] sm:$0x7] %vm1622_vm13, %v1831_v34  ;;  %v1865_v47 = vld [vmem:[#allocation2 + $0x10] sm:$0xff] }
 0x1e6   : > { %1841 = vst.msk [vmem:[#allocation2 + $0x36] sm:$0x7] %vm1622_vm13, %v1839_v31  ;;  %2789 = vmatprep.subr.mxu0 %v3042_v11  ;;  %1825 = vst.msk [vmem:[#allocation2 + $0x2d] sm:$0x7] %vm1622_vm13, %v1823_v0 }
 0x1e7   : > { %2790 = vmatpush3.msra.mxu0 %v1696_v35 }
 0x1e8   : > { %v1815_v41 = vpop.permute.xlu1 %1814  ;;  %2791 = vmatprep.subr.mxu0 %v3042_v11 }
 0x1e9   : > { %1817 = vst.msk [vmem:[#allocation2 + $0x2a] sm:$0x7] %vm1622_vm13, %v1815_v41  ;;  %2792 = vmatpush3.msra.mxu0 %v1695_v36  ;;  %v1867_v45 = vld [vmem:[#allocation2 + $0x20] sm:$0xff]  ;;  %v1866_v46 = vld [vmem:[#allocation2 + $0x18] sm:$0xff] }
 0x1ea   : > { %2793 = vmatprep.subr.mxu0 %v3042_v11 }
 0x1eb   : > { %2794 = vmatpush3.msra.mxu0 %v3597_v8 }
 0x1ec   : > { %2795 = vmatprep.subr.mxu0 %v3042_v11 }
 0x1ed   : > { %v1870_v22 = vld [vmem:[#allocation2 + $0x38] sm:$0xff]  ;;  %2796 = vmatpush3.msra.mxu0 %v1693_v18  ;;  %v1869_v43 = vld [vmem:[#allocation2 + $0x30] sm:$0xff]  ;;  %v1529_v59 = vpop.permute.xlu0 %1528 }
 0x1ee   : > { %2807 = vmatpush3.msra.mxu1 %v1870_v22  ;;  %2797 = vmatprep.subr.mxu0 %v3042_v11 }
 0x1ef   : > { %2808 = vmatprep.subr.mxu1 %v3042_v11  ;;  %2798 = vmatpush3.msra.mxu0 %v3611_v14 }
 0x1f0   : > { %2809 = vmatpush3.msra.mxu1 %v1869_v43  ;;  %2799 = vmatprep.subr.mxu0 %v3042_v11  ;;  %v1868_v38 = vld [vmem:[#allocation2 + $0x28] sm:$0xff] }
 0x1f1   : > { %2810 = vmatprep.subr.mxu1 %v3042_v11  ;;  %2800 = vmatpush3.msra.mxu0 %v3613_v5  ;;  %v1612_v61 = vpop.permute.xlu0 %1611 }
 0x1f2   : > { %2811 = vmatpush3.msra.mxu1 %v1868_v38  ;;  %2802 = vmatmul.mubr.msk.f32.vlgmr.msra.gmra.mxu0 %vm1349_vm6, %v1690_v44 }
 0x1f3   : > { %2812 = vmatprep.subr.mxu1 %v3042_v11  ;;  %2825 = vmatprep.subr.mxu0 %v3042_v11 }
 0x1f4   : > { %2813 = vmatpush3.msra.mxu1 %v1867_v45  ;;  %2831 = vmatprep.mubr.msk.f32.mxu0 %vm3043_vm3, %v3042_v11  ;;  %v2315_v45 = vld [vmem:[%s3955_s10 + $0xf8] sm:$0xff] }
 0x1f5   : > { %2814 = vmatprep.subr.mxu1 %v3042_v11  ;;  %v1347_v51 = vpop.permute.xlu1 %1346  ;;  %v1619_v3 = vpop.permute.xlu0 %1618 }
 0x1f6   : > { %2815 = vmatpush3.msra.mxu1 %v1866_v46  ;;  %v2299_v46 = vld [vmem:[%s3955_s10 + $0x78] sm:$0xff] }
 0x1f7   : > { %2816 = vmatprep.subr.mxu1 %v3042_v11 }
 0x1f8   : > { %2817 = vmatpush3.msra.mxu1 %v1865_v47  ;;  %v2314_v47 = vld [vmem:[%s3955_s10 + $0xf0] sm:$0xff] }
 0x1f9   : > { %2818 = vmatprep.subr.mxu1 %v3042_v11  ;;  %v1432_v52 = vpop.permute.xlu1 %1431  ;;  %v1704_v6 = vpop.permute.xlu0 %1703 }
 0x1fa   : > { %2819 = vmatpush3.msra.mxu1 %v1864_v48  ;;  %v2298_v48 = vld [vmem:[%s3955_s10 + $0x70] sm:$0xff] }
 0x1fb   : > { %2820 = vmatprep.subr.mxu1 %v3042_v11 }
 0x1fc   : > { %2821 = vmatpush3.msra.mxu1 %v1863_v50  ;;  %v2328_v50 = vld [vmem:[%s3955_s10 + $0x160] sm:$0xff] }
 0x1fd   : > { %2823 = vmatmul.mubr.msk.f32.vlgmr.msra.gmra.mxu1 %vm1349_vm6, %v1862_v49  ;;  %2834 = vmatprep.subr.mxu1 %v3042_v11  ;;  %v1439_v57 = vpop.permute.xlu1 %1438  ;;  %v1787_v7 = vpop.permute.xlu0 %1786  ;;  %v2313_v49 = vld [vmem:[%s3955_s10 + $0xe8] sm:$0xff]  ;;  %vm2212_vm6 = vcmask 736256  }
 0x1fe   : > { %2840 = vmatprep.mubr.msk.f32.mxu1 %vm3043_vm3, %v3042_v11 }
 0x201   : > { %v1876_v13 = vpop.permute.xlu1 %1875  ;;  %v1794_v5 = vpop.permute.xlu0 %1793 }
 0x205   : > { %v1959_v17 = vpop.permute.xlu1 %1958 }
 0x209   : > { %v1966_v24 = vpop.permute.xlu1 %1965 }
 0x27a   : > { %v1423_v53 = vpop.f32.mrf.mxu0 }
 0x27b   : > { %v1424_v54 = vadd.f32 %v1423_v53, %v1347_v51  ;;  %v2297_v51 = vld [vmem:[%s3955_s10 + $0x68] sm:$0xff]  ;;  %v2312_v53 = vld [vmem:[%s3955_s10 + $0xe0] sm:$0xff] }
 0x27c   : > { %v2761_v55 = vpop.f32.mrf.mxu0 }
 0x27d   : > { %v1427_v56 = vmax.f32 %v1424_v54, 0.0  ;;  %v2296_v54 = vld [vmem:[%s3955_s10 + $0x60] sm:$0xff]  ;;  %v2311_v55 = vld [vmem:[%s3955_s10 + $0xd8] sm:$0xff] }
 0x27f   : > { %v1434_v32 = vmul.f32 %v1432_v52, %v1427_v56  ;;  %v2327_v52 = vld [vmem:[%s3955_s10 + $0x158] sm:$0xff]  ;;  %v2173_v56 = vlaneseq }
 0x281   : > { %v1441_v58 = vadd.f32 %v1439_v57, %v1434_v32  ;;  %v3096_v32 = vmov 1966171168   ;;  %vm2204_vm13 = vcmp.ge.s32.totalorder %v2173_v56, 45  ;;  %vm2205_vm14 = vcmp.lt.s32.totalorder %v2173_v56, 90 }
 0x282   : > { %v2180_v57 = vunpack.c.l.s4 %v3096_v32  ;;  %vm2206_vm15 = vmand %vm2204_vm13, %vm2205_vm14  ;;  %vm3873_vm0 = vcmp.ge.s32.totalorder %v2173_v56, 90  ;;  %vm3878_vm1 = vcmp.lt.s32.totalorder %v2173_v56, 135  ;;  %vm3883_vm2 = vcmp.ge.s32.totalorder %v2173_v56, 7 }
 0x283   : > { %1970 = vst.msk [vmem:[#allocation3] sm:$0x1f] %vm1969_vm11, %v1441_v58  ;;  %2065 = vrot.lane.b32.xlu1 %v1441_v58, %s3080_s23  ;;  %vm3888_vm5 = vcmp.lt.s32.totalorder %v2173_v56, 52  ;;  %vm2217_vm4 = vmand %vm3873_vm0, %vm3878_vm1  ;;  %vm3901_vm8 = vcmp.ge.s32.totalorder %v2173_v56, 52  ;;  %vm3906_vm9 = vcmp.lt.s32.totalorder %v2173_v56, 97  ;;  %vm2260_vm13 = vcmask 793600  }
 0x284   : > { %vm2225_vm7 = vmand %vm3883_vm2, %vm3888_vm5  ;;  %vm2279_vm0 = vcmp.ge.s32.totalorder %v2173_v56, 59  ;;  %vm2280_vm1 = vcmp.lt.s32.totalorder %v2173_v56, 104 }
 0x285   : > { %vm2247_vm14 = vmand %vm3901_vm8, %vm3906_vm9 }
 0x286   : > { %vm2281_vm5 = vmand %vm2279_vm0, %vm2280_vm1 }
 0x287   : > { %2081 = vperm.xlu1 %2943, %v2078_v42  }
 0x28a   : > { %v1603_v63 = vpop.f32.mrf.mxu1 }
 0x28b   : > { %v1604_v60 = vadd.f32 %v1603_v63, %v1529_v59  ;;  %v2181_v59 = vunpack.c.0.s8 %v2180_v57  ;;  %v2310_v63 = vld [vmem:[%s3955_s10 + $0xd0] sm:$0xff] }
 0x28c   : > { %v2782_v62 = vpop.f32.mrf.mxu1 }
 0x28d   : > { %v1607_v1 = vmax.f32 %v1604_v60, 0.0  ;;  %v2326_v60 = vld [vmem:[%s3955_s10 + $0x150] sm:$0xff] }
 0x28f   : > { %v1614_v2 = vmul.f32 %v1612_v61, %v1607_v1  ;;  %v2295_v61 = vld [vmem:[%s3955_s10 + $0x58] sm:$0xff]  ;;  %v2294_v1 = vld [vmem:[%s3955_s10 + $0x50] sm:$0xff] }
 0x291   : > { %v1621_v4 = vadd.f32 %v1619_v3, %v1614_v2  ;;  %v2309_v3 = vld [vmem:[%s3955_s10 + $0xc8] sm:$0xff] }
 0x293   : > { %2070 = vrot.lane.b32.xlu0 %v1621_v4, %s3080_s23  ;;  %1971 = vst.msk [vmem:[#allocation3 + $0x5] sm:$0x1f] %vm1969_vm11, %v1621_v4  ;;  %v2325_v4 = vld [vmem:[%s3955_s10 + $0x148] sm:$0xff] }
 0x297   : > { %1981 = vperm.xlu0 %2942, %v2078_v42   ;;  %v3751_v42 = vshrl.u32 %v2173_v56, 7 }
 0x29a   : > { %v1975_v16 = vld [vmem:[#allocation3] sm:$0xff] }
 0x2b2   : > { %v1778_v8 = vpop.f32.mrf.mxu0 }
 0x2b3   : > { %v1779_v9 = vadd.f32 %v1778_v8, %v1704_v6  ;;  %v2184_v6 = vsub.s32 %v2181_v59, %v3751_v42  ;;  %v2293_v8 = vld [vmem:[%s3955_s10 + $0x48] sm:$0xff] }
 0x2b4   : > { %v2803_v10 = vpop.f32.mrf.mxu0 }
 0x2b5   : > { %v1782_v12 = vmax.f32 %v1779_v9, 0.0  ;;  %v2308_v9 = vld [vmem:[%s3955_s10 + $0xc0] sm:$0xff] }
 0x2b6   : > { %v2324_v10 = vld [vmem:[%s3955_s10 + $0x140] sm:$0xff] }
 0x2b7   : > { %v1789_v14 = vmul.f32 %v1787_v7, %v1782_v12 }
 0x2b9   : > { %v1796_v15 = vadd.f32 %v1794_v5, %v1789_v14  ;;  %v2307_v14 = vld [vmem:[%s3955_s10 + $0xb8] sm:$0xff] }
 0x2ba   : > { %v2323_v5 = vld [vmem:[%s3955_s10 + $0x138] sm:$0xff] }
 0x2bb   : > { %1972 = vst.msk [vmem:[#allocation3 + $0xa] sm:$0x1f] %vm1969_vm11, %v1796_v15  ;;  %2062 = vst.msk [vmem:[#allocation3] sm:$0x1f] %vm1969_vm11, %v1796_v15 }
 0x2bd   : > { %v1950_v18 = vpop.f32.mrf.mxu1 }
 0x2be   : > { %v1951_v19 = vadd.f32 %v1950_v18, %v1876_v13  ;;  %v2292_v13 = vld [vmem:[%s3955_s10 + $0x40] sm:$0xff]  ;;  %v2306_v18 = vld [vmem:[%s3955_s10 + $0xb0] sm:$0xff] }
 0x2bf   : > { %v2824_v20 = vpop.f32.mrf.mxu1 }
 0x2c0   : > { %v1954_v21 = vmax.f32 %v1951_v19, 0.0  ;;  %v2322_v19 = vld [vmem:[%s3955_s10 + $0x130] sm:$0xff] }
 0x2c2   : > { %v1961_v23 = vmul.f32 %v1959_v17, %v1954_v21  ;;  %v2291_v17 = vld [vmem:[%s3955_s10 + $0x38] sm:$0xff] }
 0x2c4   : > { %v1968_v25 = vadd.f32 %v1966_v24, %v1961_v23  ;;  %v2290_v24 = vld [vmem:[%s3955_s10 + $0x30] sm:$0xff] }
 0x2c6   : > { %1973 = vst.msk [vmem:[#allocation3 + $0xf] sm:$0x1f] %vm1969_vm11, %v1968_v25 }
 0x2cd   : > { %v1977_v26 = vld [vmem:[#allocation3 + $0x10] sm:$0xf]  ;;  %v1976_v27 = vld [vmem:[#allocation3 + $0x8] sm:$0xff] }
 0x2ce   : > { %2826 = vmatpush3.msk.msra.mxu0 %vm1987_vm12, %v1977_v26  ;;  %2063 = vst.msk [vmem:[#allocation3 + $0x5] sm:$0x1f] %vm1969_vm11, %v1968_v25  ;;  %v2305_v25 = vld [vmem:[%s3955_s10 + $0xa8] sm:$0xff] }
 0x2cf   : > { %2827 = vmatprep.subr.mxu0 %v3042_v11  ;;  %v2321_v26 = vld [vmem:[%s3955_s10 + $0x128] sm:$0xff] }
 0x2d0   : > { %2828 = vmatpush3.msra.mxu0 %v1976_v27 }
 0x2d1   : > { %2829 = vmatprep.subr.mxu0 %v3042_v11 }
 0x2d2   : > { %2830 = vmatpush3.msra.mxu0 %v1975_v16 }
 0x2d3   : > { %2832 = vmatmul.mubr.msk.f32.vlgmr.msra.gmra.mxu0 %vm1822_vm10, %v1974_v28  ;;  %2680 = vmatprep.subr.mxu0 %v2315_v45  ;;  %v2317_v45 = vld [vmem:[%s3955_s10 + $0x108] sm:$0xff] }
 0x2d4   : > { %2681 = vmatpush3.msra.mxu0 %v2299_v46  ;;  %v2285_v46 = vld [vmem:[%s3955_s10 + $0x8] sm:$0xff] }
 0x2d5   : > { %v2075_v35 = vld [vmem:[#allocation3] sm:$0xff]  ;;  %2682 = vmatprep.subr.mxu0 %v2314_v47  ;;  %v2300_v47 = vld [vmem:[%s3955_s10 + $0x80] sm:$0xff] }
 0x2d6   : > { %2683 = vmatpush3.msra.mxu0 %v2298_v48  ;;  %v2316_v48 = vld [vmem:[%s3955_s10 + $0x100] sm:$0xff] }
 0x2d7   : > { %2684 = vmatprep.subr.mxu0 %v2313_v49 }
 0x2d8   : > { %2685 = vmatpush3.msra.mxu0 %v2297_v51 }
 0x2d9   : > { %2686 = vmatprep.subr.mxu0 %v2312_v53 }
 0x2da   : > { %2687 = vmatpush3.msra.mxu0 %v2296_v54 }
 0x2db   : > { %2688 = vmatprep.subr.mxu0 %v2311_v55 }
 0x2dc   : > { %2689 = vmatpush3.msra.mxu0 %v2295_v61 }
 0x2dd   : > { %2690 = vmatprep.subr.mxu0 %v2310_v63 }
 0x2de   : > { %2691 = vmatpush3.msra.mxu0 %v2294_v1 }
 0x2df   : > { %2692 = vmatprep.subr.mxu0 %v2309_v3 }
 0x2e0   : > { %2693 = vmatpush3.msra.mxu0 %v2293_v8  ;;  %v2341_v8 = vsub.s32 2, %v3751_v42 }
 0x2e1   : > { %2694 = vmatprep.subr.mxu0 %v2308_v9  ;;  %v2333_v9 = vsub.s32 0, %v3751_v42 }
 0x2e2   : > { %2695 = vmatpush3.msra.mxu0 %v2292_v13 }
 0x2e3   : > { %2696 = vmatprep.subr.mxu0 %v2307_v14 }
 0x2e4   : > { %2697 = vmatpush3.msra.mxu0 %v2291_v17 }
 0x2e5   : > { %2698 = vmatprep.subr.mxu0 %v2306_v18 }
 0x2e6   : > { %2699 = vmatpush3.msra.mxu0 %v2290_v24 }
 0x2e7   : > { %2700 = vmatprep.subr.mxu0 %v2305_v25 }
 0x2f5   : > { %v2066_v29 = vpop.permute.xlu1 %2065 }
 0x2f6   : > { %2068 = vst.msk [vmem:[#allocation3 + $0xa] sm:$0x1f] %vm1969_vm11, %v2066_v29 }
 0x302   : > { %v2082_v0 = vpop.permute.xlu1 %2081 }
 0x305   : > { %v2071_v30 = vpop.permute.xlu0 %2070 }
 0x306   : > { %2073 = vst.msk [vmem:[#allocation3 + $0xf] sm:$0x1f] %vm1969_vm11, %v2071_v30  ;;  %v2289_v30 = vld [vmem:[%s3955_s10 + $0x28] sm:$0xff]  ;;  %vm3916_vm11 = vcmp.lt.s32.totalorder %v2173_v56, 142 }
 0x307   : > { %2701 = vmatpush3.msra.mxu0 %v2289_v30 }
 0x30d   : > { %v2077_v33 = vld [vmem:[#allocation3 + $0x10] sm:$0xf]  ;;  %v2076_v34 = vld [vmem:[#allocation3 + $0x8] sm:$0xff] }
 0x30e   : > { %2835 = vmatpush3.msk.msra.mxu1 %vm1987_vm12, %v2077_v33  ;;  %v2304_v33 = vld [vmem:[%s3955_s10 + $0xa0] sm:$0xff]  ;;  %vm2271_vm12 = vcmp.ge.s32.totalorder %v2173_v56, 14 }
 0x30f   : > { %2836 = vmatprep.subr.mxu1 %v3042_v11  ;;  %2702 = vmatprep.subr.mxu0 %v2304_v33 }
 0x310   : > { %2837 = vmatpush3.msra.mxu1 %v2076_v34  ;;  %v2320_v34 = vld [vmem:[%s3955_s10 + $0x120] sm:$0xff] }
 0x311   : > { %2838 = vmatprep.subr.mxu1 %v3042_v11 }
 0x312   : > { %2839 = vmatpush3.msra.mxu1 %v2075_v35  ;;  %v1982_v36 = vpop.permute.xlu0 %1981  ;;  %v2288_v35 = vld [vmem:[%s3955_s10 + $0x20] sm:$0xff] }
 0x313   : > { %2841 = vmatmul.mubr.msk.f32.vlgmr.msra.gmra.mxu1 %vm1822_vm10, %v1974_v28  ;;  %2843 = vmatprep.subr.mxu1 %v3042_v11  ;;  %vm3911_vm10 = vcmp.ge.s32.totalorder %v2173_v56, 97 }
 0x314   : > { %2869 = vmatprep.mubr.msk.f32.mxu1 %vm3043_vm3, %v3042_v11  ;;  %2844 = vmatpush3.msra.mxu1 %v2328_v50  ;;  %vm2175_vm3 = vcmp.lt.s32.totalorder %v2173_v56, 45  ;;  %v2284_v50 = vld [vmem:[%s3955_s10] sm:$0xff] }
 0x315   : > { %2845 = vmatprep.subr.mxu1 %v3042_v11  ;;  %2703 = vmatpush3.msra.mxu0 %v2288_v35 }
 0x316   : > { %2846 = vmatpush3.msra.mxu1 %v2327_v52 }
 0x317   : > { %2847 = vmatprep.subr.mxu1 %v3042_v11 }
 0x318   : > { %2848 = vmatpush3.msra.mxu1 %v2326_v60 }
 0x319   : > { %2849 = vmatprep.subr.mxu1 %v3042_v11 }
 0x31a   : > { %2850 = vmatpush3.msra.mxu1 %v2325_v4 }
 0x31b   : > { %2851 = vmatprep.subr.mxu1 %v3042_v11 }
 0x31c   : > { %2852 = vmatpush3.msra.mxu1 %v2324_v10 }
 0x31d   : > { %2853 = vmatprep.subr.mxu1 %v3042_v11 }
 0x31e   : > { %2854 = vmatpush3.msra.mxu1 %v2323_v5 }
 0x31f   : > { %2855 = vmatprep.subr.mxu1 %v3042_v11 }
 0x320   : > { %2856 = vmatpush3.msra.mxu1 %v2322_v19 }
 0x321   : > { %2857 = vmatprep.subr.mxu1 %v3042_v11 }
 0x322   : > { %2858 = vmatpush3.msra.mxu1 %v2321_v26 }
 0x323   : > { %2859 = vmatprep.subr.mxu1 %v3042_v11 }
 0x324   : > { %2860 = vmatpush3.msra.mxu1 %v2320_v34 }
 0x325   : > { %2861 = vmatprep.subr.mxu1 %v3042_v11 }
 0x393   : > { %v2057_v37 = vpop.f32.mrf.mxu0 }
 0x394   : > { %v2058_v31 = vadd.f32 %v2057_v37, %v1982_v36  ;;  %v2303_v36 = vld [vmem:[%s3955_s10 + $0x98] sm:$0xff] }
 0x395   : > { %v2833_v39 = vpop.f32.mrf.mxu0  ;;  %2704 = vmatprep.subr.mxu0 %v2303_v36 }
 0x396   : > { %v2061_v40 = vmax.f32 %v2058_v31, 0.0 }
 0x398   : > { %2163 = vrot.lane.b32.xlu0 %v2061_v40, %s3080_s23 }
 0x3d3   : > { %v2156_v41 = vpop.f32.mrf.mxu1 }
 0x3d4   : > { %v2157_v22 = vadd.f32 %v2156_v41, %v2082_v0  ;;  %v2287_v0 = vld [vmem:[%s3955_s10 + $0x18] sm:$0xff]  ;;  %v2302_v41 = vld [vmem:[%s3955_s10 + $0x90] sm:$0xff] }
 0x3d5   : > { %v2842_v43 = vpop.f32.mrf.mxu1  ;;  %2705 = vmatpush3.msra.mxu0 %v2287_v0 }
 0x3d6   : > { %v2160_v44 = vmax.f32 %v2157_v22, 0.0  ;;  %v2318_v22 = vld [vmem:[%s3955_s10 + $0x110] sm:$0xff]  ;;  %2706 = vmatprep.subr.mxu0 %v2302_v41 }
 0x3d7   : > { %v2286_v43 = vld [vmem:[%s3955_s10 + $0x10] sm:$0xff] }
 0x3d8   : > { %2168 = vrot.lane.b32.xlu1 %v2160_v44, %s3080_s23  ;;  %v2161_v38 = vadd.f32 %v2160_v44, %v2061_v40  ;;  %v2319_v40 = vld [vmem:[%s3955_s10 + $0x118] sm:$0xff]  ;;  %2707 = vmatpush3.msra.mxu0 %v2286_v43 }
 0x3d9   : > { %2862 = vmatpush3.msra.mxu1 %v2319_v40 }
 0x3da   : > { %2863 = vmatprep.subr.mxu1 %v3042_v11 }
 0x3db   : > { %2864 = vmatpush3.msra.mxu1 %v2318_v22 }
 0x3dc   : > { %2865 = vmatprep.subr.mxu1 %v3042_v11 }
 0x3dd   : > { %2866 = vmatpush3.msra.mxu1 %v2317_v45 }
 0x3de   : > { %2867 = vmatprep.subr.mxu1 %v3042_v11 }
 0x3df   : > { %2868 = vmatpush3.msra.mxu1 %v2316_v48 }
 0x40a   : > { %v2164_v58 = vpop.permute.xlu0 %2163 }
 0x40b   : > { %v2166_v62 = vadd.f32 %v2164_v58, %v2161_v38  ;;  %v2301_v38 = vld [vmem:[%s3955_s10 + $0x88] sm:$0xff] }
 0x40c   : > { %2708 = vmatprep.subr.mxu0 %v2301_v38 }
 0x40d   : > { %2709 = vmatpush3.msra.mxu0 %v2285_v46 }
 0x40e   : > { %2710 = vmatprep.subr.mxu0 %v2300_v47 }
 0x40f   : > { %2711 = vmatpush3.msra.mxu0 %v2284_v50 }
 0x44a   : > { %v2169_v2 = vpop.permute.xlu1 %2168 }
 0x44b   : > { %v2171_v7 = vadd.f32 %v2169_v2, %v2166_v62 }
 0x44d   : > { %v2172_v12 = vmul.f32 0.25, %v2171_v7  ;;  %v2337_v7 = vsub.s32 1, %v3751_v42 }
 0x44f   : > { %v2185_v15 = vrot.slane %v2172_v12, %v2184_v6  ;;  %v2227_v16 = vcombine.high %v2172_v12, %v2172_v12  ;;  %2177 = vst.msk [vmem:[#allocation4] sm:$0x1] %vm2175_vm3, %v2172_v12  ;;  %vm2272_vm3 = vcmp.lt.s32.totalorder %v2173_v56, 59 }
 0x450   : > { %vm2273_vm2 = vmand %vm2271_vm12, %vm2272_vm3 }
 0x451   : > { %v2234_v20 = vrot.slane %v2227_v16, %v2184_v6  ;;  %v2193_v21 = vrot.slane %v2185_v15, %v2184_v6  ;;  %v2186_v23 = vcombine.high %v2185_v15, %v2185_v15  ;;  %v2329_v16 = vld [vmem:[%s3956_s11] sm:$0x1] }
 0x453   : > { %v2208_v27 = vcombine.high %v2193_v21, %v2193_v21  ;;  %v2200_v28 = vrot.slane %v2186_v23, %v2184_v6  ;;  %v2249_v29 = vcombine.high %v2234_v20, %v2234_v20  ;;  %v2241_v39 = vrot.slane %v2234_v20, %v2184_v6 }
 0x455   : > { %2209 = vrot.lane.b32.xlu0 %v2208_v27, %s3097_s29  ;;  %2201 = vrot.lane.b32.xlu1 %v2200_v28, %s3065_s20  ;;  %v2256_v37 = vrot.slane %v2249_v29, %v2184_v6  ;;  %v2219_v31 = vcombine.high %v2200_v28, %v2200_v28  ;;  %v2267_v44 = vcombine.high %v2241_v39, %v2241_v39 }
 0x457   : > { %v2275_v49 = vcombine.high %v2256_v37, %v2256_v37 }
 0x459   : > { %2257 = vrot.lane.b32.xlu0 %v2256_v37, %s3054_s27  ;;  %2220 = vrot.lane.b32.xlu1 %v2219_v31, %s3079_s19  ;;  %s409_s19 = scalar_lea.vmem %s3957_s12, %s3975_s22 }
 0x45d   : > { %2242 = vrot.lane.b32.xlu0 %v2241_v39, %s3098_s14  ;;  %2268 = vrot.lane.b32.xlu1 %v2267_v44, %s3099_s15 }
 0x461   : > { %2276 = vrot.lane.b32.xlu0 %v2275_v49, %s3100_s25 }
 0x4c7   : > { %v2210_v54 = vpop.permute.xlu0 %2209  ;;  %v2202_v55 = vpop.permute.xlu1 %2201 }
 0x4c8   : > { %v2211_v32 = vrot.slane %v2210_v54, 7  ;;  %2207 = vst.msk [vmem:[#allocation4] sm:$0x1] %vm2206_vm15, %v2202_v55  ;;  %vm2265_vm15 = vmand %vm3911_vm10, %vm3916_vm11 }
 0x4ca   : > { %v2213_v57 = vsel %vm2212_vm6, %v2211_v32, %v2210_v54  ;;  %vm2345_vm6 = vcmask 850944  }
 0x4cb   : > { %v2258_v61 = vpop.permute.xlu0 %2257  ;;  %v2221_v63 = vpop.permute.xlu1 %2220  ;;  %2218 = vst.msk [vmem:[#allocation4] sm:$0x3] %vm2217_vm4, %v2213_v57  ;;  %vm2489_vm4 = vcmask 57344  }
 0x4cc   : > { %v2259_v1 = vrot.slane %v2258_v61, 7  ;;  %2226 = vst.msk [vmem:[#allocation4 + $0x1] sm:$0x1] %vm2225_vm7, %v2221_v63 }
 0x4ce   : > { %v2261_v3 = vsel %vm2260_vm13, %v2259_v1, %v2258_v61 }
 0x4cf   : > { %v2243_v2 = vpop.permute.xlu0 %2242  ;;  %v2269_v4 = vpop.permute.xlu1 %2268 }
 0x4d0   : > { %2248 = vst.msk [vmem:[#allocation4 + $0x1] sm:$0x1] %vm2247_vm14, %v2243_v2 }
 0x4d1   : > { %2266 = vst.msk [vmem:[#allocation4 + $0x1] sm:$0x3] %vm2265_vm15, %v2261_v3 }
 0x4d2   : > { %2274 = vst.msk [vmem:[#allocation4 + $0x2] sm:$0x1] %vm2273_vm2, %v2269_v4 }
 0x4d3   : > { %v2277_v6 = vpop.permute.xlu0 %2276 }
 0x4d4   : > { %2282 = vst.msk [vmem:[#allocation4 + $0x2] sm:$0x1] %vm2281_vm5, %v2277_v6 }
 0x4db   : > { %v2283_v10 = vld [vmem:[#allocation4] sm:$0x7] }
 0x4dc   : > { %v2338_v56 = vrot.slane %v2283_v10, %v2337_v7  ;;  %v2342_v12 = vrot.slane %v2283_v10, %v2341_v8  ;;  %v2334_v13 = vrot.slane %v2283_v10, %v2333_v9 }
 0x4de   : > { %2412 = vmatprep.mubr.f32.mxu0 %v2338_v56  ;;  %2870 = vmatmul.mubr.msk.f32.vlgmr.msra.gmra.mxu1 %vm2345_vm6, %v2342_v12 }
 0x4df   : > { %2413 = vmatmul.mubr.f32.vlgmr.msra.gmra.mxu0 %v2334_v13 }
 0x59e   : > { %v2484_v14 = vpop.f32.mrf.mxu1 }
 0x59f   : > { %v2712_v5 = vpop.f32.mrf.mxu0 }
 0x5a0   : > { %v2871_v15 = vpop.f32.mrf.mxu1 }
 0x5a1   : > { %v2713_v17 = vpop.f32.mrf.mxu0 }
 0x5a2   : > { %v2714_v18 = vadd.f32 %v2713_v17, %v2712_v5 }
 0x5a4   : > { %v2415_v19 = vadd.f32 %v2714_v18, %v2329_v16 }
 0x5a6   : > { %v2485_v42 = vadd.f32 %v2484_v14, %v2415_v19 }
 0x5a8   : > { %v2488_v20 = vmax.f32 %v2485_v42, 0.0 }
 0x5aa   : > { %2490 = vst.msk [vmem:[%s409_s19] sm:$0x1] %vm2489_vm4, %v2488_v20 }
 0x5ab PF: > { %s22_s21 = sadd.s32 1, %s3038_s21  }
 0x5ac   : > { %p19_p4 = scmp.ge.s32.totalorder %s22_s21, 6  }
 0x5ae   :  { %21 = sbr.rel (!%p19_p4) target bundleno = 1 (0x1), region = 98 }

// kernel: _lambda_.5
= control target key start
LH: loop header
LB: loop body
LE: loop exit
PB: predicated region body
PF: predicated region fallthrough
CT: control target
= control target key end

     0   :  { %s2342_s21 = smov 0   ;;  %s2923_s0 = inlined_call_operand.vmem [shape: bf16[4,46,940], index: 0, kind: input, shape index: {}]   ;;  %s2924_s1 = inlined_call_operand.vmem [shape: bf16[3,46], index: 1, kind: input, shape index: {}]   ;;  %s2925_s2 = inlined_call_operand.vmem [shape: f32[3,1], index: 2, kind: input, shape index: {}]   ;;  %s2926_s3 = inlined_call_operand.vmem [shape: f32[3,1], index: 3, kind: input, shape index: {}]   ;;  %s2927_s4 = inlined_call_operand.vmem [shape: f32[5,42], index: 4, kind: input, shape index: {}]   ;;  %s2928_s5 = inlined_call_operand.vmem [shape: f32[5,1], index: 5, kind: input, shape index: {}]   ;;  %s2929_s6 = inlined_call_operand.vmem [shape: f32[5,1], index: 6, kind: input, shape index: {}]   ;;  %s2930_s7 = inlined_call_operand.vmem [shape: f32[5,1], index: 7, kind: input, shape index: {}]   ;;  %s2931_s8 = inlined_call_operand.vmem [shape: f32[8,15], index: 8, kind: input, shape index: {}]   ;;  %s2932_s9 = inlined_call_operand.vmem [shape: f32[8,1], index: 9, kind: input, shape index: {}]   ;;  %s2933_s10 = inlined_call_operand.vmem [shape: f32[360,8], index: 10, kind: input, shape index: {}]   ;;  %s2934_s11 = inlined_call_operand.vmem [shape: f32[1,8], index: 11, kind: input, shape index: {}]   ;;  %s2935_s12 = inlined_call_operand.vmem [shape: f32[4,1,8], index: 12, kind: output, shape index: {}]  }
   0x1 LB: > { %s1945_s22 = sadd.s32 4294967295, %s2238_s21   ;;  %p1949_p0 = scmp.ge.s32.totalorder %s2238_s21, 1  ;;  %s2238_s21 = sphi %s2342_s21, %s22_s21  }
   0x2   : > { %p362_p1 = scmp.lt.s32.totalorder %s2238_s21, 5 }
   0x4   : > { %p363_p2 = pnand %p1949_p0, %p362_p1 }
   0x5   : > { %p402_p3 = scmp.lt.s32.totalorder (!%p363_p2), %s1945_s22, 3  ;;  %s2241_s15 = smov (!%p363_p2), 102  }
   0x6   : > { %366 = sbr.rel (%p363_p2) target bundleno = 1381 (0x565), region = 68  ;;  %s2242_s16 = smov (!%p363_p2), 8  }
   0x7   : > { %s2243_s17 = smov (!%p363_p2), 21   ;;  %s2244_s18 = smov (!%p363_p2), 55  }
   0x8   : > { %s2245_s19 = smov (!%p363_p2), 42   ;;  %s2246_s20 = smov (!%p363_p2), 29  }
   0x9   : > { %s2247_s23 = smov (!%p363_p2), 89   ;;  %s2249_s24 = smov (!%p363_p2), 123  }
   0xa   : > { %s2251_s26 = smov (!%p363_p2), 34   ;;  %s2252_s27 = smov (!%p363_p2), 68  }
   0xb   : > { %v2240_v0 = vmov 0   ;;  %v741_v1 = vld [vmem:[%s2925_s2] sm:$0x7]  ;;  %s2955_s22 = smov (!%p402_p3, %s1945_s22), 3  ;;  %vm552_vm0 = vcmask 1046528   ;;  %vm548_vm1 = vcmask 375808  }
   0xc   : > { %609 = vmatprep.mubr.bf16.mxu0 %v2240_v0  ;;  %650 = vmatprep.mubr.bf16.mxu1 %v2240_v0  ;;  %s2184_s25 = smul.u32 192, %s2955_s22  ;;  %v755_v2 = vld [vmem:[%s2926_s3] sm:$0x7]  ;;  %vm777_vm2 = vcmask 378880   ;;  %vm2253_vm3 = vmmov 0   ;;  %s2254_s28 = smov 97  }
   0xd   : > { %2230 = vset.pattern.permute.xlu0 %v2240_v0  ;;  %2231 = vset.pattern.permute.xlu1 %v2240_v0  ;;  %v411_v41 = vld [vmem:[%s2924_s1] sm:$0x3]  ;;  %s2255_s29 = smov 115   ;;  %s2257_s13 = smov 81   ;;  %vm823_vm4 = vcmask 64512   ;;  %vm806_vm5 = vcmask 171008  }
   0xe   : > { %744 = vperm.xlu0 %2230, %v741_v1   ;;  %s2366_s30 = scalar_lea.vmem %s2923_s0, %s2184_s25  ;;  %s2250_s25 = smov 76   ;;  %vm836_vm6 = vcmask 343040   ;;  %vm962_vm7 = vcmask 370688   ;;  %vm853_vm8 = vcmask 236544   ;;  %vm789_vm9 = vcmask 277504  }
   0xf   : > { %v428_v3 = vld [vmem:[%s2366_s30 + $0x80] sm:$0xff]  ;;  %v429_v5 = vld [vmem:[%s2366_s30 + $0x88] sm:$0xff]  ;;  %v430_v27 = vld [vmem:[%s2366_s30 + $0x90] sm:$0xff]  ;;  %s2258_s14 = smov 127   ;;  %vm873_vm10 = vcmask 1041408   ;;  %vm985_vm11 = vcmask 130048  }
  0x10   : > { %v432_v4 = vld [vmem:[%s2366_s30 + $0xa0] sm:$0x77]  ;;  %v433_v7 = vld [vmem:[%s2366_s30 + $0xa8] sm:$0x77]  ;;  %v434_v28 = vld [vmem:[%s2366_s30 + $0xb0] sm:$0x77] }
  0x11   : > { %v1968_v6 = vcombine.high %v428_v3, %v432_v4  ;;  %v1967_v8 = vcombine.low %v428_v3, %v432_v4  ;;  %v420_v9 = vld [vmem:[%s2366_s30 + $0x40] sm:$0xff]  ;;  %v1970_v11 = vcombine.high %v429_v5, %v433_v7  ;;  %v1969_v12 = vcombine.low %v429_v5, %v433_v7  ;;  %v421_v14 = vld [vmem:[%s2366_s30 + $0x48] sm:$0xff]  ;;  %v431_v29 = vld [vmem:[%s2366_s30 + $0x98] sm:$0xff] }
  0x12   : > { %758 = vperm.xlu0 %2230, %v755_v2   ;;  %v424_v10 = vld [vmem:[%s2366_s30 + $0x60] sm:$0xff]  ;;  %v425_v15 = vld [vmem:[%s2366_s30 + $0x68] sm:$0xff]  ;;  %v435_v30 = vld [vmem:[%s2366_s30 + $0xb8] sm:$0x77]  ;;  %v1972_v33 = vcombine.high %v430_v27, %v434_v28  ;;  %v1971_v34 = vcombine.low %v430_v27, %v434_v28  ;;  %v2248_v27 = vmov 0.0   ;;  %vm1131_vm12 = vcmask 269312  }
  0x13   : > { %v1960_v13 = vcombine.high %v420_v9, %v424_v10  ;;  %v412_v16 = vld [vmem:[%s2366_s30] sm:$0xff]  ;;  %1975 = vmatprep.subr.msk.bf16.mxu0 %vm552_vm0, %v1968_v6  ;;  %v554_v17 = vsel %vm552_vm0, %v1967_v8, 0  ;;  %v1962_v18 = vcombine.high %v421_v14, %v425_v15  ;;  %v413_v20 = vld [vmem:[%s2366_s30 + $0x8] sm:$0xff]  ;;  %1977 = vmatprep.subr.msk.bf16.mxu1 %vm552_vm0, %v1970_v11  ;;  %v560_v22 = vsel %vm552_vm0, %v1969_v12, 0  ;;  %v422_v37 = vld [vmem:[%s2366_s30 + $0x50] sm:$0xff] }
  0x14   : > { %v416_v19 = vld [vmem:[%s2366_s30 + $0x20] sm:$0xff]  ;;  %v417_v21 = vld [vmem:[%s2366_s30 + $0x28] sm:$0xff]  ;;  %588 = vmatpush1.bf16.msra.mxu0 %v554_v17  ;;  %v1959_v23 = vcombine.low %v420_v9, %v424_v10  ;;  %629 = vmatpush1.bf16.msra.mxu1 %v560_v22  ;;  %v1961_v24 = vcombine.low %v421_v14, %v425_v15  ;;  %v1974_v35 = vcombine.high %v431_v29, %v435_v30  ;;  %v426_v38 = vld [vmem:[%s2366_s30 + $0x70] sm:$0xff]  ;;  %v566_v42 = vsel %vm552_vm0, %v1971_v34, 0 }
  0x15   : > { %589 = vmatprep.subr.bf16.mxu0 %v1960_v13  ;;  %v1952_v25 = vcombine.high %v412_v16, %v416_v19  ;;  %630 = vmatprep.subr.bf16.mxu1 %v1962_v18  ;;  %v1954_v26 = vcombine.high %v413_v20, %v417_v21  ;;  %v1951_v31 = vcombine.low %v412_v16, %v416_v19  ;;  %v423_v39 = vld [vmem:[%s2366_s30 + $0x58] sm:$0xff]  ;;  %v414_v46 = vld [vmem:[%s2366_s30 + $0x10] sm:$0xff]  ;;  %vm1115_vm13 = vcmask 23552  }
  0x16   : > { %v1953_v32 = vcombine.low %v413_v20, %v417_v21  ;;  %v1973_v36 = vcombine.low %v431_v29, %v435_v30  ;;  %v427_v40 = vld [vmem:[%s2366_s30 + $0x78] sm:$0xff]  ;;  %v1964_v43 = vcombine.high %v422_v37, %v426_v38  ;;  %v418_v47 = vld [vmem:[%s2366_s30 + $0x30] sm:$0xff]  ;;  %v1963_v50 = vcombine.low %v422_v37, %v426_v38  ;;  %v1146_v37 = vld [vmem:[%s2928_s5] sm:$0x1f] }
  0x17   : > { %v1966_v45 = vcombine.high %v423_v39, %v427_v40  ;;  %v415_v48 = vld [vmem:[%s2366_s30 + $0x18] sm:$0xff]  ;;  %v1965_v51 = vcombine.low %v423_v39, %v427_v40  ;;  %v1956_v52 = vcombine.high %v414_v46, %v418_v47  ;;  %v1955_v54 = vcombine.low %v414_v46, %v418_v47  ;;  %v948_v38 = vld [vmem:[%s2929_s6] sm:$0x1f] }
  0x18   : > { %590 = vmatpush1.bf16.msra.mxu0 %v1959_v23  ;;  %631 = vmatpush1.bf16.msra.mxu1 %v1961_v24  ;;  %v572_v44 = vsel %vm552_vm0, %v1973_v36, 0  ;;  %v419_v49 = vld [vmem:[%s2366_s30 + $0x38] sm:$0xff]  ;;  %s2256_s30 = smov 33   ;;  %v955_v36 = vld [vmem:[%s2930_s7] sm:$0x1f]  ;;  %vm1276_vm14 = vcmask 56320  }
  0x19   : > { %591 = vmatprep.subr.bf16.mxu0 %v1952_v25  ;;  %632 = vmatprep.subr.bf16.mxu1 %v1954_v26  ;;  %v1958_v53 = vcombine.high %v415_v48, %v419_v49  ;;  %v1957_v55 = vcombine.low %v415_v48, %v419_v49  ;;  %v1229_v39 = vld [vmem:[%s2929_s6] sm:$0x1f]  ;;  %vm1260_vm15 = vcmask 162816  }
  0x1a   : > { %v1004_v40 = vld [vmem:[%s2928_s5] sm:$0x1f] }
  0x1b   : > { %v1377_v46 = vld [vmem:[%s2930_s7] sm:$0x1f] }
  0x1c   : > { %592 = vmatpush1.bf16.msra.mxu0 %v1951_v31  ;;  %633 = vmatpush1.bf16.msra.mxu1 %v1953_v32  ;;  %v2513_v47 = vld [vmem:[%s2932_s9] sm:$0xff] }
  0x1d   : > { %1979 = vmatprep.subr.msk.bf16.mxu0 %vm552_vm0, %v1972_v33  ;;  %1981 = vmatprep.subr.msk.bf16.mxu1 %vm552_vm0, %v1974_v35  ;;  %v864_v35 = vld [vmem:[%s2928_s5] sm:$0x1f] }
  0x1f   : > { %1976 = vmatmul.mubr.msk.bf16.vlgmr.msra.gmra.mxu0 %vm548_vm1, %v411_v41  ;;  %1978 = vmatmul.mubr.msk.bf16.vlgmr.msra.gmra.mxu1 %vm548_vm1, %v411_v41 }
  0x20   : > { %670 = vmatpush1.bf16.msra.mxu0 %v566_v42  ;;  %711 = vmatpush1.bf16.msra.mxu1 %v572_v44  ;;  %v1087_v42 = vld [vmem:[%s2929_s6] sm:$0x1f] }
  0x21   : > { %671 = vmatprep.subr.bf16.mxu0 %v1964_v43  ;;  %712 = vmatprep.subr.bf16.mxu1 %v1966_v45  ;;  %v1370_v43 = vld [vmem:[%s2929_s6] sm:$0x1f] }
  0x22   : > { %691 = vmatprep.mubr.bf16.mxu0 %v2240_v0  ;;  %732 = vmatprep.mubr.bf16.mxu1 %v2240_v0  ;;  %v1094_v44 = vld [vmem:[%s2930_s7] sm:$0x1f] }
  0x23   : > { %v1287_v45 = vld [vmem:[%s2928_s5] sm:$0x1f] }
  0x24   : > { %672 = vmatpush1.bf16.msra.mxu0 %v1963_v50  ;;  %713 = vmatpush1.bf16.msra.mxu1 %v1965_v51 }
  0x25   : > { %673 = vmatprep.subr.bf16.mxu0 %v1956_v52  ;;  %714 = vmatprep.subr.bf16.mxu1 %v1958_v53 }
  0x28   : > { %674 = vmatpush1.bf16.msra.mxu0 %v1955_v54  ;;  %715 = vmatpush1.bf16.msra.mxu1 %v1957_v55 }
  0x29   : > { %2081 = vmatprep.subr.mxu0 %v2248_v27  ;;  %2096 = vmatprep.subr.mxu1 %v2248_v27 }
  0x2b   : > { %1980 = vmatmul.mubr.msk.bf16.vlgmr.msra.gmra.mxu0 %vm548_vm1, %v411_v41  ;;  %1982 = vmatmul.mubr.msk.bf16.vlgmr.msra.gmra.mxu1 %vm548_vm1, %v411_v41  ;;  %v1236_v41 = vld [vmem:[%s2930_s7] sm:$0x1f]  ;;  %vm1384_vm1 = vcmask 372736  }
  0x2c   : > { %2093 = vmatprep.mubr.msk.f32.mxu0 %vm2253_vm3, %v2248_v27  ;;  %2108 = vmatprep.mubr.msk.f32.mxu1 %vm2253_vm3, %v2248_v27 }
  0x89   : > { %v2409_v56 = vpop.permute.xlu0 %744 }
  0x8d   : > { %v2412_v60 = vpop.permute.xlu0 %758 }
  0xdf   : > { %v611_v57 = vpop.f32.mrf.mxu0  ;;  %v652_v59 = vpop.f32.mrf.mxu1 }
  0xe0   : > { %v747_v58 = vmul.f32 %v2409_v56, %v611_v57  ;;  %v749_v61 = vmul.f32 %v2409_v56, %v652_v59 }
  0xe1   : > { %v613_v62 = vpop.f32.mrf.mxu0  ;;  %v654_v0 = vpop.f32.mrf.mxu1 }
  0xe2   : > { %v761_v63 = vadd.f32 %v2412_v60, %v747_v58  ;;  %v763_v1 = vadd.f32 %v2412_v60, %v749_v61  ;;  %v750_v2 = vmul.f32 %v2409_v56, %v654_v0  ;;  %v748_v7 = vmul.f32 %v2409_v56, %v613_v62 }
  0xe3   : > { %v615_v3 = vpop.f32.mrf.mxu0  ;;  %v656_v5 = vpop.f32.mrf.mxu1 }
  0xe4   : > { %v2418_v4 = vmax.f32 %v761_v63, 0.0  ;;  %v2420_v6 = vmax.f32 %v763_v1, 0.0  ;;  %v764_v8 = vadd.f32 %v2412_v60, %v750_v2  ;;  %v762_v11 = vadd.f32 %v2412_v60, %v748_v7 }
  0xe5   : > { %v616_v9 = vpop.f32.mrf.mxu0  ;;  %v657_v10 = vpop.f32.mrf.mxu1 }
  0xe6   : > { %778 = vst.msk [vmem:[#allocation2] sm:$0x7] %vm777_vm2, %v2418_v4  ;;  %810 = vrot.lane.b32.xlu1 %v2420_v6, %s2241_s15  ;;  %819 = vrot.lane.b32.xlu0 %v2420_v6, %s2242_s16  ;;  %v2429_v12 = vmax.f32 %v764_v8, 0.0  ;;  %v2434_v16 = vmax.f32 %v762_v11, 0.0  ;;  %s2259_s15 = smov 16  }
  0xea   : > { %804 = vrot.lane.b32.xlu0 %v2420_v6, %s2243_s17  ;;  %821 = vrot.lane.b32.xlu1 %v2429_v12, %s2242_s16  ;;  %s2260_s16 = smov 50  }
  0xeb   : > { %v693_v13 = vpop.f32.mrf.mxu0  ;;  %v734_v15 = vpop.f32.mrf.mxu1 }
  0xec   : > { %v751_v14 = vmul.f32 %v2409_v56, %v693_v13  ;;  %v753_v28 = vmul.f32 %v2409_v56, %v734_v15 }
  0xed   : > { %v695_v17 = vpop.f32.mrf.mxu0  ;;  %v736_v19 = vpop.f32.mrf.mxu1 }
  0xee   : > { %v765_v18 = vadd.f32 %v2412_v60, %v751_v14  ;;  %814 = vrot.lane.b32.xlu0 %v2420_v6, %s2244_s18  ;;  %802 = vrot.lane.b32.xlu1 %v2434_v16, %s2243_s17  ;;  %v752_v25 = vmul.f32 %v2409_v56, %v695_v17  ;;  %v767_v30 = vadd.f32 %v2412_v60, %v753_v28  ;;  %s2261_s17 = smov 110   ;;  %s2262_s18 = smov 114  }
  0xef   : > { %v697_v20 = vpop.f32.mrf.mxu0  ;;  %v738_v22 = vpop.f32.mrf.mxu1  ;;  %v754_v32 = vmul.f32 %v2409_v56, %v736_v19 }
  0xf0   : > { %v773_v21 = vmax.f32 %v765_v18, 0.0  ;;  %v766_v26 = vadd.f32 %v2412_v60, %v752_v25  ;;  %v775_v31 = vmax.f32 %v767_v30, 0.0 }
  0xf1   : > { %v698_v23 = vpop.f32.mrf.mxu0  ;;  %v739_v24 = vpop.f32.mrf.mxu1  ;;  %v768_v33 = vadd.f32 %v2412_v60, %v754_v32 }
  0xf2   : > { %832 = vrot.lane.b32.xlu0 %v2429_v12, %s2245_s19  ;;  %849 = vrot.lane.b32.xlu1 %v773_v21, %s2246_s20  ;;  %v774_v29 = vmax.f32 %v766_v26, 0.0 }
  0xf3   : > { %v776_v34 = vmax.f32 %v768_v33, 0.0 }
  0xf6   : > { %827 = vrot.lane.b32.xlu0 %v2429_v12, %s2247_s23  ;;  %834 = vrot.lane.b32.xlu1 %v773_v21, %s2245_s19  ;;  %s2263_s19 = smov 80   ;;  %s2265_s23 = smov 63  }
  0xfa   : > { %840 = vrot.lane.b32.xlu0 %v773_v21, %s2249_s24  ;;  %844 = vrot.lane.b32.xlu1 %v773_v21, %s2250_s25  ;;  %s2266_s24 = smov 7   ;;  %s2267_s25 = smov 20  }
  0xfe   : > { %787 = vrot.lane.b32.xlu0 %v2434_v16, %s2251_s26  ;;  %851 = vrot.lane.b32.xlu1 %v774_v29, %s2246_s20  ;;  %s2264_s20 = smov 3  }
 0x102   : > { %797 = vrot.lane.b32.xlu0 %v2434_v16, %s2252_s27  ;;  %785 = vrot.lane.b32.xlu1 %v2418_v4, %s2251_s26  ;;  %s2268_s26 = smov 54  }
 0x106   : > { %989 = vrot.lane.b32.xlu0 %v775_v31, %s2254_s28  ;;  %793 = vrot.lane.b32.xlu1 %v2434_v16, %s2255_s29 }
 0x10a   : > { %1127 = vrot.lane.b32.xlu0 %v2418_v4, %s2256_s30  ;;  %780 = vrot.lane.b32.xlu1 %v2418_v4, %s2257_s13 }
 0x10e   : > { %1119 = vrot.lane.b32.xlu0 %v2418_v4, %s2258_s14  ;;  %983 = vrot.lane.b32.xlu1 %v775_v31, %s2259_s15 }
 0x112   : > { %981 = vrot.lane.b32.xlu0 %v774_v29, %s2259_s15  ;;  %993 = vrot.lane.b32.xlu1 %v775_v31, %s2260_s16  ;;  %s2270_s16 = smov 67  }
 0x116   : > { %972 = vrot.lane.b32.xlu0 %v774_v29, %s2261_s17  ;;  %1129 = vrot.lane.b32.xlu1 %v2434_v16, %s2256_s30  ;;  %s2269_s30 = smov 101   ;;  %s2273_s17 = smov 45  }
 0x11a   : > { %1135 = vrot.lane.b32.xlu0 %v2434_v16, %s2262_s18  ;;  %1123 = vrot.lane.b32.xlu1 %v2418_v4, %s2263_s19  ;;  %s2274_s19 = smov 52   ;;  %s2276_s18 = smov 59  }
 0x11e   : > { %1113 = vrot.lane.b32.xlu0 %v776_v34, %s2264_s20  ;;  %976 = vrot.lane.b32.xlu1 %v774_v29, %s2265_s23 }
 0x122   : > { %1274 = vrot.lane.b32.xlu0 %v2429_v12, %s2266_s24  ;;  %1111 = vrot.lane.b32.xlu1 %v775_v31, %s2264_s20  ;;  %s2275_s20 = smov 14  }
 0x126   : > { %1258 = vrot.lane.b32.xlu0 %v2420_v6, %s2267_s25  ;;  %1272 = vrot.lane.b32.xlu1 %v2420_v6, %s2266_s24 }
 0x12a   : > { %1268 = vrot.lane.b32.xlu0 %v2420_v6, %s2268_s26  ;;  %1256 = vrot.lane.b32.xlu1 %v2434_v16, %s2267_s25 }
 0x12e   : > { %867 = vperm.xlu0 %2230, %v864_v35   ;;  %1264 = vrot.lane.b32.xlu1 %v2420_v6, %s2269_s30 }
 0x132   : > { %958 = vperm.xlu0 %2230, %v955_v36   ;;  %1252 = vrot.lane.b32.xlu1 %v2434_v16, %s2270_s16  ;;  %v857_v16 = vld [vmem:[%s2927_s4] sm:$0x1f]  ;;  %s2272_s16 = smov 90  }
 0x136   : > { %1149 = vperm.xlu0 %2230, %v1146_v37   ;;  %951 = vperm.xlu1 %2231, %v948_v38  }
 0x13a   : > { %1232 = vperm.xlu0 %2230, %v1229_v39   ;;  %1007 = vperm.xlu1 %2231, %v1004_v40  }
 0x13e   : > { %1239 = vperm.xlu0 %2230, %v1236_v41   ;;  %1090 = vperm.xlu1 %2231, %v1087_v42  }
 0x142   : > { %1373 = vperm.xlu0 %2230, %v1370_v43   ;;  %1097 = vperm.xlu1 %2231, %v1094_v44   ;;  %v997_v44 = vld [vmem:[%s2927_s4] sm:$0x1f] }
 0x146   : > { %1290 = vperm.xlu1 %2231, %v1287_v45  }
 0x14a   : > { %1380 = vperm.xlu1 %2231, %v1377_v46  }
 0x14e   : > { %1394 = vperm.xlu1 %2231, %v2513_v47  }
 0x158   : > { %v2516_v48 = vpop.permute.xlu1 %810  ;;  %v820_v49 = vpop.permute.xlu0 %819 }
 0x159   : > { %813 = vst.msk [vmem:[#allocation2 + $0x12] sm:$0x7] %vm777_vm2, %v2516_v48 }
 0x15c   : > { %v805_v50 = vpop.permute.xlu0 %804  ;;  %v822_v51 = vpop.permute.xlu1 %821 }
 0x15d   : > { %v824_v52 = vsel %vm823_vm4, %v820_v49, %v822_v51 }
 0x15e   : > { %826 = vst.msk [vmem:[#allocation2 + $0x18] sm:$0x7] %vm777_vm2, %v824_v52 }
 0x160   : > { %v2521_v53 = vpop.permute.xlu0 %814  ;;  %v803_v54 = vpop.permute.xlu1 %802 }
 0x161   : > { %817 = vst.msk [vmem:[#allocation2 + $0x15] sm:$0x7] %vm777_vm2, %v2521_v53  ;;  %v807_v55 = vsel %vm806_vm5, %v803_v54, %v805_v50 }
 0x162   : > { %809 = vst.msk [vmem:[#allocation2 + $0xf] sm:$0x7] %vm777_vm2, %v807_v55 }
 0x164   : > { %v833_v56 = vpop.permute.xlu0 %832  ;;  %v850_v57 = vpop.permute.xlu1 %849 }
 0x168   : > { %v828_v58 = vpop.permute.xlu0 %827  ;;  %v835_v59 = vpop.permute.xlu1 %834 }
 0x169   : > { %830 = vst.msk [vmem:[#allocation2 + $0x1b] sm:$0x7] %vm777_vm2, %v828_v58  ;;  %v2528_v60 = vsel %vm836_vm6, %v833_v56, %v835_v59  ;;  %v860_v61 = vld [vmem:[#allocation2 + $0x10] sm:$0xff] }
 0x16a   : > { %839 = vst.msk [vmem:[#allocation2 + $0x1e] sm:$0x7] %vm777_vm2, %v2528_v60 }
 0x16c   : > { %v2532_v62 = vpop.permute.xlu0 %840  ;;  %v2534_v63 = vpop.permute.xlu1 %844 }
 0x16d   : > { %843 = vst.msk [vmem:[#allocation2 + $0x21] sm:$0x7] %vm777_vm2, %v2532_v62  ;;  %847 = vst.msk [vmem:[#allocation2 + $0x24] sm:$0x7] %vm777_vm2, %v2534_v63 }
 0x16e   : > { %969 = vst.msk [vmem:[#allocation2 + $0x12] sm:$0x7] %vm962_vm7, %v2532_v62  ;;  %970 = vst.msk [vmem:[#allocation2 + $0x15] sm:$0x7] %vm962_vm7, %v2534_v63 }
 0x170   : > { %v788_v0 = vpop.permute.xlu0 %787  ;;  %v852_v1 = vpop.permute.xlu1 %851 }
 0x171   : > { %v861_v2 = vld [vmem:[#allocation2 + $0x18] sm:$0xff]  ;;  %v2544_v3 = vsel %vm853_vm8, %v850_v57, %v852_v1 }
 0x172   : > { %856 = vst.msk [vmem:[#allocation2 + $0x27] sm:$0x7] %vm777_vm2, %v2544_v3 }
 0x173   : > { %971 = vst.msk [vmem:[#allocation2 + $0x18] sm:$0x7] %vm962_vm7, %v2544_v3 }
 0x174   : > { %v798_v4 = vpop.permute.xlu0 %797  ;;  %v786_v5 = vpop.permute.xlu1 %785 }
 0x175   : > { %800 = vst.msk [vmem:[#allocation2 + $0xc] sm:$0x7] %vm777_vm2, %v798_v4  ;;  %v790_v6 = vsel %vm789_vm9, %v786_v5, %v788_v0 }
 0x176   : > { %792 = vst.msk [vmem:[#allocation2 + $0x6] sm:$0x7] %vm777_vm2, %v790_v6 }
 0x178   : > { %v2552_v7 = vpop.permute.xlu0 %989  ;;  %v794_v8 = vpop.permute.xlu1 %793 }
 0x179   : > { %v862_v9 = vld [vmem:[#allocation2 + $0x20] sm:$0xff]  ;;  %796 = vst.msk [vmem:[#allocation2 + $0x9] sm:$0x7] %vm777_vm2, %v794_v8  ;;  %v863_v10 = vld [vmem:[#allocation2 + $0x28] sm:$0x3] }
 0x17a   : > { %992 = vst.msk [vmem:[#allocation2 + $0x24] sm:$0x7] %vm962_vm7, %v2552_v7  ;;  %2082 = vmatpush3.msk.msra.mxu0 %vm873_vm10, %v863_v10 }
 0x17b   : > { %2083 = vmatprep.subr.mxu0 %v2248_v27 }
 0x17c   : > { %v1128_v11 = vpop.permute.xlu0 %1127  ;;  %2084 = vmatpush3.msra.mxu0 %v862_v9  ;;  %v781_v12 = vpop.permute.xlu1 %780 }
 0x17d   : > { %783 = vst.msk [vmem:[#allocation2 + $0x3] sm:$0x7] %vm777_vm2, %v781_v12  ;;  %2085 = vmatprep.subr.mxu0 %v2248_v27  ;;  %vm1397_vm2 = vcmask 121856  }
 0x17e   : > { %2086 = vmatpush3.msra.mxu0 %v861_v2 }
 0x17f   : > { %2087 = vmatprep.subr.mxu0 %v2248_v27 }
 0x180   : > { %v859_v13 = vld [vmem:[#allocation2 + $0x8] sm:$0xff]  ;;  %v2562_v14 = vpop.permute.xlu0 %1119  ;;  %2088 = vmatpush3.msra.mxu0 %v860_v61  ;;  %v984_v15 = vpop.permute.xlu1 %983 }
 0x181   : > { %966 = vst.msk [vmem:[#allocation2 + $0x9] sm:$0x7] %vm962_vm7, %v824_v52  ;;  %967 = vst.msk [vmem:[#allocation2 + $0xc] sm:$0x7] %vm962_vm7, %v828_v58  ;;  %2089 = vmatprep.subr.mxu0 %v2248_v27 }
 0x182   : > { %968 = vst.msk [vmem:[#allocation2 + $0xf] sm:$0x7] %vm962_vm7, %v2528_v60  ;;  %2090 = vmatpush3.msra.mxu0 %v859_v13 }
 0x183   : > { %2091 = vmatprep.subr.mxu0 %v2248_v27 }
 0x184   : > { %v858_v17 = vld [vmem:[#allocation2] sm:$0xff]  ;;  %v982_v18 = vpop.permute.xlu0 %981  ;;  %v994_v19 = vpop.permute.xlu1 %993 }
 0x185   : > { %963 = vst.msk [vmem:[#allocation2] sm:$0x7] %vm962_vm7, %v807_v55  ;;  %964 = vst.msk [vmem:[#allocation2 + $0x3] sm:$0x7] %vm962_vm7, %v2516_v48  ;;  %v986_v20 = vsel %vm985_vm11, %v982_v18, %v984_v15  ;;  %2092 = vmatpush3.msra.mxu0 %v858_v17  ;;  %v1139_v55 = vld [vmem:[%s2927_s4] sm:$0x1f] }
 0x186   : > { %965 = vst.msk [vmem:[#allocation2 + $0x6] sm:$0x7] %vm962_vm7, %v2521_v53  ;;  %996 = vst.msk [vmem:[#allocation2 + $0x27] sm:$0x7] %vm962_vm7, %v994_v19  ;;  %2094 = vmatmul.mubr.msk.f32.vlgmr.msra.gmra.mxu0 %vm836_vm6, %v857_v16  ;;  %2111 = vmatprep.subr.mxu0 %v2248_v27 }
 0x187   : > { %988 = vst.msk [vmem:[#allocation2 + $0x21] sm:$0x7] %vm962_vm7, %v986_v20  ;;  %2123 = vmatprep.mubr.msk.f32.mxu0 %vm2253_vm3, %v2248_v27 }
 0x188   : > { %v973_v22 = vpop.permute.xlu0 %972  ;;  %v1130_v23 = vpop.permute.xlu1 %1129 }
 0x189   : > { %v1000_v21 = vld [vmem:[#allocation2 + $0x10] sm:$0xff]  ;;  %975 = vst.msk [vmem:[#allocation2 + $0x1b] sm:$0x7] %vm962_vm7, %v973_v22  ;;  %v1132_v35 = vsel %vm1131_vm12, %v1128_v11, %v1130_v23 }
 0x18a   : > { %1107 = vst.msk [vmem:[#allocation2 + $0x12] sm:$0x7] %vm962_vm7, %v986_v20  ;;  %1108 = vst.msk [vmem:[#allocation2 + $0x15] sm:$0x7] %vm962_vm7, %v2552_v7 }
 0x18c   : > { %v2588_v26 = vpop.permute.xlu0 %1135  ;;  %v1124_v28 = vpop.permute.xlu1 %1123 }
 0x18d   : > { %v998_v24 = vld [vmem:[#allocation2] sm:$0xff]  ;;  %v999_v25 = vld [vmem:[#allocation2 + $0x8] sm:$0xff] }
 0x18e   : > { %v1003_v29 = vld [vmem:[#allocation2 + $0x28] sm:$0x3]  ;;  %1102 = vst.msk [vmem:[#allocation2 + $0x3] sm:$0x7] %vm962_vm7, %v2532_v62  ;;  %1101 = vst.msk [vmem:[#allocation2] sm:$0x7] %vm962_vm7, %v2528_v60 }
 0x18f   : > { %1105 = vst.msk [vmem:[#allocation2 + $0xc] sm:$0x7] %vm962_vm7, %v973_v22  ;;  %1103 = vst.msk [vmem:[#allocation2 + $0x6] sm:$0x7] %vm962_vm7, %v2534_v63  ;;  %2097 = vmatpush3.msk.msra.mxu1 %vm873_vm10, %v1003_v29  ;;  %v1280_v60 = vld [vmem:[%s2927_s4] sm:$0x1f] }
 0x190   : > { %1104 = vst.msk [vmem:[#allocation2 + $0x9] sm:$0x7] %vm962_vm7, %v2544_v3  ;;  %2098 = vmatprep.subr.mxu1 %v2248_v27  ;;  %v1114_v30 = vpop.permute.xlu0 %1113  ;;  %v977_v31 = vpop.permute.xlu1 %976 }
 0x191   : > { %979 = vst.msk [vmem:[#allocation2 + $0x1e] sm:$0x7] %vm962_vm7, %v977_v31  ;;  %1106 = vst.msk [vmem:[#allocation2 + $0xf] sm:$0x7] %vm962_vm7, %v977_v31 }
 0x194   : > { %v1275_v32 = vpop.permute.xlu0 %1274  ;;  %v1112_v33 = vpop.permute.xlu1 %1111 }
 0x195   : > { %v1116_v38 = vsel %vm1115_vm13, %v1112_v33, %v1114_v30 }
 0x196   : > { %v2603_v34 = vld [vmem:[#allocation2] sm:$0xff] }
 0x197   : > { %1243 = vst.msk [vmem:[#allocation2] sm:$0x7] %vm962_vm7, %v977_v31  ;;  %1244 = vst.msk [vmem:[#allocation2 + $0x3] sm:$0x7] %vm962_vm7, %v986_v20 }
 0x198   : > { %v1002_v36 = vld [vmem:[#allocation2 + $0x20] sm:$0xff]  ;;  %v1001_v37 = vld [vmem:[#allocation2 + $0x18] sm:$0xff]  ;;  %v1273_v39 = vpop.permute.xlu1 %1272  ;;  %v1142_v40 = vld [vmem:[#allocation2 + $0x10] sm:$0xff]  ;;  %v1259_v42 = vpop.permute.xlu0 %1258 }
 0x199   : > { %1126 = vst.msk [vmem:[#allocation2 + $0x21] sm:$0x7] %vm962_vm7, %v1124_v28  ;;  %1134 = vst.msk [vmem:[#allocation2 + $0x24] sm:$0x7] %vm962_vm7, %v1132_v35  ;;  %2099 = vmatpush3.msra.mxu1 %v1002_v36  ;;  %v1141_v41 = vld [vmem:[#allocation2 + $0x8] sm:$0xff]  ;;  %v1277_v45 = vsel %vm1276_vm14, %v1273_v39, %v1275_v32  ;;  %v1388_v36 = vld [vmem:[%s2931_s8] sm:$0xff] }
 0x19a   : > { %1138 = vst.msk [vmem:[#allocation2 + $0x27] sm:$0x7] %vm962_vm7, %v2588_v26  ;;  %1122 = vst.msk [vmem:[#allocation2 + $0x1e] sm:$0x7] %vm962_vm7, %v2562_v14  ;;  %2100 = vmatprep.subr.mxu1 %v2248_v27 }
 0x19b   : > { %1118 = vst.msk [vmem:[#allocation2 + $0x1b] sm:$0x7] %vm962_vm7, %v1116_v38  ;;  %1109 = vst.msk [vmem:[#allocation2 + $0x18] sm:$0x7] %vm962_vm7, %v994_v19  ;;  %2101 = vmatpush3.msra.mxu1 %v1001_v37 }
 0x19c   : > { %1249 = vst.msk [vmem:[#allocation2 + $0x12] sm:$0x7] %vm962_vm7, %v1124_v28  ;;  %1250 = vst.msk [vmem:[#allocation2 + $0x15] sm:$0x7] %vm962_vm7, %v1132_v35  ;;  %2102 = vmatprep.subr.mxu1 %v2248_v27  ;;  %v1257_v43 = vpop.permute.xlu1 %1256  ;;  %v1269_v46 = vpop.permute.xlu0 %1268 }
 0x19d   : > { %1246 = vst.msk [vmem:[#allocation2 + $0x9] sm:$0x7] %vm962_vm7, %v994_v19  ;;  %1247 = vst.msk [vmem:[#allocation2 + $0xc] sm:$0x7] %vm962_vm7, %v1116_v38  ;;  %2103 = vmatpush3.msra.mxu1 %v1000_v21  ;;  %v1261_v48 = vsel %vm1260_vm15, %v1257_v43, %v1259_v42 }
 0x19e   : > { %1248 = vst.msk [vmem:[#allocation2 + $0xf] sm:$0x7] %vm962_vm7, %v2562_v14  ;;  %1245 = vst.msk [vmem:[#allocation2 + $0x6] sm:$0x7] %vm962_vm7, %v2552_v7  ;;  %2104 = vmatprep.subr.mxu1 %v2248_v27 }
 0x19f   : > { %2105 = vmatpush3.msra.mxu1 %v999_v25 }
 0x1a0   : > { %2106 = vmatprep.subr.mxu1 %v2248_v27  ;;  %v1265_v49 = vpop.permute.xlu1 %1264 }
 0x1a1   : > { %v1145_v50 = vld [vmem:[#allocation2 + $0x28] sm:$0x3]  ;;  %v1144_v51 = vld [vmem:[#allocation2 + $0x20] sm:$0xff]  ;;  %2107 = vmatpush3.msra.mxu1 %v998_v24 }
 0x1a2   : > { %v1143_v52 = vld [vmem:[#allocation2 + $0x18] sm:$0xff]  ;;  %2112 = vmatpush3.msk.msra.mxu0 %vm873_vm10, %v1145_v50  ;;  %1267 = vst.msk [vmem:[#allocation2 + $0x21] sm:$0x7] %vm962_vm7, %v1265_v49  ;;  %1271 = vst.msk [vmem:[#allocation2 + $0x24] sm:$0x7] %vm962_vm7, %v1269_v46  ;;  %2109 = vmatmul.mubr.msk.f32.vlgmr.msra.gmra.mxu1 %vm836_vm6, %v997_v44 }
 0x1a3   : > { %1279 = vst.msk [vmem:[#allocation2 + $0x27] sm:$0x7] %vm962_vm7, %v1277_v45  ;;  %1251 = vst.msk [vmem:[#allocation2 + $0x18] sm:$0x7] %vm962_vm7, %v2588_v26  ;;  %2113 = vmatprep.subr.mxu0 %v2248_v27  ;;  %2126 = vmatprep.subr.mxu1 %v2248_v27 }
 0x1a4   : > { %1263 = vst.msk [vmem:[#allocation2 + $0x1e] sm:$0x7] %vm962_vm7, %v1261_v48  ;;  %2114 = vmatpush3.msra.mxu0 %v1144_v51  ;;  %v1253_v53 = vpop.permute.xlu1 %1252  ;;  %2138 = vmatprep.mubr.msk.f32.mxu1 %vm2253_vm3, %v2248_v27  ;;  %v1722_v51 = vld [vmem:[%s2933_s10 + $0xf8] sm:$0xff] }
 0x1a5   : > { %2115 = vmatprep.subr.mxu0 %v2248_v27  ;;  %1255 = vst.msk [vmem:[#allocation2 + $0x1b] sm:$0x7] %vm962_vm7, %v1253_v53  ;;  %v1283_v58 = vld [vmem:[#allocation2 + $0x10] sm:$0xff]  ;;  %v1282_v59 = vld [vmem:[#allocation2 + $0x8] sm:$0xff]  ;;  %v1281_v61 = vld [vmem:[#allocation2] sm:$0xff] }
 0x1a6   : > { %2116 = vmatpush3.msra.mxu0 %v1143_v52  ;;  %v1706_v52 = vld [vmem:[%s2933_s10 + $0x78] sm:$0xff]  ;;  %v1721_v53 = vld [vmem:[%s2933_s10 + $0xf0] sm:$0xff] }
 0x1a7   : > { %2117 = vmatprep.subr.mxu0 %v2248_v27 }
 0x1a8   : > { %2118 = vmatpush3.msra.mxu0 %v1142_v40 }
 0x1a9   : > { %2119 = vmatprep.subr.mxu0 %v2248_v27  ;;  %v868_v62 = vpop.permute.xlu0 %867 }
 0x1aa   : > { %v1286_v54 = vld [vmem:[#allocation2 + $0x28] sm:$0x3]  ;;  %2120 = vmatpush3.msra.mxu0 %v1141_v41 }
 0x1ab   : > { %2127 = vmatpush3.msk.msra.mxu1 %vm873_vm10, %v1286_v54  ;;  %2121 = vmatprep.subr.mxu0 %v2248_v27  ;;  %v1285_v56 = vld [vmem:[#allocation2 + $0x20] sm:$0xff]  ;;  %v1705_v54 = vld [vmem:[%s2933_s10 + $0x70] sm:$0xff]  ;;  %vm1619_vm10 = vcmask 736256  }
 0x1ac   : > { %2128 = vmatprep.subr.mxu1 %v2248_v27  ;;  %2122 = vmatpush3.msra.mxu0 %v2603_v34  ;;  %v1284_v57 = vld [vmem:[#allocation2 + $0x18] sm:$0xff] }
 0x1ad   : > { %2129 = vmatpush3.msra.mxu1 %v1285_v56  ;;  %2124 = vmatmul.mubr.msk.f32.vlgmr.msra.gmra.mxu0 %vm836_vm6, %v1139_v55  ;;  %v959_v5 = vpop.permute.xlu0 %958  ;;  %v1720_v55 = vld [vmem:[%s2933_s10 + $0xe8] sm:$0xff]  ;;  %v1735_v56 = vld [vmem:[%s2933_s10 + $0x160] sm:$0xff] }
 0x1ae   : > { %2130 = vmatprep.subr.mxu1 %v2248_v27  ;;  %2032 = vmatprep.subr.mxu0 %v1722_v51  ;;  %v1693_v51 = vld [vmem:[%s2933_s10 + $0x10] sm:$0xff] }
 0x1af   : > { %2131 = vmatpush3.msra.mxu1 %v1284_v57  ;;  %2033 = vmatpush3.msra.mxu0 %v1706_v52  ;;  %v1704_v57 = vld [vmem:[%s2933_s10 + $0x68] sm:$0xff] }
 0x1b0   : > { %2132 = vmatprep.subr.mxu1 %v2248_v27  ;;  %2034 = vmatprep.subr.mxu0 %v1721_v53  ;;  %v1708_v52 = vld [vmem:[%s2933_s10 + $0x88] sm:$0xff] }
 0x1b1   : > { %2133 = vmatpush3.msra.mxu1 %v1283_v58  ;;  %v952_v3 = vpop.permute.xlu1 %951  ;;  %v1150_v13 = vpop.permute.xlu0 %1149  ;;  %v1734_v58 = vld [vmem:[%s2933_s10 + $0x158] sm:$0xff]  ;;  %2035 = vmatpush3.msra.mxu0 %v1705_v54  ;;  %v1724_v53 = vld [vmem:[%s2933_s10 + $0x108] sm:$0xff] }
 0x1b2   : > { %2134 = vmatprep.subr.mxu1 %v2248_v27  ;;  %2036 = vmatprep.subr.mxu0 %v1720_v55  ;;  %v1692_v54 = vld [vmem:[%s2933_s10 + $0x8] sm:$0xff] }
 0x1b3   : > { %2135 = vmatpush3.msra.mxu1 %v1282_v59  ;;  %v1719_v59 = vld [vmem:[%s2933_s10 + $0xe0] sm:$0xff]  ;;  %2037 = vmatpush3.msra.mxu0 %v1704_v57 }
 0x1b4   : > { %2136 = vmatprep.subr.mxu1 %v2248_v27  ;;  %2038 = vmatprep.subr.mxu0 %v1719_v59  ;;  %v1723_v57 = vld [vmem:[%s2933_s10 + $0x100] sm:$0xff] }
 0x1b5   : > { %2137 = vmatpush3.msra.mxu1 %v1281_v61  ;;  %v1008_v7 = vpop.permute.xlu1 %1007  ;;  %v1233_v17 = vpop.permute.xlu0 %1232  ;;  %v1718_v61 = vld [vmem:[%s2933_s10 + $0xd8] sm:$0xff] }
 0x1b6   : > { %2139 = vmatmul.mubr.msk.f32.vlgmr.msra.gmra.mxu1 %vm836_vm6, %v1280_v60  ;;  %2141 = vmatprep.subr.mxu1 %v2248_v27  ;;  %v1703_v60 = vld [vmem:[%s2933_s10 + $0x60] sm:$0xff] }
 0x1b7   : > { %2145 = vmatprep.mubr.msk.f32.mxu1 %vm2253_vm3, %v2248_v27  ;;  %2039 = vmatpush3.msra.mxu0 %v1703_v60 }
 0x1b8   : > { %2040 = vmatprep.subr.mxu0 %v1718_v61 }
 0x1b9   : > { %v1091_v8 = vpop.permute.xlu1 %1090  ;;  %v1240_v23 = vpop.permute.xlu0 %1239 }
 0x1bd   : > { %v1098_v15 = vpop.permute.xlu1 %1097  ;;  %v1374_v31 = vpop.permute.xlu0 %1373 }
 0x1c1   : > { %v1291_v24 = vpop.permute.xlu1 %1290 }
 0x1c5   : > { %v1381_v33 = vpop.permute.xlu1 %1380 }
 0x1c9   : > { %v1395_v40 = vpop.permute.xlu1 %1394 }
 0x246   : > { %v943_v63 = vpop.f32.mrf.mxu0 }
 0x247   : > { %v944_v0 = vadd.f32 %v943_v63, %v868_v62  ;;  %v1580_v62 = vlaneseq  ;;  %v2271_v63 = vmov 1966171168  }
 0x248   : > { %v2095_v1 = vpop.f32.mrf.mxu0 }
 0x249   : > { %v947_v2 = vmax.f32 %v944_v0, 0.0  ;;  %v1587_v0 = vunpack.c.l.s4 %v2271_v63  ;;  %vm1612_vm4 = vcmp.lt.s32.totalorder %v1580_v62, 90  ;;  %vm2851_vm6 = vcmp.ge.s32.totalorder %v1580_v62, 90 }
 0x24a   : > { %vm2856_vm7 = vcmp.lt.s32.totalorder %v1580_v62, 135  ;;  %vm2861_vm8 = vcmp.ge.s32.totalorder %v1580_v62, 7  ;;  %vm2866_vm9 = vcmp.lt.s32.totalorder %v1580_v62, 52  ;;  %vm2879_vm13 = vcmp.ge.s32.totalorder %v1580_v62, 52 }
 0x24b   : > { %v954_v4 = vmul.f32 %v952_v3, %v947_v2  ;;  %v1588_v3 = vunpack.c.0.s8 %v1587_v0  ;;  %vm1624_vm11 = vmand %vm2851_vm6, %vm2856_vm7  ;;  %vm2884_vm14 = vcmp.lt.s32.totalorder %v1580_v62, 97  ;;  %vm2889_vm15 = vcmp.ge.s32.totalorder %v1580_v62, 97 }
 0x24c   : > { %vm1632_vm12 = vmand %vm2861_vm8, %vm2866_vm9  ;;  %vm1686_vm6 = vcmp.ge.s32.totalorder %v1580_v62, 59  ;;  %vm1687_vm7 = vcmp.lt.s32.totalorder %v1580_v62, 104 }
 0x24d   : > { %v961_v6 = vadd.f32 %v959_v5, %v954_v4  ;;  %v2724_v4 = vshrl.u32 %v1580_v62, 7  ;;  %v1702_v5 = vld [vmem:[%s2933_s10 + $0x58] sm:$0xff]  ;;  %vm1688_vm9 = vmand %vm1686_vm6, %vm1687_vm7 }
 0x24e   : > { %2041 = vmatpush3.msra.mxu0 %v1702_v5 }
 0x24f   : > { %1478 = vrot.lane.b32.xlu0 %v961_v6, %s2258_s14  ;;  %1385 = vst.msk [vmem:[#allocation3] sm:$0x1f] %vm1384_vm1, %v961_v6 }
 0x253   : > { %1488 = vperm.xlu0 %2230, %v2513_v47  }
 0x262   : > { %v1082_v9 = vpop.f32.mrf.mxu1 }
 0x263   : > { %v1083_v10 = vadd.f32 %v1082_v9, %v1008_v7  ;;  %v1717_v7 = vld [vmem:[%s2933_s10 + $0xd0] sm:$0xff] }
 0x264   : > { %v2110_v11 = vpop.f32.mrf.mxu1  ;;  %2042 = vmatprep.subr.mxu0 %v1717_v7 }
 0x265   : > { %v1086_v12 = vmax.f32 %v1083_v10, 0.0  ;;  %v1701_v10 = vld [vmem:[%s2933_s10 + $0x50] sm:$0xff]  ;;  %v1716_v11 = vld [vmem:[%s2933_s10 + $0xc8] sm:$0xff] }
 0x266   : > { %2043 = vmatpush3.msra.mxu0 %v1701_v10 }
 0x267   : > { %v1093_v14 = vmul.f32 %v1091_v8, %v1086_v12  ;;  %v1733_v8 = vld [vmem:[%s2933_s10 + $0x150] sm:$0xff]  ;;  %v1732_v12 = vld [vmem:[%s2933_s10 + $0x148] sm:$0xff]  ;;  %2044 = vmatprep.subr.mxu0 %v1716_v11 }
 0x269   : > { %v1100_v16 = vadd.f32 %v1098_v15, %v1093_v14  ;;  %v1744_v15 = vsub.s32 1, %v2724_v4 }
 0x26b   : > { %1386 = vst.msk [vmem:[#allocation3 + $0x5] sm:$0x1f] %vm1384_vm1, %v1100_v16  ;;  %v1700_v16 = vld [vmem:[%s2933_s10 + $0x48] sm:$0xff] }
 0x26c   : > { %2045 = vmatpush3.msra.mxu0 %v1700_v16  ;;  %v1748_v16 = vsub.s32 2, %v2724_v4 }
 0x26d   : > { %v1224_v18 = vpop.f32.mrf.mxu0 }
 0x26e   : > { %v1225_v19 = vadd.f32 %v1224_v18, %v1150_v13  ;;  %v1591_v13 = vsub.s32 %v1588_v3, %v2724_v4  ;;  %v1715_v18 = vld [vmem:[%s2933_s10 + $0xc0] sm:$0xff] }
 0x26f   : > { %v2125_v20 = vpop.f32.mrf.mxu0  ;;  %2046 = vmatprep.subr.mxu0 %v1715_v18 }
 0x270   : > { %v1228_v21 = vmax.f32 %v1225_v19, 0.0  ;;  %v1731_v19 = vld [vmem:[%s2933_s10 + $0x140] sm:$0xff] }
 0x271   : > { %v1699_v20 = vld [vmem:[%s2933_s10 + $0x40] sm:$0xff] }
 0x272   : > { %v1235_v22 = vmul.f32 %v1233_v17, %v1228_v21  ;;  %v1389_v26 = vld [vmem:[#allocation3] sm:$0xff]  ;;  %v1714_v21 = vld [vmem:[%s2933_s10 + $0xb8] sm:$0xff]  ;;  %2047 = vmatpush3.msra.mxu0 %v1699_v20 }
 0x273   : > { %2048 = vmatprep.subr.mxu0 %v1714_v21 }
 0x274   : > { %v1242_v47 = vadd.f32 %v1240_v23, %v1235_v22  ;;  %v1730_v22 = vld [vmem:[%s2933_s10 + $0x138] sm:$0xff] }
 0x276   : > { %v1365_v25 = vpop.f32.mrf.mxu1  ;;  %1387 = vst.msk [vmem:[#allocation3 + $0xa] sm:$0x1f] %vm1384_vm1, %v1242_v47  ;;  %1475 = vst.msk [vmem:[#allocation3] sm:$0x1f] %vm1384_vm1, %v1242_v47 }
 0x277   : > { %v1366_v28 = vadd.f32 %v1365_v25, %v1291_v24  ;;  %v1698_v24 = vld [vmem:[%s2933_s10 + $0x38] sm:$0xff] }
 0x278   : > { %v2140_v29 = vpop.f32.mrf.mxu1  ;;  %2049 = vmatpush3.msra.mxu0 %v1698_v24 }
 0x279   : > { %v1369_v30 = vmax.f32 %v1366_v28, 0.0  ;;  %v1713_v29 = vld [vmem:[%s2933_s10 + $0xb0] sm:$0xff] }
 0x27a   : > { %2050 = vmatprep.subr.mxu0 %v1713_v29 }
 0x27b   : > { %v1376_v32 = vmul.f32 %v1374_v31, %v1369_v30  ;;  %v1729_v30 = vld [vmem:[%s2933_s10 + $0x130] sm:$0xff] }
 0x27c   : > { %v1697_v31 = vld [vmem:[%s2933_s10 + $0x30] sm:$0xff] }
 0x27d   : > { %v1383_v34 = vadd.f32 %v1381_v33, %v1376_v32  ;;  %v1390_v35 = vld [vmem:[#allocation3 + $0x8] sm:$0x7f]  ;;  %v1712_v32 = vld [vmem:[%s2933_s10 + $0xa8] sm:$0xff]  ;;  %2051 = vmatpush3.msra.mxu0 %v1697_v31 }
 0x27e   : > { %2142 = vmatpush3.msk.msra.mxu1 %vm552_vm0, %v1390_v35  ;;  %2052 = vmatprep.subr.mxu0 %v1712_v32 }
 0x27f   : > { %1476 = vst.msk [vmem:[#allocation3 + $0x5] sm:$0x1f] %vm1384_vm1, %v1383_v34  ;;  %2143 = vmatprep.subr.mxu1 %v2248_v27 }
 0x280   : > { %2144 = vmatpush3.msra.mxu1 %v1389_v26 }
 0x281   : > { %2146 = vmatmul.mubr.msk.f32.vlgmr.msra.gmra.mxu1 %vm1397_vm2, %v1388_v36  ;;  %2148 = vmatprep.subr.mxu1 %v2248_v27 }
 0x282   : > { %2152 = vmatprep.mubr.msk.f32.mxu1 %vm2253_vm3, %v2248_v27 }
 0x286   : > { %v1483_v39 = vld [vmem:[#allocation3] sm:$0xff] }
 0x2c1   : > { %v1479_v37 = vpop.permute.xlu0 %1478 }
 0x2c2   : > { %1481 = vst.msk [vmem:[#allocation3 + $0xa] sm:$0x1f] %vm1384_vm1, %v1479_v37  ;;  %v1696_v37 = vld [vmem:[%s2933_s10 + $0x28] sm:$0xff]  ;;  %vm2894_vm1 = vcmp.lt.s32.totalorder %v1580_v62, 142 }
 0x2c3   : > { %2053 = vmatpush3.msra.mxu0 %v1696_v37 }
 0x2c9   : > { %v1484_v38 = vld [vmem:[#allocation3 + $0x8] sm:$0x7f] }
 0x2ca   : > { %2149 = vmatpush3.msk.msra.mxu1 %vm552_vm0, %v1484_v38  ;;  %vm2747_vm0 = vcmp.lt.s32.totalorder %v1580_v62, 45  ;;  %v1711_v38 = vld [vmem:[%s2933_s10 + $0xa0] sm:$0xff] }
 0x2cb   : > { %2150 = vmatprep.subr.mxu1 %v2248_v27  ;;  %2054 = vmatprep.subr.mxu0 %v1711_v38 }
 0x2cc   : > { %2151 = vmatpush3.msra.mxu1 %v1483_v39  ;;  %v1727_v39 = vld [vmem:[%s2933_s10 + $0x120] sm:$0xff] }
 0x2cd   : > { %2153 = vmatmul.mubr.msk.f32.vlgmr.msra.gmra.mxu1 %vm1397_vm2, %v1388_v36  ;;  %2155 = vmatprep.subr.mxu1 %v2248_v27  ;;  %v1728_v36 = vld [vmem:[%s2933_s10 + $0x128] sm:$0xff]  ;;  %vm1678_vm2 = vcmp.ge.s32.totalorder %v1580_v62, 14 }
 0x2ce   : > { %2181 = vmatprep.mubr.msk.f32.mxu1 %vm2253_vm3, %v2248_v27  ;;  %v1489_v45 = vpop.permute.xlu0 %1488  ;;  %2156 = vmatpush3.msra.mxu1 %v1735_v56  ;;  %v1707_v56 = vld [vmem:[%s2933_s10 + $0x80] sm:$0xff]  ;;  %vm1611_vm3 = vcmp.ge.s32.totalorder %v1580_v62, 45 }
 0x2cf   : > { %2157 = vmatprep.subr.mxu1 %v2248_v27  ;;  %vm1613_vm5 = vmand %vm1611_vm3, %vm1612_vm4  ;;  %vm1667_vm3 = vcmask 793600  }
 0x2d0   : > { %2158 = vmatpush3.msra.mxu1 %v1734_v58  ;;  %v1691_v58 = vld [vmem:[%s2933_s10] sm:$0xff]  ;;  %vm1654_vm4 = vmand %vm2879_vm13, %vm2884_vm14 }
 0x2d1   : > { %2159 = vmatprep.subr.mxu1 %v2248_v27 }
 0x2d2   : > { %2160 = vmatpush3.msra.mxu1 %v1733_v8 }
 0x2d3   : > { %2161 = vmatprep.subr.mxu1 %v2248_v27 }
 0x2d4   : > { %2162 = vmatpush3.msra.mxu1 %v1732_v12 }
 0x2d5   : > { %2163 = vmatprep.subr.mxu1 %v2248_v27 }
 0x2d6   : > { %2164 = vmatpush3.msra.mxu1 %v1731_v19 }
 0x2d7   : > { %2165 = vmatprep.subr.mxu1 %v2248_v27 }
 0x2d8   : > { %2166 = vmatpush3.msra.mxu1 %v1730_v22 }
 0x2d9   : > { %2167 = vmatprep.subr.mxu1 %v2248_v27 }
 0x2da   : > { %2168 = vmatpush3.msra.mxu1 %v1729_v30 }
 0x2db   : > { %2169 = vmatprep.subr.mxu1 %v2248_v27 }
 0x2dc   : > { %2170 = vmatpush3.msra.mxu1 %v1728_v36 }
 0x2dd   : > { %2171 = vmatprep.subr.mxu1 %v2248_v27 }
 0x2de   : > { %2172 = vmatpush3.msra.mxu1 %v1727_v39 }
 0x2df   : > { %2173 = vmatprep.subr.mxu1 %v2248_v27 }
 0x341   : > { %v1470_v41 = vpop.f32.mrf.mxu1 }
 0x342   : > { %v1471_v42 = vadd.f32 %v1470_v41, %v1395_v40  ;;  %v1695_v40 = vld [vmem:[%s2933_s10 + $0x20] sm:$0xff] }
 0x343   : > { %v2147_v43 = vpop.f32.mrf.mxu1  ;;  %2055 = vmatpush3.msra.mxu0 %v1695_v40 }
 0x344   : > { %v1474_v44 = vmax.f32 %v1471_v42, 0.0 }
 0x346   : > { %1570 = vrot.lane.b32.xlu1 %v1474_v44, %s2258_s14 }
 0x38d   : > { %v1563_v46 = vpop.f32.mrf.mxu1 }
 0x38e   : > { %v1564_v48 = vadd.f32 %v1563_v46, %v1489_v45  ;;  %v1726_v45 = vld [vmem:[%s2933_s10 + $0x118] sm:$0xff] }
 0x38f   : > { %v2154_v49 = vpop.f32.mrf.mxu1  ;;  %v1694_v46 = vld [vmem:[%s2933_s10 + $0x18] sm:$0xff]  ;;  %2174 = vmatpush3.msra.mxu1 %v1726_v45 }
 0x390   : > { %v1567_v50 = vmax.f32 %v1564_v48, 0.0  ;;  %v1709_v48 = vld [vmem:[%s2933_s10 + $0x90] sm:$0xff]  ;;  %2175 = vmatprep.subr.mxu1 %v2248_v27 }
 0x392   : > { %1575 = vrot.lane.b32.xlu0 %v1567_v50, %s2258_s14  ;;  %v1568_v2 = vadd.f32 %v1567_v50, %v1474_v44  ;;  %v1710_v44 = vld [vmem:[%s2933_s10 + $0x98] sm:$0xff]  ;;  %v1725_v50 = vld [vmem:[%s2933_s10 + $0x110] sm:$0xff] }
 0x393   : > { %2056 = vmatprep.subr.mxu0 %v1710_v44  ;;  %2176 = vmatpush3.msra.mxu1 %v1725_v50 }
 0x394   : > { %2057 = vmatpush3.msra.mxu0 %v1694_v46  ;;  %2177 = vmatprep.subr.mxu1 %v2248_v27 }
 0x395   : > { %2058 = vmatprep.subr.mxu0 %v1709_v48  ;;  %2178 = vmatpush3.msra.mxu1 %v1724_v53 }
 0x396   : > { %2059 = vmatpush3.msra.mxu0 %v1693_v51  ;;  %2179 = vmatprep.subr.mxu1 %v2248_v27 }
 0x397   : > { %2060 = vmatprep.subr.mxu0 %v1708_v52  ;;  %2180 = vmatpush3.msra.mxu1 %v1723_v57 }
 0x398   : > { %2061 = vmatpush3.msra.mxu0 %v1692_v54 }
 0x399   : > { %2062 = vmatprep.subr.mxu0 %v1707_v56 }
 0x39a   : > { %2063 = vmatpush3.msra.mxu0 %v1691_v58 }
 0x3b8   : > { %v1571_v1 = vpop.permute.xlu1 %1570 }
 0x3b9   : > { %v1573_v6 = vadd.f32 %v1571_v1, %v1568_v2 }
 0x404   : > { %v1576_v9 = vpop.permute.xlu0 %1575 }
 0x405   : > { %v1578_v14 = vadd.f32 %v1576_v9, %v1573_v6 }
 0x407   : > { %v1579_v17 = vmul.f32 0.25, %v1578_v14 }
 0x409   : > { %v1592_v23 = vrot.slane %v1579_v17, %v1591_v13  ;;  %v1634_v47 = vcombine.high %v1579_v17, %v1579_v17  ;;  %1584 = vst.msk [vmem:[#allocation4] sm:$0x1] %vm2747_vm0, %v1579_v17  ;;  %vm1679_vm0 = vcmp.lt.s32.totalorder %v1580_v62, 59  ;;  %v1740_v17 = vsub.s32 0, %v2724_v4 }
 0x40a   : > { %vm1680_vm8 = vmand %vm1678_vm2, %vm1679_vm0 }
 0x40b   : > { %v1641_v25 = vrot.slane %v1634_v47, %v1591_v13  ;;  %v1600_v26 = vrot.slane %v1592_v23, %v1591_v13  ;;  %v1593_v28 = vcombine.high %v1592_v23, %v1592_v23  ;;  %v1736_v47 = vld [vmem:[%s2934_s11] sm:$0x1] }
 0x40d   : > { %v1615_v33 = vcombine.high %v1600_v26, %v1600_v26  ;;  %v1607_v34 = vrot.slane %v1593_v28, %v1591_v13  ;;  %v1656_v35 = vcombine.high %v1641_v25, %v1641_v25  ;;  %v1648_v43 = vrot.slane %v1641_v25, %v1591_v13 }
 0x40f   : > { %1616 = vrot.lane.b32.xlu1 %v1615_v33, %s2272_s16  ;;  %1608 = vrot.lane.b32.xlu0 %v1607_v34, %s2273_s17  ;;  %v1663_v41 = vrot.slane %v1656_v35, %v1591_v13  ;;  %v1626_v42 = vcombine.high %v1607_v34, %v1607_v34  ;;  %v1674_v49 = vcombine.high %v1648_v43, %v1648_v43 }
 0x411   : > { %v1682_v55 = vcombine.high %v1663_v41, %v1663_v41 }
 0x413   : > { %1664 = vrot.lane.b32.xlu1 %v1663_v41, %s2254_s28  ;;  %1627 = vrot.lane.b32.xlu0 %v1626_v42, %s2266_s24 }
 0x417   : > { %1649 = vrot.lane.b32.xlu1 %v1648_v43, %s2274_s19  ;;  %1675 = vrot.lane.b32.xlu0 %v1674_v49, %s2275_s20  ;;  %s409_s20 = scalar_lea.vmem %s2935_s12, %s2955_s22 }
 0x41b   : > { %1683 = vrot.lane.b32.xlu1 %v1682_v55, %s2276_s18 }
 0x481   : > { %v1617_v63 = vpop.permute.xlu1 %1616  ;;  %v1609_v0 = vpop.permute.xlu0 %1608 }
 0x482   : > { %v1618_v1 = vrot.slane %v1617_v63, 7  ;;  %1614 = vst.msk [vmem:[#allocation4] sm:$0x1] %vm1613_vm5, %v1609_v0  ;;  %vm1672_vm5 = vmand %vm2889_vm15, %vm2894_vm1 }
 0x484   : > { %v1620_v2 = vsel %vm1619_vm10, %v1618_v1, %v1617_v63  ;;  %vm1752_vm10 = vcmask 850944  }
 0x485   : > { %v1665_v6 = vpop.permute.xlu1 %1664  ;;  %v1628_v7 = vpop.permute.xlu0 %1627  ;;  %1625 = vst.msk [vmem:[#allocation4] sm:$0x3] %vm1624_vm11, %v1620_v2  ;;  %vm1896_vm11 = vcmask 57344  }
 0x486   : > { %v1666_v10 = vrot.slane %v1665_v6, 7  ;;  %1633 = vst.msk [vmem:[#allocation4 + $0x1] sm:$0x1] %vm1632_vm12, %v1628_v7 }
 0x488   : > { %v1668_v12 = vsel %vm1667_vm3, %v1666_v10, %v1665_v6 }
 0x489   : > { %v1650_v11 = vpop.permute.xlu1 %1649  ;;  %v1676_v13 = vpop.permute.xlu0 %1675 }
 0x48a   : > { %1655 = vst.msk [vmem:[#allocation4 + $0x1] sm:$0x1] %vm1654_vm4, %v1650_v11 }
 0x48b   : > { %1673 = vst.msk [vmem:[#allocation4 + $0x1] sm:$0x3] %vm1672_vm5, %v1668_v12 }
 0x48c   : > { %1681 = vst.msk [vmem:[#allocation4 + $0x2] sm:$0x1] %vm1680_vm8, %v1676_v13 }
 0x48d   : > { %v1684_v14 = vpop.permute.xlu1 %1683 }
 0x48e   : > { %1689 = vst.msk [vmem:[#allocation4 + $0x2] sm:$0x1] %vm1688_vm9, %v1684_v14 }
 0x495   : > { %v1690_v18 = vld [vmem:[#allocation4] sm:$0x7] }
 0x496   : > { %v1745_v62 = vrot.slane %v1690_v18, %v1744_v15  ;;  %v1749_v19 = vrot.slane %v1690_v18, %v1748_v16  ;;  %v1741_v20 = vrot.slane %v1690_v18, %v1740_v17 }
 0x498   : > { %1819 = vmatprep.mubr.f32.mxu0 %v1745_v62  ;;  %2182 = vmatmul.mubr.msk.f32.vlgmr.msra.gmra.mxu1 %vm1752_vm10, %v1749_v19 }
 0x499   : > { %1820 = vmatmul.mubr.f32.vlgmr.msra.gmra.mxu0 %v1741_v20 }
 0x558   : > { %v1891_v21 = vpop.f32.mrf.mxu1 }
 0x559   : > { %v2064_v22 = vpop.f32.mrf.mxu0 }
 0x55a   : > { %v2183_v23 = vpop.f32.mrf.mxu1 }
 0x55b   : > { %v2065_v24 = vpop.f32.mrf.mxu0 }
 0x55c   : > { %v2066_v25 = vadd.f32 %v2065_v24, %v2064_v22 }
 0x55e   : > { %v1822_v26 = vadd.f32 %v2066_v25, %v1736_v47 }
 0x560   : > { %v1892_v4 = vadd.f32 %v1891_v21, %v1822_v26 }
 0x562   : > { %v1895_v28 = vmax.f32 %v1892_v4, 0.0 }
 0x564   : > { %1897 = vst.msk [vmem:[%s409_s20] sm:$0x1] %vm1896_vm11, %v1895_v28 }
 0x565 PF: > { %s22_s21 = sadd.s32 1, %s2238_s21  }
 0x566   : > { %p19_p4 = scmp.ge.s32.totalorder %s22_s21, 6  }
 0x568   :  { %21 = sbr.rel (!%p19_p4) target bundleno = 1 (0x1), region = 98 }

// kernel: _lambda_.7
= control target key start
LH: loop header
LB: loop body
LE: loop exit
PB: predicated region body
PF: predicated region fallthrough
CT: control target
= control target key end

     0   :  { %11 = vsyncpa [#allocation4], 0  ;;  %v1112_v2 = vmov 0.0   ;;  %vm36_vm0 = vcmask 261120   ;;  %vm1113_vm1 = vmmov 0   ;;  %vm110_vm2 = vcmask 257024   ;;  %s1398_s0 = inlined_call_operand.vmem [shape: f32[4,32], index: 0, kind: input, shape index: {}]   ;;  %s1399_s1 = inlined_call_operand.vmem [shape: f32[4,32,32], index: 1, kind: input, shape index: {}]   ;;  %s1400_s2 = inlined_call_operand.vmem [shape: f32[4,32,32], index: 2, kind: input, shape index: {}]   ;;  %s1401_s3 = inlined_call_operand.vmem [shape: f32[4,1,32], index: 3, kind: input, shape index: {}]   ;;  %s1402_s4 = inlined_call_operand.vmem [shape: f32[32,125], index: 4, kind: input, shape index: {}]   ;;  %s1403_s5 = inlined_call_operand.vmem [shape: f32[1,125], index: 5, kind: input, shape index: {}]   ;;  %s1404_s6 = inlined_call_operand.hbm [shape: f32[1,125], index: 6, kind: output, shape index: {}]  }
   0x1   :  { %v28_v0 = vld [vmem:[%s1399_s1 + $0x18] sm:$0xff]  ;;  %920 = vmatprep.subr.mxu0 %v1112_v2  ;;  %931 = vmatprep.subr.mxu1 %v1112_v2  ;;  %v27_v3 = vld [vmem:[%s1399_s1 + $0x10] sm:$0xff]  ;;  %v26_v5 = vld [vmem:[%s1399_s1 + $0x8] sm:$0xff]  ;;  %v1327_v50 = vmov 0.0   ;;  %v1329_v51 = vmov 0.0   ;;  %s1331_s18 = smov 0  }
   0x2   :  { %v834_v1 = vld [vmem:[%s1399_s1 + $0x38] sm:$0xff]  ;;  %v833_v4 = vld [vmem:[%s1399_s1 + $0x30] sm:$0xff]  ;;  %921 = vmatpush3.msra.mxu0 %v28_v0  ;;  %v832_v6 = vld [vmem:[%s1399_s1 + $0x28] sm:$0xff]  ;;  %928 = vmatprep.mubr.msk.f32.mxu0 %vm1113_vm1, %v1112_v2 }
   0x3   :  { %932 = vmatpush3.msra.mxu1 %v834_v1  ;;  %922 = vmatprep.subr.mxu0 %v1112_v2  ;;  %v25_v7 = vld [vmem:[%s1399_s1] sm:$0xff]  ;;  %v841_v10 = vld [vmem:[%s1399_s1 + $0x58] sm:$0xff]  ;;  %v840_v12 = vld [vmem:[%s1399_s1 + $0x50] sm:$0xff] }
   0x4   :  { %933 = vmatprep.subr.mxu1 %v1112_v2  ;;  %923 = vmatpush3.msra.mxu0 %v27_v3  ;;  %v831_v8 = vld [vmem:[%s1399_s1 + $0x20] sm:$0xff]  ;;  %v848_v11 = vld [vmem:[%s1399_s1 + $0x78] sm:$0xff]  ;;  %v847_v13 = vld [vmem:[%s1399_s1 + $0x70] sm:$0xff] }
   0x5   :  { %934 = vmatpush3.msra.mxu1 %v833_v4  ;;  %924 = vmatprep.subr.mxu0 %v1112_v2  ;;  %v24_v9 = vld [vmem:[%s1398_s0] sm:$0xf]  ;;  %v839_v14 = vld [vmem:[%s1399_s1 + $0x48] sm:$0xff]  ;;  %v1244_v20 = vld [vmem:[%s1400_s2 + $0x10] sm:$0xff] }
   0x6   :  { %935 = vmatprep.subr.mxu1 %v1112_v2  ;;  %925 = vmatpush3.msra.mxu0 %v26_v5  ;;  %v846_v15 = vld [vmem:[%s1399_s1 + $0x68] sm:$0xff]  ;;  %v838_v16 = vld [vmem:[%s1399_s1 + $0x40] sm:$0xff]  ;;  %v1249_v21 = vld [vmem:[%s1400_s2 + $0x18] sm:$0xff] }
   0x7   :  { %936 = vmatpush3.msra.mxu1 %v832_v6  ;;  %926 = vmatprep.subr.mxu0 %v1112_v2  ;;  %v845_v17 = vld [vmem:[%s1399_s1 + $0x60] sm:$0xff]  ;;  %v1239_v19 = vld [vmem:[%s1400_s2 + $0x8] sm:$0xff]  ;;  %v1264_v24 = vld [vmem:[%s1400_s2 + $0x30] sm:$0xff] }
   0x8   :  { %937 = vmatprep.subr.mxu1 %v1112_v2  ;;  %927 = vmatpush3.msra.mxu0 %v25_v7  ;;  %v1234_v18 = vld [vmem:[%s1400_s2] sm:$0xff]  ;;  %v1259_v23 = vld [vmem:[%s1400_s2 + $0x28] sm:$0xff]  ;;  %v1269_v25 = vld [vmem:[%s1400_s2 + $0x38] sm:$0xff] }
   0x9   :  { %938 = vmatpush3.msra.mxu1 %v831_v8  ;;  %939 = vmatprep.mubr.msk.f32.mxu1 %vm1113_vm1, %v1112_v2  ;;  %v1254_v22 = vld [vmem:[%s1400_s2 + $0x20] sm:$0xff]  ;;  %v1279_v27 = vld [vmem:[%s1400_s2 + $0x48] sm:$0xff]  ;;  %v1284_v28 = vld [vmem:[%s1400_s2 + $0x50] sm:$0xff] }
   0xa   :  { %929 = vmatmul.mubr.msk.f32.vlgmr.msra.gmra.mxu0 %vm36_vm0, %v24_v9  ;;  %940 = vmatmul.mubr.msk.f32.vlgmr.msra.gmra.mxu1 %vm36_vm0, %v24_v9  ;;  %v1274_v26 = vld [vmem:[%s1400_s2 + $0x40] sm:$0xff]  ;;  %v1289_v29 = vld [vmem:[%s1400_s2 + $0x58] sm:$0xff]  ;;  %v1299_v31 = vld [vmem:[%s1400_s2 + $0x68] sm:$0xff] }
   0xb   :  { %942 = vmatprep.subr.mxu0 %v1112_v2  ;;  %953 = vmatprep.subr.mxu1 %v1112_v2  ;;  %v1294_v30 = vld [vmem:[%s1400_s2 + $0x60] sm:$0xff]  ;;  %v1304_v32 = vld [vmem:[%s1400_s2 + $0x70] sm:$0xff]  ;;  %v1309_v33 = vld [vmem:[%s1400_s2 + $0x78] sm:$0xff] }
   0xc   :  { %943 = vmatpush3.msra.mxu0 %v841_v10  ;;  %954 = vmatpush3.msra.mxu1 %v848_v11  ;;  %v829_v34 = vld [vmem:[%s1401_s3] ss:$0 sm:$0xff]  ;;  %v836_v35 = vld [vmem:[%s1401_s3 + $0x1] ss:$0 sm:$0xff]  ;;  %v843_v42 = vld [vmem:[%s1401_s3 + $0x2] ss:$0 sm:$0xff] }
   0xd   :  { %944 = vmatprep.subr.mxu0 %v1112_v2  ;;  %955 = vmatprep.subr.mxu1 %v1112_v2  ;;  %v850_v43 = vld [vmem:[%s1401_s3 + $0x3] ss:$0 sm:$0xff] }
   0xe   :  { %945 = vmatpush3.msra.mxu0 %v840_v12  ;;  %956 = vmatpush3.msra.mxu1 %v847_v13 }
   0xf   :  { %946 = vmatprep.subr.mxu0 %v1112_v2  ;;  %957 = vmatprep.subr.mxu1 %v1112_v2 }
  0x10   :  { %947 = vmatpush3.msra.mxu0 %v839_v14  ;;  %958 = vmatpush3.msra.mxu1 %v846_v15 }
  0x11   :  { %948 = vmatprep.subr.mxu0 %v1112_v2  ;;  %959 = vmatprep.subr.mxu1 %v1112_v2 }
  0x12   :  { %949 = vmatpush3.msra.mxu0 %v838_v16  ;;  %950 = vmatprep.mubr.msk.f32.mxu0 %vm1113_vm1, %v1112_v2 }
  0x13   :  { %960 = vmatpush3.msra.mxu1 %v845_v17  ;;  %961 = vmatprep.mubr.msk.f32.mxu1 %vm1113_vm1, %v1112_v2 }
  0x14   :  { %951 = vmatmul.mubr.msk.f32.vlgmr.msra.gmra.mxu0 %vm36_vm0, %v24_v9  ;;  %962 = vmatmul.mubr.msk.f32.vlgmr.msra.gmra.mxu1 %vm36_vm0, %v24_v9 }
  0xca   :  { %v106_v36 = vpop.f32.mrf.mxu0  ;;  %v191_v37 = vpop.f32.mrf.mxu1 }
  0xcb   :  { %v107_v38 = vadd.f32 %v829_v34, %v106_v36  ;;  %v192_v39 = vadd.f32 %v836_v35, %v191_v37 }
  0xcc   :  { %v930_v40 = vpop.f32.mrf.mxu0  ;;  %v941_v41 = vpop.f32.mrf.mxu1 }
  0xcd   :  { %111 = vst.msk [vmem:[#allocation2] sm:$0xf] %vm110_vm2, %v107_v38  ;;  %196 = vst.msk [vmem:[#allocation2 + $0x4] sm:$0xf] %vm110_vm2, %v192_v39 }
  0xd4   :  { %v276_v44 = vpop.f32.mrf.mxu0  ;;  %v361_v45 = vpop.f32.mrf.mxu1 }
  0xd5   :  { %v277_v46 = vadd.f32 %v843_v42, %v276_v44  ;;  %v362_v47 = vadd.f32 %v850_v43, %v361_v45 }
  0xd6   :  { %v952_v48 = vpop.f32.mrf.mxu0  ;;  %v963_v49 = vpop.f32.mrf.mxu1 }
  0xd7   :  { %281 = vst.msk [vmem:[#allocation2 + $0x8] sm:$0xf] %vm110_vm2, %v277_v46  ;;  %366 = vst.msk [vmem:[#allocation2 + $0xc] sm:$0xf] %vm110_vm2, %v362_v47 }
  0xd8 LB: > { %v1114_v52 = vmov 0.0   ;;  %vm1115_vm3 = vmmov 0   ;;  %s394_s3 = scalar_lea.vmem [#allocation2], %s1110_s18  ;;  %s391_s18 = sadd.s32 1, %s1110_s18   ;;  %s1110_s18 = sphi %s1331_s18, %s391_s18   ;;  %v1106_v51 = vphi %v1329_v51, %v1405_v51   ;;  %v1102_v50 = vphi %v1327_v50, %v713_v50  }
  0xd9   : > { %964 = vmatprep.subr.mxu0 %v1114_v52  ;;  %975 = vmatprep.subr.mxu1 %v1114_v52  ;;  %p388_p0 = scmp.ge.s32.totalorder %s391_s18, 4  }
  0xda   : > { %965 = vmatpush3.msra.mxu0 %v1249_v21  ;;  %976 = vmatpush3.msra.mxu1 %v1269_v25  ;;  %v719_v39 = vld [vmem:[%s1402_s4 + $0x18] sm:$0xff] (%p388_p0)  ;;  %v718_v40 = vld [vmem:[%s1402_s4 + $0x10] sm:$0xff] (%p388_p0)  ;;  %v717_v41 = vld [vmem:[%s1402_s4 + $0x8] sm:$0xff] (%p388_p0)  ;;  %s1116_s28 = smov (%p388_p0), [#allocation3]   ;;  %vm795_vm4 = vcmask (%p388_p0), 1015808  }
  0xdb   : > { %966 = vmatprep.subr.mxu0 %v1114_v52  ;;  %977 = vmatprep.subr.mxu1 %v1114_v52  ;;  %s803_s29 = sshll.u32 (%p388_p0), %s1116_s28, 4  ;;  %s804_s29 = int_to_ptr.vmem [resolvable:$true] %s803_s29 }
  0xdc   : > { %967 = vmatpush3.msra.mxu0 %v1244_v20  ;;  %978 = vmatpush3.msra.mxu1 %v1264_v24  ;;  %s1070_s30 = scalar_lea.vmem (%p388_p0), %s804_s29, 32  ;;  %p1071_p2 = scmp.lt.s32.totalorder (%p388_p0), %s804_s29, %s804_s29 }
  0xdd   : > { %968 = vmatprep.subr.mxu0 %v1114_v52  ;;  %979 = vmatprep.subr.mxu1 %v1114_v52 }
  0xde   : > { %969 = vmatpush3.msra.mxu0 %v1239_v19  ;;  %980 = vmatpush3.msra.mxu1 %v1259_v23  ;;  %v395_v53 = vld [vmem:[%s394_s3] sm:$0x1]  ;;  %v865_v54 = vld [vmem:[%s394_s3 + $0x4] sm:$0x1]  ;;  %v869_v63 = vld [vmem:[%s394_s3 + $0xc] sm:$0x1] }
  0xdf   : > { %970 = vmatprep.subr.mxu0 %v1114_v52  ;;  %981 = vmatprep.subr.mxu1 %v1114_v52  ;;  %v867_v4 = vld [vmem:[%s394_s3 + $0x8] sm:$0x1]  ;;  %v720_v19 = vld [vmem:[%s1403_s5] sm:$0x1] (%p388_p0) }
  0xe0   : > { %971 = vmatpush3.msra.mxu0 %v1234_v18  ;;  %972 = vmatprep.mubr.msk.f32.mxu0 %vm1115_vm3, %v1114_v52  ;;  %v716_v18 = vld [vmem:[%s1402_s4] sm:$0xff] (%p388_p0)  ;;  %s1066_s4 = scalar_lea.vmem (%p388_p0), %s804_s29, 16 }
  0xe1   : > { %982 = vmatpush3.msra.mxu1 %v1254_v22  ;;  %983 = vmatprep.mubr.msk.f32.mxu1 %vm1115_vm3, %v1114_v52  ;;  %p1067_p1 = scmp.ne.s32.totalorder (%p388_p0), %s804_s29, %s1066_s4  ;;  %p1072_p3 = scmp.lt.s32.totalorder (%p388_p0), %s1070_s30, %s1066_s4 }
  0xe2   : > { %973 = vmatmul.mubr.msk.f32.vlgmr.msra.gmra.mxu0 %vm36_vm0, %v1106_v51  ;;  %984 = vmatmul.mubr.msk.f32.vlgmr.msra.gmra.mxu1 %vm36_vm0, %v1106_v51 }
  0xe3   : > { %986 = vmatprep.subr.mxu0 %v1114_v52  ;;  %997 = vmatprep.subr.mxu1 %v1114_v52  ;;  %p1073_p4 = por (%p388_p0), %p1072_p3, %p1071_p2 }
  0xe4   : > { %987 = vmatpush3.msra.mxu0 %v1289_v29  ;;  %998 = vmatpush3.msra.mxu1 %v1309_v33 }
  0xe5   : > { %988 = vmatprep.subr.mxu0 %v1114_v52  ;;  %999 = vmatprep.subr.mxu1 %v1114_v52  ;;  %p1074_p5 = pnand (%p388_p0), %p1073_p4, %p1067_p1 }
  0xe6   : > { %989 = vmatpush3.msra.mxu0 %v1284_v28  ;;  %1000 = vmatpush3.msra.mxu1 %v1304_v32 }
  0xe7   : > { %990 = vmatprep.subr.mxu0 %v1114_v52  ;;  %1001 = vmatprep.subr.mxu1 %v1114_v52 }
  0xe8   : > { %991 = vmatpush3.msra.mxu0 %v1279_v27  ;;  %1002 = vmatpush3.msra.mxu1 %v1299_v31 }
  0xe9   : > { %992 = vmatprep.subr.mxu0 %v1114_v52  ;;  %1003 = vmatprep.subr.mxu1 %v1114_v52 }
  0xea   : > { %993 = vmatpush3.msra.mxu0 %v1274_v26  ;;  %994 = vmatprep.mubr.msk.f32.mxu0 %vm1115_vm3, %v1114_v52 }
  0xeb   : > { %1004 = vmatpush3.msra.mxu1 %v1294_v30  ;;  %1005 = vmatprep.mubr.msk.f32.mxu1 %vm1115_vm3, %v1114_v52 }
  0xec   : > { %995 = vmatmul.mubr.msk.f32.vlgmr.msra.gmra.mxu0 %vm36_vm0, %v1106_v51  ;;  %1006 = vmatmul.mubr.msk.f32.vlgmr.msra.gmra.mxu1 %vm36_vm0, %v1106_v51 }
  0xed   :  { %1008 = vmatprep.subr.mxu0 (%p388_p0), %v1112_v2  ;;  %1016 = vmatprep.mubr.msk.f32.mxu0 (%p388_p0), %vm1113_vm1, %v1112_v2 }
  0xee   :  { %1009 = vmatpush3.msra.mxu0 (%p388_p0), %v719_v39 }
  0xef   :  { %1010 = vmatprep.subr.mxu0 (%p388_p0), %v1112_v2 }
  0xf0   :  { %1011 = vmatpush3.msra.mxu0 (%p388_p0), %v718_v40 }
  0xf1   :  { %1012 = vmatprep.subr.mxu0 (%p388_p0), %v1112_v2 }
  0xf2   :  { %1013 = vmatpush3.msra.mxu0 (%p388_p0), %v717_v41 }
  0xf3   :  { %1014 = vmatprep.subr.mxu0 (%p388_p0), %v1112_v2 }
  0xf4   :  { %1015 = vmatpush3.msra.mxu0 (%p388_p0), %v716_v18 }
 0x1a2   : > { %v465_v55 = vpop.f32.mrf.mxu0  ;;  %v539_v56 = vpop.f32.mrf.mxu1 }
 0x1a3   : > { %v469_v57 = vadd.f32 %v465_v55, %v395_v53  ;;  %v543_v58 = vadd.f32 %v865_v54, %v539_v56 }
 0x1a4   : > { %v974_v59 = vpop.f32.mrf.mxu0  ;;  %v985_v60 = vpop.f32.mrf.mxu1 }
 0x1a5   : > { %v871_v61 = vmul.f32 -1.442695, %v469_v57  ;;  %v872_v62 = vmul.f32 -1.442695, %v543_v58 }
 0x1a7   : > { %1048 = vpow2.f32 %v871_v61 }
 0x1a8   : > { %1050 = vpow2.f32 %v872_v62 }
 0x1ac   : > { %v613_v0 = vpop.f32.mrf.mxu0  ;;  %v687_v1 = vpop.f32.mrf.mxu1 }
 0x1ad   : > { %v691_v3 = vadd.f32 %v869_v63, %v687_v1  ;;  %v617_v8 = vadd.f32 %v867_v4, %v613_v0 }
 0x1ae   : > { %v996_v5 = vpop.f32.mrf.mxu0  ;;  %v1007_v6 = vpop.f32.mrf.mxu1 }
 0x1af   : > { %v873_v7 = vmul.f32 -1.442695, %v691_v3 }
 0x1b1   : > { %1052 = vpow2.f32 %v873_v7 }
 0x1b2   : > { %1054 = vtanh.f32 %v617_v8 }
 0x1b4   : > { %v1049_v9 = vpop.eup %1048 }
 0x1b5   : > { %v1051_v10 = vpop.eup %1050  ;;  %v695_v11 = vadd.f32 1.0, %v1049_v9 }
 0x1b6   : > { %v701_v12 = vadd.f32 1.0, %v1051_v10 }
 0x1b7   : > { %1056 = vrcp.f32 %v695_v11 }
 0x1b8   : > { %1058 = vrcp.f32 %v701_v12 }
 0x1be   : > { %v1053_v13 = vpop.eup %1052 }
 0x1bf   : > { %v1055_v14 = vpop.eup %1054  ;;  %v708_v16 = vadd.f32 1.0, %v1053_v13 }
 0x1c1   : > { %1060 = vrcp.f32 %v708_v16 }
 0x1c4   : > { %v1057_v15 = vpop.eup %1056 }
 0x1c5   : > { %v1059_v17 = vpop.eup %1058  ;;  %v712_v34 = vmul.f32 %v1057_v15, %v1055_v14 }
 0x1c6   : > { %v711_v35 = vmul.f32 %v1102_v50, %v1059_v17 }
 0x1c8   : > { %v713_v50 = vadd.f32 %v712_v34, %v711_v35  }
 0x1ca   : > { %1062 = vtanh.f32 %v713_v50 }
 0x1ce   : > { %v1061_v36 = vpop.eup %1060 }
 0x1d6   :  { %390 = sbr.rel (!%p388_p0) target bundleno = 216 (0xd8), region = 67 }
 0x1d7   : > { %v1063_v37 = vpop.eup %1062 }
 0x1d8   : > { %v715_v38 = vmul.f32 %v1063_v37, %v1061_v36  }
 0x1da   : > { %v1405_v51 = vmov %v715_v38  ;;  %1017 = vmatmul.mubr.msk.f32.vlgmr.msra.gmra.mxu0 (%p388_p0), %vm36_vm0, %v715_v38 }
 0x29a   :  { %v790_v20 = vpop.f32.mrf.mxu0 }
 0x29b   :  { %v791_v21 = vadd.f32 %v790_v20, %v720_v19 }
 0x29c   :  { %v1018_v22 = vpop.f32.mrf.mxu0 }
 0x29d   :  { %1064 = vtanh.f32 %v791_v21 }
 0x2aa   :  { %v1065_v23 = vpop.eup %1064 }
 0x2ab   :  { %796 = vst.msk [vmem:[#allocation3] sm:$0x1] %vm795_vm4, %v1065_v23 }
 0x2ac   :  { %1077 = shalt.err (!%p1074_p5)
}
 0x2ad   :  { %806 = dma.vmem_to_hbm [thread:$0]  %s804_s29, 16, %s1404_s6, [#allocation4]  }
 0x2ae   :  { %1098 = dma.done.wait [#allocation4], 16  }
 0x2af   :  { %1099 = vsyncadd [#allocation4], 4294967280 }
 0x2b0   :  { %810 = vsyncpa [#allocation4], 1 }

// kernel: _lambda_.6
= control target key start
LH: loop header
LB: loop body
LE: loop exit
PB: predicated region body
PF: predicated region fallthrough
CT: control target
= control target key end

     0   :  { %s2319_s21 = smov 0   ;;  %s2859_s0 = inlined_call_operand.vmem [shape: bf16[4,21,60], index: 0, kind: input, shape index: {}]   ;;  %s2860_s1 = inlined_call_operand.vmem [shape: bf16[6,21], index: 1, kind: input, shape index: {}]   ;;  %s2861_s2 = inlined_call_operand.vmem [shape: f32[6,1], index: 2, kind: input, shape index: {}]   ;;  %s2862_s3 = inlined_call_operand.vmem [shape: f32[6,1], index: 3, kind: input, shape index: {}]   ;;  %s2863_s4 = inlined_call_operand.vmem [shape: f32[15,18], index: 4, kind: input, shape index: {}]   ;;  %s2864_s5 = inlined_call_operand.vmem [shape: f32[15,1], index: 5, kind: input, shape index: {}]   ;;  %s2865_s6 = inlined_call_operand.vmem [shape: f32[15,1], index: 6, kind: input, shape index: {}]   ;;  %s2866_s7 = inlined_call_operand.vmem [shape: f32[15,1], index: 7, kind: input, shape index: {}]   ;;  %s2867_s8 = inlined_call_operand.vmem [shape: f32[24,60], index: 8, kind: input, shape index: {}]   ;;  %s2868_s9 = inlined_call_operand.vmem [shape: f32[24,1], index: 9, kind: input, shape index: {}]   ;;  %s2869_s10 = inlined_call_operand.vmem [shape: f32[312,16], index: 10, kind: input, shape index: {}]   ;;  %s2870_s11 = inlined_call_operand.vmem [shape: f32[1,16], index: 11, kind: input, shape index: {}]   ;;  %s2871_s12 = inlined_call_operand.vmem [shape: f32[4,1,16], index: 12, kind: output, shape index: {}]  }
   0x1 LB: > { %s1936_s22 = sadd.s32 4294967295, %s2219_s21   ;;  %p1940_p0 = scmp.ge.s32.totalorder %s2219_s21, 1  ;;  %s2219_s21 = sphi %s2319_s21, %s22_s21  }
   0x2   : > { %p362_p1 = scmp.lt.s32.totalorder %s2219_s21, 5 }
   0x4   : > { %p363_p2 = pnand %p1940_p0, %p362_p1 }
   0x5   : > { %p402_p3 = scmp.lt.s32.totalorder (!%p363_p2), %s1936_s22, 3  ;;  %s2225_s15 = smov (!%p363_p2), 83  }
   0x6   : > { %366 = sbr.rel (%p363_p2) target bundleno = 1400 (0x578), region = 68  ;;  %s2226_s16 = smov (!%p363_p2), 113  }
   0x7   : > { %s2227_s19 = smov (!%p363_p2), 112   ;;  %s2228_s20 = smov (!%p363_p2), 98  }
   0x8   : > { %s2232_s29 = smov (!%p363_p2), 13   ;;  %s2234_s13 = smov (!%p363_p2), 39  }
   0x9   : > { %s2235_s14 = smov (!%p363_p2), 78   ;;  %s2240_s17 = smov (!%p363_p2), 117  }
   0xa   : > { %s2241_s27 = smov (!%p363_p2), 28   ;;  %s2243_s18 = smov (!%p363_p2), 54  }
   0xb   : > { %vm428_vm0 = vcmask 1041408   ;;  %v2221_v0 = vmov 0.0   ;;  %s2911_s22 = smov (!%p402_p3, %s1936_s22), 3  ;;  %vm2222_vm1 = vmmov 0   ;;  %v2223_v1 = vmov 0   ;;  %v2354_v20 = vld [vmem:[%s2863_s4] sm:$0xff] }
   0xc   : > { %2056 = vmatprep.subr.bf16.mxu0 %v2221_v0  ;;  %2060 = vmatprep.mubr.msk.bf16.mxu0 %vm2222_vm1, %v2221_v0  ;;  %v475_v2 = vld [vmem:[%s2861_s2] sm:$0x3f]  ;;  %vm429_vm2 = vcmask 1042432   ;;  %v2224_v3 = vmov 65535   ;;  %s2167_s25 = smul.u32 12, %s2911_s22  ;;  %vm424_vm3 = vcmask 171008  }
   0xd   : > { %2209 = vset.pattern.permute.xlu0 %v2223_v1  ;;  %v430_v4 = vsel %vm428_vm0, 4294967295, %v2224_v3  ;;  %2210 = vset.pattern.permute.xlu1 %v2223_v1  ;;  %v482_v5 = vld [vmem:[%s2862_s3] sm:$0x3f]  ;;  %vm490_vm4 = vcmask 119808   ;;  %vm518_vm5 = vcmask 146432   ;;  %vm770_vm6 = vcmask 111616  }
   0xe   : > { %478 = vperm.xlu0 %2209, %v475_v2   ;;  %s406_s30 = scalar_lea.vmem %s2859_s0, %s2167_s25  ;;  %v431_v6 = vsel %vm429_vm2, %v430_v4, 0  ;;  %v411_v10 = vld [vmem:[%s2860_s1] sm:$0x7]  ;;  %2070 = vmatprep.mubr.msk.f32.mxu1 %vm518_vm5, %v2354_v20  ;;  %s2229_s25 = smov 127   ;;  %v743_v22 = vld [vmem:[%s2865_s6 + $0x8] sm:$0x7f] }
   0xf   : > { %v2211_v7 = vld [vmem:[%s406_s30 + $0x8] ss:$0 sps:$4 sm:$0x77]   ;;  %v2212_v9 = vld [vmem:[%s406_s30] sm:$0xff]   ;;  %vm1047_vm7 = vcmask 112640   ;;  %vm1045_vm8 = vcmask 113664  }
  0x10   : > { %v433_v8 = vand.u32 %v2211_v7, %v431_v6  ;;  %v644_v21 = vld [vmem:[%s2864_s5] sm:$0xff]  ;;  %v606_v24 = vld [vmem:[%s2865_s6 + $0x8] sm:$0x7f]  ;;  %vm1094_vm9 = vcmask 1043456   ;;  %vm1084_vm10 = vcmask 490496   ;;  %s2233_s30 = smov 52  }
  0x11   : > { %v742_v23 = vld [vmem:[%s2865_s6] sm:$0xff]  ;;  %v645_v26 = vld [vmem:[%s2864_s5 + $0x8] sm:$0x7f]  ;;  %s2244_s23 = smov 41   ;;  %s2252_s26 = smov 17  }
  0x12   : > { %485 = vperm.xlu0 %2209, %v482_v5   ;;  %2057 = vmatpush3.bf16.msra.mxu0 %v433_v8  ;;  %v619_v25 = vld [vmem:[%s2866_s7] sm:$0xff]  ;;  %v920_v27 = vld [vmem:[%s2864_s5 + $0x8] sm:$0x7f] }
  0x13   : > { %2058 = vmatprep.subr.bf16.mxu0 %v2221_v0  ;;  %v507_v28 = vld [vmem:[%s2864_s5 + $0x8] sm:$0x7f] }
  0x14   : > { %v1018_v29 = vld [vmem:[%s2865_s6 + $0x8] sm:$0x7f] }
  0x15   : > { %v757_v30 = vld [vmem:[%s2866_s7 + $0x8] sm:$0x7f] }
  0x16   : > { %2059 = vmatpush3.bf16.msra.mxu0 %v2212_v9  ;;  %v620_v31 = vld [vmem:[%s2866_s7 + $0x8] sm:$0x7f] }
  0x17   : > { %2100 = vmatprep.subr.mxu0 %v2221_v0  ;;  %v783_v32 = vld [vmem:[%s2864_s5 + $0x8] sm:$0x7f] }
  0x18   : > { %v881_v33 = vld [vmem:[%s2865_s6 + $0x8] sm:$0x7f] }
  0x19   : > { %2061 = vmatmul.mubr.msk.bf16.vlgmr.msra.gmra.mxu0 %vm424_vm3, %v411_v10  ;;  %v1032_v34 = vld [vmem:[%s2866_s7 + $0x8] sm:$0x7f] }
  0x1a   : > { %2116 = vmatprep.mubr.msk.f32.mxu0 %vm2222_vm1, %v2221_v0  ;;  %v895_v35 = vld [vmem:[%s2866_s7 + $0x8] sm:$0x7f] }
  0x1b   : > { %v502_v42 = vld [vmem:[%s2863_s4 + $0x8] sm:$0x7f] }
  0x1c   : > { %v640_v47 = vld [vmem:[%s2863_s4 + $0x8] sm:$0x7f] }
  0x1d   : > { %v778_v52 = vld [vmem:[%s2863_s4 + $0x8] sm:$0x7f] }
  0x1e   : > { %v915_v56 = vld [vmem:[%s2863_s4 + $0x8] sm:$0x7f] }
  0x89   : > { %v479_v11 = vpop.permute.xlu0 %478 }
  0x8d   : > { %v486_v14 = vpop.permute.xlu0 %485 }
  0xd9   : > { %v469_v12 = vpop.f32.mrf.mxu0 }
  0xda   : > { %v481_v13 = vmul.f32 %v479_v11, %v469_v12 }
  0xdb   : > { %v2062_v15 = vpop.f32.mrf.mxu0 }
  0xdc   : > { %v488_v16 = vadd.f32 %v486_v14, %v481_v13 }
  0xdd   : > { %v472_v17 = vpop.f32.mrf.mxu0 }
  0xde   : > { %v489_v18 = vmax.f32 %v488_v16, 0.0 }
  0xdf   : > { %v2063_v19 = vpop.f32.mrf.mxu0 }
  0xe0   : > { %635 = vrot.lane.b32.xlu0 %v489_v18, %s2225_s15  ;;  %493 = vrot.lane.b32.xlu1 %v489_v18, %s2226_s16  ;;  %491 = vst.msk [vmem:[#allocation2] sm:$0x3f] %vm490_vm4, %v489_v18  ;;  %s2236_s15 = smov 65  }
  0xe4   : > { %910 = vrot.lane.b32.xlu0 %v489_v18, %s2227_s19  ;;  %497 = vrot.lane.b32.xlu1 %v489_v18, %s2228_s20  ;;  %s2237_s20 = smov 91   ;;  %s409_s19 = scalar_lea.vmem %s2871_s12, %s2911_s22 }
  0xe8   : > { %648 = vperm.xlu0 %2209, %v644_v21   ;;  %773 = vrot.lane.b32.xlu1 %v489_v18, %s2229_s25 }
  0xec   : > { %751 = vperm.xlu0 %2209, %v743_v22   ;;  %653 = vperm.xlu1 %2210, %v645_v26  }
  0xf0   : > { %746 = vperm.xlu0 %2209, %v742_v23   ;;  %515 = vperm.xlu1 %2210, %v507_v28  }
  0xf4   : > { %614 = vperm.xlu0 %2209, %v606_v24   ;;  %510 = vperm.xlu1 %2210, %v644_v21  }
  0xf8   : > { %609 = vperm.xlu0 %2209, %v742_v23   ;;  %765 = vperm.xlu1 %2210, %v757_v30  }
  0xfc   : > { %623 = vperm.xlu0 %2209, %v619_v25   ;;  %760 = vperm.xlu1 %2210, %v619_v25  }
 0x100   : > { %928 = vperm.xlu0 %2209, %v920_v27   ;;  %628 = vperm.xlu1 %2210, %v620_v31  }
 0x104   : > { %786 = vperm.xlu0 %2209, %v644_v21   ;;  %923 = vperm.xlu1 %2210, %v644_v21  }
 0x108   : > { %1026 = vperm.xlu0 %2209, %v1018_v29   ;;  %791 = vperm.xlu1 %2210, %v783_v32  }
 0x10c   : > { %1035 = vperm.xlu0 %2209, %v619_v25   ;;  %1021 = vperm.xlu1 %2210, %v742_v23  }
 0x110   : > { %884 = vperm.xlu0 %2209, %v742_v23   ;;  %889 = vperm.xlu1 %2210, %v881_v33  }
 0x114   : > { %898 = vperm.xlu0 %2209, %v619_v25   ;;  %1040 = vperm.xlu1 %2210, %v1032_v34  }
 0x118   : > { %903 = vperm.xlu1 %2210, %v895_v35  }
 0x152   : > { %v494_v36 = vpop.permute.xlu1 %493  ;;  %v636_v39 = vpop.permute.xlu0 %635 }
 0x153   : > { %496 = vst.msk [vmem:[#allocation2 + $0x6] sm:$0x3f] %vm490_vm4, %v494_v36 }
 0x156   : > { %v498_v37 = vpop.permute.xlu1 %497  ;;  %v911_v48 = vpop.permute.xlu0 %910 }
 0x157   : > { %500 = vst.msk [vmem:[#allocation2 + $0xc] sm:$0x3f] %vm490_vm4, %v498_v37 }
 0x15a   : > { %v503_v38 = vld [vmem:[#allocation2] sm:$0xff]  ;;  %v774_v44 = vpop.permute.xlu1 %773 }
 0x15b   : > { %633 = vst.msk [vmem:[#allocation2] sm:$0x3f] %vm490_vm4, %v494_v36 }
 0x15e   : > { %v504_v40 = vld [vmem:[#allocation2 + $0x8] sm:$0xff]  ;;  %v505_v41 = vld [vmem:[#allocation2 + $0x10] sm:$0x3] }
 0x15f   : > { %634 = vst.msk [vmem:[#allocation2 + $0x6] sm:$0x3f] %vm490_vm4, %v498_v37  ;;  %2064 = vmatprep.subr.msk.mxu1 %vm428_vm0, %v505_v41  ;;  %638 = vst.msk [vmem:[#allocation2 + $0xc] sm:$0x3f] %vm490_vm4, %v636_v39 }
 0x160   : > { %2065 = vmatpush3.msk.msra.mxu1 %vm428_vm0, %v505_v41 }
 0x161   : > { %2066 = vmatprep.subr.mxu1 %v504_v40 }
 0x162   : > { %2067 = vmatpush3.msra.mxu1 %v504_v40 }
 0x163   : > { %2068 = vmatprep.subr.mxu1 %v503_v38  ;;  %v649_v58 = vpop.permute.xlu0 %648 }
 0x164   : > { %2069 = vmatpush3.msra.mxu1 %v503_v38 }
 0x165   : > { %2071 = vmatmul.mubr.msk.f32.vlgmr.msra.gmra.mxu1 %vm518_vm5, %v502_v42 }
 0x166   : > { %v641_v43 = vld [vmem:[#allocation2] sm:$0xff]  ;;  %v643_v45 = vld [vmem:[#allocation2 + $0x10] sm:$0x3]  ;;  %v642_v46 = vld [vmem:[#allocation2 + $0x8] sm:$0xff]  ;;  %2079 = vmatprep.mubr.msk.f32.mxu1 %vm518_vm5, %v2354_v20 }
 0x167   : > { %771 = vst.msk [vmem:[#allocation2] sm:$0x3f] %vm770_vm6, %v498_v37  ;;  %2073 = vmatprep.subr.msk.mxu1 %vm428_vm0, %v643_v45  ;;  %772 = vst.msk [vmem:[#allocation2 + $0x6] sm:$0x3f] %vm770_vm6, %v636_v39  ;;  %v654_v57 = vpop.permute.xlu1 %653  ;;  %v752_v60 = vpop.permute.xlu0 %751 }
 0x168   : > { %776 = vst.msk [vmem:[#allocation2 + $0xc] sm:$0x3f] %vm770_vm6, %v774_v44  ;;  %2074 = vmatpush3.msk.msra.mxu1 %vm428_vm0, %v643_v45 }
 0x169   : > { %2075 = vmatprep.subr.mxu1 %v642_v46 }
 0x16a   : > { %2076 = vmatpush3.msra.mxu1 %v642_v46 }
 0x16b   : > { %2077 = vmatprep.subr.mxu1 %v641_v43  ;;  %v516_v59 = vpop.permute.xlu1 %515  ;;  %v747_v62 = vpop.permute.xlu0 %746 }
 0x16c   : > { %2078 = vmatpush3.msra.mxu1 %v641_v43 }
 0x16d   : > { %2080 = vmatmul.mubr.msk.f32.vlgmr.msra.gmra.mxu1 %vm518_vm5, %v640_v47 }
 0x16e   : > { %v779_v51 = vld [vmem:[#allocation2] sm:$0xff]  ;;  %2088 = vmatprep.mubr.msk.f32.mxu1 %vm518_vm5, %v2354_v20 }
 0x16f   : > { %v781_v49 = vld [vmem:[#allocation2 + $0x10] sm:$0x3]  ;;  %v780_v50 = vld [vmem:[#allocation2 + $0x8] sm:$0xff]  ;;  %908 = vst.msk [vmem:[#allocation2] sm:$0x3f] %vm770_vm6, %v636_v39  ;;  %v511_v61 = vpop.permute.xlu1 %510  ;;  %v615_v1 = vpop.permute.xlu0 %614 }
 0x170   : > { %2082 = vmatprep.subr.msk.mxu1 %vm428_vm0, %v781_v49  ;;  %913 = vst.msk [vmem:[#allocation2 + $0xc] sm:$0x3f] %vm770_vm6, %v911_v48  ;;  %909 = vst.msk [vmem:[#allocation2 + $0x6] sm:$0x3f] %vm770_vm6, %v774_v44  ;;  %v1066_v44 = vld [vmem:[%s2868_s9] sm:$0xff] }
 0x171   : > { %2083 = vmatpush3.msk.msra.mxu1 %vm428_vm0, %v781_v49 }
 0x172   : > { %2084 = vmatprep.subr.mxu1 %v780_v50 }
 0x173   : > { %2085 = vmatpush3.msra.mxu1 %v780_v50  ;;  %v766_v63 = vpop.permute.xlu1 %765  ;;  %v610_v3 = vpop.permute.xlu0 %609 }
 0x174   : > { %2086 = vmatprep.subr.mxu1 %v779_v51 }
 0x175   : > { %2087 = vmatpush3.msra.mxu1 %v779_v51 }
 0x176   : > { %2089 = vmatmul.mubr.msk.f32.vlgmr.msra.gmra.mxu1 %vm518_vm5, %v778_v52  ;;  %v1067_v52 = vld [vmem:[%s2868_s9 + $0x8] sm:$0xff] }
 0x177   : > { %v918_v53 = vld [vmem:[#allocation2 + $0x10] sm:$0x3]  ;;  %2097 = vmatprep.mubr.msk.f32.mxu1 %vm518_vm5, %v2354_v20  ;;  %v917_v54 = vld [vmem:[#allocation2 + $0x8] sm:$0xff]  ;;  %v916_v55 = vld [vmem:[#allocation2] sm:$0xff]  ;;  %v761_v2 = vpop.permute.xlu1 %760  ;;  %v624_v5 = vpop.permute.xlu0 %623 }
 0x178   : > { %2091 = vmatprep.subr.msk.mxu1 %vm428_vm0, %v918_v53 }
 0x179   : > { %2092 = vmatpush3.msk.msra.mxu1 %vm428_vm0, %v918_v53 }
 0x17a   : > { %2093 = vmatprep.subr.mxu1 %v917_v54 }
 0x17b   : > { %2094 = vmatpush3.msra.mxu1 %v917_v54  ;;  %v629_v4 = vpop.permute.xlu1 %628  ;;  %v929_v7 = vpop.permute.xlu0 %928 }
 0x17c   : > { %2095 = vmatprep.subr.mxu1 %v916_v55 }
 0x17d   : > { %2096 = vmatpush3.msra.mxu1 %v916_v55 }
 0x17e   : > { %2098 = vmatmul.mubr.msk.f32.vlgmr.msra.gmra.mxu1 %vm518_vm5, %v915_v56  ;;  %2125 = vmatprep.subr.mxu1 %v2221_v0 }
 0x17f   : > { %2141 = vmatprep.mubr.msk.f32.mxu1 %vm2222_vm1, %v2221_v0  ;;  %v2448_v6 = vpop.permute.xlu1 %923  ;;  %v787_v9 = vpop.permute.xlu0 %786 }
 0x183   : > { %v792_v8 = vpop.permute.xlu1 %791  ;;  %v1027_v18 = vpop.permute.xlu0 %1026 }
 0x187   : > { %v2450_v15 = vpop.permute.xlu1 %1021  ;;  %v1036_v28 = vpop.permute.xlu0 %1035 }
 0x18b   : > { %v890_v24 = vpop.permute.xlu1 %889  ;;  %v885_v37 = vpop.permute.xlu0 %884 }
 0x18f   : > { %v1041_v33 = vpop.permute.xlu1 %1040  ;;  %v899_v47 = vpop.permute.xlu0 %898 }
 0x193   : > { %v904_v43 = vpop.permute.xlu1 %903 }
 0x225   : > { %v2072_v10 = vpop.f32.mrf.mxu1 }
 0x226   : > { %v600_v11 = vadd.f32 %v2072_v10, %v516_v59  ;;  %v1068_v59 = vld [vmem:[%s2868_s9 + $0x10] sm:$0xff] }
 0x227   : > { %v594_v12 = vpop.f32.mrf.mxu1 }
 0x228   : > { %v604_v13 = vmax.f32 %v600_v11, 0.0  ;;  %v595_v14 = vadd.f32 %v594_v12, %v511_v61 }
 0x22a   : > { %v618_v16 = vmul.f32 %v615_v1, %v604_v13  ;;  %v603_v17 = vmax.f32 %v595_v14, 0.0 }
 0x22c   : > { %v617_v19 = vmul.f32 %v610_v3, %v603_v17  ;;  %v632_v20 = vadd.f32 %v629_v4, %v618_v16 }
 0x22d   : > { %v2081_v21 = vpop.f32.mrf.mxu1 }
 0x22e   : > { %v737_v22 = vadd.f32 %v2081_v21, %v654_v57  ;;  %1048 = vst.msk [vmem:[#allocation3 + $0x8] sm:$0x7f] %vm1047_vm7, %v632_v20  ;;  %v631_v23 = vadd.f32 %v624_v5, %v617_v19 }
 0x22f   : > { %v731_v25 = vpop.f32.mrf.mxu1 }
 0x230   : > { %v741_v26 = vmax.f32 %v737_v22, 0.0  ;;  %v732_v27 = vadd.f32 %v731_v25, %v649_v58  ;;  %1046 = vst.msk [vmem:[#allocation3] sm:$0xff] %vm1045_vm8, %v631_v23 }
 0x232   : > { %v755_v29 = vmul.f32 %v752_v60, %v741_v26  ;;  %v740_v30 = vmax.f32 %v732_v27, 0.0 }
 0x234   : > { %v754_v31 = vmul.f32 %v747_v62, %v740_v30  ;;  %v769_v32 = vadd.f32 %v766_v63, %v755_v29 }
 0x236   : > { %v2090_v34 = vpop.f32.mrf.mxu1  ;;  %1199 = vrot.lane.b32.xlu1 %v769_v32, %s2229_s25  ;;  %1050 = vst.msk [vmem:[#allocation3 + $0x17] sm:$0x7f] %vm1047_vm7, %v769_v32  ;;  %v768_v36 = vadd.f32 %v761_v2, %v754_v31 }
 0x237   : > { %v875_v35 = vadd.f32 %v2090_v34, %v792_v8  ;;  %v1058_v54 = vld [vmem:[#allocation3] sm:$0xff]  ;;  %v1057_v8 = vld [vmem:[%s2867_s8 + $0x10] sm:$0xff] }
 0x238   : > { %v869_v38 = vpop.f32.mrf.mxu1  ;;  %1197 = vrot.lane.b32.xlu0 %v768_v36, %s2229_s25  ;;  %1049 = vst.msk [vmem:[#allocation3 + $0xf] sm:$0xff] %vm1045_vm8, %v768_v36 }
 0x239   : > { %v879_v39 = vmax.f32 %v875_v35, 0.0  ;;  %v870_v40 = vadd.f32 %v869_v38, %v787_v9 }
 0x23a   : > { %1189 = vrot.lane.b32.xlu1 %v632_v20, %s2229_s25 }
 0x23b   : > { %v893_v41 = vmul.f32 %v890_v24, %v879_v39  ;;  %v878_v42 = vmax.f32 %v870_v40, 0.0 }
 0x23c   : > { %1187 = vrot.lane.b32.xlu0 %v631_v23, %s2229_s25 }
 0x23d   : > { %v907_v45 = vadd.f32 %v904_v43, %v893_v41  ;;  %v892_v46 = vmul.f32 %v885_v37, %v878_v42 }
 0x23e   : > { %v2099_v48 = vpop.f32.mrf.mxu1  ;;  %1071 = vperm.xlu1 %2210, %v1066_v44  }
 0x23f   : > { %1052 = vst.msk [vmem:[#allocation3 + $0x26] sm:$0x7f] %vm1047_vm7, %v907_v45  ;;  %v906_v49 = vadd.f32 %v899_v47, %v892_v46  ;;  %v1012_v50 = vadd.f32 %v2099_v48, %v929_v7  ;;  %v1059_v53 = vld [vmem:[#allocation3 + $0x8] sm:$0xff]  ;;  %v1060_v1 = vld [vmem:[#allocation3 + $0x10] sm:$0xff] }
 0x240   : > { %v1006_v51 = vpop.f32.mrf.mxu1  ;;  %1221 = vperm.xlu0 %2209, %v1066_v44   ;;  %1182 = vst.msk [vmem:[#allocation3 + $0x8] sm:$0x7f] %vm1047_vm7, %v907_v45  ;;  %v1056_v7 = vld [vmem:[%s2867_s8 + $0x8] sm:$0xff] }
 0x241   : > { %1051 = vst.msk [vmem:[#allocation3 + $0x1e] sm:$0xff] %vm1045_vm8, %v906_v49  ;;  %v1016_v55 = vmax.f32 %v1012_v50, 0.0  ;;  %v1007_v56 = vadd.f32 %v1006_v51, %v2448_v6  ;;  %1181 = vst.msk [vmem:[#allocation3] sm:$0xff] %vm1045_vm8, %v906_v49  ;;  %v1055_v6 = vld [vmem:[%s2867_s8] sm:$0xff]  ;;  %v1365_v51 = vlaneseq }
 0x242   : > { %1076 = vperm.xlu1 %2210, %v1067_v52  }
 0x243   : > { %v1030_v57 = vmul.f32 %v1027_v18, %v1016_v55  ;;  %v1015_v58 = vmax.f32 %v1007_v56, 0.0  ;;  %vm1367_vm11 = vcmp.lt.s32.totalorder %v1365_v51, 13  ;;  %vm1396_vm12 = vcmp.ge.s32.totalorder %v1365_v51, 13 }
 0x244   : > { %1226 = vperm.xlu0 %2209, %v1067_v52   ;;  %v2230_v52 = vmov 1966171168   ;;  %vm1397_vm13 = vcmp.lt.s32.totalorder %v1365_v51, 26  ;;  %vm1404_vm14 = vcmp.ge.s32.totalorder %v1365_v51, 26  ;;  %vm1405_vm15 = vcmp.lt.s32.totalorder %v1365_v51, 39 }
 0x245   : > { %v1044_v60 = vadd.f32 %v1041_v33, %v1030_v57  ;;  %v1029_v61 = vmul.f32 %v2450_v15, %v1015_v58  ;;  %v2537_v57 = vshrl.u32 %v1365_v51, 7  ;;  %vm1398_vm0 = vmand %vm1396_vm12, %vm1397_vm13  ;;  %vm2691_vm2 = vcmp.ge.s32.totalorder %v1365_v51, 39 }
 0x246   : > { %1081 = vperm.xlu1 %2210, %v1068_v59   ;;  %vm1413_vm3 = vcmp.lt.s32.totalorder %v1365_v51, 52  ;;  %vm1434_vm4 = vcmp.ge.s32.totalorder %v1365_v51, 52  ;;  %vm1435_vm5 = vcmp.lt.s32.totalorder %v1365_v51, 65  ;;  %vm1465_vm13 = vcmp.ge.s32.totalorder %v1365_v51, 91 }
 0x247   : > { %1054 = vst.msk [vmem:[#allocation3 + $0x35] sm:$0x7f] %vm1047_vm7, %v1044_v60  ;;  %v1043_v62 = vadd.f32 %v1036_v28, %v1029_v61  ;;  %vm1414_vm6 = vmand %vm2691_vm2, %vm1413_vm3 }
 0x248   : > { %v1061_v63 = vld [vmem:[#allocation3 + $0x18] sm:$0xff]  ;;  %1231 = vperm.xlu0 %2209, %v1068_v59   ;;  %v1062_v5 = vld [vmem:[#allocation3 + $0x20] sm:$0xff] }
 0x249   : > { %1053 = vst.msk [vmem:[#allocation3 + $0x2d] sm:$0xff] %vm1045_vm8, %v1043_v62  ;;  %1183 = vst.msk [vmem:[#allocation3 + $0xf] sm:$0xff] %vm1045_vm8, %v1043_v62  ;;  %v1208_v20 = vld [vmem:[#allocation3] sm:$0xff] }
 0x24a   : > { %1184 = vst.msk [vmem:[#allocation3 + $0x17] sm:$0x7f] %vm1047_vm7, %v1044_v60 }
 0x24e   : > { %v1065_v2 = vld [vmem:[#allocation3 + $0x38] sm:$0xf] }
 0x24f   : > { %2101 = vmatpush3.msk.msra.mxu0 %vm1094_vm9, %v1065_v2 }
 0x250   : > { %2102 = vmatprep.subr.mxu0 %v2221_v0  ;;  %v1064_v3 = vld [vmem:[#allocation3 + $0x30] sm:$0xff]  ;;  %v1063_v4 = vld [vmem:[#allocation3 + $0x28] sm:$0xff] }
 0x251   : > { %2103 = vmatpush3.msra.mxu0 %v1064_v3  ;;  %v1210_v18 = vld [vmem:[#allocation3 + $0x10] sm:$0xff]  ;;  %v1209_v19 = vld [vmem:[#allocation3 + $0x8] sm:$0xff] }
 0x252   : > { %2104 = vmatprep.subr.mxu0 %v2221_v0 }
 0x253   : > { %2105 = vmatpush3.msra.mxu0 %v1063_v4 }
 0x254   : > { %2106 = vmatprep.subr.mxu0 %v2221_v0 }
 0x255   : > { %2107 = vmatpush3.msra.mxu0 %v1062_v5 }
 0x256   : > { %2108 = vmatprep.subr.mxu0 %v2221_v0 }
 0x257   : > { %2109 = vmatpush3.msra.mxu0 %v1061_v63 }
 0x258   : > { %2110 = vmatprep.subr.mxu0 %v2221_v0 }
 0x259   : > { %2111 = vmatpush3.msra.mxu0 %v1060_v1 }
 0x25a   : > { %2112 = vmatprep.subr.mxu0 %v2221_v0 }
 0x25b   : > { %2113 = vmatpush3.msra.mxu0 %v1059_v53  ;;  %v1372_v53 = vunpack.c.l.s4 %v2230_v52  ;;  %v1697_v52 = vld [vmem:[%s2869_s10 + $0x48] sm:$0xff] }
 0x25c   : > { %2114 = vmatprep.subr.mxu0 %v2221_v0 }
 0x25d   : > { %2115 = vmatpush3.msra.mxu0 %v1058_v54  ;;  %v1373_v56 = vunpack.c.0.s8 %v1372_v53  ;;  %v1712_v53 = vld [vmem:[%s2869_s10 + $0xc0] sm:$0xff] }
 0x25e   : > { %2117 = vmatmul.mubr.msk.f32.vlgmr.msra.gmra.mxu0 %vm1084_vm10, %v1055_v6 }
 0x25f   : > { %2119 = vmatprep.mubr.msk.f32.mxu0 %vm2222_vm1, %v2221_v0  ;;  %v2540_v60 = vsub.s32 %v1373_v56, %v2537_v57 }
 0x262   : > { %2120 = vmatmul.mubr.msk.f32.gmra.mxu0 %vm1084_vm10, %v1056_v7 }
 0x263   : > { %2122 = vmatprep.mubr.msk.f32.mxu0 %vm2222_vm1, %v2221_v0 }
 0x266   : > { %2123 = vmatmul.mubr.msk.f32.gmra.mxu0 %vm1084_vm10, %v1057_v8 }
 0x2a8   : > { %v1200_v9 = vpop.permute.xlu1 %1199 }
 0x2a9   : > { %1204 = vst.msk [vmem:[#allocation3 + $0x35] sm:$0x7f] %vm1047_vm7, %v1200_v9 }
 0x2aa   : > { %v1198_v10 = vpop.permute.xlu0 %1197 }
 0x2ab   : > { %1203 = vst.msk [vmem:[#allocation3 + $0x2d] sm:$0xff] %vm1045_vm8, %v1198_v10 }
 0x2ac   : > { %v1190_v11 = vpop.permute.xlu1 %1189 }
 0x2ad   : > { %1194 = vst.msk [vmem:[#allocation3 + $0x26] sm:$0x7f] %vm1047_vm7, %v1190_v11  ;;  %vm1436_vm7 = vmand %vm1434_vm4, %vm1435_vm5  ;;  %vm2715_vm4 = vcmp.ge.s32.totalorder %v1365_v51, 117  ;;  %vm2720_vm5 = vcmp.lt.s32.totalorder %v1365_v51, 130 }
 0x2ae   : > { %v1188_v12 = vpop.permute.xlu0 %1187 }
 0x2af   : > { %1193 = vst.msk [vmem:[#allocation3 + $0x1e] sm:$0xff] %vm1045_vm8, %v1188_v12  ;;  %vm2701_vm8 = vcmp.ge.s32.totalorder %v1365_v51, 65 }
 0x2b0   : > { %v1215_v13 = vld [vmem:[#allocation3 + $0x38] sm:$0xf] }
 0x2b1   : > { %2126 = vmatpush3.msk.msra.mxu1 %vm1094_vm9, %v1215_v13  ;;  %vm1450_vm9 = vcmp.lt.s32.totalorder %v1365_v51, 78 }
 0x2b2   : > { %2127 = vmatprep.subr.mxu1 %v2221_v0  ;;  %v1214_v14 = vld [vmem:[#allocation3 + $0x30] sm:$0xff]  ;;  %vm1451_vm12 = vmand %vm2701_vm8, %vm1450_vm9  ;;  %vm1502_vm8 = vcmask 957440   ;;  %vm2735_vm9 = vcmp.ge.s32.totalorder %v1365_v51, 15 }
 0x2b3   : > { %2128 = vmatpush3.msra.mxu1 %v1214_v14 }
 0x2b4   : > { %2129 = vmatprep.subr.mxu1 %v2221_v0  ;;  %v1213_v15 = vld [vmem:[#allocation3 + $0x28] sm:$0xff] }
 0x2b5   : > { %2130 = vmatpush3.msra.mxu1 %v1213_v15 }
 0x2b6   : > { %2131 = vmatprep.subr.mxu1 %v2221_v0  ;;  %v1212_v16 = vld [vmem:[#allocation3 + $0x20] sm:$0xff]  ;;  %v1211_v17 = vld [vmem:[#allocation3 + $0x18] sm:$0xff] }
 0x2b7   : > { %2132 = vmatpush3.msra.mxu1 %v1212_v16 }
 0x2b8   : > { %2133 = vmatprep.subr.mxu1 %v2221_v0 }
 0x2b9   : > { %2134 = vmatpush3.msra.mxu1 %v1211_v17  ;;  %v1072_v21 = vpop.permute.xlu1 %1071 }
 0x2ba   : > { %2135 = vmatprep.subr.mxu1 %v2221_v0 }
 0x2bb   : > { %2136 = vmatpush3.msra.mxu1 %v1210_v18  ;;  %v1222_v36 = vpop.permute.xlu0 %1221 }
 0x2bc   : > { %2137 = vmatprep.subr.mxu1 %v2221_v0 }
 0x2bd   : > { %2138 = vmatpush3.msra.mxu1 %v1209_v19  ;;  %v1077_v24 = vpop.permute.xlu1 %1076 }
 0x2be   : > { %2139 = vmatprep.subr.mxu1 %v2221_v0 }
 0x2bf   : > { %2140 = vmatpush3.msra.mxu1 %v1208_v20  ;;  %v1227_v39 = vpop.permute.xlu0 %1226  ;;  %v1719_v20 = vld [vmem:[%s2869_s10 + $0xf8] sm:$0xff] }
 0x2c0   : > { %2142 = vmatmul.mubr.msk.f32.vlgmr.msra.gmra.mxu1 %vm1084_vm10, %v1055_v6  ;;  %2150 = vmatprep.subr.mxu1 %v2221_v0 }
 0x2c1   : > { %2144 = vmatprep.mubr.msk.f32.mxu1 %vm2222_vm1, %v2221_v0  ;;  %v1082_v31 = vpop.permute.xlu1 %1081  ;;  %2013 = vmatprep.subr.mxu0 %v1719_v20 }
 0x2c3   : > { %v1232_v46 = vpop.permute.xlu0 %1231 }
 0x2c4   : > { %2145 = vmatmul.mubr.msk.f32.gmra.mxu1 %vm1084_vm10, %v1056_v7 }
 0x2c5   : > { %2147 = vmatprep.mubr.msk.f32.mxu1 %vm2222_vm1, %v2221_v0 }
 0x2c8   : > { %2148 = vmatmul.mubr.msk.f32.gmra.mxu1 %vm1084_vm10, %v1057_v8  ;;  %vm1457_vm10 = vcmp.ge.s32.totalorder %v1365_v51, 78 }
 0x2c9   : > { %2164 = vmatprep.mubr.msk.f32.mxu1 %vm2222_vm1, %v2221_v0  ;;  %vm1406_vm1 = vmand %vm1404_vm14, %vm1405_vm15  ;;  %vm1466_vm14 = vcmp.lt.s32.totalorder %v1365_v51, 104 }
 0x2ca   : > { %vm1467_vm2 = vmand %vm1465_vm13, %vm1466_vm14  ;;  %vm2754_vm13 = vcmp.lt.s32.totalorder %v1365_v51, 41 }
 0x31e   : > { %v1164_v22 = vpop.f32.mrf.mxu0 }
 0x31f   : > { %v1165_v23 = vadd.f32 %v1164_v22, %v1072_v21 }
 0x320   : > { %v2118_v25 = vpop.f32.mrf.mxu0 }
 0x321   : > { %v1178_v26 = vmax.f32 %v1165_v23, 0.0 }
 0x322   : > { %v1169_v27 = vpop.f32.mrf.mxu0 }
 0x323   : > { %v1170_v28 = vadd.f32 %v1169_v27, %v1077_v24  ;;  %1335 = vrot.lane.b32.xlu1 %v1178_v26, %s2229_s25  ;;  %v1703_v27 = vld [vmem:[%s2869_s10 + $0x78] sm:$0xff] }
 0x324   : > { %v2121_v29 = vpop.f32.mrf.mxu0  ;;  %2014 = vmatpush3.msra.mxu0 %v1703_v27 }
 0x325   : > { %v1179_v30 = vmax.f32 %v1170_v28, 0.0  ;;  %v1718_v29 = vld [vmem:[%s2869_s10 + $0xf0] sm:$0xff] }
 0x326   : > { %v1174_v32 = vpop.f32.mrf.mxu0  ;;  %2015 = vmatprep.subr.mxu0 %v1718_v29 }
 0x327   : > { %v2526_v33 = vadd.f32 %v1174_v32, %v1082_v31  ;;  %1337 = vrot.lane.b32.xlu1 %v1179_v30, %s2229_s25  ;;  %v1717_v31 = vld [vmem:[%s2869_s10 + $0xe8] sm:$0xff] }
 0x328   : > { %v2124_v34 = vpop.f32.mrf.mxu0 }
 0x329   : > { %v1180_v35 = vmax.f32 %v2526_v33, 0.0 }
 0x32b   : > { %1339 = vrot.lane.b32.xlu1 %v1180_v35, %s2229_s25 }
 0x380   : > { %v1312_v37 = vpop.f32.mrf.mxu1 }
 0x381   : > { %v1313_v38 = vadd.f32 %v1312_v37, %v1222_v36  ;;  %v1701_v36 = vld [vmem:[%s2869_s10 + $0x68] sm:$0xff]  ;;  %v1716_v37 = vld [vmem:[%s2869_s10 + $0xe0] sm:$0xff] }
 0x382   : > { %v2143_v40 = vpop.f32.mrf.mxu1 }
 0x383   : > { %v1326_v41 = vmax.f32 %v1313_v38, 0.0  ;;  %v1700_v38 = vld [vmem:[%s2869_s10 + $0x60] sm:$0xff] }
 0x384   : > { %v1317_v42 = vpop.f32.mrf.mxu1 }
 0x385   : > { %v1318_v43 = vadd.f32 %v1317_v42, %v1227_v39  ;;  %1350 = vrot.lane.b32.xlu0 %v1326_v41, %s2229_s25  ;;  %v1329_v55 = vadd.f32 %v1326_v41, %v1178_v26  ;;  %v1715_v39 = vld [vmem:[%s2869_s10 + $0xd8] sm:$0xff] }
 0x386   : > { %v2146_v44 = vpop.f32.mrf.mxu1 }
 0x387   : > { %v1327_v45 = vmax.f32 %v1318_v43, 0.0  ;;  %v1699_v44 = vld [vmem:[%s2869_s10 + $0x58] sm:$0xff] }
 0x388   : > { %v1322_v47 = vpop.f32.mrf.mxu1 }
 0x389   : > { %v1323_v48 = vadd.f32 %v1322_v47, %v1232_v46  ;;  %1352 = vrot.lane.b32.xlu0 %v1327_v45, %s2229_s25  ;;  %v1330_v1 = vadd.f32 %v1327_v45, %v1179_v30  ;;  %v1702_v30 = vld [vmem:[%s2869_s10 + $0x70] sm:$0xff]  ;;  %v1713_v47 = vld [vmem:[%s2869_s10 + $0xc8] sm:$0xff] }
 0x38a   : > { %v2149_v49 = vpop.f32.mrf.mxu1  ;;  %2016 = vmatpush3.msra.mxu0 %v1702_v30  ;;  %v1714_v45 = vld [vmem:[%s2869_s10 + $0xd0] sm:$0xff] }
 0x38b   : > { %v1328_v50 = vmax.f32 %v1323_v48, 0.0  ;;  %2017 = vmatprep.subr.mxu0 %v1717_v31  ;;  %v1698_v46 = vld [vmem:[%s2869_s10 + $0x50] sm:$0xff] }
 0x38c   : > { %2018 = vmatpush3.msra.mxu0 %v1701_v36 }
 0x38d   : > { %1354 = vrot.lane.b32.xlu0 %v1328_v50, %s2229_s25  ;;  %s2231_s25 = smov 26   ;;  %v1331_v21 = vadd.f32 %v1328_v50, %v1180_v35  ;;  %2019 = vmatprep.subr.mxu0 %v1716_v37 }
 0x38e   : > { %2020 = vmatpush3.msra.mxu0 %v1700_v38 }
 0x38f   : > { %2021 = vmatprep.subr.mxu0 %v1715_v39 }
 0x390   : > { %2022 = vmatpush3.msra.mxu0 %v1699_v44 }
 0x391   : > { %2023 = vmatprep.subr.mxu0 %v1714_v45 }
 0x392   : > { %2024 = vmatpush3.msra.mxu0 %v1698_v46 }
 0x393   : > { %2025 = vmatprep.subr.mxu0 %v1713_v47 }
 0x394   : > { %2026 = vmatpush3.msra.mxu0 %v1697_v52 }
 0x395   : > { %v1336_v54 = vpop.permute.xlu1 %1335  ;;  %2027 = vmatprep.subr.mxu0 %v1712_v53 }
 0x396   : > { %v1344_v58 = vadd.f32 %v1336_v54, %v1329_v55  ;;  %v1696_v54 = vld [vmem:[%s2869_s10 + $0x40] sm:$0xff] }
 0x397   : > { %2028 = vmatpush3.msra.mxu0 %v1696_v54 }
 0x399   : > { %v1338_v63 = vpop.permute.xlu1 %1337 }
 0x39a   : > { %v1345_v5 = vadd.f32 %v1338_v63, %v1330_v1  ;;  %v1710_v63 = vld [vmem:[%s2869_s10 + $0xb0] sm:$0xff] }
 0x39b   : > { %v1726_v1 = vld [vmem:[%s2869_s10 + $0x130] sm:$0xff] }
 0x39c   : > { %2151 = vmatpush3.msra.mxu1 %v1726_v1 }
 0x39d   : > { %v1340_v19 = vpop.permute.xlu1 %1339  ;;  %2152 = vmatprep.subr.mxu1 %v2221_v0 }
 0x39e   : > { %v1346_v28 = vadd.f32 %v1340_v19, %v1331_v21  ;;  %v1722_v19 = vld [vmem:[%s2869_s10 + $0x110] sm:$0xff] }
 0x39f   : > { %v1690_v21 = vld [vmem:[%s2869_s10 + $0x10] sm:$0xff] }
 0x3f7   : > { %v1351_v59 = vpop.permute.xlu0 %1350 }
 0x3f8   : > { %v1359_v61 = vadd.f32 %v1351_v59, %v1344_v58  ;;  %v1711_v59 = vld [vmem:[%s2869_s10 + $0xb8] sm:$0xff] }
 0x3f9   : > { %2029 = vmatprep.subr.mxu0 %v1711_v59 }
 0x3fa   : > { %v1362_v62 = vmul.f32 0.25, %v1359_v61 }
 0x3fb   : > { %v1353_v4 = vpop.permute.xlu0 %1352 }
 0x3fc   : > { %v1377_v2 = vrot.slane %v1362_v62, %v2540_v60  ;;  %v1416_v3 = vcombine.high %v1362_v62, %v1362_v62  ;;  %1369 = vst.msk [vmem:[#allocation4] sm:$0x1] %vm1367_vm11, %v1362_v62  ;;  %v1360_v8 = vadd.f32 %v1353_v4, %v1345_v5  ;;  %v1695_v62 = vld [vmem:[%s2869_s10 + $0x38] sm:$0xff]  ;;  %v1725_v4 = vld [vmem:[%s2869_s10 + $0x128] sm:$0xff]  ;;  %vm1458_vm11 = vcmp.lt.s32.totalorder %v1365_v51, 91 }
 0x3fd   : > { %2030 = vmatpush3.msra.mxu0 %v1695_v62  ;;  %2153 = vmatpush3.msra.mxu1 %v1725_v4  ;;  %vm1459_vm15 = vmand %vm1457_vm10, %vm1458_vm11  ;;  %vm2740_vm10 = vcmp.lt.s32.totalorder %v1365_v51, 28 }
 0x3fe   : > { %v1385_v6 = vrot.slane %v1377_v2, %v2540_v60  ;;  %v1378_v7 = vcombine.high %v1377_v2, %v1377_v2  ;;  %v1423_v10 = vrot.slane %v1416_v3, %v2540_v60  ;;  %v1363_v12 = vmul.f32 0.25, %v1360_v8  ;;  %2031 = vmatprep.subr.mxu0 %v1710_v63  ;;  %v1694_v2 = vld [vmem:[%s2869_s10 + $0x30] sm:$0xff]  ;;  %v1709_v3 = vld [vmem:[%s2869_s10 + $0xa8] sm:$0xff]  ;;  %2154 = vmatprep.subr.mxu1 %v2221_v0  ;;  %vm1507_vm11 = vmand %vm2715_vm4, %vm2720_vm5 }
 0x3ff   : > { %v1355_v26 = vpop.permute.xlu0 %1354  ;;  %2032 = vmatpush3.msra.mxu0 %v1694_v2  ;;  %v1693_v8 = vld [vmem:[%s2869_s10 + $0x28] sm:$0xff]  ;;  %vm1567_vm4 = vcmp.lt.s32.totalorder %v1365_v51, 67 }
 0x400   : > { %v1400_v9 = vcombine.high %v1385_v6, %v1385_v6  ;;  %v1392_v11 = vrot.slane %v1378_v7, %v2540_v60  ;;  %v1430_v13 = vrot.slane %v1423_v10, %v2540_v60  ;;  %v1438_v14 = vcombine.high %v1423_v10, %v1423_v10  ;;  %2033 = vmatprep.subr.mxu0 %v1709_v3  ;;  %v1724_v10 = vld [vmem:[%s2869_s10 + $0x120] sm:$0xff] }
 0x401   : > { %v1476_v16 = vrot.slane %v1363_v12, %v2540_v60  ;;  %v1525_v22 = vcombine.high %v1363_v12, %v1363_v12  ;;  %v1361_v33 = vadd.f32 %v1355_v26, %v1346_v28  ;;  %2034 = vmatpush3.msra.mxu0 %v1693_v8  ;;  %2155 = vmatpush3.msra.mxu1 %v1724_v10  ;;  %v1720_v26 = vld [vmem:[%s2869_s10 + $0x100] sm:$0xff] }
 0x402   : > { %1401 = vrot.lane.b32.xlu0 %v1400_v9, %s2231_s25  ;;  %1393 = vrot.lane.b32.xlu1 %v1392_v11, %s2232_s29  ;;  %v1408_v15 = vcombine.high %v1392_v11, %v1392_v11  ;;  %v1453_v17 = vcombine.high %v1430_v13, %v1430_v13  ;;  %v1445_v18 = vrot.slane %v1438_v14, %v2540_v60  ;;  %s2238_s29 = smov 104   ;;  %s2247_s25 = smov 93   ;;  %v1708_v9 = vld [vmem:[%s2869_s10 + $0xa0] sm:$0xff] }
 0x403   : > { %v1483_v24 = vrot.slane %v1476_v16, %v2540_v60  ;;  %v1491_v25 = vcombine.high %v1476_v16, %v1476_v16  ;;  %v1532_v32 = vrot.slane %v1525_v22, %v2540_v60  ;;  %v1364_v40 = vmul.f32 0.25, %v1361_v33  ;;  %v1692_v11 = vld [vmem:[%s2869_s10 + $0x20] sm:$0xff]  ;;  %2035 = vmatprep.subr.mxu0 %v1708_v9  ;;  %v1723_v16 = vld [vmem:[%s2869_s10 + $0x118] sm:$0xff]  ;;  %2156 = vmatprep.subr.mxu1 %v2221_v0 }
 0x404   : > { %v1461_v23 = vcombine.high %v1445_v18, %v1445_v18  ;;  %2036 = vmatpush3.msra.mxu0 %v1692_v11  ;;  %2157 = vmatpush3.msra.mxu1 %v1723_v16  ;;  %v1688_v28 = vld [vmem:[%s2869_s10] sm:$0xff]  ;;  %v1739_v16 = vsub.s32 2, %v2537_v57 }
 0x405   : > { %v1509_v34 = vcombine.high %v1483_v24, %v1483_v24  ;;  %v1498_v35 = vrot.slane %v1491_v25, %v2540_v60  ;;  %v1539_v41 = vrot.slane %v1532_v32, %v2540_v60  ;;  %v1547_v43 = vcombine.high %v1532_v32, %v1532_v32  ;;  %2158 = vmatprep.subr.mxu1 %v2221_v0  ;;  %v1689_v25 = vld [vmem:[%s2869_s10 + $0x8] sm:$0xff] }
 0x406   : > { %1431 = vrot.lane.b32.xlu0 %v1430_v13, %s2233_s30  ;;  %1409 = vrot.lane.b32.xlu1 %v1408_v15, %s2234_s13  ;;  %s2242_s13 = smov 15   ;;  %v1585_v48 = vrot.slane %v1364_v40, %v2540_v60  ;;  %v1634_v56 = vcombine.high %v1364_v40, %v1364_v40  ;;  %s2245_s30 = smov 80   ;;  %v1707_v13 = vld [vmem:[%s2869_s10 + $0x98] sm:$0xff] }
 0x407   : > { %v1517_v42 = vcombine.high %v1498_v35, %v1498_v35  ;;  %v1562_v49 = vcombine.high %v1539_v41, %v1539_v41  ;;  %v1554_v50 = vrot.slane %v1547_v43, %v2540_v60  ;;  %2037 = vmatprep.subr.mxu0 %v1707_v13  ;;  %2159 = vmatpush3.msra.mxu1 %v1722_v19 }
 0x408   : > { %v1600_v55 = vcombine.high %v1585_v48, %v1585_v48  ;;  %v1592_v58 = vrot.slane %v1585_v48, %v2540_v60  ;;  %v1641_v5 = vrot.slane %v1634_v56, %v2540_v60  ;;  %2160 = vmatprep.subr.mxu1 %v2221_v0 }
 0x409   : > { %v1570_v61 = vcombine.high %v1554_v50, %v1554_v50 }
 0x40a   : > { %1454 = vrot.lane.b32.xlu0 %v1453_v17, %s2235_s14  ;;  %1446 = vrot.lane.b32.xlu1 %v1445_v18, %s2236_s15  ;;  %s2239_s14 = smov 2   ;;  %v1607_v6 = vrot.slane %v1600_v55, %v2540_v60  ;;  %v1615_v7 = vcombine.high %v1592_v58, %v1592_v58  ;;  %v1648_v12 = vrot.slane %v1641_v5, %v2540_v60  ;;  %v1691_v17 = vld [vmem:[%s2869_s10 + $0x18] sm:$0xff]  ;;  %v1706_v18 = vld [vmem:[%s2869_s10 + $0x90] sm:$0xff] }
 0x40b   : > { %v1656_v15 = vcombine.high %v1641_v5, %v1641_v5  ;;  %2038 = vmatpush3.msra.mxu0 %v1691_v17 }
 0x40c   : > { %v1623_v14 = vcombine.high %v1607_v6, %v1607_v6  ;;  %v1671_v20 = vcombine.high %v1648_v12, %v1648_v12  ;;  %2039 = vmatprep.subr.mxu0 %v1706_v18 }
 0x40d   : > { %v1663_v22 = vrot.slane %v1656_v15, %v2540_v60  ;;  %2040 = vmatpush3.msra.mxu0 %v1690_v21  ;;  %v1704_v60 = vld [vmem:[%s2869_s10 + $0x80] sm:$0xff]  ;;  %v1735_v15 = vsub.s32 1, %v2537_v57 }
 0x40e   : > { %1462 = vrot.lane.b32.xlu0 %v1461_v23, %s2237_s20  ;;  %1484 = vrot.lane.b32.xlu1 %v1483_v24, %s2238_s29  ;;  %s2250_s29 = smov 119   ;;  %v1705_v23 = vld [vmem:[%s2869_s10 + $0x88] sm:$0xff] }
 0x40f   : > { %v1721_v24 = vld [vmem:[%s2869_s10 + $0x108] sm:$0xff]  ;;  %2041 = vmatprep.subr.mxu0 %v1705_v23  ;;  %v1679_v27 = vcombine.high %v1663_v22, %v1663_v22  ;;  %v1727_v23 = vld [vmem:[%s2870_s11] sm:$0x1] }
 0x410   : > { %2161 = vmatpush3.msra.mxu1 %v1721_v24  ;;  %2042 = vmatpush3.msra.mxu0 %v1689_v25 }
 0x411   : > { %2162 = vmatprep.subr.mxu1 %v2221_v0  ;;  %2043 = vmatprep.subr.mxu0 %v1704_v60 }
 0x412   : > { %1510 = vrot.lane.b32.xlu0 %v1509_v34, %s2239_s14  ;;  %1499 = vrot.lane.b32.xlu1 %v1498_v35, %s2240_s17  ;;  %s2246_s17 = smov 67   ;;  %s2253_s14 = smov 43  }
 0x413   : > { %2163 = vmatpush3.msra.mxu1 %v1720_v26  ;;  %2044 = vmatpush3.msra.mxu0 %v1688_v28 }
 0x416   : > { %1540 = vrot.lane.b32.xlu0 %v1539_v41, %s2241_s27  ;;  %1518 = vrot.lane.b32.xlu1 %v1517_v42, %s2242_s13  ;;  %s2249_s27 = smov 4  }
 0x41a   : > { %1563 = vrot.lane.b32.xlu0 %v1562_v49, %s2243_s18  ;;  %1555 = vrot.lane.b32.xlu1 %v1554_v50, %s2244_s23  ;;  %s2251_s18 = smov 30  }
 0x41e   : > { %1593 = vrot.lane.b32.xlu0 %v1592_v58, %s2245_s30  ;;  %1571 = vrot.lane.b32.xlu1 %v1570_v61, %s2246_s17  ;;  %s2248_s17 = smov 106  }
 0x422   : > { %1608 = vrot.lane.b32.xlu0 %v1607_v6, %s2247_s25  ;;  %1616 = vrot.lane.b32.xlu1 %v1615_v7, %s2248_s17 }
 0x426   : > { %1649 = vrot.lane.b32.xlu0 %v1648_v12, %s2249_s27  ;;  %1624 = vrot.lane.b32.xlu1 %v1623_v14, %s2250_s29  ;;  %v1731_v14 = vsub.s32 0, %v2537_v57 }
 0x42a   : > { %1672 = vrot.lane.b32.xlu0 %v1671_v20, %s2251_s18  ;;  %1664 = vrot.lane.b32.xlu1 %v1663_v22, %s2252_s26 }
 0x42e   : > { %1680 = vrot.lane.b32.xlu1 %v1679_v27, %s2253_s14 }
 0x474   : > { %v1402_v29 = vpop.permute.xlu0 %1401  ;;  %v1394_v0 = vpop.permute.xlu1 %1393 }
 0x475   : > { %1399 = vst.msk [vmem:[#allocation4] sm:$0x1] %vm1398_vm0, %v1394_v0  ;;  %vm1487_vm0 = vcmp.ge.s32.totalorder %v1365_v51, 104 }
 0x476   : > { %1407 = vst.msk [vmem:[#allocation4] sm:$0x1] %vm1406_vm1, %v1402_v29  ;;  %vm1488_vm1 = vcmp.lt.s32.totalorder %v1365_v51, 117 }
 0x477   : > { %vm1489_vm3 = vmand %vm1487_vm0, %vm1488_vm1  ;;  %vm2767_vm0 = vcmp.ge.s32.totalorder %v1365_v51, 41  ;;  %vm2772_vm1 = vcmp.lt.s32.totalorder %v1365_v51, 54 }
 0x478   : > { %v1432_v31 = vpop.permute.xlu0 %1431  ;;  %v1410_v33 = vpop.permute.xlu1 %1409  ;;  %vm1560_vm5 = vmand %vm2767_vm0, %vm2772_vm1  ;;  %vm1620_vm0 = vcmp.lt.s32.totalorder %v1365_v51, 119 }
 0x479   : > { %1415 = vst.msk [vmem:[#allocation4] sm:$0x1] %vm1414_vm6, %v1410_v33  ;;  %vm2725_vm6 = vcmp.ge.s32.totalorder %v1365_v51, 2 }
 0x47a   : > { %1437 = vst.msk [vmem:[#allocation4] sm:$0x1] %vm1436_vm7, %v1432_v31  ;;  %vm2730_vm7 = vcmp.lt.s32.totalorder %v1365_v51, 15 }
 0x47b   : > { %vm1515_vm14 = vmand %vm2725_vm6, %vm2730_vm7  ;;  %vm2787_vm7 = vcmp.ge.s32.totalorder %v1365_v51, 67 }
 0x47c   : > { %v1455_v34 = vpop.permute.xlu0 %1454  ;;  %v1447_v35 = vpop.permute.xlu1 %1446 }
 0x47d   : > { %1452 = vst.msk [vmem:[#allocation4] sm:$0x1] %vm1451_vm12, %v1447_v35  ;;  %vm2749_vm12 = vcmp.ge.s32.totalorder %v1365_v51, 28 }
 0x47e   : > { %1460 = vst.msk [vmem:[#allocation4] sm:$0x1] %vm1459_vm15, %v1455_v34  ;;  %vm1523_vm15 = vmand %vm2735_vm9, %vm2740_vm10  ;;  %vm1596_vm9 = vcmp.ge.s32.totalorder %v1365_v51, 80  ;;  %vm1597_vm10 = vcmp.lt.s32.totalorder %v1365_v51, 93 }
 0x480   : > { %v1463_v36 = vpop.permute.xlu0 %1462  ;;  %v1485_v37 = vpop.permute.xlu1 %1484 }
 0x481   : > { %1468 = vst.msk [vmem:[#allocation4] sm:$0x1] %vm1467_vm2, %v1463_v36  ;;  %vm1545_vm2 = vmand %vm2749_vm12, %vm2754_vm13  ;;  %vm1611_vm12 = vcmp.ge.s32.totalorder %v1365_v51, 93  ;;  %vm1612_vm13 = vcmp.lt.s32.totalorder %v1365_v51, 106 }
 0x482   : > { %1490 = vst.msk [vmem:[#allocation4] sm:$0x1] %vm1489_vm3, %v1485_v37  ;;  %vm1566_vm3 = vcmp.ge.s32.totalorder %v1365_v51, 54  ;;  %vm1613_vm1 = vmand %vm1611_vm12, %vm1612_vm13  ;;  %vm1676_vm12 = vcmp.lt.s32.totalorder %v1365_v51, 43 }
 0x483   : > { %vm1568_vm6 = vmand %vm1566_vm3, %vm1567_vm4  ;;  %vm2801_vm3 = vcmp.ge.s32.totalorder %v1365_v51, 119  ;;  %vm2806_vm4 = vcmp.lt.s32.totalorder %v1365_v51, 132 }
 0x484   : > { %v1511_v40 = vpop.permute.xlu0 %1510  ;;  %v1500_v43 = vpop.permute.xlu1 %1499 }
 0x485   : > { %v1501_v46 = vrot.slane %v1500_v43, 7 }
 0x487   : > { %v1503_v49 = vsel %vm1502_vm8, %v1501_v46, %v1500_v43  ;;  %vm1575_vm8 = vcmp.lt.s32.totalorder %v1365_v51, 80 }
 0x488   : > { %v1541_v50 = vpop.permute.xlu0 %1540  ;;  %1508 = vst.msk [vmem:[#allocation4] sm:$0x3] %vm1507_vm11, %v1503_v49  ;;  %v1519_v54 = vpop.permute.xlu1 %1518  ;;  %vm1576_vm11 = vmand %vm2787_vm7, %vm1575_vm8  ;;  %vm1627_vm7 = vcmask 973824   ;;  %vm2821_vm8 = vcmp.ge.s32.totalorder %v1365_v51, 17 }
 0x489   : > { %1516 = vst.msk [vmem:[#allocation4 + $0x1] sm:$0x1] %vm1515_vm14, %v1511_v40  ;;  %vm1598_vm14 = vmand %vm1596_vm9, %vm1597_vm10  ;;  %vm2826_vm9 = vcmp.lt.s32.totalorder %v1365_v51, 30 }
 0x48a   : > { %1524 = vst.msk [vmem:[#allocation4 + $0x1] sm:$0x1] %vm1523_vm15, %v1519_v54  ;;  %vm1619_vm15 = vcmp.ge.s32.totalorder %v1365_v51, 106  ;;  %vm1632_vm10 = vmand %vm2801_vm3, %vm2806_vm4  ;;  %vm1743_vm3 = vcmask 457728   ;;  %vm1887_vm4 = vcmask 122880  }
 0x48b   : > { %1546 = vst.msk [vmem:[#allocation4 + $0x1] sm:$0x1] %vm1545_vm2, %v1541_v50  ;;  %vm1621_vm2 = vmand %vm1619_vm15, %vm1620_vm0  ;;  %vm1683_vm15 = vcmp.ge.s32.totalorder %v1365_v51, 43  ;;  %vm1684_vm0 = vcmp.lt.s32.totalorder %v1365_v51, 56 }
 0x48c   : > { %v1564_v55 = vpop.permute.xlu0 %1563  ;;  %v1556_v58 = vpop.permute.xlu1 %1555 }
 0x48d   : > { %1561 = vst.msk [vmem:[#allocation4 + $0x1] sm:$0x1] %vm1560_vm5, %v1556_v58  ;;  %vm2811_vm5 = vcmp.ge.s32.totalorder %v1365_v51, 4 }
 0x48e   : > { %1569 = vst.msk [vmem:[#allocation4 + $0x1] sm:$0x1] %vm1568_vm6, %v1564_v55  ;;  %vm2816_vm6 = vcmp.lt.s32.totalorder %v1365_v51, 17 }
 0x48f   : > { %vm1654_vm13 = vmand %vm2811_vm5, %vm2816_vm6 }
 0x490   : > { %v1594_v59 = vpop.permute.xlu0 %1593  ;;  %v1572_v61 = vpop.permute.xlu1 %1571 }
 0x491   : > { %1577 = vst.msk [vmem:[#allocation4 + $0x1] sm:$0x1] %vm1576_vm11, %v1572_v61  ;;  %vm1675_vm11 = vcmp.ge.s32.totalorder %v1365_v51, 30 }
 0x492   : > { %1599 = vst.msk [vmem:[#allocation4 + $0x1] sm:$0x1] %vm1598_vm14, %v1594_v59  ;;  %vm1669_vm14 = vmand %vm2821_vm8, %vm2826_vm9 }
 0x494   : > { %v1609_v62 = vpop.permute.xlu0 %1608  ;;  %v1617_v63 = vpop.permute.xlu1 %1616 }
 0x495   : > { %1614 = vst.msk [vmem:[#allocation4 + $0x1] sm:$0x1] %vm1613_vm1, %v1609_v62  ;;  %vm1677_vm1 = vmand %vm1675_vm11, %vm1676_vm12 }
 0x496   : > { %1622 = vst.msk [vmem:[#allocation4 + $0x1] sm:$0x1] %vm1621_vm2, %v1617_v63  ;;  %vm1685_vm2 = vmand %vm1683_vm15, %vm1684_vm0 }
 0x498   : > { %v1650_v5 = vpop.permute.xlu0 %1649  ;;  %v1625_v6 = vpop.permute.xlu1 %1624 }
 0x499   : > { %v1626_v9 = vrot.slane %v1625_v6, 7 }
 0x49b   : > { %v1628_v10 = vsel %vm1627_vm7, %v1626_v9, %v1625_v6 }
 0x49c   : > { %1633 = vst.msk [vmem:[#allocation4 + $0x1] sm:$0x3] %vm1632_vm10, %v1628_v10  ;;  %v1665_v11 = vpop.permute.xlu1 %1664  ;;  %v1673_v12 = vpop.permute.xlu0 %1672 }
 0x49d   : > { %1655 = vst.msk [vmem:[#allocation4 + $0x2] sm:$0x1] %vm1654_vm13, %v1650_v5 }
 0x49e   : > { %1670 = vst.msk [vmem:[#allocation4 + $0x2] sm:$0x1] %vm1669_vm14, %v1665_v11 }
 0x49f   : > { %1678 = vst.msk [vmem:[#allocation4 + $0x2] sm:$0x1] %vm1677_vm1, %v1673_v12 }
 0x4a0   : > { %v1681_v13 = vpop.permute.xlu1 %1680 }
 0x4a1   : > { %1686 = vst.msk [vmem:[#allocation4 + $0x2] sm:$0x1] %vm1685_vm2, %v1681_v13 }
 0x4a8   : > { %v1687_v17 = vld [vmem:[#allocation4] sm:$0x7] }
 0x4a9   : > { %v1732_v51 = vrot.slane %v1687_v17, %v1731_v14  ;;  %v1736_v18 = vrot.slane %v1687_v17, %v1735_v15  ;;  %v1740_v19 = vrot.slane %v1687_v17, %v1739_v16 }
 0x4ab   : > { %1810 = vmatprep.mubr.f32.mxu0 %v1736_v18  ;;  %2165 = vmatmul.mubr.msk.f32.vlgmr.msra.gmra.mxu1 %vm1743_vm3, %v1740_v19 }
 0x4ac   : > { %1811 = vmatmul.mubr.f32.vlgmr.msra.gmra.mxu0 %v1732_v51 }
 0x56b   : > { %v1882_v20 = vpop.f32.mrf.mxu1 }
 0x56c   : > { %v2045_v21 = vpop.f32.mrf.mxu0 }
 0x56d   : > { %v2166_v22 = vpop.f32.mrf.mxu1 }
 0x56e   : > { %v2046_v24 = vpop.f32.mrf.mxu0 }
 0x56f   : > { %v2047_v25 = vadd.f32 %v2046_v24, %v2045_v21 }
 0x571   : > { %v1813_v60 = vadd.f32 %v2047_v25, %v1727_v23 }
 0x573   : > { %v1883_v57 = vadd.f32 %v1882_v20, %v1813_v60 }
 0x575   : > { %v1886_v26 = vmax.f32 %v1883_v57, 0.0 }
 0x577   : > { %1888 = vst.msk [vmem:[%s409_s19] sm:$0x1] %vm1887_vm4, %v1886_v26 }
 0x578 PF: > { %s22_s21 = sadd.s32 1, %s2219_s21  }
 0x579   : > { %p19_p4 = scmp.ge.s32.totalorder %s22_s21, 6  }
 0x57b   :  { %21 = sbr.rel (!%p19_p4) target bundleno = 1 (0x1), region = 98 }

</bundles_post_ra>
